<compile_context>
chip_gen: v7x
topology: tpu7x:2x2x1
jax: 0.10.0
libtpu: 0.0.40
codegen_flags: <defaults>
</compile_context>

<pallas_src>
import functools

import jax
import jax.numpy as jnp
from jax.experimental import pallas as pl
from jax.experimental.pallas import tpu as pltpu

LANES = 128                    # lane width -> Cout padding for lane-dense stores
TM_MAX = 512                   # M-rows per grid step for the conv matmuls
VMEM_LIMIT = 32 * 1024 * 1024  # explicit scoped-VMEM limit (safe on v5e/v6e/v7x)


def _round_up(x, m):
    return (x + m - 1) // m * m


# ----------------------------------------------------------------------------
# Pallas kernels
# ----------------------------------------------------------------------------

def _matmul_bias_kernel(x_ref, w_ref, b_ref, o_ref, *, relu):
    """o = [relu]((x @ w) + bias); BN scale already folded into w."""
    acc = jnp.dot(x_ref[...], w_ref[...], preferred_element_type=jnp.float32)
    acc = acc + b_ref[...]
    if relu:
        acc = jnp.maximum(acc, 0.0)
    o_ref[...] = acc.astype(o_ref.dtype)


def _matmul_bias_res_kernel(x_ref, w_ref, b_ref, r_ref, o_ref):
    """o = relu((x @ w) + bias + residual)  -- BasicBlock tail (identity skip)."""
    acc = jnp.dot(x_ref[...], w_ref[...], preferred_element_type=jnp.float32)
    acc = acc + b_ref[...] + r_ref[...].astype(jnp.float32)
    o_ref[...] = jnp.maximum(acc, 0.0).astype(o_ref.dtype)


def _matmul2_bias_kernel(x_ref, w_ref, xd_ref, wd_ref, b_ref, o_ref):
    """o = relu(x @ w + xd @ wd + bias)  -- BasicBlock tail with fused
    1x1 downsample projection (both BN biases pre-summed into `bias`)."""
    acc = jnp.dot(x_ref[...], w_ref[...], preferred_element_type=jnp.float32)
    acc = acc + jnp.dot(xd_ref[...], wd_ref[...],
                        preferred_element_type=jnp.float32)
    acc = acc + b_ref[...]
    o_ref[...] = jnp.maximum(acc, 0.0).astype(o_ref.dtype)


def _maxpool_kernel(ee_ref, eo_ref, oe_ref, oo_ref, o_ref):
    """3x3/s2/p1 max from even/odd row/col splits of the -inf padded input."""
    oh, ow = o_ref.shape[1], o_ref.shape[2]
    ee = ee_ref[0]          # (oh+1, ow+1, C)  even rows / even cols
    eo = eo_ref[0]          # (oh+1, ow,   C)  even rows / odd  cols
    oe = oe_ref[0]          # (oh,   ow+1, C)  odd  rows / even cols
    m = oo_ref[0]           # (oh,   ow,   C)  odd  rows / odd  cols (center tap)
    m = jnp.maximum(m, ee[0:oh, 0:ow, :])
    m = jnp.maximum(m, ee[0:oh, 1:ow + 1, :])
    m = jnp.maximum(m, ee[1:oh + 1, 0:ow, :])
    m = jnp.maximum(m, ee[1:oh + 1, 1:ow + 1, :])
    m = jnp.maximum(m, eo[0:oh, :, :])
    m = jnp.maximum(m, eo[1:oh + 1, :, :])
    m = jnp.maximum(m, oe[:, 0:ow, :])
    m = jnp.maximum(m, oe[:, 1:ow + 1, :])
    o_ref[0] = m


# ----------------------------------------------------------------------------
# Pallas wrappers
# ----------------------------------------------------------------------------

def _fused_matmul(x2d, w2d, bias2d, *, relu=True, residual2d=None, proj=None):
    """(M, K) bf16 @ (K, Cp) bf16 -> (M, Cp) bf16 with fused bias / residual /
    projection / relu.  Tiled over M with a 1-D 'parallel' grid; weights and
    bias use constant index_maps so they stay VMEM-resident across grid steps.
    """
    M, K = x2d.shape
    Cp = w2d.shape[1]

    TM = min(TM_MAX, _round_up(M, 8))
    Mp = _round_up(M, TM)
    if Mp != M:
        pad = ((0, Mp - M), (0, 0))
        x2d = jnp.pad(x2d, pad)
        if residual2d is not None:
            residual2d = jnp.pad(residual2d, pad)
        if proj is not None:
            proj = (jnp.pad(proj[0], pad), proj[1])

    grid = (Mp // TM,)
    cparams = pltpu.CompilerParams(
        dimension_semantics=("parallel",), vmem_limit_bytes=VMEM_LIMIT)
    out_shape = jax.ShapeDtypeStruct((Mp, Cp), jnp.bfloat16)

    def rows(width):                       # M-tiled operand
        return pl.BlockSpec((TM, width), lambda i: (i, 0))

    def const(a, b):                       # VMEM-resident operand
        return pl.BlockSpec((a, b), lambda i: (0, 0))

    o_spec = pl.BlockSpec((TM, Cp), lambda i: (i, 0))

    if proj is not None:
        xd2d, wd2d = proj
        Kd = xd2d.shape[1]
        out = pl.pallas_call(
            _matmul2_bias_kernel,
            grid=grid,
            in_specs=[rows(K), const(K, Cp), rows(Kd), const(Kd, Cp),
                      const(1, Cp)],
            out_specs=o_spec,
            out_shape=out_shape,
            compiler_params=cparams,
        )(x2d, w2d, xd2d, wd2d, bias2d)
    elif residual2d is not None:
        out = pl.pallas_call(
            _matmul_bias_res_kernel,
            grid=grid,
            in_specs=[rows(K), const(K, Cp), const(1, Cp), rows(Cp)],
            out_specs=o_spec,
            out_shape=out_shape,
            compiler_params=cparams,
        )(x2d, w2d, bias2d, residual2d)
    else:
        out = pl.pallas_call(
            functools.partial(_matmul_bias_kernel, relu=relu),
            grid=grid,
            in_specs=[rows(K), const(K, Cp), const(1, Cp)],
            out_specs=o_spec,
            out_shape=out_shape,
            compiler_params=cparams,
        )(x2d, w2d, bias2d)

    return out[:M] if Mp != M else out


def maxpool_3x3_s2_p1(x):
    """x: (N, H, W, C) bf16, C padded to 128 (padded channels are zero)."""
    N, H, W, C = x.shape
    OH = (H - 1) // 2 + 1
    OW = (W - 1) // 2 + 1
    xp = jnp.pad(x, ((0, 0), (1, 1), (1, 1), (0, 0)),
                 constant_values=-jnp.inf)       # -inf never wins the max
    # even/odd split along H and W (total data = 1x input, no 9x patch stack);
    # trimmed so every block shape equals the full array shape.
    xe = xp[:, 0:2 * OH + 1:2]                   # even padded rows  -> OH+1
    xo = xp[:, 1:2 * OH:2]                       # odd  padded rows  -> OH
    ee = xe[:, :, 0:2 * OW + 1:2]                # (N, OH+1, OW+1, C)
    eo = xe[:, :, 1:2 * OW:2]                    # (N, OH+1, OW,   C)
    oe = xo[:, :, 0:2 * OW + 1:2]                # (N, OH,   OW+1, C)
    oo = xo[:, :, 1:2 * OW:2]                    # (N, OH,   OW,   C)

    return pl.pallas_call(
        _maxpool_kernel,
        grid=(N,),
        in_specs=[
            pl.BlockSpec((1, OH + 1, OW + 1, C), lambda n: (n, 0, 0, 0)),
            pl.BlockSpec((1, OH + 1, OW, C), lambda n: (n, 0, 0, 0)),
            pl.BlockSpec((1, OH, OW + 1, C), lambda n: (n, 0, 0, 0)),
            pl.BlockSpec((1, OH, OW, C), lambda n: (n, 0, 0, 0)),
        ],
        out_specs=pl.BlockSpec((1, OH, OW, C), lambda n: (n, 0, 0, 0)),
        out_shape=jax.ShapeDtypeStruct((N, OH, OW, C), x.dtype),
        compiler_params=pltpu.CompilerParams(
            dimension_semantics=("parallel",),
            vmem_limit_bytes=VMEM_LIMIT),
    )(ee, eo, oe, oo)


# ----------------------------------------------------------------------------
# Plain-JAX glue: im2col, conv/bn wiring (all shape parameters are static)
# ----------------------------------------------------------------------------

def _to_bf16_cin(x, cin):
    """Slice/pad the channel dim to the sublane-rounded real input width."""
    cin_p = _round_up(cin, 8)
    C = x.shape[-1]
    if C < cin_p:
        x = jnp.pad(x, ((0, 0),) * (x.ndim - 1) + ((0, cin_p - C),))
    elif C > cin_p:
        x = x[..., :cin_p]                  # drop lane-padding channels (zeros)
    return x.astype(jnp.bfloat16), cin_p


def _extract_patches(x, k, stride, pad):
    """x: (N,H,W,C) -> patches (N*OH*OW, k*k*C), plus (OH, OW). All static."""
    N, H, W, C = x.shape
    xp = jnp.pad(x, ((0, 0), (pad, pad), (pad, pad), (0, 0)))
    OH = (H + 2 * pad - k) // stride + 1
    OW = (W + 2 * pad - k) // stride + 1
    cols = []
    for i in range(k):
        for j in range(k):
            cols.append(xp[:, i:i + stride * (OH - 1) + 1:stride,
                            j:j + stride * (OW - 1) + 1:stride, :])
    patches = jnp.concatenate(cols, axis=-1)          # (N, OH, OW, k*k*C)
    return patches.reshape(N * OH * OW, k * k * C), (OH, OW)


def conv_bn(x, p, c, relu=True, residual=None):
    """Fused conv + BN (+ residual + ReLU).  `c` is static, `p` holds arrays."""
    N = x.shape[0]
    x, cin_p = _to_bf16_cin(x, c["cin"])

    k, s = c["k"], c["stride"]
    if k == 1:
        xs = x[:, ::s, ::s, :]
        OH, OW = xs.shape[1], xs.shape[2]
        patches = xs.reshape(N * OH * OW, cin_p)
    else:
        patches, (OH, OW) = _extract_patches(x, k, s, c["pad"])

    res2d = None
    if residual is not None:
        res2d = residual.astype(jnp.bfloat16).reshape(
            N * OH * OW, residual.shape[-1])

    out2d = _fused_matmul(patches, p["w2d"], p["bias"],
                          relu=relu, residual2d=res2d)
    return out2d.reshape(N, OH, OW, -1)


def block_tail_proj(out, x, p, c):
    """relu( bn2(conv2(out)) + bn_d(1x1 downsample(x)) ) in ONE Pallas call."""
    c2, cd = c["conv2"], c["down"]
    N = out.shape[0]
    o2, _ = _to_bf16_cin(out, c2["cin"])
    patches, (OH, OW) = _extract_patches(o2, c2["k"], c2["stride"], c2["pad"])
    xd, cind_p = _to_bf16_cin(x, cd["cin"])
    s = cd["stride"]
    xd = xd[:, ::s, ::s, :]
    xd2d = xd.reshape(N * OH * OW, cind_p)
    bias = p["conv2"]["bias"] + p["down"]["bias"]     # both BN biases combined
    out2d = _fused_matmul(patches, p["conv2"]["w2d"], bias,
                          relu=True, proj=(xd2d, p["down"]["w2d"]))
    return out2d.reshape(N, OH, OW, -1)


def basic_block(x, p, c):
    out = conv_bn(x, p["conv1"], c["conv1"], relu=True)
    if c["down"] is not None:
        # conv2 + bn2 + (1x1 downsample conv + bn) + add + relu, fully fused
        out = block_tail_proj(out, x, p, c)
    else:
        # conv2 + bn2 + identity residual + relu, fully fused
        out = conv_bn(out, p["conv2"], c["conv2"], relu=True, residual=x)
    return out


def resnet_forward(x_nchw, params, cfg):
    x = jnp.transpose(x_nchw, (0, 2, 3, 1)).astype(jnp.bfloat16)   # NCHW->NHWC
    for p, c in zip(params["stem"], cfg["stem"]):
        x = conv_bn(x, p, c, relu=True)           # relu_i(bn_i(conv_i(x)))
    x = maxpool_3x3_s2_p1(x)                      # maxpool
    for name in ("layer1", "layer2", "layer3", "layer4"):
        for p, c in zip(params[name], cfg[name]):
            x = basic_block(x, p, c)
    x = x[..., :cfg["out_channels"]].astype(jnp.float32)
    return jnp.transpose(x, (0, 3, 1, 2))         # NHWC -> NCHW


# ----------------------------------------------------------------------------
# Static architecture config + deterministic synthetic parameters
# ----------------------------------------------------------------------------

def make_config():
    """Static structure (Python ints only) — never passes through jit."""
    cfg = {}
    c1, c2, c3 = 8, 8, 16                     # scaled-down deep stem
    cfg["stem"] = [
        dict(k=3, stride=2, pad=1, cin=3, cout=c1),
        dict(k=3, stride=1, pad=1, cin=c1, cout=c2),
        dict(k=3, stride=1, pad=1, cin=c2, cout=c3),
    ]
    inplanes = c3
    for name, planes, stride, nblocks in [("layer1", 8, 1, 2), ("layer2", 16, 2, 2),
                                          ("layer3", 32, 2, 2), ("layer4", 64, 2, 2)]:
        blocks = []
        for b in range(nblocks):
            s = stride if b == 0 else 1
            need_down = (s != 1) or (inplanes != planes)
            blocks.append(dict(
                conv1=dict(k=3, stride=s, pad=1, cin=inplanes, cout=planes),
                conv2=dict(k=3, stride=1, pad=1, cin=planes, cout=planes),
                down=(dict(k=1, stride=s, pad=0, cin=inplanes, cout=planes)
                      if need_down else None)))
            inplanes = planes
        cfg[name] = blocks
    cfg["out_channels"] = inplanes
    return cfg


def _prepare_conv(w, bn, eps=1e-5):
    """Fold eval-mode BN into the weights/bias; pad to lane-dense layout."""
    cout, cin, k, _ = w.shape
    cin_p = _round_up(cin, 8)
    gamma, beta, mean, var = bn
    scale = gamma / jnp.sqrt(var + eps)
    bias = beta - mean * scale
    w = jnp.pad(w, ((0, 0), (0, cin_p - cin), (0, 0), (0, 0)))
    w2d = jnp.transpose(w, (2, 3, 1, 0)).reshape(k * k * cin_p, cout)
    w2d = w2d * scale[None, :]                              # BN scale folded in
    cout_p = _round_up(cout, LANES)
    w2d = jnp.pad(w2d, ((0, 0), (0, cout_p - cout))).astype(jnp.bfloat16)
    bias = jnp.pad(bias, (0, cout_p - cout)).reshape(1, cout_p).astype(jnp.float32)
    return dict(w2d=w2d, bias=bias)


def init_and_prepare_params(key, cfg):
    keys = iter(jax.random.split(key, 256))

    def init_conv(c):
        fan_in = c["cin"] * c["k"] * c["k"]
        w = (jax.random.normal(next(keys), (c["cout"], c["cin"], c["k"], c["k"]),
                               jnp.float32) / float(fan_in) ** 0.5)
        kb = jax.random.split(next(keys), 4)
        bn = (1.0 + 0.1 * jax.random.normal(kb[0], (c["cout"],), jnp.float32),
              0.1 * jax.random.normal(kb[1], (c["cout"],), jnp.float32),
              0.1 * jax.random.normal(kb[2], (c["cout"],), jnp.float32),
              jnp.abs(jax.random.normal(kb[3], (c["cout"],), jnp.float32)) + 1.0)
        return _prepare_conv(w, bn)

    params = {"stem": [init_conv(c) for c in cfg["stem"]]}
    for name in ("layer1", "layer2", "layer3", "layer4"):
        blocks = []
        for bc in cfg[name]:
            blk = {"conv1": init_conv(bc["conv1"]), "conv2": init_conv(bc["conv2"])}
            if bc["down"] is not None:
                blk["down"] = init_conv(bc["down"])
            blocks.append(blk)
        params[name] = blocks
    return params


# ----------------------------------------------------------------------------

if __name__ == "__main__":
    key = jax.random.PRNGKey(0)
    kx, kp = jax.random.split(key)

    cfg = make_config()
    params = init_and_prepare_params(kp, cfg)     # arrays only (prep done once)

    # NCHW input like the PyTorch module; 64x64 so stem matmuls get a >1 grid
    x = jax.random.normal(kx, (2, 3, 64, 64), jnp.float32)

    fwd = jax.jit(lambda xx, pp: resnet_forward(xx, pp, cfg))
    out = fwd(x, params)
    jax.block_until_ready(out)

    assert out.shape == (2, 64, 2, 2), out.shape
    assert bool(jnp.all(jnp.isfinite(out)))
    print("KERNEL_OK")
</pallas_src>

<mosaic_0001>
module attributes {stable_mosaic.version = 11 : i64} {
  func.func @_matmul_bias_kernel(%arg0: i32, %arg1: memref<512x72xbf16, #tpu.memory_space<vmem>>, %arg2: memref<72x128xbf16, #tpu.memory_space<vmem>>, %arg3: memref<1x128xf32, #tpu.memory_space<vmem>>, %arg4: memref<512x128xbf16, #tpu.memory_space<vmem>>) attributes {dimension_semantics = [#tpu.dimension_semantics<parallel>], iteration_bounds = array<i64: 4>, scalar_prefetch = 0 : i64, scratch_operands = 0 : i64, tpu.core_type = #tpu.core_type<tc>, window_params = [{transform_indices = @transform_0, window_bounds = array<i64: 512, 72>}, {pipeline_mode = #tpu.pipeline_mode<synchronous>, transform_indices = @transform_1, window_bounds = array<i64: 72, 128>}, {pipeline_mode = #tpu.pipeline_mode<synchronous>, transform_indices = @transform_2, window_bounds = array<i64: 1, 128>}, {transform_indices = @transform_3, window_bounds = array<i64: 512, 128>}]} {
    %c0 = arith.constant 0 : index
    %c0_0 = arith.constant 0 : index
    %0 = vector.load %arg1[%c0, %c0_0] : memref<512x72xbf16, #tpu.memory_space<vmem>>, vector<512x72xbf16>
    %c0_1 = arith.constant 0 : index
    %c0_2 = arith.constant 0 : index
    %1 = vector.load %arg2[%c0_1, %c0_2] : memref<72x128xbf16, #tpu.memory_space<vmem>>, vector<72x128xbf16>
    %cst = arith.constant dense<0.000000e+00> : vector<512x128xf32>
    %2 = tpu.matmul %0, %1, %cst {dimension_numbers = #tpu.dot_dimension_numbers<[1], [0], [0], [1], [0, 0, 1, 1], [], []>} : vector<512x72xbf16>, vector<72x128xbf16>, vector<512x128xf32> -> vector<512x128xf32>
    %c0_3 = arith.constant 0 : index
    %c0_4 = arith.constant 0 : index
    %3 = vector.load %arg3[%c0_3, %c0_4] : memref<1x128xf32, #tpu.memory_space<vmem>>, vector<1x128xf32>
    %4 = vector.broadcast %3 : vector<1x128xf32> to vector<512x128xf32>
    %5 = arith.addf %2, %4 : vector<512x128xf32>
    %cst_5 = arith.constant 0.000000e+00 : f32
    %6 = vector.broadcast %cst_5 : f32 to vector<512x128xf32>
    %7 = arith.maximumf %5, %6 : vector<512x128xf32>
    %8 = arith.truncf %7 : vector<512x128xf32> to vector<512x128xbf16>
    %c0_6 = arith.constant 0 : index
    %c0_7 = arith.constant 0 : index
    %9 = vector.load %arg4[%c0_6, %c0_7] : memref<512x128xbf16, #tpu.memory_space<vmem>>, vector<512x128xbf16>
    tpu.vector_store %arg4[%c0_6, %c0_7], %8 {strides = array<i32>} : memref<512x128xbf16, #tpu.memory_space<vmem>>, vector<512x128xbf16>,
    return
  }
  func.func @transform_0(%arg0: i32) -> (i32, i32) {
    %c0_i32 = arith.constant 0 : i32
    %c0_i32_0 = arith.constant 0 : i32
    return %arg0, %c0_i32 : i32, i32
  }
  func.func @transform_1(%arg0: i32) -> (i32, i32) {
    %c0_i32 = arith.constant 0 : i32
    %c0_i32_0 = arith.constant 0 : i32
    %c0_i32_1 = arith.constant 0 : i32
    return %c0_i32, %c0_i32_0 : i32, i32
  }
  func.func @transform_2(%arg0: i32) -> (i32, i32) {
    %c0_i32 = arith.constant 0 : i32
    %c0_i32_0 = arith.constant 0 : i32
    %c0_i32_1 = arith.constant 0 : i32
    return %c0_i32, %c0_i32_0 : i32, i32
  }
  func.func @transform_3(%arg0: i32) -> (i32, i32) {
    %c0_i32 = arith.constant 0 : i32
    %c0_i32_0 = arith.constant 0 : i32
    return %arg0, %c0_i32 : i32, i32
  }
}

module attributes {stable_mosaic.version = 11 : i64} {
  func.func @_maxpool_kernel(%arg0: i32, %arg1: memref<1x17x17x128xbf16, #tpu.memory_space<vmem>>, %arg2: memref<1x17x16x128xbf16, #tpu.memory_space<vmem>>, %arg3: memref<1x16x17x128xbf16, #tpu.memory_space<vmem>>, %arg4: memref<1x16x16x128xbf16, #tpu.memory_space<vmem>>, %arg5: memref<1x16x16x128xbf16, #tpu.memory_space<vmem>>) attributes {dimension_semantics = [#tpu.dimension_semantics<parallel>], iteration_bounds = array<i64: 2>, scalar_prefetch = 0 : i64, scratch_operands = 0 : i64, tpu.core_type = #tpu.core_type<tc>, window_params = [{transform_indices = @transform_0, window_bounds = array<i64: 1, 17, 17, 128>}, {transform_indices = @transform_1, window_bounds = array<i64: 1, 17, 16, 128>}, {transform_indices = @transform_2, window_bounds = array<i64: 1, 16, 17, 128>}, {transform_indices = @transform_3, window_bounds = array<i64: 1, 16, 16, 128>}, {transform_indices = @transform_4, window_bounds = array<i64: 1, 16, 16, 128>}]} {
    %c0 = arith.constant 0 : index
    %c0_0 = arith.constant 0 : index
    %c0_1 = arith.constant 0 : index
    %c0_2 = arith.constant 0 : index
    %0 = vector.load %arg1[%c0, %c0_0, %c0_1, %c0_2] : memref<1x17x17x128xbf16, #tpu.memory_space<vmem>>, vector<1x17x17x128xbf16>
    %1 = vector.shape_cast %0 : vector<1x17x17x128xbf16> to vector<17x17x128xbf16>
    %c0_3 = arith.constant 0 : index
    %c0_4 = arith.constant 0 : index
    %c0_5 = arith.constant 0 : index
    %c0_6 = arith.constant 0 : index
    %2 = vector.load %arg2[%c0_3, %c0_4, %c0_5, %c0_6] : memref<1x17x16x128xbf16, #tpu.memory_space<vmem>>, vector<1x17x16x128xbf16>
    %3 = vector.shape_cast %2 : vector<1x17x16x128xbf16> to vector<17x16x128xbf16>
    %c0_7 = arith.constant 0 : index
    %c0_8 = arith.constant 0 : index
    %c0_9 = arith.constant 0 : index
    %c0_10 = arith.constant 0 : index
    %4 = vector.load %arg3[%c0_7, %c0_8, %c0_9, %c0_10] : memref<1x16x17x128xbf16, #tpu.memory_space<vmem>>, vector<1x16x17x128xbf16>
    %5 = vector.shape_cast %4 : vector<1x16x17x128xbf16> to vector<16x17x128xbf16>
    %c0_11 = arith.constant 0 : index
    %c0_12 = arith.constant 0 : index
    %c0_13 = arith.constant 0 : index
    %c0_14 = arith.constant 0 : index
    %6 = vector.load %arg4[%c0_11, %c0_12, %c0_13, %c0_14] : memref<1x16x16x128xbf16, #tpu.memory_space<vmem>>, vector<1x16x16x128xbf16>
    %7 = vector.shape_cast %6 : vector<1x16x16x128xbf16> to vector<16x16x128xbf16>
    %8 = vector.extract_strided_slice %1 {offsets = [0, 0, 0], sizes = [16, 16, 128], strides = [1, 1, 1]} : vector<17x17x128xbf16> to vector<16x16x128xbf16>
    %9 = arith.maximumf %7, %8 : vector<16x16x128xbf16>
    %10 = vector.extract_strided_slice %1 {offsets = [0, 1, 0], sizes = [16, 16, 128], strides = [1, 1, 1]} : vector<17x17x128xbf16> to vector<16x16x128xbf16>
    %11 = arith.maximumf %9, %10 : vector<16x16x128xbf16>
    %12 = vector.extract_strided_slice %1 {offsets = [1, 0, 0], sizes = [16, 16, 128], strides = [1, 1, 1]} : vector<17x17x128xbf16> to vector<16x16x128xbf16>
    %13 = arith.maximumf %11, %12 : vector<16x16x128xbf16>
    %14 = vector.extract_strided_slice %1 {offsets = [1, 1, 0], sizes = [16, 16, 128], strides = [1, 1, 1]} : vector<17x17x128xbf16> to vector<16x16x128xbf16>
    %15 = arith.maximumf %13, %14 : vector<16x16x128xbf16>
    %16 = vector.extract_strided_slice %3 {offsets = [0, 0, 0], sizes = [16, 16, 128], strides = [1, 1, 1]} : vector<17x16x128xbf16> to vector<16x16x128xbf16>
    %17 = arith.maximumf %15, %16 : vector<16x16x128xbf16>
    %18 = vector.extract_strided_slice %3 {offsets = [1, 0, 0], sizes = [16, 16, 128], strides = [1, 1, 1]} : vector<17x16x128xbf16> to vector<16x16x128xbf16>
    %19 = arith.maximumf %17, %18 : vector<16x16x128xbf16>
    %20 = vector.extract_strided_slice %5 {offsets = [0, 0, 0], sizes = [16, 16, 128], strides = [1, 1, 1]} : vector<16x17x128xbf16> to vector<16x16x128xbf16>
    %21 = arith.maximumf %19, %20 : vector<16x16x128xbf16>
    %22 = vector.extract_strided_slice %5 {offsets = [0, 1, 0], sizes = [16, 16, 128], strides = [1, 1, 1]} : vector<16x17x128xbf16> to vector<16x16x128xbf16>
    %23 = arith.maximumf %21, %22 : vector<16x16x128xbf16>
    %c0_15 = arith.constant 0 : index
    %c0_16 = arith.constant 0 : index
    %c0_17 = arith.constant 0 : index
    %c0_18 = arith.constant 0 : index
    %24 = vector.load %arg5[%c0_15, %c0_16, %c0_17, %c0_18] : memref<1x16x16x128xbf16, #tpu.memory_space<vmem>>, vector<1x16x16x128xbf16>
    %25 = vector.shape_cast %24 : vector<1x16x16x128xbf16> to vector<16x16x128xbf16>
    %26 = vector.shape_cast %23 : vector<16x16x128xbf16> to vector<1x16x16x128xbf16>
    tpu.vector_store %arg5[%c0_15, %c0_16, %c0_17, %c0_18], %26 {strides = array<i32>} : memref<1x16x16x128xbf16, #tpu.memory_space<vmem>>, vector<1x16x16x128xbf16>,
    return
  }
  func.func @transform_0(%arg0: i32) -> (i32, i32, i32, i32) {
    %c0_i32 = arith.constant 0 : i32
    %c0_i32_0 = arith.constant 0 : i32
    %c0_i32_1 = arith.constant 0 : i32
    %c0_i32_2 = arith.constant 0 : i32
    return %arg0, %c0_i32, %c0_i32_0, %c0_i32_1 : i32, i32, i32, i32
  }
  func.func @transform_1(%arg0: i32) -> (i32, i32, i32, i32) {
    %c0_i32 = arith.constant 0 : i32
    %c0_i32_0 = arith.constant 0 : i32
    %c0_i32_1 = arith.constant 0 : i32
    %c0_i32_2 = arith.constant 0 : i32
    return %arg0, %c0_i32, %c0_i32_0, %c0_i32_1 : i32, i32, i32, i32
  }
  func.func @transform_2(%arg0: i32) -> (i32, i32, i32, i32) {
    %c0_i32 = arith.constant 0 : i32
    %c0_i32_0 = arith.constant 0 : i32
    %c0_i32_1 = arith.constant 0 : i32
    %c0_i32_2 = arith.constant 0 : i32
    return %arg0, %c0_i32, %c0_i32_0, %c0_i32_1 : i32, i32, i32, i32
  }
  func.func @transform_3(%arg0: i32) -> (i32, i32, i32, i32) {
    %c0_i32 = arith.constant 0 : i32
    %c0_i32_0 = arith.constant 0 : i32
    %c0_i32_1 = arith.constant 0 : i32
    %c0_i32_2 = arith.constant 0 : i32
    return %arg0, %c0_i32, %c0_i32_0, %c0_i32_1 : i32, i32, i32, i32
  }
  func.func @transform_4(%arg0: i32) -> (i32, i32, i32, i32) {
    %c0_i32 = arith.constant 0 : i32
    %c0_i32_0 = arith.constant 0 : i32
    %c0_i32_1 = arith.constant 0 : i32
    %c0_i32_2 = arith.constant 0 : i32
    return %arg0, %c0_i32, %c0_i32_0, %c0_i32_1 : i32, i32, i32, i32
  }
}

module attributes {stable_mosaic.version = 11 : i64} {
  func.func @_matmul_bias_kernel(%arg0: i32, %arg1: memref<512x144xbf16, #tpu.memory_space<vmem>>, %arg2: memref<144x128xbf16, #tpu.memory_space<vmem>>, %arg3: memref<1x128xf32, #tpu.memory_space<vmem>>, %arg4: memref<512x128xbf16, #tpu.memory_space<vmem>>) attributes {dimension_semantics = [#tpu.dimension_semantics<parallel>], iteration_bounds = array<i64: 1>, scalar_prefetch = 0 : i64, scratch_operands = 0 : i64, tpu.core_type = #tpu.core_type<tc>, window_params = [{transform_indices = @transform_0, window_bounds = array<i64: 512, 144>}, {pipeline_mode = #tpu.pipeline_mode<synchronous>, transform_indices = @transform_1, window_bounds = array<i64: 144, 128>}, {pipeline_mode = #tpu.pipeline_mode<synchronous>, transform_indices = @transform_2, window_bounds = array<i64: 1, 128>}, {transform_indices = @transform_3, window_bounds = array<i64: 512, 128>}]} {
    %c0 = arith.constant 0 : index
    %c0_0 = arith.constant 0 : index
    %0 = vector.load %arg1[%c0, %c0_0] : memref<512x144xbf16, #tpu.memory_space<vmem>>, vector<512x144xbf16>
    %c0_1 = arith.constant 0 : index
    %c0_2 = arith.constant 0 : index
    %1 = vector.load %arg2[%c0_1, %c0_2] : memref<144x128xbf16, #tpu.memory_space<vmem>>, vector<144x128xbf16>
    %cst = arith.constant dense<0.000000e+00> : vector<512x128xf32>
    %2 = tpu.matmul %0, %1, %cst {dimension_numbers = #tpu.dot_dimension_numbers<[1], [0], [0], [1], [0, 0, 1, 1], [], []>} : vector<512x144xbf16>, vector<144x128xbf16>, vector<512x128xf32> -> vector<512x128xf32>
    %c0_3 = arith.constant 0 : index
    %c0_4 = arith.constant 0 : index
    %3 = vector.load %arg3[%c0_3, %c0_4] : memref<1x128xf32, #tpu.memory_space<vmem>>, vector<1x128xf32>
    %4 = vector.broadcast %3 : vector<1x128xf32> to vector<512x128xf32>
    %5 = arith.addf %2, %4 : vector<512x128xf32>
    %cst_5 = arith.constant 0.000000e+00 : f32
    %6 = vector.broadcast %cst_5 : f32 to vector<512x128xf32>
    %7 = arith.maximumf %5, %6 : vector<512x128xf32>
    %8 = arith.truncf %7 : vector<512x128xf32> to vector<512x128xbf16>
    %c0_6 = arith.constant 0 : index
    %c0_7 = arith.constant 0 : index
    %9 = vector.load %arg4[%c0_6, %c0_7] : memref<512x128xbf16, #tpu.memory_space<vmem>>, vector<512x128xbf16>
    tpu.vector_store %arg4[%c0_6, %c0_7], %8 {strides = array<i32>} : memref<512x128xbf16, #tpu.memory_space<vmem>>, vector<512x128xbf16>,
    return
  }
  func.func @transform_0(%arg0: i32) -> (i32, i32) {
    %c0_i32 = arith.constant 0 : i32
    %c0_i32_0 = arith.constant 0 : i32
    return %arg0, %c0_i32 : i32, i32
  }
  func.func @transform_1(%arg0: i32) -> (i32, i32) {
    %c0_i32 = arith.constant 0 : i32
    %c0_i32_0 = arith.constant 0 : i32
    %c0_i32_1 = arith.constant 0 : i32
    return %c0_i32, %c0_i32_0 : i32, i32
  }
  func.func @transform_2(%arg0: i32) -> (i32, i32) {
    %c0_i32 = arith.constant 0 : i32
    %c0_i32_0 = arith.constant 0 : i32
    %c0_i32_1 = arith.constant 0 : i32
    return %c0_i32, %c0_i32_0 : i32, i32
  }
  func.func @transform_3(%arg0: i32) -> (i32, i32) {
    %c0_i32 = arith.constant 0 : i32
    %c0_i32_0 = arith.constant 0 : i32
    return %arg0, %c0_i32 : i32, i32
  }
}

module attributes {stable_mosaic.version = 11 : i64} {
  func.func @_matmul2_bias_kernel(%arg0: i32, %arg1: memref<512x72xbf16, #tpu.memory_space<vmem>>, %arg2: memref<72x128xbf16, #tpu.memory_space<vmem>>, %arg3: memref<512x16xbf16, #tpu.memory_space<vmem>>, %arg4: memref<16x128xbf16, #tpu.memory_space<vmem>>, %arg5: memref<1x128xf32, #tpu.memory_space<vmem>>, %arg6: memref<512x128xbf16, #tpu.memory_space<vmem>>) attributes {dimension_semantics = [#tpu.dimension_semantics<parallel>], iteration_bounds = array<i64: 1>, scalar_prefetch = 0 : i64, scratch_operands = 0 : i64, tpu.core_type = #tpu.core_type<tc>, window_params = [{transform_indices = @transform_0, window_bounds = array<i64: 512, 72>}, {pipeline_mode = #tpu.pipeline_mode<synchronous>, transform_indices = @transform_1, window_bounds = array<i64: 72, 128>}, {transform_indices = @transform_2, window_bounds = array<i64: 512, 16>}, {pipeline_mode = #tpu.pipeline_mode<synchronous>, transform_indices = @transform_3, window_bounds = array<i64: 16, 128>}, {pipeline_mode = #tpu.pipeline_mode<synchronous>, transform_indices = @transform_4, window_bounds = array<i64: 1, 128>}, {transform_indices = @transform_5, window_bounds = array<i64: 512, 128>}]} {
    %c0 = arith.constant 0 : index
    %c0_0 = arith.constant 0 : index
    %0 = vector.load %arg1[%c0, %c0_0] : memref<512x72xbf16, #tpu.memory_space<vmem>>, vector<512x72xbf16>
    %c0_1 = arith.constant 0 : index
    %c0_2 = arith.constant 0 : index
    %1 = vector.load %arg2[%c0_1, %c0_2] : memref<72x128xbf16, #tpu.memory_space<vmem>>, vector<72x128xbf16>
    %cst = arith.constant dense<0.000000e+00> : vector<512x128xf32>
    %2 = tpu.matmul %0, %1, %cst {dimension_numbers = #tpu.dot_dimension_numbers<[1], [0], [0], [1], [0, 0, 1, 1], [], []>} : vector<512x72xbf16>, vector<72x128xbf16>, vector<512x128xf32> -> vector<512x128xf32>
    %c0_3 = arith.constant 0 : index
    %c0_4 = arith.constant 0 : index
    %3 = vector.load %arg3[%c0_3, %c0_4] : memref<512x16xbf16, #tpu.memory_space<vmem>>, vector<512x16xbf16>
    %c0_5 = arith.constant 0 : index
    %c0_6 = arith.constant 0 : index
    %4 = vector.load %arg4[%c0_5, %c0_6] : memref<16x128xbf16, #tpu.memory_space<vmem>>, vector<16x128xbf16>
    %cst_7 = arith.constant dense<0.000000e+00> : vector<512x128xf32>
    %5 = tpu.matmul %3, %4, %cst_7 {dimension_numbers = #tpu.dot_dimension_numbers<[1], [0], [0], [1], [0, 0, 1, 1], [], []>} : vector<512x16xbf16>, vector<16x128xbf16>, vector<512x128xf32> -> vector<512x128xf32>
    %6 = arith.addf %2, %5 : vector<512x128xf32>
    %c0_8 = arith.constant 0 : index
    %c0_9 = arith.constant 0 : index
    %7 = vector.load %arg5[%c0_8, %c0_9] : memref<1x128xf32, #tpu.memory_space<vmem>>, vector<1x128xf32>
    %8 = vector.broadcast %7 : vector<1x128xf32> to vector<512x128xf32>
    %9 = arith.addf %6, %8 : vector<512x128xf32>
    %cst_10 = arith.constant 0.000000e+00 : f32
    %10 = vector.broadcast %cst_10 : f32 to vector<512x128xf32>
    %11 = arith.maximumf %9, %10 : vector<512x128xf32>
    %12 = arith.truncf %11 : vector<512x128xf32> to vector<512x128xbf16>
    %c0_11 = arith.constant 0 : index
    %c0_12 = arith.constant 0 : index
    %13 = vector.load %arg6[%c0_11, %c0_12] : memref<512x128xbf16, #tpu.memory_space<vmem>>, vector<512x128xbf16>
    tpu.vector_store %arg6[%c0_11, %c0_12], %12 {strides = array<i32>} : memref<512x128xbf16, #tpu.memory_space<vmem>>, vector<512x128xbf16>,
    return
  }
  func.func @transform_0(%arg0: i32) -> (i32, i32) {
    %c0_i32 = arith.constant 0 : i32
    %c0_i32_0 = arith.constant 0 : i32
    return %arg0, %c0_i32 : i32, i32
  }
  func.func @transform_1(%arg0: i32) -> (i32, i32) {
    %c0_i32 = arith.constant 0 : i32
    %c0_i32_0 = arith.constant 0 : i32
    %c0_i32_1 = arith.constant 0 : i32
    return %c0_i32, %c0_i32_0 : i32, i32
  }
  func.func @transform_2(%arg0: i32) -> (i32, i32) {
    %c0_i32 = arith.constant 0 : i32
    %c0_i32_0 = arith.constant 0 : i32
    return %arg0, %c0_i32 : i32, i32
  }
  func.func @transform_3(%arg0: i32) -> (i32, i32) {
    %c0_i32 = arith.constant 0 : i32
    %c0_i32_0 = arith.constant 0 : i32
    %c0_i32_1 = arith.constant 0 : i32
    return %c0_i32, %c0_i32_0 : i32, i32
  }
  func.func @transform_4(%arg0: i32) -> (i32, i32) {
    %c0_i32 = arith.constant 0 : i32
    %c0_i32_0 = arith.constant 0 : i32
    %c0_i32_1 = arith.constant 0 : i32
    return %c0_i32, %c0_i32_0 : i32, i32
  }
  func.func @transform_5(%arg0: i32) -> (i32, i32) {
    %c0_i32 = arith.constant 0 : i32
    %c0_i32_0 = arith.constant 0 : i32
    return %arg0, %c0_i32 : i32, i32
  }
}

module attributes {stable_mosaic.version = 11 : i64} {
  func.func @_matmul_bias_kernel(%arg0: i32, %arg1: memref<512x72xbf16, #tpu.memory_space<vmem>>, %arg2: memref<72x128xbf16, #tpu.memory_space<vmem>>, %arg3: memref<1x128xf32, #tpu.memory_space<vmem>>, %arg4: memref<512x128xbf16, #tpu.memory_space<vmem>>) attributes {dimension_semantics = [#tpu.dimension_semantics<parallel>], iteration_bounds = array<i64: 1>, scalar_prefetch = 0 : i64, scratch_operands = 0 : i64, tpu.core_type = #tpu.core_type<tc>, window_params = [{transform_indices = @transform_0, window_bounds = array<i64: 512, 72>}, {pipeline_mode = #tpu.pipeline_mode<synchronous>, transform_indices = @transform_1, window_bounds = array<i64: 72, 128>}, {pipeline_mode = #tpu.pipeline_mode<synchronous>, transform_indices = @transform_2, window_bounds = array<i64: 1, 128>}, {transform_indices = @transform_3, window_bounds = array<i64: 512, 128>}]} {
    %c0 = arith.constant 0 : index
    %c0_0 = arith.constant 0 : index
    %0 = vector.load %arg1[%c0, %c0_0] : memref<512x72xbf16, #tpu.memory_space<vmem>>, vector<512x72xbf16>
    %c0_1 = arith.constant 0 : index
    %c0_2 = arith.constant 0 : index
    %1 = vector.load %arg2[%c0_1, %c0_2] : memref<72x128xbf16, #tpu.memory_space<vmem>>, vector<72x128xbf16>
    %cst = arith.constant dense<0.000000e+00> : vector<512x128xf32>
    %2 = tpu.matmul %0, %1, %cst {dimension_numbers = #tpu.dot_dimension_numbers<[1], [0], [0], [1], [0, 0, 1, 1], [], []>} : vector<512x72xbf16>, vector<72x128xbf16>, vector<512x128xf32> -> vector<512x128xf32>
    %c0_3 = arith.constant 0 : index
    %c0_4 = arith.constant 0 : index
    %3 = vector.load %arg3[%c0_3, %c0_4] : memref<1x128xf32, #tpu.memory_space<vmem>>, vector<1x128xf32>
    %4 = vector.broadcast %3 : vector<1x128xf32> to vector<512x128xf32>
    %5 = arith.addf %2, %4 : vector<512x128xf32>
    %cst_5 = arith.constant 0.000000e+00 : f32
    %6 = vector.broadcast %cst_5 : f32 to vector<512x128xf32>
    %7 = arith.maximumf %5, %6 : vector<512x128xf32>
    %8 = arith.truncf %7 : vector<512x128xf32> to vector<512x128xbf16>
    %c0_6 = arith.constant 0 : index
    %c0_7 = arith.constant 0 : index
    %9 = vector.load %arg4[%c0_6, %c0_7] : memref<512x128xbf16, #tpu.memory_space<vmem>>, vector<512x128xbf16>
    tpu.vector_store %arg4[%c0_6, %c0_7], %8 {strides = array<i32>} : memref<512x128xbf16, #tpu.memory_space<vmem>>, vector<512x128xbf16>,
    return
  }
  func.func @transform_0(%arg0: i32) -> (i32, i32) {
    %c0_i32 = arith.constant 0 : i32
    %c0_i32_0 = arith.constant 0 : i32
    return %arg0, %c0_i32 : i32, i32
  }
  func.func @transform_1(%arg0: i32) -> (i32, i32) {
    %c0_i32 = arith.constant 0 : i32
    %c0_i32_0 = arith.constant 0 : i32
    %c0_i32_1 = arith.constant 0 : i32
    return %c0_i32, %c0_i32_0 : i32, i32
  }
  func.func @transform_2(%arg0: i32) -> (i32, i32) {
    %c0_i32 = arith.constant 0 : i32
    %c0_i32_0 = arith.constant 0 : i32
    %c0_i32_1 = arith.constant 0 : i32
    return %c0_i32, %c0_i32_0 : i32, i32
  }
  func.func @transform_3(%arg0: i32) -> (i32, i32) {
    %c0_i32 = arith.constant 0 : i32
    %c0_i32_0 = arith.constant 0 : i32
    return %arg0, %c0_i32 : i32, i32
  }
}

module attributes {stable_mosaic.version = 11 : i64} {
  func.func @_matmul_bias_res_kernel(%arg0: i32, %arg1: memref<512x72xbf16, #tpu.memory_space<vmem>>, %arg2: memref<72x128xbf16, #tpu.memory_space<vmem>>, %arg3: memref<1x128xf32, #tpu.memory_space<vmem>>, %arg4: memref<512x128xbf16, #tpu.memory_space<vmem>>, %arg5: memref<512x128xbf16, #tpu.memory_space<vmem>>) attributes {dimension_semantics = [#tpu.dimension_semantics<parallel>], iteration_bounds = array<i64: 1>, scalar_prefetch = 0 : i64, scratch_operands = 0 : i64, tpu.core_type = #tpu.core_type<tc>, window_params = [{transform_indices = @transform_0, window_bounds = array<i64: 512, 72>}, {pipeline_mode = #tpu.pipeline_mode<synchronous>, transform_indices = @transform_1, window_bounds = array<i64: 72, 128>}, {pipeline_mode = #tpu.pipeline_mode<synchronous>, transform_indices = @transform_2, window_bounds = array<i64: 1, 128>}, {transform_indices = @transform_3, window_bounds = array<i64: 512, 128>}, {transform_indices = @transform_4, window_bounds = array<i64: 512, 128>}]} {
    %c0 = arith.constant 0 : index
    %c0_0 = arith.constant 0 : index
    %0 = vector.load %arg1[%c0, %c0_0] : memref<512x72xbf16, #tpu.memory_space<vmem>>, vector<512x72xbf16>
    %c0_1 = arith.constant 0 : index
    %c0_2 = arith.constant 0 : index
    %1 = vector.load %arg2[%c0_1, %c0_2] : memref<72x128xbf16, #tpu.memory_space<vmem>>, vector<72x128xbf16>
    %cst = arith.constant dense<0.000000e+00> : vector<512x128xf32>
    %2 = tpu.matmul %0, %1, %cst {dimension_numbers = #tpu.dot_dimension_numbers<[1], [0], [0], [1], [0, 0, 1, 1], [], []>} : vector<512x72xbf16>, vector<72x128xbf16>, vector<512x128xf32> -> vector<512x128xf32>
    %c0_3 = arith.constant 0 : index
    %c0_4 = arith.constant 0 : index
    %3 = vector.load %arg3[%c0_3, %c0_4] : memref<1x128xf32, #tpu.memory_space<vmem>>, vector<1x128xf32>
    %4 = vector.broadcast %3 : vector<1x128xf32> to vector<512x128xf32>
    %5 = arith.addf %2, %4 : vector<512x128xf32>
    %c0_5 = arith.constant 0 : index
    %c0_6 = arith.constant 0 : index
    %6 = vector.load %arg4[%c0_5, %c0_6] : memref<512x128xbf16, #tpu.memory_space<vmem>>, vector<512x128xbf16>
    %7 = arith.extf %6 : vector<512x128xbf16> to vector<512x128xf32>
    %8 = arith.addf %5, %7 : vector<512x128xf32>
    %cst_7 = arith.constant 0.000000e+00 : f32
    %9 = vector.broadcast %cst_7 : f32 to vector<512x128xf32>
    %10 = arith.maximumf %8, %9 : vector<512x128xf32>
    %11 = arith.truncf %10 : vector<512x128xf32> to vector<512x128xbf16>
    %c0_8 = arith.constant 0 : index
    %c0_9 = arith.constant 0 : index
    %12 = vector.load %arg5[%c0_8, %c0_9] : memref<512x128xbf16, #tpu.memory_space<vmem>>, vector<512x128xbf16>
    tpu.vector_store %arg5[%c0_8, %c0_9], %11 {strides = array<i32>} : memref<512x128xbf16, #tpu.memory_space<vmem>>, vector<512x128xbf16>,
    return
  }
  func.func @transform_0(%arg0: i32) -> (i32, i32) {
    %c0_i32 = arith.constant 0 : i32
    %c0_i32_0 = arith.constant 0 : i32
    return %arg0, %c0_i32 : i32, i32
  }
  func.func @transform_1(%arg0: i32) -> (i32, i32) {
    %c0_i32 = arith.constant 0 : i32
    %c0_i32_0 = arith.constant 0 : i32
    %c0_i32_1 = arith.constant 0 : i32
    return %c0_i32, %c0_i32_0 : i32, i32
  }
  func.func @transform_2(%arg0: i32) -> (i32, i32) {
    %c0_i32 = arith.constant 0 : i32
    %c0_i32_0 = arith.constant 0 : i32
    %c0_i32_1 = arith.constant 0 : i32
    return %c0_i32, %c0_i32_0 : i32, i32
  }
  func.func @transform_3(%arg0: i32) -> (i32, i32) {
    %c0_i32 = arith.constant 0 : i32
    %c0_i32_0 = arith.constant 0 : i32
    return %arg0, %c0_i32 : i32, i32
  }
  func.func @transform_4(%arg0: i32) -> (i32, i32) {
    %c0_i32 = arith.constant 0 : i32
    %c0_i32_0 = arith.constant 0 : i32
    return %arg0, %c0_i32 : i32, i32
  }
}

module attributes {stable_mosaic.version = 11 : i64} {
  func.func @_matmul_bias_kernel(%arg0: i32, %arg1: memref<128x72xbf16, #tpu.memory_space<vmem>>, %arg2: memref<72x128xbf16, #tpu.memory_space<vmem>>, %arg3: memref<1x128xf32, #tpu.memory_space<vmem>>, %arg4: memref<128x128xbf16, #tpu.memory_space<vmem>>) attributes {dimension_semantics = [#tpu.dimension_semantics<parallel>], iteration_bounds = array<i64: 1>, scalar_prefetch = 0 : i64, scratch_operands = 0 : i64, tpu.core_type = #tpu.core_type<tc>, window_params = [{transform_indices = @transform_0, window_bounds = array<i64: 128, 72>}, {pipeline_mode = #tpu.pipeline_mode<synchronous>, transform_indices = @transform_1, window_bounds = array<i64: 72, 128>}, {pipeline_mode = #tpu.pipeline_mode<synchronous>, transform_indices = @transform_2, window_bounds = array<i64: 1, 128>}, {transform_indices = @transform_3, window_bounds = array<i64: 128, 128>}]} {
    %c0 = arith.constant 0 : index
    %c0_0 = arith.constant 0 : index
    %0 = vector.load %arg1[%c0, %c0_0] : memref<128x72xbf16, #tpu.memory_space<vmem>>, vector<128x72xbf16>
    %c0_1 = arith.constant 0 : index
    %c0_2 = arith.constant 0 : index
    %1 = vector.load %arg2[%c0_1, %c0_2] : memref<72x128xbf16, #tpu.memory_space<vmem>>, vector<72x128xbf16>
    %cst = arith.constant dense<0.000000e+00> : vector<128x128xf32>
    %2 = tpu.matmul %0, %1, %cst {dimension_numbers = #tpu.dot_dimension_numbers<[1], [0], [0], [1], [0, 0, 1, 1], [], []>} : vector<128x72xbf16>, vector<72x128xbf16>, vector<128x128xf32> -> vector<128x128xf32>
    %c0_3 = arith.constant 0 : index
    %c0_4 = arith.constant 0 : index
    %3 = vector.load %arg3[%c0_3, %c0_4] : memref<1x128xf32, #tpu.memory_space<vmem>>, vector<1x128xf32>
    %4 = vector.broadcast %3 : vector<1x128xf32> to vector<128x128xf32>
    %5 = arith.addf %2, %4 : vector<128x128xf32>
    %cst_5 = arith.constant 0.000000e+00 : f32
    %6 = vector.broadcast %cst_5 : f32 to vector<128x128xf32>
    %7 = arith.maximumf %5, %6 : vector<128x128xf32>
    %8 = arith.truncf %7 : vector<128x128xf32> to vector<128x128xbf16>
    %c0_6 = arith.constant 0 : index
    %c0_7 = arith.constant 0 : index
    %9 = vector.load %arg4[%c0_6, %c0_7] : memref<128x128xbf16, #tpu.memory_space<vmem>>, vector<128x128xbf16>
    tpu.vector_store %arg4[%c0_6, %c0_7], %8 {strides = array<i32>} : memref<128x128xbf16, #tpu.memory_space<vmem>>, vector<128x128xbf16>,
    return
  }
  func.func @transform_0(%arg0: i32) -> (i32, i32) {
    %c0_i32 = arith.constant 0 : i32
    %c0_i32_0 = arith.constant 0 : i32
    return %arg0, %c0_i32 : i32, i32
  }
  func.func @transform_1(%arg0: i32) -> (i32, i32) {
    %c0_i32 = arith.constant 0 : i32
    %c0_i32_0 = arith.constant 0 : i32
    %c0_i32_1 = arith.constant 0 : i32
    return %c0_i32, %c0_i32_0 : i32, i32
  }
  func.func @transform_2(%arg0: i32) -> (i32, i32) {
    %c0_i32 = arith.constant 0 : i32
    %c0_i32_0 = arith.constant 0 : i32
    %c0_i32_1 = arith.constant 0 : i32
    return %c0_i32, %c0_i32_0 : i32, i32
  }
  func.func @transform_3(%arg0: i32) -> (i32, i32) {
    %c0_i32 = arith.constant 0 : i32
    %c0_i32_0 = arith.constant 0 : i32
    return %arg0, %c0_i32 : i32, i32
  }
}

module attributes {stable_mosaic.version = 11 : i64} {
  func.func @_matmul_bias_kernel(%arg0: i32, %arg1: memref<128x144xbf16, #tpu.memory_space<vmem>>, %arg2: memref<144x128xbf16, #tpu.memory_space<vmem>>, %arg3: memref<1x128xf32, #tpu.memory_space<vmem>>, %arg4: memref<128x128xbf16, #tpu.memory_space<vmem>>) attributes {dimension_semantics = [#tpu.dimension_semantics<parallel>], iteration_bounds = array<i64: 1>, scalar_prefetch = 0 : i64, scratch_operands = 0 : i64, tpu.core_type = #tpu.core_type<tc>, window_params = [{transform_indices = @transform_0, window_bounds = array<i64: 128, 144>}, {pipeline_mode = #tpu.pipeline_mode<synchronous>, transform_indices = @transform_1, window_bounds = array<i64: 144, 128>}, {pipeline_mode = #tpu.pipeline_mode<synchronous>, transform_indices = @transform_2, window_bounds = array<i64: 1, 128>}, {transform_indices = @transform_3, window_bounds = array<i64: 128, 128>}]} {
    %c0 = arith.constant 0 : index
    %c0_0 = arith.constant 0 : index
    %0 = vector.load %arg1[%c0, %c0_0] : memref<128x144xbf16, #tpu.memory_space<vmem>>, vector<128x144xbf16>
    %c0_1 = arith.constant 0 : index
    %c0_2 = arith.constant 0 : index
    %1 = vector.load %arg2[%c0_1, %c0_2] : memref<144x128xbf16, #tpu.memory_space<vmem>>, vector<144x128xbf16>
    %cst = arith.constant dense<0.000000e+00> : vector<128x128xf32>
    %2 = tpu.matmul %0, %1, %cst {dimension_numbers = #tpu.dot_dimension_numbers<[1], [0], [0], [1], [0, 0, 1, 1], [], []>} : vector<128x144xbf16>, vector<144x128xbf16>, vector<128x128xf32> -> vector<128x128xf32>
    %c0_3 = arith.constant 0 : index
    %c0_4 = arith.constant 0 : index
    %3 = vector.load %arg3[%c0_3, %c0_4] : memref<1x128xf32, #tpu.memory_space<vmem>>, vector<1x128xf32>
    %4 = vector.broadcast %3 : vector<1x128xf32> to vector<128x128xf32>
    %5 = arith.addf %2, %4 : vector<128x128xf32>
    %cst_5 = arith.constant 0.000000e+00 : f32
    %6 = vector.broadcast %cst_5 : f32 to vector<128x128xf32>
    %7 = arith.maximumf %5, %6 : vector<128x128xf32>
    %8 = arith.truncf %7 : vector<128x128xf32> to vector<128x128xbf16>
    %c0_6 = arith.constant 0 : index
    %c0_7 = arith.constant 0 : index
    %9 = vector.load %arg4[%c0_6, %c0_7] : memref<128x128xbf16, #tpu.memory_space<vmem>>, vector<128x128xbf16>
    tpu.vector_store %arg4[%c0_6, %c0_7], %8 {strides = array<i32>} : memref<128x128xbf16, #tpu.memory_space<vmem>>, vector<128x128xbf16>,
    return
  }
  func.func @transform_0(%arg0: i32) -> (i32, i32) {
    %c0_i32 = arith.constant 0 : i32
    %c0_i32_0 = arith.constant 0 : i32
    return %arg0, %c0_i32 : i32, i32
  }
  func.func @transform_1(%arg0: i32) -> (i32, i32) {
    %c0_i32 = arith.constant 0 : i32
    %c0_i32_0 = arith.constant 0 : i32
    %c0_i32_1 = arith.constant 0 : i32
    return %c0_i32, %c0_i32_0 : i32, i32
  }
  func.func @transform_2(%arg0: i32) -> (i32, i32) {
    %c0_i32 = arith.constant 0 : i32
    %c0_i32_0 = arith.constant 0 : i32
    %c0_i32_1 = arith.constant 0 : i32
    return %c0_i32, %c0_i32_0 : i32, i32
  }
  func.func @transform_3(%arg0: i32) -> (i32, i32) {
    %c0_i32 = arith.constant 0 : i32
    %c0_i32_0 = arith.constant 0 : i32
    return %arg0, %c0_i32 : i32, i32
  }
}

module attributes {stable_mosaic.version = 11 : i64} {
  func.func @_matmul2_bias_kernel(%arg0: i32, %arg1: memref<128x144xbf16, #tpu.memory_space<vmem>>, %arg2: memref<144x128xbf16, #tpu.memory_space<vmem>>, %arg3: memref<128x8xbf16, #tpu.memory_space<vmem>>, %arg4: memref<8x128xbf16, #tpu.memory_space<vmem>>, %arg5: memref<1x128xf32, #tpu.memory_space<vmem>>, %arg6: memref<128x128xbf16, #tpu.memory_space<vmem>>) attributes {dimension_semantics = [#tpu.dimension_semantics<parallel>], iteration_bounds = array<i64: 1>, scalar_prefetch = 0 : i64, scratch_operands = 0 : i64, tpu.core_type = #tpu.core_type<tc>, window_params = [{transform_indices = @transform_0, window_bounds = array<i64: 128, 144>}, {pipeline_mode = #tpu.pipeline_mode<synchronous>, transform_indices = @transform_1, window_bounds = array<i64: 144, 128>}, {transform_indices = @transform_2, window_bounds = array<i64: 128, 8>}, {pipeline_mode = #tpu.pipeline_mode<synchronous>, transform_indices = @transform_3, window_bounds = array<i64: 8, 128>}, {pipeline_mode = #tpu.pipeline_mode<synchronous>, transform_indices = @transform_4, window_bounds = array<i64: 1, 128>}, {transform_indices = @transform_5, window_bounds = array<i64: 128, 128>}]} {
    %c0 = arith.constant 0 : index
    %c0_0 = arith.constant 0 : index
    %0 = vector.load %arg1[%c0, %c0_0] : memref<128x144xbf16, #tpu.memory_space<vmem>>, vector<128x144xbf16>
    %c0_1 = arith.constant 0 : index
    %c0_2 = arith.constant 0 : index
    %1 = vector.load %arg2[%c0_1, %c0_2] : memref<144x128xbf16, #tpu.memory_space<vmem>>, vector<144x128xbf16>
    %cst = arith.constant dense<0.000000e+00> : vector<128x128xf32>
    %2 = tpu.matmul %0, %1, %cst {dimension_numbers = #tpu.dot_dimension_numbers<[1], [0], [0], [1], [0, 0, 1, 1], [], []>} : vector<128x144xbf16>, vector<144x128xbf16>, vector<128x128xf32> -> vector<128x128xf32>
    %c0_3 = arith.constant 0 : index
    %c0_4 = arith.constant 0 : index
    %3 = vector.load %arg3[%c0_3, %c0_4] : memref<128x8xbf16, #tpu.memory_space<vmem>>, vector<128x8xbf16>
    %c0_5 = arith.constant 0 : index
    %c0_6 = arith.constant 0 : index
    %4 = vector.load %arg4[%c0_5, %c0_6] : memref<8x128xbf16, #tpu.memory_space<vmem>>, vector<8x128xbf16>
    %cst_7 = arith.constant dense<0.000000e+00> : vector<128x128xf32>
    %5 = tpu.matmul %3, %4, %cst_7 {dimension_numbers = #tpu.dot_dimension_numbers<[1], [0], [0], [1], [0, 0, 1, 1], [], []>} : vector<128x8xbf16>, vector<8x128xbf16>, vector<128x128xf32> -> vector<128x128xf32>
    %6 = arith.addf %2, %5 : vector<128x128xf32>
    %c0_8 = arith.constant 0 : index
    %c0_9 = arith.constant 0 : index
    %7 = vector.load %arg5[%c0_8, %c0_9] : memref<1x128xf32, #tpu.memory_space<vmem>>, vector<1x128xf32>
    %8 = vector.broadcast %7 : vector<1x128xf32> to vector<128x128xf32>
    %9 = arith.addf %6, %8 : vector<128x128xf32>
    %cst_10 = arith.constant 0.000000e+00 : f32
    %10 = vector.broadcast %cst_10 : f32 to vector<128x128xf32>
    %11 = arith.maximumf %9, %10 : vector<128x128xf32>
    %12 = arith.truncf %11 : vector<128x128xf32> to vector<128x128xbf16>
    %c0_11 = arith.constant 0 : index
    %c0_12 = arith.constant 0 : index
    %13 = vector.load %arg6[%c0_11, %c0_12] : memref<128x128xbf16, #tpu.memory_space<vmem>>, vector<128x128xbf16>
    tpu.vector_store %arg6[%c0_11, %c0_12], %12 {strides = array<i32>} : memref<128x128xbf16, #tpu.memory_space<vmem>>, vector<128x128xbf16>,
    return
  }
  func.func @transform_0(%arg0: i32) -> (i32, i32) {
    %c0_i32 = arith.constant 0 : i32
    %c0_i32_0 = arith.constant 0 : i32
    return %arg0, %c0_i32 : i32, i32
  }
  func.func @transform_1(%arg0: i32) -> (i32, i32) {
    %c0_i32 = arith.constant 0 : i32
    %c0_i32_0 = arith.constant 0 : i32
    %c0_i32_1 = arith.constant 0 : i32
    return %c0_i32, %c0_i32_0 : i32, i32
  }
  func.func @transform_2(%arg0: i32) -> (i32, i32) {
    %c0_i32 = arith.constant 0 : i32
    %c0_i32_0 = arith.constant 0 : i32
    return %arg0, %c0_i32 : i32, i32
  }
  func.func @transform_3(%arg0: i32) -> (i32, i32) {
    %c0_i32 = arith.constant 0 : i32
    %c0_i32_0 = arith.constant 0 : i32
    %c0_i32_1 = arith.constant 0 : i32
    return %c0_i32, %c0_i32_0 : i32, i32
  }
  func.func @transform_4(%arg0: i32) -> (i32, i32) {
    %c0_i32 = arith.constant 0 : i32
    %c0_i32_0 = arith.constant 0 : i32
    %c0_i32_1 = arith.constant 0 : i32
    return %c0_i32, %c0_i32_0 : i32, i32
  }
  func.func @transform_5(%arg0: i32) -> (i32, i32) {
    %c0_i32 = arith.constant 0 : i32
    %c0_i32_0 = arith.constant 0 : i32
    return %arg0, %c0_i32 : i32, i32
  }
}

module attributes {stable_mosaic.version = 11 : i64} {
  func.func @_matmul_bias_res_kernel(%arg0: i32, %arg1: memref<128x144xbf16, #tpu.memory_space<vmem>>, %arg2: memref<144x128xbf16, #tpu.memory_space<vmem>>, %arg3: memref<1x128xf32, #tpu.memory_space<vmem>>, %arg4: memref<128x128xbf16, #tpu.memory_space<vmem>>, %arg5: memref<128x128xbf16, #tpu.memory_space<vmem>>) attributes {dimension_semantics = [#tpu.dimension_semantics<parallel>], iteration_bounds = array<i64: 1>, scalar_prefetch = 0 : i64, scratch_operands = 0 : i64, tpu.core_type = #tpu.core_type<tc>, window_params = [{transform_indices = @transform_0, window_bounds = array<i64: 128, 144>}, {pipeline_mode = #tpu.pipeline_mode<synchronous>, transform_indices = @transform_1, window_bounds = array<i64: 144, 128>}, {pipeline_mode = #tpu.pipeline_mode<synchronous>, transform_indices = @transform_2, window_bounds = array<i64: 1, 128>}, {transform_indices = @transform_3, window_bounds = array<i64: 128, 128>}, {transform_indices = @transform_4, window_bounds = array<i64: 128, 128>}]} {
    %c0 = arith.constant 0 : index
    %c0_0 = arith.constant 0 : index
    %0 = vector.load %arg1[%c0, %c0_0] : memref<128x144xbf16, #tpu.memory_space<vmem>>, vector<128x144xbf16>
    %c0_1 = arith.constant 0 : index
    %c0_2 = arith.constant 0 : index
    %1 = vector.load %arg2[%c0_1, %c0_2] : memref<144x128xbf16, #tpu.memory_space<vmem>>, vector<144x128xbf16>
    %cst = arith.constant dense<0.000000e+00> : vector<128x128xf32>
    %2 = tpu.matmul %0, %1, %cst {dimension_numbers = #tpu.dot_dimension_numbers<[1], [0], [0], [1], [0, 0, 1, 1], [], []>} : vector<128x144xbf16>, vector<144x128xbf16>, vector<128x128xf32> -> vector<128x128xf32>
    %c0_3 = arith.constant 0 : index
    %c0_4 = arith.constant 0 : index
    %3 = vector.load %arg3[%c0_3, %c0_4] : memref<1x128xf32, #tpu.memory_space<vmem>>, vector<1x128xf32>
    %4 = vector.broadcast %3 : vector<1x128xf32> to vector<128x128xf32>
    %5 = arith.addf %2, %4 : vector<128x128xf32>
    %c0_5 = arith.constant 0 : index
    %c0_6 = arith.constant 0 : index
    %6 = vector.load %arg4[%c0_5, %c0_6] : memref<128x128xbf16, #tpu.memory_space<vmem>>, vector<128x128xbf16>
    %7 = arith.extf %6 : vector<128x128xbf16> to vector<128x128xf32>
    %8 = arith.addf %5, %7 : vector<128x128xf32>
    %cst_7 = arith.constant 0.000000e+00 : f32
    %9 = vector.broadcast %cst_7 : f32 to vector<128x128xf32>
    %10 = arith.maximumf %8, %9 : vector<128x128xf32>
    %11 = arith.truncf %10 : vector<128x128xf32> to vector<128x128xbf16>
    %c0_8 = arith.constant 0 : index
    %c0_9 = arith.constant 0 : index
    %12 = vector.load %arg5[%c0_8, %c0_9] : memref<128x128xbf16, #tpu.memory_space<vmem>>, vector<128x128xbf16>
    tpu.vector_store %arg5[%c0_8, %c0_9], %11 {strides = array<i32>} : memref<128x128xbf16, #tpu.memory_space<vmem>>, vector<128x128xbf16>,
    return
  }
  func.func @transform_0(%arg0: i32) -> (i32, i32) {
    %c0_i32 = arith.constant 0 : i32
    %c0_i32_0 = arith.constant 0 : i32
    return %arg0, %c0_i32 : i32, i32
  }
  func.func @transform_1(%arg0: i32) -> (i32, i32) {
    %c0_i32 = arith.constant 0 : i32
    %c0_i32_0 = arith.constant 0 : i32
    %c0_i32_1 = arith.constant 0 : i32
    return %c0_i32, %c0_i32_0 : i32, i32
  }
  func.func @transform_2(%arg0: i32) -> (i32, i32) {
    %c0_i32 = arith.constant 0 : i32
    %c0_i32_0 = arith.constant 0 : i32
    %c0_i32_1 = arith.constant 0 : i32
    return %c0_i32, %c0_i32_0 : i32, i32
  }
  func.func @transform_3(%arg0: i32) -> (i32, i32) {
    %c0_i32 = arith.constant 0 : i32
    %c0_i32_0 = arith.constant 0 : i32
    return %arg0, %c0_i32 : i32, i32
  }
  func.func @transform_4(%arg0: i32) -> (i32, i32) {
    %c0_i32 = arith.constant 0 : i32
    %c0_i32_0 = arith.constant 0 : i32
    return %arg0, %c0_i32 : i32, i32
  }
}

module attributes {stable_mosaic.version = 11 : i64} {
  func.func @_matmul_bias_kernel(%arg0: i32, %arg1: memref<32x144xbf16, #tpu.memory_space<vmem>>, %arg2: memref<144x128xbf16, #tpu.memory_space<vmem>>, %arg3: memref<1x128xf32, #tpu.memory_space<vmem>>, %arg4: memref<32x128xbf16, #tpu.memory_space<vmem>>) attributes {dimension_semantics = [#tpu.dimension_semantics<parallel>], iteration_bounds = array<i64: 1>, scalar_prefetch = 0 : i64, scratch_operands = 0 : i64, tpu.core_type = #tpu.core_type<tc>, window_params = [{transform_indices = @transform_0, window_bounds = array<i64: 32, 144>}, {pipeline_mode = #tpu.pipeline_mode<synchronous>, transform_indices = @transform_1, window_bounds = array<i64: 144, 128>}, {pipeline_mode = #tpu.pipeline_mode<synchronous>, transform_indices = @transform_2, window_bounds = array<i64: 1, 128>}, {transform_indices = @transform_3, window_bounds = array<i64: 32, 128>}]} {
    %c0 = arith.constant 0 : index
    %c0_0 = arith.constant 0 : index
    %0 = vector.load %arg1[%c0, %c0_0] : memref<32x144xbf16, #tpu.memory_space<vmem>>, vector<32x144xbf16>
    %c0_1 = arith.constant 0 : index
    %c0_2 = arith.constant 0 : index
    %1 = vector.load %arg2[%c0_1, %c0_2] : memref<144x128xbf16, #tpu.memory_space<vmem>>, vector<144x128xbf16>
    %cst = arith.constant dense<0.000000e+00> : vector<32x128xf32>
    %2 = tpu.matmul %0, %1, %cst {dimension_numbers = #tpu.dot_dimension_numbers<[1], [0], [0], [1], [0, 0, 1, 1], [], []>} : vector<32x144xbf16>, vector<144x128xbf16>, vector<32x128xf32> -> vector<32x128xf32>
    %c0_3 = arith.constant 0 : index
    %c0_4 = arith.constant 0 : index
    %3 = vector.load %arg3[%c0_3, %c0_4] : memref<1x128xf32, #tpu.memory_space<vmem>>, vector<1x128xf32>
    %4 = vector.broadcast %3 : vector<1x128xf32> to vector<32x128xf32>
    %5 = arith.addf %2, %4 : vector<32x128xf32>
    %cst_5 = arith.constant 0.000000e+00 : f32
    %6 = vector.broadcast %cst_5 : f32 to vector<32x128xf32>
    %7 = arith.maximumf %5, %6 : vector<32x128xf32>
    %8 = arith.truncf %7 : vector<32x128xf32> to vector<32x128xbf16>
    %c0_6 = arith.constant 0 : index
    %c0_7 = arith.constant 0 : index
    %9 = vector.load %arg4[%c0_6, %c0_7] : memref<32x128xbf16, #tpu.memory_space<vmem>>, vector<32x128xbf16>
    tpu.vector_store %arg4[%c0_6, %c0_7], %8 {strides = array<i32>} : memref<32x128xbf16, #tpu.memory_space<vmem>>, vector<32x128xbf16>,
    return
  }
  func.func @transform_0(%arg0: i32) -> (i32, i32) {
    %c0_i32 = arith.constant 0 : i32
    %c0_i32_0 = arith.constant 0 : i32
    return %arg0, %c0_i32 : i32, i32
  }
  func.func @transform_1(%arg0: i32) -> (i32, i32) {
    %c0_i32 = arith.constant 0 : i32
    %c0_i32_0 = arith.constant 0 : i32
    %c0_i32_1 = arith.constant 0 : i32
    return %c0_i32, %c0_i32_0 : i32, i32
  }
  func.func @transform_2(%arg0: i32) -> (i32, i32) {
    %c0_i32 = arith.constant 0 : i32
    %c0_i32_0 = arith.constant 0 : i32
    %c0_i32_1 = arith.constant 0 : i32
    return %c0_i32, %c0_i32_0 : i32, i32
  }
  func.func @transform_3(%arg0: i32) -> (i32, i32) {
    %c0_i32 = arith.constant 0 : i32
    %c0_i32_0 = arith.constant 0 : i32
    return %arg0, %c0_i32 : i32, i32
  }
}

module attributes {stable_mosaic.version = 11 : i64} {
  func.func @_matmul2_bias_kernel(%arg0: i32, %arg1: memref<32x288xbf16, #tpu.memory_space<vmem>>, %arg2: memref<288x128xbf16, #tpu.memory_space<vmem>>, %arg3: memref<32x16xbf16, #tpu.memory_space<vmem>>, %arg4: memref<16x128xbf16, #tpu.memory_space<vmem>>, %arg5: memref<1x128xf32, #tpu.memory_space<vmem>>, %arg6: memref<32x128xbf16, #tpu.memory_space<vmem>>) attributes {dimension_semantics = [#tpu.dimension_semantics<parallel>], iteration_bounds = array<i64: 1>, scalar_prefetch = 0 : i64, scratch_operands = 0 : i64, tpu.core_type = #tpu.core_type<tc>, window_params = [{transform_indices = @transform_0, window_bounds = array<i64: 32, 288>}, {pipeline_mode = #tpu.pipeline_mode<synchronous>, transform_indices = @transform_1, window_bounds = array<i64: 288, 128>}, {transform_indices = @transform_2, window_bounds = array<i64: 32, 16>}, {pipeline_mode = #tpu.pipeline_mode<synchronous>, transform_indices = @transform_3, window_bounds = array<i64: 16, 128>}, {pipeline_mode = #tpu.pipeline_mode<synchronous>, transform_indices = @transform_4, window_bounds = array<i64: 1, 128>}, {transform_indices = @transform_5, window_bounds = array<i64: 32, 128>}]} {
    %c0 = arith.constant 0 : index
    %c0_0 = arith.constant 0 : index
    %0 = vector.load %arg1[%c0, %c0_0] : memref<32x288xbf16, #tpu.memory_space<vmem>>, vector<32x288xbf16>
    %c0_1 = arith.constant 0 : index
    %c0_2 = arith.constant 0 : index
    %1 = vector.load %arg2[%c0_1, %c0_2] : memref<288x128xbf16, #tpu.memory_space<vmem>>, vector<288x128xbf16>
    %cst = arith.constant dense<0.000000e+00> : vector<32x128xf32>
    %2 = tpu.matmul %0, %1, %cst {dimension_numbers = #tpu.dot_dimension_numbers<[1], [0], [0], [1], [0, 0, 1, 1], [], []>} : vector<32x288xbf16>, vector<288x128xbf16>, vector<32x128xf32> -> vector<32x128xf32>
    %c0_3 = arith.constant 0 : index
    %c0_4 = arith.constant 0 : index
    %3 = vector.load %arg3[%c0_3, %c0_4] : memref<32x16xbf16, #tpu.memory_space<vmem>>, vector<32x16xbf16>
    %c0_5 = arith.constant 0 : index
    %c0_6 = arith.constant 0 : index
    %4 = vector.load %arg4[%c0_5, %c0_6] : memref<16x128xbf16, #tpu.memory_space<vmem>>, vector<16x128xbf16>
    %cst_7 = arith.constant dense<0.000000e+00> : vector<32x128xf32>
    %5 = tpu.matmul %3, %4, %cst_7 {dimension_numbers = #tpu.dot_dimension_numbers<[1], [0], [0], [1], [0, 0, 1, 1], [], []>} : vector<32x16xbf16>, vector<16x128xbf16>, vector<32x128xf32> -> vector<32x128xf32>
    %6 = arith.addf %2, %5 : vector<32x128xf32>
    %c0_8 = arith.constant 0 : index
    %c0_9 = arith.constant 0 : index
    %7 = vector.load %arg5[%c0_8, %c0_9] : memref<1x128xf32, #tpu.memory_space<vmem>>, vector<1x128xf32>
    %8 = vector.broadcast %7 : vector<1x128xf32> to vector<32x128xf32>
    %9 = arith.addf %6, %8 : vector<32x128xf32>
    %cst_10 = arith.constant 0.000000e+00 : f32
    %10 = vector.broadcast %cst_10 : f32 to vector<32x128xf32>
    %11 = arith.maximumf %9, %10 : vector<32x128xf32>
    %12 = arith.truncf %11 : vector<32x128xf32> to vector<32x128xbf16>
    %c0_11 = arith.constant 0 : index
    %c0_12 = arith.constant 0 : index
    %13 = vector.load %arg6[%c0_11, %c0_12] : memref<32x128xbf16, #tpu.memory_space<vmem>>, vector<32x128xbf16>
    tpu.vector_store %arg6[%c0_11, %c0_12], %12 {strides = array<i32>} : memref<32x128xbf16, #tpu.memory_space<vmem>>, vector<32x128xbf16>,
    return
  }
  func.func @transform_0(%arg0: i32) -> (i32, i32) {
    %c0_i32 = arith.constant 0 : i32
    %c0_i32_0 = arith.constant 0 : i32
    return %arg0, %c0_i32 : i32, i32
  }
  func.func @transform_1(%arg0: i32) -> (i32, i32) {
    %c0_i32 = arith.constant 0 : i32
    %c0_i32_0 = arith.constant 0 : i32
    %c0_i32_1 = arith.constant 0 : i32
    return %c0_i32, %c0_i32_0 : i32, i32
  }
  func.func @transform_2(%arg0: i32) -> (i32, i32) {
    %c0_i32 = arith.constant 0 : i32
    %c0_i32_0 = arith.constant 0 : i32
    return %arg0, %c0_i32 : i32, i32
  }
  func.func @transform_3(%arg0: i32) -> (i32, i32) {
    %c0_i32 = arith.constant 0 : i32
    %c0_i32_0 = arith.constant 0 : i32
    %c0_i32_1 = arith.constant 0 : i32
    return %c0_i32, %c0_i32_0 : i32, i32
  }
  func.func @transform_4(%arg0: i32) -> (i32, i32) {
    %c0_i32 = arith.constant 0 : i32
    %c0_i32_0 = arith.constant 0 : i32
    %c0_i32_1 = arith.constant 0 : i32
    return %c0_i32, %c0_i32_0 : i32, i32
  }
  func.func @transform_5(%arg0: i32) -> (i32, i32) {
    %c0_i32 = arith.constant 0 : i32
    %c0_i32_0 = arith.constant 0 : i32
    return %arg0, %c0_i32 : i32, i32
  }
}

module attributes {stable_mosaic.version = 11 : i64} {
  func.func @_matmul_bias_kernel(%arg0: i32, %arg1: memref<32x288xbf16, #tpu.memory_space<vmem>>, %arg2: memref<288x128xbf16, #tpu.memory_space<vmem>>, %arg3: memref<1x128xf32, #tpu.memory_space<vmem>>, %arg4: memref<32x128xbf16, #tpu.memory_space<vmem>>) attributes {dimension_semantics = [#tpu.dimension_semantics<parallel>], iteration_bounds = array<i64: 1>, scalar_prefetch = 0 : i64, scratch_operands = 0 : i64, tpu.core_type = #tpu.core_type<tc>, window_params = [{transform_indices = @transform_0, window_bounds = array<i64: 32, 288>}, {pipeline_mode = #tpu.pipeline_mode<synchronous>, transform_indices = @transform_1, window_bounds = array<i64: 288, 128>}, {pipeline_mode = #tpu.pipeline_mode<synchronous>, transform_indices = @transform_2, window_bounds = array<i64: 1, 128>}, {transform_indices = @transform_3, window_bounds = array<i64: 32, 128>}]} {
    %c0 = arith.constant 0 : index
    %c0_0 = arith.constant 0 : index
    %0 = vector.load %arg1[%c0, %c0_0] : memref<32x288xbf16, #tpu.memory_space<vmem>>, vector<32x288xbf16>
    %c0_1 = arith.constant 0 : index
    %c0_2 = arith.constant 0 : index
    %1 = vector.load %arg2[%c0_1, %c0_2] : memref<288x128xbf16, #tpu.memory_space<vmem>>, vector<288x128xbf16>
    %cst = arith.constant dense<0.000000e+00> : vector<32x128xf32>
    %2 = tpu.matmul %0, %1, %cst {dimension_numbers = #tpu.dot_dimension_numbers<[1], [0], [0], [1], [0, 0, 1, 1], [], []>} : vector<32x288xbf16>, vector<288x128xbf16>, vector<32x128xf32> -> vector<32x128xf32>
    %c0_3 = arith.constant 0 : index
    %c0_4 = arith.constant 0 : index
    %3 = vector.load %arg3[%c0_3, %c0_4] : memref<1x128xf32, #tpu.memory_space<vmem>>, vector<1x128xf32>
    %4 = vector.broadcast %3 : vector<1x128xf32> to vector<32x128xf32>
    %5 = arith.addf %2, %4 : vector<32x128xf32>
    %cst_5 = arith.constant 0.000000e+00 : f32
    %6 = vector.broadcast %cst_5 : f32 to vector<32x128xf32>
    %7 = arith.maximumf %5, %6 : vector<32x128xf32>
    %8 = arith.truncf %7 : vector<32x128xf32> to vector<32x128xbf16>
    %c0_6 = arith.constant 0 : index
    %c0_7 = arith.constant 0 : index
    %9 = vector.load %arg4[%c0_6, %c0_7] : memref<32x128xbf16, #tpu.memory_space<vmem>>, vector<32x128xbf16>
    tpu.vector_store %arg4[%c0_6, %c0_7], %8 {strides = array<i32>} : memref<32x128xbf16, #tpu.memory_space<vmem>>, vector<32x128xbf16>,
    return
  }
  func.func @transform_0(%arg0: i32) -> (i32, i32) {
    %c0_i32 = arith.constant 0 : i32
    %c0_i32_0 = arith.constant 0 : i32
    return %arg0, %c0_i32 : i32, i32
  }
  func.func @transform_1(%arg0: i32) -> (i32, i32) {
    %c0_i32 = arith.constant 0 : i32
    %c0_i32_0 = arith.constant 0 : i32
    %c0_i32_1 = arith.constant 0 : i32
    return %c0_i32, %c0_i32_0 : i32, i32
  }
  func.func @transform_2(%arg0: i32) -> (i32, i32) {
    %c0_i32 = arith.constant 0 : i32
    %c0_i32_0 = arith.constant 0 : i32
    %c0_i32_1 = arith.constant 0 : i32
    return %c0_i32, %c0_i32_0 : i32, i32
  }
  func.func @transform_3(%arg0: i32) -> (i32, i32) {
    %c0_i32 = arith.constant 0 : i32
    %c0_i32_0 = arith.constant 0 : i32
    return %arg0, %c0_i32 : i32, i32
  }
}

module attributes {stable_mosaic.version = 11 : i64} {
  func.func @_matmul_bias_res_kernel(%arg0: i32, %arg1: memref<32x288xbf16, #tpu.memory_space<vmem>>, %arg2: memref<288x128xbf16, #tpu.memory_space<vmem>>, %arg3: memref<1x128xf32, #tpu.memory_space<vmem>>, %arg4: memref<32x128xbf16, #tpu.memory_space<vmem>>, %arg5: memref<32x128xbf16, #tpu.memory_space<vmem>>) attributes {dimension_semantics = [#tpu.dimension_semantics<parallel>], iteration_bounds = array<i64: 1>, scalar_prefetch = 0 : i64, scratch_operands = 0 : i64, tpu.core_type = #tpu.core_type<tc>, window_params = [{transform_indices = @transform_0, window_bounds = array<i64: 32, 288>}, {pipeline_mode = #tpu.pipeline_mode<synchronous>, transform_indices = @transform_1, window_bounds = array<i64: 288, 128>}, {pipeline_mode = #tpu.pipeline_mode<synchronous>, transform_indices = @transform_2, window_bounds = array<i64: 1, 128>}, {transform_indices = @transform_3, window_bounds = array<i64: 32, 128>}, {transform_indices = @transform_4, window_bounds = array<i64: 32, 128>}]} {
    %c0 = arith.constant 0 : index
    %c0_0 = arith.constant 0 : index
    %0 = vector.load %arg1[%c0, %c0_0] : memref<32x288xbf16, #tpu.memory_space<vmem>>, vector<32x288xbf16>
    %c0_1 = arith.constant 0 : index
    %c0_2 = arith.constant 0 : index
    %1 = vector.load %arg2[%c0_1, %c0_2] : memref<288x128xbf16, #tpu.memory_space<vmem>>, vector<288x128xbf16>
    %cst = arith.constant dense<0.000000e+00> : vector<32x128xf32>
    %2 = tpu.matmul %0, %1, %cst {dimension_numbers = #tpu.dot_dimension_numbers<[1], [0], [0], [1], [0, 0, 1, 1], [], []>} : vector<32x288xbf16>, vector<288x128xbf16>, vector<32x128xf32> -> vector<32x128xf32>
    %c0_3 = arith.constant 0 : index
    %c0_4 = arith.constant 0 : index
    %3 = vector.load %arg3[%c0_3, %c0_4] : memref<1x128xf32, #tpu.memory_space<vmem>>, vector<1x128xf32>
    %4 = vector.broadcast %3 : vector<1x128xf32> to vector<32x128xf32>
    %5 = arith.addf %2, %4 : vector<32x128xf32>
    %c0_5 = arith.constant 0 : index
    %c0_6 = arith.constant 0 : index
    %6 = vector.load %arg4[%c0_5, %c0_6] : memref<32x128xbf16, #tpu.memory_space<vmem>>, vector<32x128xbf16>
    %7 = arith.extf %6 : vector<32x128xbf16> to vector<32x128xf32>
    %8 = arith.addf %5, %7 : vector<32x128xf32>
    %cst_7 = arith.constant 0.000000e+00 : f32
    %9 = vector.broadcast %cst_7 : f32 to vector<32x128xf32>
    %10 = arith.maximumf %8, %9 : vector<32x128xf32>
    %11 = arith.truncf %10 : vector<32x128xf32> to vector<32x128xbf16>
    %c0_8 = arith.constant 0 : index
    %c0_9 = arith.constant 0 : index
    %12 = vector.load %arg5[%c0_8, %c0_9] : memref<32x128xbf16, #tpu.memory_space<vmem>>, vector<32x128xbf16>
    tpu.vector_store %arg5[%c0_8, %c0_9], %11 {strides = array<i32>} : memref<32x128xbf16, #tpu.memory_space<vmem>>, vector<32x128xbf16>,
    return
  }
  func.func @transform_0(%arg0: i32) -> (i32, i32) {
    %c0_i32 = arith.constant 0 : i32
    %c0_i32_0 = arith.constant 0 : i32
    return %arg0, %c0_i32 : i32, i32
  }
  func.func @transform_1(%arg0: i32) -> (i32, i32) {
    %c0_i32 = arith.constant 0 : i32
    %c0_i32_0 = arith.constant 0 : i32
    %c0_i32_1 = arith.constant 0 : i32
    return %c0_i32, %c0_i32_0 : i32, i32
  }
  func.func @transform_2(%arg0: i32) -> (i32, i32) {
    %c0_i32 = arith.constant 0 : i32
    %c0_i32_0 = arith.constant 0 : i32
    %c0_i32_1 = arith.constant 0 : i32
    return %c0_i32, %c0_i32_0 : i32, i32
  }
  func.func @transform_3(%arg0: i32) -> (i32, i32) {
    %c0_i32 = arith.constant 0 : i32
    %c0_i32_0 = arith.constant 0 : i32
    return %arg0, %c0_i32 : i32, i32
  }
  func.func @transform_4(%arg0: i32) -> (i32, i32) {
    %c0_i32 = arith.constant 0 : i32
    %c0_i32_0 = arith.constant 0 : i32
    return %arg0, %c0_i32 : i32, i32
  }
}

module attributes {stable_mosaic.version = 11 : i64} {
  func.func @_matmul_bias_kernel(%arg0: i32, %arg1: memref<8x288xbf16, #tpu.memory_space<vmem>>, %arg2: memref<288x128xbf16, #tpu.memory_space<vmem>>, %arg3: memref<1x128xf32, #tpu.memory_space<vmem>>, %arg4: memref<8x128xbf16, #tpu.memory_space<vmem>>) attributes {dimension_semantics = [#tpu.dimension_semantics<parallel>], iteration_bounds = array<i64: 1>, scalar_prefetch = 0 : i64, scratch_operands = 0 : i64, tpu.core_type = #tpu.core_type<tc>, window_params = [{transform_indices = @transform_0, window_bounds = array<i64: 8, 288>}, {pipeline_mode = #tpu.pipeline_mode<synchronous>, transform_indices = @transform_1, window_bounds = array<i64: 288, 128>}, {pipeline_mode = #tpu.pipeline_mode<synchronous>, transform_indices = @transform_2, window_bounds = array<i64: 1, 128>}, {transform_indices = @transform_3, window_bounds = array<i64: 8, 128>}]} {
    %c0 = arith.constant 0 : index
    %c0_0 = arith.constant 0 : index
    %0 = vector.load %arg1[%c0, %c0_0] : memref<8x288xbf16, #tpu.memory_space<vmem>>, vector<8x288xbf16>
    %c0_1 = arith.constant 0 : index
    %c0_2 = arith.constant 0 : index
    %1 = vector.load %arg2[%c0_1, %c0_2] : memref<288x128xbf16, #tpu.memory_space<vmem>>, vector<288x128xbf16>
    %cst = arith.constant dense<0.000000e+00> : vector<8x128xf32>
    %2 = tpu.matmul %0, %1, %cst {dimension_numbers = #tpu.dot_dimension_numbers<[1], [0], [0], [1], [0, 0, 1, 1], [], []>} : vector<8x288xbf16>, vector<288x128xbf16>, vector<8x128xf32> -> vector<8x128xf32>
    %c0_3 = arith.constant 0 : index
    %c0_4 = arith.constant 0 : index
    %3 = vector.load %arg3[%c0_3, %c0_4] : memref<1x128xf32, #tpu.memory_space<vmem>>, vector<1x128xf32>
    %4 = vector.broadcast %3 : vector<1x128xf32> to vector<8x128xf32>
    %5 = arith.addf %2, %4 : vector<8x128xf32>
    %cst_5 = arith.constant 0.000000e+00 : f32
    %6 = vector.broadcast %cst_5 : f32 to vector<8x128xf32>
    %7 = arith.maximumf %5, %6 : vector<8x128xf32>
    %8 = arith.truncf %7 : vector<8x128xf32> to vector<8x128xbf16>
    %c0_6 = arith.constant 0 : index
    %c0_7 = arith.constant 0 : index
    %9 = vector.load %arg4[%c0_6, %c0_7] : memref<8x128xbf16, #tpu.memory_space<vmem>>, vector<8x128xbf16>
    tpu.vector_store %arg4[%c0_6, %c0_7], %8 {strides = array<i32>} : memref<8x128xbf16, #tpu.memory_space<vmem>>, vector<8x128xbf16>,
    return
  }
  func.func @transform_0(%arg0: i32) -> (i32, i32) {
    %c0_i32 = arith.constant 0 : i32
    %c0_i32_0 = arith.constant 0 : i32
    return %arg0, %c0_i32 : i32, i32
  }
  func.func @transform_1(%arg0: i32) -> (i32, i32) {
    %c0_i32 = arith.constant 0 : i32
    %c0_i32_0 = arith.constant 0 : i32
    %c0_i32_1 = arith.constant 0 : i32
    return %c0_i32, %c0_i32_0 : i32, i32
  }
  func.func @transform_2(%arg0: i32) -> (i32, i32) {
    %c0_i32 = arith.constant 0 : i32
    %c0_i32_0 = arith.constant 0 : i32
    %c0_i32_1 = arith.constant 0 : i32
    return %c0_i32, %c0_i32_0 : i32, i32
  }
  func.func @transform_3(%arg0: i32) -> (i32, i32) {
    %c0_i32 = arith.constant 0 : i32
    %c0_i32_0 = arith.constant 0 : i32
    return %arg0, %c0_i32 : i32, i32
  }
}

module attributes {stable_mosaic.version = 11 : i64} {
  func.func @_matmul2_bias_kernel(%arg0: i32, %arg1: memref<8x576xbf16, #tpu.memory_space<vmem>>, %arg2: memref<576x128xbf16, #tpu.memory_space<vmem>>, %arg3: memref<8x32xbf16, #tpu.memory_space<vmem>>, %arg4: memref<32x128xbf16, #tpu.memory_space<vmem>>, %arg5: memref<1x128xf32, #tpu.memory_space<vmem>>, %arg6: memref<8x128xbf16, #tpu.memory_space<vmem>>) attributes {dimension_semantics = [#tpu.dimension_semantics<parallel>], iteration_bounds = array<i64: 1>, scalar_prefetch = 0 : i64, scratch_operands = 0 : i64, tpu.core_type = #tpu.core_type<tc>, window_params = [{transform_indices = @transform_0, window_bounds = array<i64: 8, 576>}, {pipeline_mode = #tpu.pipeline_mode<synchronous>, transform_indices = @transform_1, window_bounds = array<i64: 576, 128>}, {transform_indices = @transform_2, window_bounds = array<i64: 8, 32>}, {pipeline_mode = #tpu.pipeline_mode<synchronous>, transform_indices = @transform_3, window_bounds = array<i64: 32, 128>}, {pipeline_mode = #tpu.pipeline_mode<synchronous>, transform_indices = @transform_4, window_bounds = array<i64: 1, 128>}, {transform_indices = @transform_5, window_bounds = array<i64: 8, 128>}]} {
    %c0 = arith.constant 0 : index
    %c0_0 = arith.constant 0 : index
    %0 = vector.load %arg1[%c0, %c0_0] : memref<8x576xbf16, #tpu.memory_space<vmem>>, vector<8x576xbf16>
    %c0_1 = arith.constant 0 : index
    %c0_2 = arith.constant 0 : index
    %1 = vector.load %arg2[%c0_1, %c0_2] : memref<576x128xbf16, #tpu.memory_space<vmem>>, vector<576x128xbf16>
    %cst = arith.constant dense<0.000000e+00> : vector<8x128xf32>
    %2 = tpu.matmul %0, %1, %cst {dimension_numbers = #tpu.dot_dimension_numbers<[1], [0], [0], [1], [0, 0, 1, 1], [], []>} : vector<8x576xbf16>, vector<576x128xbf16>, vector<8x128xf32> -> vector<8x128xf32>
    %c0_3 = arith.constant 0 : index
    %c0_4 = arith.constant 0 : index
    %3 = vector.load %arg3[%c0_3, %c0_4] : memref<8x32xbf16, #tpu.memory_space<vmem>>, vector<8x32xbf16>
    %c0_5 = arith.constant 0 : index
    %c0_6 = arith.constant 0 : index
    %4 = vector.load %arg4[%c0_5, %c0_6] : memref<32x128xbf16, #tpu.memory_space<vmem>>, vector<32x128xbf16>
    %cst_7 = arith.constant dense<0.000000e+00> : vector<8x128xf32>
    %5 = tpu.matmul %3, %4, %cst_7 {dimension_numbers = #tpu.dot_dimension_numbers<[1], [0], [0], [1], [0, 0, 1, 1], [], []>} : vector<8x32xbf16>, vector<32x128xbf16>, vector<8x128xf32> -> vector<8x128xf32>
    %6 = arith.addf %2, %5 : vector<8x128xf32>
    %c0_8 = arith.constant 0 : index
    %c0_9 = arith.constant 0 : index
    %7 = vector.load %arg5[%c0_8, %c0_9] : memref<1x128xf32, #tpu.memory_space<vmem>>, vector<1x128xf32>
    %8 = vector.broadcast %7 : vector<1x128xf32> to vector<8x128xf32>
    %9 = arith.addf %6, %8 : vector<8x128xf32>
    %cst_10 = arith.constant 0.000000e+00 : f32
    %10 = vector.broadcast %cst_10 : f32 to vector<8x128xf32>
    %11 = arith.maximumf %9, %10 : vector<8x128xf32>
    %12 = arith.truncf %11 : vector<8x128xf32> to vector<8x128xbf16>
    %c0_11 = arith.constant 0 : index
    %c0_12 = arith.constant 0 : index
    %13 = vector.load %arg6[%c0_11, %c0_12] : memref<8x128xbf16, #tpu.memory_space<vmem>>, vector<8x128xbf16>
    tpu.vector_store %arg6[%c0_11, %c0_12], %12 {strides = array<i32>} : memref<8x128xbf16, #tpu.memory_space<vmem>>, vector<8x128xbf16>,
    return
  }
  func.func @transform_0(%arg0: i32) -> (i32, i32) {
    %c0_i32 = arith.constant 0 : i32
    %c0_i32_0 = arith.constant 0 : i32
    return %arg0, %c0_i32 : i32, i32
  }
  func.func @transform_1(%arg0: i32) -> (i32, i32) {
    %c0_i32 = arith.constant 0 : i32
    %c0_i32_0 = arith.constant 0 : i32
    %c0_i32_1 = arith.constant 0 : i32
    return %c0_i32, %c0_i32_0 : i32, i32
  }
  func.func @transform_2(%arg0: i32) -> (i32, i32) {
    %c0_i32 = arith.constant 0 : i32
    %c0_i32_0 = arith.constant 0 : i32
    return %arg0, %c0_i32 : i32, i32
  }
  func.func @transform_3(%arg0: i32) -> (i32, i32) {
    %c0_i32 = arith.constant 0 : i32
    %c0_i32_0 = arith.constant 0 : i32
    %c0_i32_1 = arith.constant 0 : i32
    return %c0_i32, %c0_i32_0 : i32, i32
  }
  func.func @transform_4(%arg0: i32) -> (i32, i32) {
    %c0_i32 = arith.constant 0 : i32
    %c0_i32_0 = arith.constant 0 : i32
    %c0_i32_1 = arith.constant 0 : i32
    return %c0_i32, %c0_i32_0 : i32, i32
  }
  func.func @transform_5(%arg0: i32) -> (i32, i32) {
    %c0_i32 = arith.constant 0 : i32
    %c0_i32_0 = arith.constant 0 : i32
    return %arg0, %c0_i32 : i32, i32
  }
}

module attributes {stable_mosaic.version = 11 : i64} {
  func.func @_matmul_bias_kernel(%arg0: i32, %arg1: memref<8x576xbf16, #tpu.memory_space<vmem>>, %arg2: memref<576x128xbf16, #tpu.memory_space<vmem>>, %arg3: memref<1x128xf32, #tpu.memory_space<vmem>>, %arg4: memref<8x128xbf16, #tpu.memory_space<vmem>>) attributes {dimension_semantics = [#tpu.dimension_semantics<parallel>], iteration_bounds = array<i64: 1>, scalar_prefetch = 0 : i64, scratch_operands = 0 : i64, tpu.core_type = #tpu.core_type<tc>, window_params = [{transform_indices = @transform_0, window_bounds = array<i64: 8, 576>}, {pipeline_mode = #tpu.pipeline_mode<synchronous>, transform_indices = @transform_1, window_bounds = array<i64: 576, 128>}, {pipeline_mode = #tpu.pipeline_mode<synchronous>, transform_indices = @transform_2, window_bounds = array<i64: 1, 128>}, {transform_indices = @transform_3, window_bounds = array<i64: 8, 128>}]} {
    %c0 = arith.constant 0 : index
    %c0_0 = arith.constant 0 : index
    %0 = vector.load %arg1[%c0, %c0_0] : memref<8x576xbf16, #tpu.memory_space<vmem>>, vector<8x576xbf16>
    %c0_1 = arith.constant 0 : index
    %c0_2 = arith.constant 0 : index
    %1 = vector.load %arg2[%c0_1, %c0_2] : memref<576x128xbf16, #tpu.memory_space<vmem>>, vector<576x128xbf16>
    %cst = arith.constant dense<0.000000e+00> : vector<8x128xf32>
    %2 = tpu.matmul %0, %1, %cst {dimension_numbers = #tpu.dot_dimension_numbers<[1], [0], [0], [1], [0, 0, 1, 1], [], []>} : vector<8x576xbf16>, vector<576x128xbf16>, vector<8x128xf32> -> vector<8x128xf32>
    %c0_3 = arith.constant 0 : index
    %c0_4 = arith.constant 0 : index
    %3 = vector.load %arg3[%c0_3, %c0_4] : memref<1x128xf32, #tpu.memory_space<vmem>>, vector<1x128xf32>
    %4 = vector.broadcast %3 : vector<1x128xf32> to vector<8x128xf32>
    %5 = arith.addf %2, %4 : vector<8x128xf32>
    %cst_5 = arith.constant 0.000000e+00 : f32
    %6 = vector.broadcast %cst_5 : f32 to vector<8x128xf32>
    %7 = arith.maximumf %5, %6 : vector<8x128xf32>
    %8 = arith.truncf %7 : vector<8x128xf32> to vector<8x128xbf16>
    %c0_6 = arith.constant 0 : index
    %c0_7 = arith.constant 0 : index
    %9 = vector.load %arg4[%c0_6, %c0_7] : memref<8x128xbf16, #tpu.memory_space<vmem>>, vector<8x128xbf16>
    tpu.vector_store %arg4[%c0_6, %c0_7], %8 {strides = array<i32>} : memref<8x128xbf16, #tpu.memory_space<vmem>>, vector<8x128xbf16>,
    return
  }
  func.func @transform_0(%arg0: i32) -> (i32, i32) {
    %c0_i32 = arith.constant 0 : i32
    %c0_i32_0 = arith.constant 0 : i32
    return %arg0, %c0_i32 : i32, i32
  }
  func.func @transform_1(%arg0: i32) -> (i32, i32) {
    %c0_i32 = arith.constant 0 : i32
    %c0_i32_0 = arith.constant 0 : i32
    %c0_i32_1 = arith.constant 0 : i32
    return %c0_i32, %c0_i32_0 : i32, i32
  }
  func.func @transform_2(%arg0: i32) -> (i32, i32) {
    %c0_i32 = arith.constant 0 : i32
    %c0_i32_0 = arith.constant 0 : i32
    %c0_i32_1 = arith.constant 0 : i32
    return %c0_i32, %c0_i32_0 : i32, i32
  }
  func.func @transform_3(%arg0: i32) -> (i32, i32) {
    %c0_i32 = arith.constant 0 : i32
    %c0_i32_0 = arith.constant 0 : i32
    return %arg0, %c0_i32 : i32, i32
  }
}

module attributes {stable_mosaic.version = 11 : i64} {
  func.func @_matmul_bias_res_kernel(%arg0: i32, %arg1: memref<8x576xbf16, #tpu.memory_space<vmem>>, %arg2: memref<576x128xbf16, #tpu.memory_space<vmem>>, %arg3: memref<1x128xf32, #tpu.memory_space<vmem>>, %arg4: memref<8x128xbf16, #tpu.memory_space<vmem>>, %arg5: memref<8x128xbf16, #tpu.memory_space<vmem>>) attributes {dimension_semantics = [#tpu.dimension_semantics<parallel>], iteration_bounds = array<i64: 1>, scalar_prefetch = 0 : i64, scratch_operands = 0 : i64, tpu.core_type = #tpu.core_type<tc>, window_params = [{transform_indices = @transform_0, window_bounds = array<i64: 8, 576>}, {pipeline_mode = #tpu.pipeline_mode<synchronous>, transform_indices = @transform_1, window_bounds = array<i64: 576, 128>}, {pipeline_mode = #tpu.pipeline_mode<synchronous>, transform_indices = @transform_2, window_bounds = array<i64: 1, 128>}, {transform_indices = @transform_3, window_bounds = array<i64: 8, 128>}, {transform_indices = @transform_4, window_bounds = array<i64: 8, 128>}]} {
    %c0 = arith.constant 0 : index
    %c0_0 = arith.constant 0 : index
    %0 = vector.load %arg1[%c0, %c0_0] : memref<8x576xbf16, #tpu.memory_space<vmem>>, vector<8x576xbf16>
    %c0_1 = arith.constant 0 : index
    %c0_2 = arith.constant 0 : index
    %1 = vector.load %arg2[%c0_1, %c0_2] : memref<576x128xbf16, #tpu.memory_space<vmem>>, vector<576x128xbf16>
    %cst = arith.constant dense<0.000000e+00> : vector<8x128xf32>
    %2 = tpu.matmul %0, %1, %cst {dimension_numbers = #tpu.dot_dimension_numbers<[1], [0], [0], [1], [0, 0, 1, 1], [], []>} : vector<8x576xbf16>, vector<576x128xbf16>, vector<8x128xf32> -> vector<8x128xf32>
    %c0_3 = arith.constant 0 : index
    %c0_4 = arith.constant 0 : index
    %3 = vector.load %arg3[%c0_3, %c0_4] : memref<1x128xf32, #tpu.memory_space<vmem>>, vector<1x128xf32>
    %4 = vector.broadcast %3 : vector<1x128xf32> to vector<8x128xf32>
    %5 = arith.addf %2, %4 : vector<8x128xf32>
    %c0_5 = arith.constant 0 : index
    %c0_6 = arith.constant 0 : index
    %6 = vector.load %arg4[%c0_5, %c0_6] : memref<8x128xbf16, #tpu.memory_space<vmem>>, vector<8x128xbf16>
    %7 = arith.extf %6 : vector<8x128xbf16> to vector<8x128xf32>
    %8 = arith.addf %5, %7 : vector<8x128xf32>
    %cst_7 = arith.constant 0.000000e+00 : f32
    %9 = vector.broadcast %cst_7 : f32 to vector<8x128xf32>
    %10 = arith.maximumf %8, %9 : vector<8x128xf32>
    %11 = arith.truncf %10 : vector<8x128xf32> to vector<8x128xbf16>
    %c0_8 = arith.constant 0 : index
    %c0_9 = arith.constant 0 : index
    %12 = vector.load %arg5[%c0_8, %c0_9] : memref<8x128xbf16, #tpu.memory_space<vmem>>, vector<8x128xbf16>
    tpu.vector_store %arg5[%c0_8, %c0_9], %11 {strides = array<i32>} : memref<8x128xbf16, #tpu.memory_space<vmem>>, vector<8x128xbf16>,
    return
  }
  func.func @transform_0(%arg0: i32) -> (i32, i32) {
    %c0_i32 = arith.constant 0 : i32
    %c0_i32_0 = arith.constant 0 : i32
    return %arg0, %c0_i32 : i32, i32
  }
  func.func @transform_1(%arg0: i32) -> (i32, i32) {
    %c0_i32 = arith.constant 0 : i32
    %c0_i32_0 = arith.constant 0 : i32
    %c0_i32_1 = arith.constant 0 : i32
    return %c0_i32, %c0_i32_0 : i32, i32
  }
  func.func @transform_2(%arg0: i32) -> (i32, i32) {
    %c0_i32 = arith.constant 0 : i32
    %c0_i32_0 = arith.constant 0 : i32
    %c0_i32_1 = arith.constant 0 : i32
    return %c0_i32, %c0_i32_0 : i32, i32
  }
  func.func @transform_3(%arg0: i32) -> (i32, i32) {
    %c0_i32 = arith.constant 0 : i32
    %c0_i32_0 = arith.constant 0 : i32
    return %arg0, %c0_i32 : i32, i32
  }
  func.func @transform_4(%arg0: i32) -> (i32, i32) {
    %c0_i32 = arith.constant 0 : i32
    %c0_i32_0 = arith.constant 0 : i32
    return %arg0, %c0_i32 : i32, i32
  }
}

</mosaic_0001>

<bundles_post_ra>
// kernel: _lambda_.20
= control target key start
LH: loop header
LB: loop body
LE: loop exit
PB: predicated region body
PF: predicated region fallthrough
CT: control target
= control target key end

     0   :  { %s1868_s12 = smov 0   ;;  %s2076_s0 = inlined_call_operand.vmem [shape: bf16[2048,72], index: 0, kind: input, shape index: {}]   ;;  %s2077_s1 = inlined_call_operand.vmem [shape: bf16[72,128], index: 1, kind: input, shape index: {}]   ;;  %s2078_s2 = inlined_call_operand.vmem [shape: f32[1,128], index: 2, kind: input, shape index: {}]   ;;  %s2079_s3 = inlined_call_operand.vmem [shape: bf16[2048,128], index: 3, kind: output, shape index: {}]  }
   0x1 LB: > { %s1272_s13 = sadd.s32 4294967295, %s1846_s12   ;;  %p1276_p0 = scmp.ge.s32.totalorder %s1846_s12, 1  ;;  %s1846_s12 = sphi %s1868_s12, %s13_s12  }
   0x2   : > { %p138_p1 = scmp.lt.s32.totalorder %s1846_s12, 5 }
   0x4   : > { %p139_p2 = pnand %p1276_p0, %p138_p1 }
   0x5   : > { %v1803_v0 = vld [vmem:[%s2077_s1] sm:$0xff] (!%p139_p2)   ;;  %v1804_v1 = vld [vmem:[%s2077_s1 + $0x8] sm:$0xff] (!%p139_p2)   ;;  %s1277_s18 = sshll.u32 (!%p139_p2), %s1272_s13, 6  ;;  %v1805_v2 = vld [vmem:[%s2077_s1 + $0x10] sm:$0xff] (!%p139_p2)   ;;  %vm442_vm0 = vcmask (!%p139_p2), 588800   ;;  %vm539_vm1 = vcmask (!%p139_p2), 1043456  }
   0x6   : > { %142 = sbr.rel (%p139_p2) target bundleno = 304 (0x130), region = 32  ;;  %1709 = vmatprep.subr.bf16.mxu0 (!%p139_p2), %v1803_v0  ;;  %1783 = vmatprep.subr.bf16.mxu1 (!%p139_p2), %v1803_v0  ;;  %p163_p3 = scmp.lt.s32.totalorder (!%p139_p2), %s1277_s18, 255  ;;  %v1806_v3 = vld [vmem:[%s2077_s1 + $0x18] sm:$0xff] (!%p139_p2)   ;;  %v1807_v6 = vld [vmem:[%s2077_s1 + $0x20] ss:$0 sps:$4 sm:$0xff] (!%p139_p2)  }
   0x7   : > { %1710 = vmatpush3.bf16.msra.mxu0 (!%p139_p2), %v1803_v0  ;;  %1788 = vmatpush3.bf16.msra.mxu1 (!%p139_p2), %v1803_v0  ;;  %v541_v7 = vsel (!%p139_p2), %vm539_vm1, %v1807_v6, 0  ;;  %v1968_v38 = vld [vmem:[%s2078_s2] ss:$0 sm:$0xff] (!%p139_p2) }
   0x8   : > { %1711 = vmatprep.subr.bf16.mxu0 (!%p139_p2), %v1804_v1  ;;  %1784 = vmatprep.subr.bf16.mxu1 (!%p139_p2), %v1804_v1 }
   0xb   : > { %1712 = vmatpush3.bf16.msra.mxu0 (!%p139_p2), %v1804_v1  ;;  %1789 = vmatpush3.bf16.msra.mxu1 (!%p139_p2), %v1804_v1 }
   0xc   : > { %1713 = vmatprep.subr.bf16.mxu0 (!%p139_p2), %v1805_v2  ;;  %1785 = vmatprep.subr.bf16.mxu1 (!%p139_p2), %v1805_v2 }
   0xd   : > { %s2081_s18 = smov (!%p163_p3, %s1277_s18), 255 }
   0xe   : > { %s1278_s21 = sshll.u32 %s2081_s18, 2 }
   0xf   : > { %s1896_s26 = scalar_lea.vmem %s2076_s0, %s1278_s21  ;;  %1714 = vmatpush3.bf16.msra.mxu0 %v1805_v2  ;;  %1790 = vmatpush3.bf16.msra.mxu1 %v1805_v2  ;;  %s1983_s6 = scalar_lea.vmem %s2079_s3, %s1278_s21 }
  0x10   : > { %v1808_v4 = vld [vmem:[%s1896_s26] sm:$0xff]   ;;  %1715 = vmatprep.subr.bf16.mxu0 %v1806_v3  ;;  %1786 = vmatprep.subr.bf16.mxu1 %v1806_v3  ;;  %v1810_v8 = vld [vmem:[%s1896_s26 + $0x8] sm:$0xff]   ;;  %v1812_v10 = vld [vmem:[%s1896_s26 + $0x10] sm:$0xff]  }
  0x11   : > { %v1809_v5 = vld [vmem:[%s1896_s26 + $0x80] sm:$0xff]   ;;  %1719 = vmatprep.mubr.msk.bf16.mxu0 %vm442_vm0, %v1808_v4  ;;  %v1811_v9 = vld [vmem:[%s1896_s26 + $0x88] sm:$0xff]   ;;  %v1813_v11 = vld [vmem:[%s1896_s26 + $0x90] sm:$0xff]  }
  0x12   : > { %1751 = vmatprep.mubr.msk.bf16.mxu1 %vm442_vm0, %v1809_v5  ;;  %v1814_v12 = vld [vmem:[%s1896_s26 + $0x18] sm:$0xff]   ;;  %v1816_v14 = vld [vmem:[%s1896_s26 + $0x20] sm:$0xff]   ;;  %v1818_v16 = vld [vmem:[%s1896_s26 + $0x28] sm:$0xff]  }
  0x13   : > { %1716 = vmatpush3.bf16.msra.mxu0 %v1806_v3  ;;  %1791 = vmatpush3.bf16.msra.mxu1 %v1806_v3  ;;  %v1815_v13 = vld [vmem:[%s1896_s26 + $0x98] sm:$0xff]   ;;  %v1817_v15 = vld [vmem:[%s1896_s26 + $0xa0] sm:$0xff]   ;;  %v1819_v17 = vld [vmem:[%s1896_s26 + $0xa8] sm:$0xff]  }
  0x14   : > { %1793 = vmatprep.subr.msk.bf16.mxu0 %vm539_vm1, %v1807_v6  ;;  %1794 = vmatprep.subr.msk.bf16.mxu1 %vm539_vm1, %v1807_v6  ;;  %v1820_v18 = vld [vmem:[%s1896_s26 + $0x30] sm:$0xff]   ;;  %v1822_v20 = vld [vmem:[%s1896_s26 + $0x38] sm:$0xff]   ;;  %v1824_v22 = vld [vmem:[%s1896_s26 + $0x40] sm:$0xff]  }
  0x15   : > { %v1821_v19 = vld [vmem:[%s1896_s26 + $0xb0] sm:$0xff]   ;;  %v1823_v21 = vld [vmem:[%s1896_s26 + $0xb8] sm:$0xff]   ;;  %v1825_v23 = vld [vmem:[%s1896_s26 + $0xc0] sm:$0xff]  }
  0x16   : > { %v1826_v24 = vld [vmem:[%s1896_s26 + $0x48] sm:$0xff]   ;;  %v1828_v26 = vld [vmem:[%s1896_s26 + $0x50] sm:$0xff]   ;;  %v1830_v28 = vld [vmem:[%s1896_s26 + $0x58] sm:$0xff]  }
  0x17   : > { %1718 = vmatpush3.bf16.msra.mxu0 %v541_v7  ;;  %1792 = vmatpush3.bf16.msra.mxu1 %v541_v7  ;;  %v1827_v25 = vld [vmem:[%s1896_s26 + $0xc8] sm:$0xff]   ;;  %v1829_v27 = vld [vmem:[%s1896_s26 + $0xd0] sm:$0xff]   ;;  %v1831_v29 = vld [vmem:[%s1896_s26 + $0xd8] sm:$0xff]  }
  0x18   : > { %v1832_v30 = vld [vmem:[%s1896_s26 + $0x60] sm:$0xff]   ;;  %v1834_v32 = vld [vmem:[%s1896_s26 + $0x68] sm:$0xff]   ;;  %v1836_v34 = vld [vmem:[%s1896_s26 + $0x70] sm:$0xff]  }
  0x19   : > { %v1833_v31 = vld [vmem:[%s1896_s26 + $0xe0] sm:$0xff]   ;;  %v1835_v33 = vld [vmem:[%s1896_s26 + $0xe8] sm:$0xff]   ;;  %v1837_v35 = vld [vmem:[%s1896_s26 + $0xf0] sm:$0xff]  }
  0x1a   : > { %1720 = vmatmul.mubr.msk.bf16.vlgmr.msra.gmra.mrb[0].mxu0 %vm442_vm0, %v1810_v8  ;;  %1752 = vmatmul.mubr.msk.bf16.vlgmr.msra.gmra.mrb[0].mxu1 %vm442_vm0, %v1811_v9  ;;  %v1838_v36 = vld [vmem:[%s1896_s26 + $0x78] sm:$0xff]  }
  0x1b   : > { %1723 = vmatprep.mubr.msk.bf16.mxu0 %vm442_vm0, %v1812_v10  ;;  %1755 = vmatprep.mubr.msk.bf16.mxu1 %vm442_vm0, %v1813_v11  ;;  %v1839_v37 = vld [vmem:[%s1896_s26 + $0xf8] sm:$0xff]  }
  0x22   : > { %1724 = vmatmul.mubr.msk.bf16.gmra.mrb[4].mxu0 %vm442_vm0, %v1814_v12  ;;  %1756 = vmatmul.mubr.msk.bf16.gmra.mrb[4].mxu1 %vm442_vm0, %v1815_v13 }
  0x23   : > { %1727 = vmatprep.mubr.msk.bf16.mxu0 %vm442_vm0, %v1816_v14  ;;  %1759 = vmatprep.mubr.msk.bf16.mxu1 %vm442_vm0, %v1817_v15 }
  0x2a   : > { %1728 = vmatmul.mubr.msk.bf16.gmra.mrb[8].mxu0 %vm442_vm0, %v1818_v16  ;;  %1760 = vmatmul.mubr.msk.bf16.gmra.mrb[8].mxu1 %vm442_vm0, %v1819_v17 }
  0x2b   : > { %1731 = vmatprep.mubr.msk.bf16.mxu0 %vm442_vm0, %v1820_v18  ;;  %1763 = vmatprep.mubr.msk.bf16.mxu1 %vm442_vm0, %v1821_v19 }
  0x32   : > { %1732 = vmatmul.mubr.msk.bf16.gmra.mrb[12].mxu0 %vm442_vm0, %v1822_v20  ;;  %1764 = vmatmul.mubr.msk.bf16.gmra.mrb[12].mxu1 %vm442_vm0, %v1823_v21 }
  0x33   : > { %1735 = vmatprep.mubr.msk.bf16.mxu0 %vm442_vm0, %v1824_v22  ;;  %1767 = vmatprep.mubr.msk.bf16.mxu1 %vm442_vm0, %v1825_v23 }
  0x3a   : > { %1736 = vmatmul.mubr.msk.bf16.gmra.mrb[16].mxu0 %vm442_vm0, %v1826_v24  ;;  %1768 = vmatmul.mubr.msk.bf16.gmra.mrb[16].mxu1 %vm442_vm0, %v1827_v25 }
  0x3b   : > { %1739 = vmatprep.mubr.msk.bf16.mxu0 %vm442_vm0, %v1828_v26  ;;  %1771 = vmatprep.mubr.msk.bf16.mxu1 %vm442_vm0, %v1829_v27 }
  0x42   : > { %1740 = vmatmul.mubr.msk.bf16.gmra.mrb[20].mxu0 %vm442_vm0, %v1830_v28  ;;  %1772 = vmatmul.mubr.msk.bf16.gmra.mrb[20].mxu1 %vm442_vm0, %v1831_v29 }
  0x43   : > { %1743 = vmatprep.mubr.msk.bf16.mxu0 %vm442_vm0, %v1832_v30  ;;  %1775 = vmatprep.mubr.msk.bf16.mxu1 %vm442_vm0, %v1833_v31 }
  0x4a   : > { %1744 = vmatmul.mubr.msk.bf16.gmra.mrb[24].mxu0 %vm442_vm0, %v1834_v32  ;;  %1776 = vmatmul.mubr.msk.bf16.gmra.mrb[24].mxu1 %vm442_vm0, %v1835_v33 }
  0x4b   : > { %1747 = vmatprep.mubr.msk.bf16.mxu0 %vm442_vm0, %v1836_v34  ;;  %1779 = vmatprep.mubr.msk.bf16.mxu1 %vm442_vm0, %v1837_v35 }
  0x52   : > { %1748 = vmatmul.mubr.msk.bf16.gmra.mrb[28].mxu0 %vm442_vm0, %v1838_v36  ;;  %1780 = vmatmul.mubr.msk.bf16.gmra.mrb[28].mxu1 %vm442_vm0, %v1839_v37 }
  0xed   : > { %v1721_v39 = vpop.f32.mrb[0].mxu0  ;;  %v1753_v40 = vpop.f32.mrb[0].mxu1 }
  0xee   : > { %v586_v41 = vadd.f32 %v1721_v39, %v1968_v38  ;;  %v714_v42 = vadd.f32 %v1753_v40, %v1968_v38  ;;  %v577_v43 = vpop.f32.mrb[1].mxu0  ;;  %v705_v44 = vpop.f32.mrb[1].mxu1 }
  0xef   : > { %v578_v45 = vadd.f32 %v1968_v38, %v577_v43  ;;  %v706_v46 = vadd.f32 %v1968_v38, %v705_v44  ;;  %v1722_v47 = vpop.f32.mrb[2].mxu0  ;;  %v1754_v48 = vpop.f32.mrb[2].mxu1 }
  0xf0   : > { %v589_v49 = vadd.f32 %v1722_v47, %v1968_v38  ;;  %v717_v50 = vadd.f32 %v1754_v48, %v1968_v38  ;;  %v580_v51 = vpop.f32.mrb[3].mxu0  ;;  %v708_v52 = vpop.f32.mrb[3].mxu1  ;;  %v834_v55 = vmax.f32 %v586_v41, 0.0  ;;  %v866_v56 = vmax.f32 %v714_v42, 0.0 }
  0xf1   : > { %v581_v53 = vadd.f32 %v1968_v38, %v580_v51  ;;  %v709_v54 = vadd.f32 %v1968_v38, %v708_v52  ;;  %v832_v59 = vmax.f32 %v578_v45, 0.0  ;;  %v864_v60 = vmax.f32 %v706_v46, 0.0 }
  0xf2   : > { %v835_v57 = vmax.f32 %v589_v49, 0.0  ;;  %v867_v58 = vmax.f32 %v717_v50, 0.0 }
  0xf3   : > { %v833_v61 = vmax.f32 %v581_v53, 0.0  ;;  %v865_v62 = vmax.f32 %v709_v54, 0.0 }
  0xf4   : > { %v1489_v63 = vpack.c.bf16 %v835_v57, %v834_v55  ;;  %v1569_v0 = vpack.c.bf16 %v867_v58, %v866_v56 }
  0xf5   : > { %v1484_v1 = vpack.c.bf16 %v833_v61, %v832_v59  ;;  %v1564_v2 = vpack.c.bf16 %v865_v62, %v864_v60  ;;  %v1725_v3 = vpop.f32.mrb[4].mxu0  ;;  %v1757_v4 = vpop.f32.mrb[4].mxu1 }
  0xf6   : > { %1641 = vst [vmem:[%s1983_s6 + $0x8] sm:$0xff] %v1489_v63   ;;  %1657 = vst [vmem:[%s1983_s6 + $0x88] sm:$0xff] %v1569_v0   ;;  %v602_v5 = vadd.f32 %v1725_v3, %v1968_v38  ;;  %v730_v6 = vadd.f32 %v1757_v4, %v1968_v38  ;;  %v593_v7 = vpop.f32.mrb[5].mxu0  ;;  %v721_v8 = vpop.f32.mrb[5].mxu1 }
  0xf7   : > { %1485 = vst [vmem:[%s1983_s6] sm:$0xff] %v1484_v1   ;;  %1656 = vst [vmem:[%s1983_s6 + $0x80] sm:$0xff] %v1564_v2   ;;  %v594_v9 = vadd.f32 %v1968_v38, %v593_v7  ;;  %v722_v10 = vadd.f32 %v1968_v38, %v721_v8  ;;  %v1726_v11 = vpop.f32.mrb[6].mxu0  ;;  %v1758_v12 = vpop.f32.mrb[6].mxu1 }
  0xf8   : > { %v605_v13 = vadd.f32 %v1726_v11, %v1968_v38  ;;  %v733_v14 = vadd.f32 %v1758_v12, %v1968_v38  ;;  %v596_v15 = vpop.f32.mrb[7].mxu0  ;;  %v724_v16 = vpop.f32.mrb[7].mxu1  ;;  %v838_v19 = vmax.f32 %v602_v5, 0.0  ;;  %v870_v20 = vmax.f32 %v730_v6, 0.0 }
  0xf9   : > { %v597_v17 = vadd.f32 %v1968_v38, %v596_v15  ;;  %v725_v18 = vadd.f32 %v1968_v38, %v724_v16  ;;  %v836_v23 = vmax.f32 %v594_v9, 0.0  ;;  %v868_v24 = vmax.f32 %v722_v10, 0.0 }
  0xfa   : > { %v839_v21 = vmax.f32 %v605_v13, 0.0  ;;  %v871_v22 = vmax.f32 %v733_v14, 0.0 }
  0xfb   : > { %v837_v25 = vmax.f32 %v597_v17, 0.0  ;;  %v869_v26 = vmax.f32 %v725_v18, 0.0 }
  0xfc   : > { %v1499_v27 = vpack.c.bf16 %v839_v21, %v838_v19  ;;  %v1579_v28 = vpack.c.bf16 %v871_v22, %v870_v20 }
  0xfd   : > { %v1494_v29 = vpack.c.bf16 %v837_v25, %v836_v23  ;;  %v1574_v30 = vpack.c.bf16 %v869_v26, %v868_v24  ;;  %v1729_v31 = vpop.f32.mrb[8].mxu0  ;;  %v1761_v32 = vpop.f32.mrb[8].mxu1 }
  0xfe   : > { %1643 = vst [vmem:[%s1983_s6 + $0x18] sm:$0xff] %v1499_v27   ;;  %1659 = vst [vmem:[%s1983_s6 + $0x98] sm:$0xff] %v1579_v28   ;;  %v618_v33 = vadd.f32 %v1729_v31, %v1968_v38  ;;  %v746_v34 = vadd.f32 %v1761_v32, %v1968_v38  ;;  %v609_v35 = vpop.f32.mrb[9].mxu0  ;;  %v737_v36 = vpop.f32.mrb[9].mxu1 }
  0xff   : > { %1642 = vst [vmem:[%s1983_s6 + $0x10] sm:$0xff] %v1494_v29   ;;  %1658 = vst [vmem:[%s1983_s6 + $0x90] sm:$0xff] %v1574_v30   ;;  %v610_v37 = vadd.f32 %v1968_v38, %v609_v35  ;;  %v738_v39 = vadd.f32 %v1968_v38, %v737_v36  ;;  %v1730_v40 = vpop.f32.mrb[10].mxu0  ;;  %v1762_v41 = vpop.f32.mrb[10].mxu1 }
 0x100   : > { %v621_v42 = vadd.f32 %v1730_v40, %v1968_v38  ;;  %v749_v43 = vadd.f32 %v1762_v41, %v1968_v38  ;;  %v612_v44 = vpop.f32.mrb[11].mxu0  ;;  %v740_v45 = vpop.f32.mrb[11].mxu1  ;;  %v842_v48 = vmax.f32 %v618_v33, 0.0  ;;  %v874_v49 = vmax.f32 %v746_v34, 0.0 }
 0x101   : > { %v613_v46 = vadd.f32 %v1968_v38, %v612_v44  ;;  %v741_v47 = vadd.f32 %v1968_v38, %v740_v45  ;;  %v840_v52 = vmax.f32 %v610_v37, 0.0  ;;  %v872_v53 = vmax.f32 %v738_v39, 0.0 }
 0x102   : > { %v843_v50 = vmax.f32 %v621_v42, 0.0  ;;  %v875_v51 = vmax.f32 %v749_v43, 0.0 }
 0x103   : > { %v841_v54 = vmax.f32 %v613_v46, 0.0  ;;  %v873_v55 = vmax.f32 %v741_v47, 0.0 }
 0x104   : > { %v1509_v56 = vpack.c.bf16 %v843_v50, %v842_v48  ;;  %v1589_v57 = vpack.c.bf16 %v875_v51, %v874_v49 }
 0x105   : > { %v1504_v58 = vpack.c.bf16 %v841_v54, %v840_v52  ;;  %v1584_v59 = vpack.c.bf16 %v873_v55, %v872_v53  ;;  %v1733_v60 = vpop.f32.mrb[12].mxu0  ;;  %v1765_v61 = vpop.f32.mrb[12].mxu1 }
 0x106   : > { %1645 = vst [vmem:[%s1983_s6 + $0x28] sm:$0xff] %v1509_v56   ;;  %1661 = vst [vmem:[%s1983_s6 + $0xa8] sm:$0xff] %v1589_v57   ;;  %v634_v62 = vadd.f32 %v1733_v60, %v1968_v38  ;;  %v762_v63 = vadd.f32 %v1765_v61, %v1968_v38  ;;  %v625_v0 = vpop.f32.mrb[13].mxu0  ;;  %v753_v1 = vpop.f32.mrb[13].mxu1 }
 0x107   : > { %1644 = vst [vmem:[%s1983_s6 + $0x20] sm:$0xff] %v1504_v58   ;;  %1660 = vst [vmem:[%s1983_s6 + $0xa0] sm:$0xff] %v1584_v59   ;;  %v626_v2 = vadd.f32 %v1968_v38, %v625_v0  ;;  %v754_v3 = vadd.f32 %v1968_v38, %v753_v1  ;;  %v1734_v4 = vpop.f32.mrb[14].mxu0  ;;  %v1766_v5 = vpop.f32.mrb[14].mxu1 }
 0x108   : > { %v637_v6 = vadd.f32 %v1734_v4, %v1968_v38  ;;  %v765_v7 = vadd.f32 %v1766_v5, %v1968_v38  ;;  %v628_v8 = vpop.f32.mrb[15].mxu0  ;;  %v756_v9 = vpop.f32.mrb[15].mxu1  ;;  %v846_v12 = vmax.f32 %v634_v62, 0.0  ;;  %v878_v13 = vmax.f32 %v762_v63, 0.0 }
 0x109   : > { %v629_v10 = vadd.f32 %v1968_v38, %v628_v8  ;;  %v757_v11 = vadd.f32 %v1968_v38, %v756_v9  ;;  %v844_v16 = vmax.f32 %v626_v2, 0.0  ;;  %v876_v17 = vmax.f32 %v754_v3, 0.0 }
 0x10a   : > { %v847_v14 = vmax.f32 %v637_v6, 0.0  ;;  %v879_v15 = vmax.f32 %v765_v7, 0.0 }
 0x10b   : > { %v845_v18 = vmax.f32 %v629_v10, 0.0  ;;  %v877_v19 = vmax.f32 %v757_v11, 0.0 }
 0x10c   : > { %v1519_v20 = vpack.c.bf16 %v847_v14, %v846_v12  ;;  %v1599_v21 = vpack.c.bf16 %v879_v15, %v878_v13 }
 0x10d   : > { %v1514_v22 = vpack.c.bf16 %v845_v18, %v844_v16  ;;  %v1594_v23 = vpack.c.bf16 %v877_v19, %v876_v17  ;;  %v1737_v24 = vpop.f32.mrb[16].mxu0  ;;  %v1769_v25 = vpop.f32.mrb[16].mxu1 }
 0x10e   : > { %1647 = vst [vmem:[%s1983_s6 + $0x38] sm:$0xff] %v1519_v20   ;;  %1663 = vst [vmem:[%s1983_s6 + $0xb8] sm:$0xff] %v1599_v21   ;;  %v650_v26 = vadd.f32 %v1737_v24, %v1968_v38  ;;  %v778_v27 = vadd.f32 %v1769_v25, %v1968_v38  ;;  %v641_v28 = vpop.f32.mrb[17].mxu0  ;;  %v769_v29 = vpop.f32.mrb[17].mxu1 }
 0x10f   : > { %1646 = vst [vmem:[%s1983_s6 + $0x30] sm:$0xff] %v1514_v22   ;;  %1662 = vst [vmem:[%s1983_s6 + $0xb0] sm:$0xff] %v1594_v23   ;;  %v642_v30 = vadd.f32 %v1968_v38, %v641_v28  ;;  %v770_v31 = vadd.f32 %v1968_v38, %v769_v29  ;;  %v1738_v32 = vpop.f32.mrb[18].mxu0  ;;  %v1770_v33 = vpop.f32.mrb[18].mxu1 }
 0x110   : > { %v653_v34 = vadd.f32 %v1738_v32, %v1968_v38  ;;  %v781_v35 = vadd.f32 %v1770_v33, %v1968_v38  ;;  %v644_v36 = vpop.f32.mrb[19].mxu0  ;;  %v772_v37 = vpop.f32.mrb[19].mxu1  ;;  %v850_v41 = vmax.f32 %v650_v26, 0.0  ;;  %v882_v42 = vmax.f32 %v778_v27, 0.0 }
 0x111   : > { %v645_v39 = vadd.f32 %v1968_v38, %v644_v36  ;;  %v773_v40 = vadd.f32 %v1968_v38, %v772_v37  ;;  %v848_v45 = vmax.f32 %v642_v30, 0.0  ;;  %v880_v46 = vmax.f32 %v770_v31, 0.0 }
 0x112   : > { %v851_v43 = vmax.f32 %v653_v34, 0.0  ;;  %v883_v44 = vmax.f32 %v781_v35, 0.0 }
 0x113   : > { %v849_v47 = vmax.f32 %v645_v39, 0.0  ;;  %v881_v48 = vmax.f32 %v773_v40, 0.0 }
 0x114   : > { %v1529_v49 = vpack.c.bf16 %v851_v43, %v850_v41  ;;  %v1609_v50 = vpack.c.bf16 %v883_v44, %v882_v42 }
 0x115   : > { %v1524_v51 = vpack.c.bf16 %v849_v47, %v848_v45  ;;  %v1604_v52 = vpack.c.bf16 %v881_v48, %v880_v46  ;;  %v1741_v53 = vpop.f32.mrb[20].mxu0  ;;  %v1773_v54 = vpop.f32.mrb[20].mxu1 }
 0x116   : > { %1649 = vst [vmem:[%s1983_s6 + $0x48] sm:$0xff] %v1529_v49   ;;  %1665 = vst [vmem:[%s1983_s6 + $0xc8] sm:$0xff] %v1609_v50   ;;  %v666_v55 = vadd.f32 %v1741_v53, %v1968_v38  ;;  %v794_v56 = vadd.f32 %v1773_v54, %v1968_v38  ;;  %v657_v57 = vpop.f32.mrb[21].mxu0  ;;  %v785_v58 = vpop.f32.mrb[21].mxu1 }
 0x117   : > { %1648 = vst [vmem:[%s1983_s6 + $0x40] sm:$0xff] %v1524_v51   ;;  %1664 = vst [vmem:[%s1983_s6 + $0xc0] sm:$0xff] %v1604_v52   ;;  %v658_v59 = vadd.f32 %v1968_v38, %v657_v57  ;;  %v786_v60 = vadd.f32 %v1968_v38, %v785_v58  ;;  %v1742_v61 = vpop.f32.mrb[22].mxu0  ;;  %v1774_v62 = vpop.f32.mrb[22].mxu1 }
 0x118   : > { %v669_v63 = vadd.f32 %v1742_v61, %v1968_v38  ;;  %v797_v0 = vadd.f32 %v1774_v62, %v1968_v38  ;;  %v660_v1 = vpop.f32.mrb[23].mxu0  ;;  %v788_v2 = vpop.f32.mrb[23].mxu1  ;;  %v854_v5 = vmax.f32 %v666_v55, 0.0  ;;  %v886_v6 = vmax.f32 %v794_v56, 0.0 }
 0x119   : > { %v661_v3 = vadd.f32 %v1968_v38, %v660_v1  ;;  %v789_v4 = vadd.f32 %v1968_v38, %v788_v2  ;;  %v852_v9 = vmax.f32 %v658_v59, 0.0  ;;  %v884_v10 = vmax.f32 %v786_v60, 0.0 }
 0x11a   : > { %v855_v7 = vmax.f32 %v669_v63, 0.0  ;;  %v887_v8 = vmax.f32 %v797_v0, 0.0 }
 0x11b   : > { %v853_v11 = vmax.f32 %v661_v3, 0.0  ;;  %v885_v12 = vmax.f32 %v789_v4, 0.0 }
 0x11c   : > { %v1539_v13 = vpack.c.bf16 %v855_v7, %v854_v5  ;;  %v1619_v14 = vpack.c.bf16 %v887_v8, %v886_v6 }
 0x11d   : > { %v1534_v15 = vpack.c.bf16 %v853_v11, %v852_v9  ;;  %v1614_v16 = vpack.c.bf16 %v885_v12, %v884_v10  ;;  %v1745_v17 = vpop.f32.mrb[24].mxu0  ;;  %v1777_v18 = vpop.f32.mrb[24].mxu1 }
 0x11e   : > { %1651 = vst [vmem:[%s1983_s6 + $0x58] sm:$0xff] %v1539_v13   ;;  %1667 = vst [vmem:[%s1983_s6 + $0xd8] sm:$0xff] %v1619_v14   ;;  %v682_v19 = vadd.f32 %v1745_v17, %v1968_v38  ;;  %v810_v20 = vadd.f32 %v1777_v18, %v1968_v38  ;;  %v673_v21 = vpop.f32.mrb[25].mxu0  ;;  %v801_v22 = vpop.f32.mrb[25].mxu1 }
 0x11f   : > { %1650 = vst [vmem:[%s1983_s6 + $0x50] sm:$0xff] %v1534_v15   ;;  %1666 = vst [vmem:[%s1983_s6 + $0xd0] sm:$0xff] %v1614_v16   ;;  %v674_v23 = vadd.f32 %v1968_v38, %v673_v21  ;;  %v802_v24 = vadd.f32 %v1968_v38, %v801_v22  ;;  %v1746_v25 = vpop.f32.mrb[26].mxu0  ;;  %v1778_v26 = vpop.f32.mrb[26].mxu1 }
 0x120   : > { %v685_v27 = vadd.f32 %v1746_v25, %v1968_v38  ;;  %v813_v28 = vadd.f32 %v1778_v26, %v1968_v38  ;;  %v676_v29 = vpop.f32.mrb[27].mxu0  ;;  %v804_v30 = vpop.f32.mrb[27].mxu1  ;;  %v858_v33 = vmax.f32 %v682_v19, 0.0  ;;  %v890_v34 = vmax.f32 %v810_v20, 0.0 }
 0x121   : > { %v677_v31 = vadd.f32 %v1968_v38, %v676_v29  ;;  %v805_v32 = vadd.f32 %v1968_v38, %v804_v30  ;;  %v856_v37 = vmax.f32 %v674_v23, 0.0  ;;  %v888_v39 = vmax.f32 %v802_v24, 0.0 }
 0x122   : > { %v859_v35 = vmax.f32 %v685_v27, 0.0  ;;  %v891_v36 = vmax.f32 %v813_v28, 0.0 }
 0x123   : > { %v857_v40 = vmax.f32 %v677_v31, 0.0  ;;  %v889_v41 = vmax.f32 %v805_v32, 0.0 }
 0x124   : > { %v1549_v42 = vpack.c.bf16 %v859_v35, %v858_v33  ;;  %v1629_v43 = vpack.c.bf16 %v891_v36, %v890_v34 }
 0x125   : > { %v1544_v44 = vpack.c.bf16 %v857_v40, %v856_v37  ;;  %v1624_v45 = vpack.c.bf16 %v889_v41, %v888_v39  ;;  %v1749_v46 = vpop.f32.mrb[28].mxu0  ;;  %v1781_v47 = vpop.f32.mrb[28].mxu1 }
 0x126   : > { %1653 = vst [vmem:[%s1983_s6 + $0x68] sm:$0xff] %v1549_v42   ;;  %1669 = vst [vmem:[%s1983_s6 + $0xe8] sm:$0xff] %v1629_v43   ;;  %v698_v48 = vadd.f32 %v1749_v46, %v1968_v38  ;;  %v826_v49 = vadd.f32 %v1781_v47, %v1968_v38  ;;  %v689_v50 = vpop.f32.mrb[29].mxu0  ;;  %v817_v51 = vpop.f32.mrb[29].mxu1 }
 0x127   : > { %1652 = vst [vmem:[%s1983_s6 + $0x60] sm:$0xff] %v1544_v44   ;;  %1668 = vst [vmem:[%s1983_s6 + $0xe0] sm:$0xff] %v1624_v45   ;;  %v690_v52 = vadd.f32 %v1968_v38, %v689_v50  ;;  %v818_v53 = vadd.f32 %v1968_v38, %v817_v51  ;;  %v1750_v54 = vpop.f32.mrb[30].mxu0  ;;  %v1782_v55 = vpop.f32.mrb[30].mxu1 }
 0x128   : > { %v701_v56 = vadd.f32 %v1750_v54, %v1968_v38  ;;  %v829_v57 = vadd.f32 %v1782_v55, %v1968_v38  ;;  %v692_v58 = vpop.f32.mrb[31].mxu0  ;;  %v820_v59 = vpop.f32.mrb[31].mxu1  ;;  %v862_v62 = vmax.f32 %v698_v48, 0.0  ;;  %v894_v63 = vmax.f32 %v826_v49, 0.0 }
 0x129   : > { %v693_v60 = vadd.f32 %v1968_v38, %v692_v58  ;;  %v821_v61 = vadd.f32 %v1968_v38, %v820_v59  ;;  %v860_v2 = vmax.f32 %v690_v52, 0.0  ;;  %v892_v3 = vmax.f32 %v818_v53, 0.0 }
 0x12a   : > { %v863_v0 = vmax.f32 %v701_v56, 0.0  ;;  %v895_v1 = vmax.f32 %v829_v57, 0.0 }
 0x12b   : > { %v861_v4 = vmax.f32 %v693_v60, 0.0  ;;  %v893_v5 = vmax.f32 %v821_v61, 0.0 }
 0x12c   : > { %v1559_v6 = vpack.c.bf16 %v863_v0, %v862_v62  ;;  %v1639_v7 = vpack.c.bf16 %v895_v1, %v894_v63 }
 0x12d   : > { %v1554_v8 = vpack.c.bf16 %v861_v4, %v860_v2  ;;  %v1634_v9 = vpack.c.bf16 %v893_v5, %v892_v3 }
 0x12e   : > { %1655 = vst [vmem:[%s1983_s6 + $0x78] sm:$0xff] %v1559_v6   ;;  %1671 = vst [vmem:[%s1983_s6 + $0xf8] sm:$0xff] %v1639_v7  }
 0x12f   : > { %1654 = vst [vmem:[%s1983_s6 + $0x70] sm:$0xff] %v1554_v8   ;;  %1670 = vst [vmem:[%s1983_s6 + $0xf0] sm:$0xff] %v1634_v9  }
 0x130 PF: > { %s13_s12 = sadd.s32 1, %s1846_s12  }
 0x131   : > { %p10_p4 = scmp.ge.s32.totalorder %s13_s12, 6  }
 0x133   :  { %12 = sbr.rel (!%p10_p4) target bundleno = 1 (0x1), region = 62 }

// kernel: _lambda_.23
= control target key start
LH: loop header
LB: loop body
LE: loop exit
PB: predicated region body
PF: predicated region fallthrough
CT: control target
= control target key end

     0   :  { %s1834_s15 = smov 0   ;;  %s2661_s0 = inlined_call_operand.vmem [shape: bf16[2,17,17,128], index: 0, kind: input, shape index: {}]   ;;  %s2662_s1 = inlined_call_operand.vmem [shape: bf16[2,17,16,128], index: 1, kind: input, shape index: {}]   ;;  %s2663_s2 = inlined_call_operand.vmem [shape: bf16[2,16,17,128], index: 2, kind: input, shape index: {}]   ;;  %s2664_s3 = inlined_call_operand.vmem [shape: bf16[2,16,16,128], index: 3, kind: input, shape index: {}]   ;;  %s2665_s4 = inlined_call_operand.vmem [shape: bf16[2,16,16,128], index: 4, kind: output, shape index: {}]  }
   0x1 LB: > { %s1663_s16 = sadd.s32 4294967295, %s1807_s15   ;;  %p1667_p0 = scmp.ge.s32.totalorder %s1807_s15, 1  ;;  %s1807_s15 = sphi %s1834_s15, %s14_s15  }
   0x2   : > { %p192_p1 = scmp.lt.s32.totalorder %s1807_s15, 3 }
   0x4   : > { %p193_p2 = pnand %p1667_p0, %p192_p1 }
   0x5   : > { %p233_p3 = scmp.lt.s32.totalorder (!%p193_p2), %s1663_s16, 1  ;;  %vm455_vm0 = vsmask.f32 (!%p193_p2), 3328  ;;  %vm456_vm1 = vsmask.f32 (!%p193_p2), 7440 }
   0x6   : > { %196 = sbr.rel (%p193_p2) target bundleno = 228 (0xe4), region = 36  ;;  %vm1899_vm2 = vmor (!%p193_p2), %vm455_vm0, %vm456_vm1 }
   0xd   : > { %s2669_s16 = smov (!%p233_p3, %s1663_s16), 1 }
   0xe   : > { %s1790_s17 = smul.u32 204, %s2669_s16  ;;  %s1677_s18 = sshll.u32 %s2669_s16, 7 }
   0xf   : > { %s1851_s21 = scalar_lea.vmem %s2664_s3, %s1677_s18  ;;  %s1792_s25 = smul.u32 192, %s2669_s16 }
  0x10   : > { %s1856_s24 = scalar_lea.vmem %s2661_s0, %s1790_s17  ;;  %v391_v0 = vld [vmem:[%s1851_s21] sm:$0xf]  ;;  %v1861_v1 = vld [vmem:[%s1851_s21 + $0x4] sm:$0xf]  ;;  %v393_v7 = vld [vmem:[%s1851_s21 + $0x8] sm:$0xf]  ;;  %s1971_s9 = scalar_lea.vmem %s2665_s4, %s1677_s18 }
  0x11   : > { %v258_v2 = vld [vmem:[%s1856_s24] sm:$0xf]  ;;  %v259_v3 = vld [vmem:[%s1856_s24 + $0x4] sm:$0xf]  ;;  %v260_v4 = vld [vmem:[%s1856_s24 + $0x8] sm:$0x1]  ;;  %s1872_s28 = scalar_lea.vmem %s2663_s2, %s1792_s25 }
  0x12   : > { %v1867_v5 = vld [vmem:[%s1856_s24 + $0xc] sm:$0xf]  ;;  %v1875_v6 = vld [vmem:[%s1856_s24 + $0x10] sm:$0xf]  ;;  %v423_v9 = vmax.bf16 %v391_v0, %v258_v2  ;;  %v424_v10 = vmax.bf16 %v1861_v1, %v259_v3  ;;  %v459_v13 = vshrl.u32 %v258_v2, 16  ;;  %v462_v14 = vshll.u32 %v258_v2, 16 }
  0x13   : > { %v1879_v8 = vld [vmem:[%s1851_s21 + $0xc] sm:$0xf]  ;;  %v425_v11 = vmax.bf16 %v393_v7, %v1867_v5  ;;  %v263_v15 = vld [vmem:[%s1856_s24 + $0x14] sm:$0x1]  ;;  %v468_v16 = vshll.u32 %v259_v3, 16  ;;  %v472_v17 = vshrl.u32 %v259_v3, 16 }
  0x14   : > { %v426_v12 = vmax.bf16 %v1879_v8, %v1875_v6  ;;  %v478_v18 = vshll.u32 %v260_v4, 16  ;;  %v483_v19 = vshrl.u32 %v1867_v5, 16  ;;  %v1888_v20 = vld [vmem:[%s1872_s28] sm:$0xf]  ;;  %v461_v21 = vrot.slane %v459_v13, 4  ;;  %s1791_s29 = smul.u32 136, %s2669_s16 }
  0x15   : > { %v464_v22 = vrot.slane %v462_v14, 5  ;;  %v486_v23 = vshll.u32 %v1867_v5, 16  ;;  %v492_v24 = vshll.u32 %v1875_v6, 16  ;;  %v1893_v25 = vld [vmem:[%s1872_s28 + $0x4] sm:$0xf]  ;;  %v470_v26 = vrot.slane %v468_v16, 5 }
  0x16   : > { %v474_v27 = vrot.slane %v472_v17, 4  ;;  %v480_v28 = vrot.slane %v478_v18, 5  ;;  %v485_v29 = vrot.slane %v483_v19, 4  ;;  %v496_v33 = vshrl.u32 %v1875_v6, 16  ;;  %v345_v43 = vld [vmem:[%s1872_s28 + $0x8] sm:$0x1]  ;;  %s1912_s6 = scalar_lea.vmem %s2662_s1, %s1791_s29 }
  0x17   : > { %v465_v30 = vor.u32 %v464_v22, %v461_v21  ;;  %v488_v31 = vrot.slane %v486_v23, 5  ;;  %v494_v32 = vrot.slane %v492_v24, 5  ;;  %v502_v36 = vshll.u32 %v263_v15, 16  ;;  %v1918_v56 = vld [vmem:[%s1851_s21 + $0x10] sm:$0xf] }
  0x18   : > { %v475_v35 = vor.u32 %v474_v27, %v470_v26  ;;  %v1093_v37 = vshrl.u32 %v1888_v20, 16  ;;  %v1096_v38 = vshll.u32 %v1888_v20, 16  ;;  %v498_v41 = vrot.slane %v496_v33, 4  ;;  %v264_v1 = vld [vmem:[%s1856_s24 + $0x18] sm:$0xf] }
  0x19   : > { %v466_v39 = vrot.slane %v465_v30, 4  ;;  %v489_v40 = vor.u32 %v488_v31, %v485_v29  ;;  %v1102_v42 = vshll.u32 %v1893_v25, 16  ;;  %v504_v45 = vrot.slane %v502_v36, 5  ;;  %v1927_v2 = vld [vmem:[%s1851_s21 + $0x14] sm:$0xf] }
  0x1a   : > { %v476_v44 = vrot.slane %v475_v35, 4  ;;  %v1095_v46 = vrot.slane %v1093_v37, 4  ;;  %v1098_v47 = vrot.slane %v1096_v38, 5  ;;  %v499_v50 = vor.u32 %v498_v41, %v494_v32  ;;  %v309_v3 = vld [vmem:[%s1912_s6] sm:$0xf] }
  0x1b   : > { %v471_v48 = vsel %vm1899_vm2, %v466_v39, %v470_v26  ;;  %v490_v49 = vrot.slane %v489_v40, 4  ;;  %v1104_v51 = vrot.slane %v1102_v42, 5  ;;  %v1106_v55 = vshrl.u32 %v1893_v25, 16  ;;  %v310_v13 = vld [vmem:[%s1912_s6 + $0x4] sm:$0xf] }
  0x1c   : > { %v481_v52 = vsel %vm1899_vm2, %v476_v44, %v480_v28  ;;  %v874_v53 = vmax.bf16 %v471_v48, %v423_v9  ;;  %v1099_v54 = vor.u32 %v1098_v47, %v1095_v46  ;;  %v500_v58 = vrot.slane %v499_v50, 4  ;;  %v266_v17 = vld [vmem:[%s1856_s24 + $0x20] sm:$0x1]  ;;  %v311_v23 = vld [vmem:[%s1912_s6 + $0x8] sm:$0xf] }
  0x1d   : > { %v495_v57 = vsel %vm1899_vm2, %v490_v49, %v494_v32  ;;  %v875_v59 = vmax.bf16 %v481_v52, %v424_v10  ;;  %v1112_v60 = vshll.u32 %v345_v43, 16  ;;  %v1108_v0 = vrot.slane %v1106_v55, 4  ;;  %v265_v10 = vld [vmem:[%s1856_s24 + $0x1c] sm:$0xf]  ;;  %v312_v31 = vld [vmem:[%s1912_s6 + $0xc] sm:$0xf] }
  0x1e   : > { %v1922_v61 = vmax.bf16 %v495_v57, %v425_v11  ;;  %v906_v62 = vmax.bf16 %v874_v53, %v1867_v5  ;;  %v1100_v63 = vrot.slane %v1099_v54, 4  ;;  %v505_v4 = vsel %vm1899_vm2, %v500_v58, %v504_v45  ;;  %v1951_v35 = vld [vmem:[%s1872_s28 + $0x10] sm:$0xf]  ;;  %v348_v54 = vld [vmem:[%s1872_s28 + $0x14] sm:$0x1] }
  0x1f   : > { %v907_v7 = vmax.bf16 %v875_v59, %v1875_v6  ;;  %v1114_v9 = vrot.slane %v1112_v60, 5  ;;  %v427_v11 = vmax.bf16 %v1918_v56, %v264_v1  ;;  %v877_v5 = vmax.bf16 %v505_v4, %v426_v12  ;;  %v1945_v12 = vld [vmem:[%s1872_s28 + $0xc] sm:$0xf] }
  0x20   : > { %v964_v14 = vmax.bf16 %v906_v62, %v495_v57  ;;  %v1105_v15 = vsel %vm1899_vm2, %v1100_v63, %v1104_v51  ;;  %v1109_v16 = vor.u32 %v1108_v0, %v1104_v51  ;;  %v428_v19 = vmax.bf16 %v1927_v2, %v265_v10  ;;  %v1978_v62 = vld [vmem:[%s1856_s24 + $0x24] sm:$0xf]  ;;  %v1981_v63 = vld [vmem:[%s1851_s21 + $0x1c] sm:$0xf] }
  0x21   : > { %v965_v18 = vmax.bf16 %v907_v7, %v505_v4  ;;  %v507_v21 = vshrl.u32 %v264_v1, 16  ;;  %v510_v22 = vshll.u32 %v264_v1, 16  ;;  %v516_v27 = vshll.u32 %v265_v10, 16 }
  0x22   : > { %v996_v24 = vmax.bf16 %v964_v14, %v309_v3  ;;  %v1110_v26 = vrot.slane %v1109_v16, 4  ;;  %v520_v6 = vshrl.u32 %v265_v10, 16  ;;  %v526_v30 = vshll.u32 %v266_v17, 16 }
  0x23   : > { %v997_v8 = vmax.bf16 %v965_v18, %v310_v13  ;;  %v509_v28 = vrot.slane %v507_v21, 4  ;;  %v512_v29 = vrot.slane %v510_v22, 5  ;;  %v518_v36 = vrot.slane %v516_v27, 5  ;;  %v1992_v13 = vld [vmem:[%s1912_s6 + $0x10] sm:$0xf] }
  0x24   : > { %v1028_v32 = vmax.bf16 %v996_v24, %v311_v23  ;;  %v1115_v33 = vsel %vm1899_vm2, %v1110_v26, %v1114_v9  ;;  %v522_v37 = vrot.slane %v520_v6, 4  ;;  %v528_v40 = vrot.slane %v526_v30, 5  ;;  %v269_v22 = vld [vmem:[%s1856_s24 + $0x2c] sm:$0x1] }
  0x25   : > { %v1029_v38 = vmax.bf16 %v997_v8, %v312_v31  ;;  %v513_v39 = vor.u32 %v512_v29, %v509_v28  ;;  %v908_v41 = vmax.bf16 %v1922_v61, %v264_v1  ;;  %v909_v44 = vmax.bf16 %v877_v5, %v265_v10  ;;  %v1986_v10 = vld [vmem:[%s1856_s24 + $0x28] sm:$0xf]  ;;  %v1995_v5 = vld [vmem:[%s1912_s6 + $0x14] sm:$0xf]  ;;  %v2011_v29 = vld [vmem:[%s1872_s28 + $0x18] sm:$0xf] }
  0x26   : > { %v1060_v42 = vmax.bf16 %v1028_v32, %v1888_v20  ;;  %v523_v43 = vor.u32 %v522_v37, %v518_v36  ;;  %v1117_v45 = vshrl.u32 %v1945_v12, 16  ;;  %v1120_v48 = vshll.u32 %v1945_v12, 16 }
  0x27   : > { %v1061_v46 = vmax.bf16 %v1029_v38, %v1893_v25  ;;  %v514_v47 = vrot.slane %v513_v39, 4  ;;  %v1126_v49 = vshll.u32 %v1951_v35, 16  ;;  %v1130_v20 = vshrl.u32 %v1951_v35, 16  ;;  %v1964_v25 = vld [vmem:[%s1851_s21 + $0x18] sm:$0xf] }
  0x28   : > { %v1508_v50 = vmax.bf16 %v1105_v15, %v1060_v42  ;;  %v524_v51 = vrot.slane %v523_v43, 4  ;;  %v1119_v52 = vrot.slane %v1117_v45, 4  ;;  %v1122_v56 = vrot.slane %v1120_v48, 5 }
  0x29   : > { %v1509_v53 = vmax.bf16 %v1115_v33, %v1061_v46  ;;  %v519_v55 = vsel %vm1899_vm2, %v514_v47, %v518_v36  ;;  %v1128_v57 = vrot.slane %v1126_v49, 5  ;;  %v1132_v61 = vrot.slane %v1130_v20, 4  ;;  %v2016_v33 = vld [vmem:[%s1872_s28 + $0x1c] sm:$0xf] }
  0x2a   : > { %v529_v58 = vsel %vm1899_vm2, %v524_v51, %v528_v40  ;;  %v1975_v59 = vmax.bf16 %v519_v55, %v427_v11  ;;  %v966_v60 = vmax.bf16 %v908_v41, %v519_v55  ;;  %v1123_v3 = vor.u32 %v1122_v56, %v1119_v52 }
  0x2b   : > { %v1759_v0 = vcombine.low %v1508_v50, %v1509_v53  ;;  %v1983_v1 = vmax.bf16 %v529_v58, %v428_v19  ;;  %v967_v2 = vmax.bf16 %v909_v44, %v529_v58  ;;  %v1133_v7 = vor.u32 %v1132_v61, %v1128_v57  ;;  %v2028_v50 = vld [vmem:[%s1851_s21 + $0x20] sm:$0xf] }
  0x2c   : > { %v998_v4 = vmax.bf16 %v966_v60, %v311_v23  ;;  %v1136_v9 = vshll.u32 %v348_v54, 16  ;;  %v429_v11 = vmax.bf16 %v1964_v25, %v1978_v62  ;;  %v1124_v15 = vrot.slane %v1123_v3, 4  ;;  %v2031_v54 = vld [vmem:[%s1851_s21 + $0x24] sm:$0xf] }
  0x2d   : > { %1683 = vst [vmem:[%s1971_s9] sm:$0xff] %v1759_v0   ;;  %v999_v14 = vmax.bf16 %v967_v2, %v312_v31  ;;  %v430_v16 = vmax.bf16 %v1981_v63, %v1986_v10  ;;  %v531_v17 = vshrl.u32 %v1978_v62, 16  ;;  %v1134_v19 = vrot.slane %v1133_v7, 4  ;;  %v271_v63 = vld [vmem:[%s1856_s24 + $0x34] sm:$0xf] }
  0x2e   : > { %v1030_v18 = vmax.bf16 %v998_v4, %v1992_v13  ;;  %v1138_v21 = vrot.slane %v1136_v9, 5  ;;  %v534_v23 = vshll.u32 %v1978_v62, 16  ;;  %v1129_v26 = vsel %vm1899_vm2, %v1124_v15, %v1128_v57  ;;  %v2045_v4 = vld [vmem:[%s1912_s6 + $0x18] sm:$0xf] }
  0x2f   : > { %v1031_v24 = vmax.bf16 %v999_v14, %v1995_v5  ;;  %v533_v27 = vrot.slane %v531_v17, 4  ;;  %v540_v6 = vshll.u32 %v1986_v10, 16  ;;  %v544_v31 = vshrl.u32 %v1986_v10, 16  ;;  %v272_v15 = vld [vmem:[%s1856_s24 + $0x38] sm:$0x1] }
  0x30   : > { %v1062_v8 = vmax.bf16 %v1030_v18, %v1945_v12  ;;  %v1139_v28 = vsel %vm1899_vm2, %v1134_v19, %v1138_v21  ;;  %v536_v30 = vrot.slane %v534_v23, 5  ;;  %v550_v37 = vshll.u32 %v269_v22, 16  ;;  %v351_v12 = vld [vmem:[%s1872_s28 + $0x20] sm:$0x1] }
  0x31   : > { %v1063_v32 = vmax.bf16 %v1031_v24, %v1951_v35  ;;  %v542_v36 = vrot.slane %v540_v6, 5  ;;  %v910_v38 = vmax.bf16 %v1975_v59, %v1978_v62  ;;  %v546_v41 = vrot.slane %v544_v31, 4  ;;  %v270_v62 = vld [vmem:[%s1856_s24 + $0x30] sm:$0xf]  ;;  %v2054_v24 = vld [vmem:[%s1872_s28 + $0x24] sm:$0xf] }
  0x32   : > { %v1510_v39 = vmax.bf16 %v1129_v26, %v1062_v8  ;;  %v537_v40 = vor.u32 %v536_v30, %v533_v27  ;;  %v911_v42 = vmax.bf16 %v1983_v1, %v1986_v10  ;;  %v552_v44 = vrot.slane %v550_v37, 5  ;;  %v316_v26 = vld [vmem:[%s1912_s6 + $0x1c] sm:$0xf] }
  0x33   : > { %v1511_v43 = vmax.bf16 %v1139_v28, %v1063_v32  ;;  %v1141_v35 = vshrl.u32 %v2011_v29, 16  ;;  %v1144_v45 = vshll.u32 %v2011_v29, 16  ;;  %v547_v47 = vor.u32 %v546_v41, %v542_v36 }
  0x34   : > { %v538_v46 = vrot.slane %v537_v40, 4  ;;  %v1150_v48 = vshll.u32 %v2016_v33, 16  ;;  %v1154_v49 = vshrl.u32 %v2016_v33, 16  ;;  %v1160_v53 = vshll.u32 %v351_v12, 16 }
  0x35   : > { %v1760_v51 = vcombine.low %v1510_v39, %v1511_v43  ;;  %v1143_v52 = vrot.slane %v1141_v35, 4  ;;  %v1146_v20 = vrot.slane %v1144_v45, 5  ;;  %v548_v56 = vrot.slane %v547_v47, 4 }
  0x36   : > { %v543_v55 = vsel %vm1899_vm2, %v538_v46, %v542_v36  ;;  %v1152_v57 = vrot.slane %v1150_v48, 5  ;;  %v1156_v25 = vrot.slane %v1154_v49, 4  ;;  %v1162_v61 = vrot.slane %v1160_v53, 5  ;;  %v354_v36 = vld [vmem:[%s1872_s28 + $0x2c] sm:$0x1] }
  0x37   : > { %1761 = vst [vmem:[%s1971_s9 + $0x8] sm:$0xff] %v1760_v51   ;;  %v2036_v58 = vmax.bf16 %v543_v55, %v429_v11  ;;  %v968_v59 = vmax.bf16 %v910_v38, %v543_v55  ;;  %v1147_v60 = vor.u32 %v1146_v20, %v1143_v52  ;;  %v553_v0 = vsel %vm1899_vm2, %v548_v56, %v552_v44  ;;  %v2068_v44 = vld [vmem:[%s1851_s21 + $0x28] sm:$0xf]  ;;  %v2079_v53 = vld [vmem:[%s1851_s21 + $0x2c] sm:$0xf] }
  0x38   : > { %v1157_v1 = vor.u32 %v1156_v25, %v1152_v57  ;;  %v431_v2 = vmax.bf16 %v2028_v50, %v270_v62  ;;  %v432_v3 = vmax.bf16 %v2031_v54, %v271_v63  ;;  %v881_v7 = vmax.bf16 %v553_v0, %v430_v16 }
  0x39   : > { %v969_v9 = vmax.bf16 %v911_v42, %v553_v0  ;;  %v1000_v10 = vmax.bf16 %v968_v59, %v1992_v13  ;;  %v1148_v11 = vrot.slane %v1147_v60, 4  ;;  %v555_v17 = vshrl.u32 %v270_v62, 16 }
  0x3a   : > { %v1158_v14 = vrot.slane %v1157_v1, 4  ;;  %v558_v18 = vshll.u32 %v270_v62, 16  ;;  %v564_v19 = vshll.u32 %v271_v63, 16  ;;  %v568_v16 = vshrl.u32 %v271_v63, 16 }
  0x3b   : > { %v1001_v21 = vmax.bf16 %v969_v9, %v1995_v5  ;;  %v1032_v22 = vmax.bf16 %v1000_v10, %v2045_v4  ;;  %v1153_v23 = vsel %vm1899_vm2, %v1148_v11, %v1152_v57  ;;  %v557_v27 = vrot.slane %v555_v17, 4  ;;  %v2061_v5 = vld [vmem:[%s1872_s28 + $0x28] sm:$0xf]  ;;  %v2091_v9 = vld [vmem:[%s1912_s6 + $0x20] sm:$0xf] }
  0x3c   : > { %v1163_v13 = vsel %vm1899_vm2, %v1158_v14, %v1162_v61  ;;  %v560_v6 = vrot.slane %v558_v18, 5  ;;  %v566_v8 = vrot.slane %v564_v19, 5  ;;  %v570_v31 = vrot.slane %v568_v16, 4 }
  0x3d   : > { %v1033_v28 = vmax.bf16 %v1001_v21, %v316_v26  ;;  %v1064_v30 = vmax.bf16 %v1032_v22, %v2011_v29  ;;  %v574_v32 = vshll.u32 %v272_v15, 16  ;;  %v912_v38 = vmax.bf16 %v2036_v58, %v270_v62  ;;  %v274_v62 = vld [vmem:[%s1856_s24 + $0x40] sm:$0xf]  ;;  %v2096_v15 = vld [vmem:[%s1912_s6 + $0x24] sm:$0xf] }
  0x3e   : > { %v561_v37 = vor.u32 %v560_v6, %v557_v27  ;;  %v913_v39 = vmax.bf16 %v881_v7, %v271_v63  ;;  %v1165_v12 = vshrl.u32 %v2054_v24, 16  ;;  %v571_v42 = vor.u32 %v570_v31, %v566_v8  ;;  %v2110_v31 = vld [vmem:[%s1872_s28 + $0x34] sm:$0xf] }
  0x3f   : > { %v1065_v40 = vmax.bf16 %v1033_v28, %v2016_v33  ;;  %v1512_v41 = vmax.bf16 %v1153_v23, %v1064_v30  ;;  %v576_v43 = vrot.slane %v574_v32, 5  ;;  %v1168_v45 = vshll.u32 %v2054_v24, 16  ;;  %v2074_v33 = vld [vmem:[%s1856_s24 + $0x3c] sm:$0xf]  ;;  %v357_v32 = vld [vmem:[%s1872_s28 + $0x38] sm:$0x1] }
  0x40   : > { %v562_v29 = vrot.slane %v561_v37, 4  ;;  %v1167_v35 = vrot.slane %v1165_v12, 4  ;;  %v1174_v46 = vshll.u32 %v2061_v5, 16  ;;  %v572_v48 = vrot.slane %v571_v42, 4 }
  0x41   : > { %v1513_v47 = vmax.bf16 %v1163_v13, %v1065_v40  ;;  %v1178_v49 = vshrl.u32 %v2061_v5, 16  ;;  %v1184_v50 = vshll.u32 %v354_v36, 16  ;;  %v1170_v52 = vrot.slane %v1168_v45, 5  ;;  %v2104_v13 = vld [vmem:[%s1872_s28 + $0x30] sm:$0xf] }
  0x42   : > { %v567_v51 = vsel %vm1899_vm2, %v562_v29, %v566_v8  ;;  %v1176_v20 = vrot.slane %v1174_v46, 5  ;;  %v433_v54 = vmax.bf16 %v2068_v44, %v2074_v33  ;;  %v577_v56 = vsel %vm1899_vm2, %v572_v48, %v576_v43 }
  0x43   : > { %v1762_v55 = vcombine.low %v1512_v41, %v1513_v47  ;;  %v882_v57 = vmax.bf16 %v567_v51, %v431_v2  ;;  %v970_v25 = vmax.bf16 %v912_v38, %v567_v51  ;;  %v883_v58 = vmax.bf16 %v577_v56, %v432_v3  ;;  %v275_v3 = vld [vmem:[%s1856_s24 + $0x44] sm:$0x1] }
  0x44   : > { %v971_v59 = vmax.bf16 %v913_v39, %v577_v56  ;;  %v1171_v60 = vor.u32 %v1170_v52, %v1167_v35  ;;  %v1180_v61 = vrot.slane %v1178_v49, 4  ;;  %v1186_v0 = vrot.slane %v1184_v50, 5  ;;  %v2121_v49 = vld [vmem:[%s1851_s21 + $0x30] sm:$0xf]  ;;  %v2124_v50 = vld [vmem:[%s1851_s21 + $0x34] sm:$0xf] }
  0x45   : > { %1763 = vst [vmem:[%s1971_s9 + $0x10] sm:$0xff] %v1762_v55   ;;  %v1002_v63 = vmax.bf16 %v970_v25, %v2045_v4  ;;  %v434_v1 = vmax.bf16 %v2079_v53, %v274_v62  ;;  %v579_v7 = vshrl.u32 %v2074_v33, 16  ;;  %v582_v14 = vshll.u32 %v2074_v33, 16  ;;  %v2131_v53 = vld [vmem:[%s1856_s24 + $0x48] sm:$0xf] }
  0x46   : > { %v1003_v2 = vmax.bf16 %v971_v59, %v316_v26  ;;  %v1172_v10 = vrot.slane %v1171_v60, 4  ;;  %v1181_v11 = vor.u32 %v1180_v61, %v1176_v20  ;;  %v588_v18 = vshll.u32 %v274_v62, 16 }
  0x47   : > { %v1034_v17 = vmax.bf16 %v1002_v63, %v2091_v9  ;;  %v581_v4 = vrot.slane %v579_v7, 4  ;;  %v592_v19 = vshrl.u32 %v274_v62, 16  ;;  %v584_v16 = vrot.slane %v582_v14, 5  ;;  %v2145_v63 = vld [vmem:[%s1912_s6 + $0x2c] sm:$0xf] }
  0x48   : > { %v1035_v21 = vmax.bf16 %v1003_v2, %v2096_v15  ;;  %v1177_v22 = vsel %vm1899_vm2, %v1172_v10, %v1176_v20  ;;  %v1182_v23 = vrot.slane %v1181_v11, 4  ;;  %v590_v27 = vrot.slane %v588_v18, 5 }
  0x49   : > { %v1066_v26 = vmax.bf16 %v1034_v17, %v2054_v24  ;;  %v594_v6 = vrot.slane %v592_v19, 4  ;;  %v598_v8 = vshll.u32 %v275_v3, 16  ;;  %v585_v36 = vor.u32 %v584_v16, %v581_v4 }
  0x4a   : > { %v1067_v28 = vmax.bf16 %v1035_v21, %v2061_v5  ;;  %v1187_v30 = vsel %vm1899_vm2, %v1182_v23, %v1186_v0  ;;  %v914_v37 = vmax.bf16 %v882_v57, %v2074_v33  ;;  %v915_v12 = vmax.bf16 %v883_v58, %v274_v62  ;;  %v277_v58 = vld [vmem:[%s1856_s24 + $0x4c] sm:$0xf]  ;;  %v2142_v62 = vld [vmem:[%s1912_s6 + $0x28] sm:$0xf]  ;;  %v2157_v21 = vld [vmem:[%s1872_s28 + $0x3c] sm:$0xf] }
  0x4b   : > { %v1514_v38 = vmax.bf16 %v1177_v22, %v1066_v26  ;;  %v595_v39 = vor.u32 %v594_v6, %v590_v27  ;;  %v600_v24 = vrot.slane %v598_v8, 5  ;;  %v586_v41 = vrot.slane %v585_v36, 4  ;;  %v2163_v6 = vld [vmem:[%s1872_s28 + $0x40] sm:$0xf] }
  0x4c   : > { %v1515_v40 = vmax.bf16 %v1187_v30, %v1067_v28  ;;  %v1189_v42 = vshrl.u32 %v2104_v13, 16  ;;  %v1192_v5 = vshll.u32 %v2104_v13, 16  ;;  %v1198_v44 = vshll.u32 %v2110_v31, 16 }
  0x4d   : > { %v596_v43 = vrot.slane %v595_v39, 4  ;;  %v1202_v29 = vshrl.u32 %v2110_v31, 16  ;;  %v1208_v35 = vshll.u32 %v357_v32, 16  ;;  %v591_v46 = vsel %vm1899_vm2, %v586_v41, %v590_v27  ;;  %v360_v32 = vld [vmem:[%s1872_s28 + $0x44] sm:$0x1] }
  0x4e   : > { %v1764_v45 = vcombine.low %v1514_v38, %v1515_v40  ;;  %v1191_v47 = vrot.slane %v1189_v42, 4  ;;  %v1194_v48 = vrot.slane %v1192_v5, 5  ;;  %v2128_v51 = vmax.bf16 %v591_v46, %v433_v54 }
  0x4f   : > { %v601_v33 = vsel %vm1899_vm2, %v596_v43, %v600_v24  ;;  %v972_v52 = vmax.bf16 %v914_v37, %v591_v46  ;;  %v1200_v20 = vrot.slane %v1198_v44, 5  ;;  %v1204_v25 = vrot.slane %v1202_v29, 4 }
  0x50   : > { %1765 = vst [vmem:[%s1971_s9 + $0x18] sm:$0xff] %v1764_v45   ;;  %v2134_v55 = vmax.bf16 %v601_v33, %v434_v1  ;;  %v973_v56 = vmax.bf16 %v915_v12, %v601_v33  ;;  %v1195_v57 = vor.u32 %v1194_v48, %v1191_v47  ;;  %v1210_v60 = vrot.slane %v1208_v35, 5  ;;  %v2174_v35 = vld [vmem:[%s1851_s21 + $0x38] sm:$0xf] }
  0x51   : > { %v1004_v59 = vmax.bf16 %v972_v52, %v2091_v9  ;;  %v435_v61 = vmax.bf16 %v2121_v49, %v2131_v53  ;;  %v436_v54 = vmax.bf16 %v2124_v50, %v277_v58  ;;  %v1205_v7 = vor.u32 %v1204_v25, %v1200_v20  ;;  %v278_v9 = vld [vmem:[%s1856_s24 + $0x50] sm:$0x1]  ;;  %v2181_v49 = vld [vmem:[%s1856_s24 + $0x54] sm:$0xf]  ;;  %v2184_v50 = vld [vmem:[%s1851_s21 + $0x3c] sm:$0xf] }
  0x52   : > { %v1005_v0 = vmax.bf16 %v973_v56, %v2096_v15  ;;  %v1196_v1 = vrot.slane %v1195_v57, 4  ;;  %v603_v2 = vshrl.u32 %v2131_v53, 16  ;;  %v606_v11 = vshll.u32 %v2131_v53, 16 }
  0x53   : > { %v1036_v10 = vmax.bf16 %v1004_v59, %v2142_v62  ;;  %v612_v3 = vshll.u32 %v277_v58, 16  ;;  %v616_v14 = vshrl.u32 %v277_v58, 16  ;;  %v1206_v18 = vrot.slane %v1205_v7, 4  ;;  %v2196_v59 = vld [vmem:[%s1912_s6 + $0x34] sm:$0xf] }
  0x54   : > { %v1037_v17 = vmax.bf16 %v1005_v0, %v2145_v63  ;;  %v1201_v4 = vsel %vm1899_vm2, %v1196_v1, %v1200_v20  ;;  %v605_v15 = vrot.slane %v603_v2, 4  ;;  %v608_v22 = vrot.slane %v606_v11, 5  ;;  %v281_v2 = vld [vmem:[%s1856_s24 + $0x5c] sm:$0x1] }
  0x55   : > { %v1068_v19 = vmax.bf16 %v1036_v10, %v2104_v13  ;;  %v614_v23 = vrot.slane %v612_v3, 5  ;;  %v618_v16 = vrot.slane %v616_v14, 4  ;;  %v1211_v27 = vsel %vm1899_vm2, %v1206_v18, %v1210_v60  ;;  %v2207_v14 = vld [vmem:[%s1872_s28 + $0x48] sm:$0xf] }
  0x56   : > { %v1069_v26 = vmax.bf16 %v1037_v17, %v2110_v31  ;;  %v622_v8 = vshll.u32 %v278_v9, 16  ;;  %v916_v28 = vmax.bf16 %v2128_v51, %v2131_v53  ;;  %v609_v13 = vor.u32 %v608_v22, %v605_v15  ;;  %v280_v53 = vld [vmem:[%s1856_s24 + $0x58] sm:$0xf] }
  0x57   : > { %v1516_v30 = vmax.bf16 %v1201_v4, %v1068_v19  ;;  %v619_v36 = vor.u32 %v618_v16, %v614_v23  ;;  %v917_v37 = vmax.bf16 %v2134_v55, %v277_v58  ;;  %v1213_v31 = vshrl.u32 %v2157_v21, 16  ;;  %v2193_v58 = vld [vmem:[%s1912_s6 + $0x30] sm:$0xf] }
  0x58   : > { %v1517_v38 = vmax.bf16 %v1211_v27, %v1069_v26  ;;  %v624_v39 = vrot.slane %v622_v8, 5  ;;  %v1216_v24 = vshll.u32 %v2157_v21, 16  ;;  %v610_v12 = vrot.slane %v609_v13, 4  ;;  %v363_v27 = vld [vmem:[%s1872_s28 + $0x50] sm:$0x1] }
  0x59   : > { %v620_v40 = vrot.slane %v619_v36, 4  ;;  %v1222_v41 = vshll.u32 %v2163_v6, 16  ;;  %v1226_v42 = vshrl.u32 %v2163_v6, 16  ;;  %v1215_v43 = vrot.slane %v1213_v31, 4 }
  0x5a   : > { %v1766_v5 = vcombine.low %v1516_v30, %v1517_v38  ;;  %v1218_v44 = vrot.slane %v1216_v24, 5  ;;  %v1232_v29 = vshll.u32 %v360_v32, 16  ;;  %v615_v45 = vsel %vm1899_vm2, %v610_v12, %v614_v23  ;;  %v2216_v23 = vld [vmem:[%s1872_s28 + $0x4c] sm:$0xf] }
  0x5b   : > { %v625_v46 = vsel %vm1899_vm2, %v620_v40, %v624_v39  ;;  %v1224_v47 = vrot.slane %v1222_v41, 5  ;;  %v1228_v48 = vrot.slane %v1226_v42, 4  ;;  %v886_v33 = vmax.bf16 %v615_v45, %v435_v61 }
  0x5c   : > { %1767 = vst [vmem:[%s1971_s9 + $0x20] sm:$0xff] %v1766_v5   ;;  %v2187_v51 = vmax.bf16 %v625_v46, %v436_v54  ;;  %v974_v52 = vmax.bf16 %v916_v28, %v615_v45  ;;  %v975_v20 = vmax.bf16 %v917_v37, %v625_v46  ;;  %v1219_v55 = vor.u32 %v1218_v44, %v1215_v43  ;;  %v2229_v5 = vld [vmem:[%s1856_s24 + $0x60] sm:$0xf] }
  0x5d   : > { %v1229_v56 = vor.u32 %v1228_v48, %v1224_v47  ;;  %v1234_v57 = vrot.slane %v1232_v29, 5  ;;  %v437_v25 = vmax.bf16 %v2174_v35, %v2181_v49  ;;  %v438_v54 = vmax.bf16 %v2184_v50, %v280_v53  ;;  %v2234_v35 = vld [vmem:[%s1851_s21 + $0x44] sm:$0xf] }
  0x5e   : > { %v1006_v60 = vmax.bf16 %v974_v52, %v2142_v62  ;;  %v1007_v61 = vmax.bf16 %v975_v20, %v2145_v63  ;;  %v627_v0 = vshrl.u32 %v2181_v49, 16  ;;  %v1220_v1 = vrot.slane %v1219_v55, 4  ;;  %v283_v50 = vld [vmem:[%s1856_s24 + $0x64] sm:$0xf] }
  0x5f   : > { %v1230_v7 = vrot.slane %v1229_v56, 4  ;;  %v630_v10 = vshll.u32 %v2181_v49, 16  ;;  %v636_v9 = vshll.u32 %v280_v53, 16  ;;  %v640_v63 = vshrl.u32 %v280_v53, 16 }
  0x60   : > { %v1038_v11 = vmax.bf16 %v1006_v60, %v2193_v58  ;;  %v1039_v3 = vmax.bf16 %v1007_v61, %v2196_v59  ;;  %v629_v62 = vrot.slane %v627_v0, 4  ;;  %v1225_v17 = vsel %vm1899_vm2, %v1220_v1, %v1224_v47  ;;  %v284_v0 = vld [vmem:[%s1856_s24 + $0x68] sm:$0x1] }
  0x61   : > { %v1235_v4 = vsel %vm1899_vm2, %v1230_v7, %v1234_v57  ;;  %v632_v18 = vrot.slane %v630_v10, 5  ;;  %v638_v15 = vrot.slane %v636_v9, 5  ;;  %v642_v16 = vrot.slane %v640_v63, 4  ;;  %v2252_v7 = vld [vmem:[%s1912_s6 + $0x3c] sm:$0xf] }
  0x62   : > { %v1070_v19 = vmax.bf16 %v1038_v11, %v2157_v21  ;;  %v1071_v22 = vmax.bf16 %v1039_v3, %v2163_v6  ;;  %v646_v26 = vshll.u32 %v281_v2, 16  ;;  %v918_v28 = vmax.bf16 %v886_v33, %v2181_v49  ;;  %v2223_v6 = vld [vmem:[%s1851_s21 + $0x40] sm:$0xf] }
  0x63   : > { %v633_v8 = vor.u32 %v632_v18, %v629_v62  ;;  %v919_v30 = vmax.bf16 %v2187_v51, %v280_v53  ;;  %v1237_v32 = vshrl.u32 %v2207_v14, 16  ;;  %v643_v37 = vor.u32 %v642_v16, %v638_v15  ;;  %v2243_v53 = vld [vmem:[%s1912_s6 + $0x38] sm:$0xf]  ;;  %v366_v16 = vld [vmem:[%s1872_s28 + $0x5c] sm:$0x1] }
  0x64   : > { %v1518_v13 = vmax.bf16 %v1225_v17, %v1070_v19  ;;  %v1519_v36 = vmax.bf16 %v1235_v4, %v1071_v22  ;;  %v648_v21 = vrot.slane %v646_v26, 5  ;;  %v1240_v31 = vshll.u32 %v2207_v14, 16  ;;  %v2265_v18 = vld [vmem:[%s1872_s28 + $0x58] sm:$0xf] }
  0x65   : > { %v634_v38 = vrot.slane %v633_v8, 4  ;;  %v1239_v39 = vrot.slane %v1237_v32, 4  ;;  %v1246_v24 = vshll.u32 %v2216_v23, 16  ;;  %v644_v40 = vrot.slane %v643_v37, 4 }
  0x66   : > { %v1768_v12 = vcombine.low %v1518_v13, %v1519_v36  ;;  %v1250_v41 = vshrl.u32 %v2216_v23, 16  ;;  %v1256_v42 = vshll.u32 %v363_v27, 16  ;;  %v1242_v44 = vrot.slane %v1240_v31, 5 }
  0x67   : > { %v639_v43 = vsel %vm1899_vm2, %v634_v38, %v638_v15  ;;  %v1248_v29 = vrot.slane %v1246_v24, 5  ;;  %v439_v45 = vmax.bf16 %v2223_v6, %v2229_v5  ;;  %v649_v46 = vsel %vm1899_vm2, %v644_v40, %v648_v21 }
  0x68   : > { %1769 = vst [vmem:[%s1971_s9 + $0x28] sm:$0xff] %v1768_v12   ;;  %v888_v47 = vmax.bf16 %v639_v43, %v437_v25  ;;  %v976_v48 = vmax.bf16 %v918_v28, %v639_v43  ;;  %v1252_v49 = vrot.slane %v1250_v41, 4  ;;  %v889_v33 = vmax.bf16 %v649_v46, %v438_v54  ;;  %v2277_v41 = vld [vmem:[%s1851_s21 + $0x48] sm:$0xf] }
  0x69   : > { %v977_v51 = vmax.bf16 %v919_v30, %v649_v46  ;;  %v1243_v52 = vor.u32 %v1242_v44, %v1239_v39  ;;  %v1258_v20 = vrot.slane %v1256_v42, 5  ;;  %v440_v57 = vmax.bf16 %v2234_v35, %v283_v50  ;;  %v2280_v42 = vld [vmem:[%s1851_s21 + $0x4c] sm:$0xf] }
  0x6a   : > { %v1008_v55 = vmax.bf16 %v976_v48, %v2193_v58  ;;  %v1253_v56 = vor.u32 %v1252_v49, %v1248_v29  ;;  %v651_v60 = vshrl.u32 %v2229_v5, 16  ;;  %v654_v54 = vshll.u32 %v2229_v5, 16  ;;  %v285_v35 = vld [vmem:[%s1856_s24 + $0x6c] sm:$0xf] }
  0x6b   : > { %v1009_v25 = vmax.bf16 %v977_v51, %v2196_v59  ;;  %v1244_v61 = vrot.slane %v1243_v52, 4  ;;  %v660_v1 = vshll.u32 %v283_v50, 16  ;;  %v664_v9 = vshrl.u32 %v283_v50, 16  ;;  %v2259_v59 = vld [vmem:[%s1872_s28 + $0x54] sm:$0xf] }
  0x6c   : > { %v1040_v2 = vmax.bf16 %v1008_v55, %v2243_v53  ;;  %v1254_v58 = vrot.slane %v1253_v56, 4  ;;  %v653_v10 = vrot.slane %v651_v60, 4  ;;  %v656_v62 = vrot.slane %v654_v54, 5  ;;  %v2294_v55 = vld [vmem:[%s1912_s6 + $0x44] sm:$0xf] }
  0x6d   : > { %v1041_v11 = vmax.bf16 %v1009_v25, %v2252_v7  ;;  %v1249_v3 = vsel %vm1899_vm2, %v1244_v61, %v1248_v29  ;;  %v662_v63 = vrot.slane %v660_v1, 5  ;;  %v666_v15 = vrot.slane %v664_v9, 4  ;;  %v287_v54 = vld [vmem:[%s1856_s24 + $0x74] sm:$0x1] }
  0x6e   : > { %v1072_v17 = vmax.bf16 %v1040_v2, %v2207_v14  ;;  %v1259_v4 = vsel %vm1899_vm2, %v1254_v58, %v1258_v20  ;;  %v670_v19 = vshll.u32 %v284_v0, 16  ;;  %v657_v26 = vor.u32 %v656_v62, %v653_v10  ;;  %v2303_v10 = vld [vmem:[%s1872_s28 + $0x60] sm:$0xf] }
  0x6f   : > { %v1073_v22 = vmax.bf16 %v1041_v11, %v2216_v23  ;;  %v920_v27 = vmax.bf16 %v888_v47, %v2229_v5  ;;  %v921_v8 = vmax.bf16 %v889_v33, %v283_v50  ;;  %v667_v30 = vor.u32 %v666_v15, %v662_v63  ;;  %v286_v50 = vld [vmem:[%s1856_s24 + $0x70] sm:$0xf]  ;;  %v2288_v33 = vld [vmem:[%s1912_s6 + $0x40] sm:$0xf] }
  0x70   : > { %v1520_v28 = vmax.bf16 %v1249_v3, %v1072_v17  ;;  %v672_v32 = vrot.slane %v670_v19, 5  ;;  %v1261_v14 = vshrl.u32 %v2259_v59, 16  ;;  %v658_v36 = vrot.slane %v657_v26, 4  ;;  %v369_v26 = vld [vmem:[%s1872_s28 + $0x68] sm:$0x1] }
  0x71   : > { %v1521_v13 = vmax.bf16 %v1259_v4, %v1073_v22  ;;  %v1264_v37 = vshll.u32 %v2259_v59, 16  ;;  %v1270_v21 = vshll.u32 %v2265_v18, 16  ;;  %v668_v23 = vrot.slane %v667_v30, 4  ;;  %v2310_v4 = vld [vmem:[%s1872_s28 + $0x64] sm:$0xf] }
  0x72   : > { %v1263_v6 = vrot.slane %v1261_v14, 4  ;;  %v1274_v38 = vshrl.u32 %v2265_v18, 16  ;;  %v1280_v39 = vshll.u32 %v366_v16, 16  ;;  %v663_v24 = vsel %vm1899_vm2, %v658_v36, %v662_v63 }
  0x73   : > { %v1770_v31 = vcombine.low %v1520_v28, %v1521_v13  ;;  %v1266_v12 = vrot.slane %v1264_v37, 5  ;;  %v1272_v40 = vrot.slane %v1270_v21, 5  ;;  %v673_v5 = vsel %vm1899_vm2, %v668_v23, %v672_v32 }
  0x74   : > { %v890_v43 = vmax.bf16 %v663_v24, %v439_v45  ;;  %v978_v44 = vmax.bf16 %v920_v27, %v663_v24  ;;  %v1276_v29 = vrot.slane %v1274_v38, 4  ;;  %v891_v46 = vmax.bf16 %v673_v5, %v440_v57 }
  0x75   : > { %1771 = vst [vmem:[%s1971_s9 + $0x30] sm:$0xff] %v1770_v31   ;;  %v979_v47 = vmax.bf16 %v921_v8, %v673_v5  ;;  %v1267_v48 = vor.u32 %v1266_v12, %v1263_v6  ;;  %v1282_v49 = vrot.slane %v1280_v39, 5  ;;  %v441_v20 = vmax.bf16 %v2277_v41, %v285_v35  ;;  %v2320_v39 = vld [vmem:[%s1851_s21 + $0x50] sm:$0xf]  ;;  %v2323_v31 = vld [vmem:[%s1851_s21 + $0x54] sm:$0xf] }
  0x76   : > { %v1010_v51 = vmax.bf16 %v978_v44, %v2243_v53  ;;  %v1277_v52 = vor.u32 %v1276_v29, %v1272_v40  ;;  %v442_v45 = vmax.bf16 %v2280_v42, %v286_v50  ;;  %v675_v60 = vshrl.u32 %v285_v35, 16  ;;  %v2330_v42 = vld [vmem:[%s1856_s24 + $0x78] sm:$0xf] }
  0x77   : > { %v1011_v56 = vmax.bf16 %v979_v47, %v2252_v7  ;;  %v1268_v57 = vrot.slane %v1267_v48, 4  ;;  %v678_v25 = vshll.u32 %v285_v35, 16  ;;  %v684_v1 = vshll.u32 %v286_v50, 16 }
  0x78   : > { %v1042_v61 = vmax.bf16 %v1010_v51, %v2288_v33  ;;  %v1278_v0 = vrot.slane %v1277_v52, 4  ;;  %v688_v53 = vshrl.u32 %v286_v50, 16  ;;  %v677_v9 = vrot.slane %v675_v60, 4  ;;  %v2344_v51 = vld [vmem:[%s1912_s6 + $0x4c] sm:$0xf] }
  0x79   : > { %v1043_v2 = vmax.bf16 %v1011_v56, %v2294_v55  ;;  %v1273_v58 = vsel %vm1899_vm2, %v1268_v57, %v1272_v40  ;;  %v680_v7 = vrot.slane %v678_v25, 5  ;;  %v686_v62 = vrot.slane %v684_v1, 5 }
  0x7a   : > { %v1074_v11 = vmax.bf16 %v1042_v61, %v2259_v59  ;;  %v1283_v3 = vsel %vm1899_vm2, %v1278_v0, %v1282_v49  ;;  %v690_v63 = vrot.slane %v688_v53, 4  ;;  %v694_v19 = vshll.u32 %v287_v54, 16 }
  0x7b   : > { %v1075_v17 = vmax.bf16 %v1043_v2, %v2265_v18  ;;  %v681_v15 = vor.u32 %v680_v7, %v677_v9  ;;  %v922_v22 = vmax.bf16 %v890_v43, %v285_v35  ;;  %v923_v8 = vmax.bf16 %v891_v46, %v286_v50  ;;  %v289_v35 = vld [vmem:[%s1856_s24 + $0x7c] sm:$0xf]  ;;  %v2341_v50 = vld [vmem:[%s1912_s6 + $0x48] sm:$0xf]  ;;  %v2356_v2 = vld [vmem:[%s1872_s28 + $0x6c] sm:$0xf] }
  0x7c   : > { %v1522_v16 = vmax.bf16 %v1273_v58, %v1074_v11  ;;  %v691_v27 = vor.u32 %v690_v63, %v686_v62  ;;  %v1285_v59 = vshrl.u32 %v2303_v10, 16  ;;  %v696_v32 = vrot.slane %v694_v19, 5  ;;  %v372_v19 = vld [vmem:[%s1872_s28 + $0x74] sm:$0x1] }
  0x7d   : > { %v1523_v28 = vmax.bf16 %v1283_v3, %v1075_v17  ;;  %v682_v30 = vrot.slane %v681_v15, 4  ;;  %v1288_v14 = vshll.u32 %v2303_v10, 16  ;;  %v1294_v36 = vshll.u32 %v2310_v4, 16 }
  0x7e   : > { %v692_v18 = vrot.slane %v691_v27, 4  ;;  %v1287_v13 = vrot.slane %v1285_v59, 4  ;;  %v1298_v37 = vshrl.u32 %v2310_v4, 16  ;;  %v1304_v38 = vshll.u32 %v369_v26, 16 }
  0x7f   : > { %v1772_v21 = vcombine.low %v1522_v16, %v1523_v28  ;;  %v687_v23 = vsel %vm1899_vm2, %v682_v30, %v686_v62  ;;  %v1290_v6 = vrot.slane %v1288_v14, 5  ;;  %v1296_v41 = vrot.slane %v1294_v36, 5  ;;  %v2362_v62 = vld [vmem:[%s1872_s28 + $0x70] sm:$0xf] }
  0x80   : > { %v697_v24 = vsel %vm1899_vm2, %v692_v18, %v696_v32  ;;  %v2327_v12 = vmax.bf16 %v687_v23, %v441_v20  ;;  %v980_v40 = vmax.bf16 %v922_v22, %v687_v23  ;;  %v1300_v29 = vrot.slane %v1298_v37, 4  ;;  %v2373_v37 = vld [vmem:[%s1851_s21 + $0x58] sm:$0xf] }
  0x81   : > { %1773 = vst [vmem:[%s1971_s9 + $0x38] sm:$0xff] %v1772_v21   ;;  %v2333_v5 = vmax.bf16 %v697_v24, %v442_v45  ;;  %v981_v43 = vmax.bf16 %v923_v8, %v697_v24  ;;  %v1291_v44 = vor.u32 %v1290_v6, %v1287_v13  ;;  %v1306_v47 = vrot.slane %v1304_v38, 5 }
  0x82   : > { %v1012_v46 = vmax.bf16 %v980_v40, %v2288_v33  ;;  %v443_v48 = vmax.bf16 %v2320_v39, %v2330_v42  ;;  %v444_v49 = vmax.bf16 %v2323_v31, %v289_v35  ;;  %v1301_v45 = vor.u32 %v1300_v29, %v1296_v41  ;;  %v290_v33 = vld [vmem:[%s1856_s24 + $0x80] sm:$0x1]  ;;  %v2380_v39 = vld [vmem:[%s1856_s24 + $0x84] sm:$0xf]  ;;  %v2383_v31 = vld [vmem:[%s1851_s21 + $0x5c] sm:$0xf] }
  0x83   : > { %v1013_v52 = vmax.bf16 %v981_v43, %v2294_v55  ;;  %v1292_v20 = vrot.slane %v1291_v44, 4  ;;  %v699_v56 = vshrl.u32 %v2330_v42, 16  ;;  %v702_v60 = vshll.u32 %v2330_v42, 16 }
  0x84   : > { %v1044_v57 = vmax.bf16 %v1012_v46, %v2341_v50  ;;  %v708_v25 = vshll.u32 %v289_v35, 16  ;;  %v712_v61 = vshrl.u32 %v289_v35, 16  ;;  %v1302_v1 = vrot.slane %v1301_v45, 4  ;;  %v2395_v46 = vld [vmem:[%s1912_s6 + $0x54] sm:$0xf] }
  0x85   : > { %v1045_v0 = vmax.bf16 %v1013_v52, %v2344_v51  ;;  %v1297_v54 = vsel %vm1899_vm2, %v1292_v20, %v1296_v41  ;;  %v701_v55 = vrot.slane %v699_v56, 4  ;;  %v704_v58 = vrot.slane %v702_v60, 5  ;;  %v293_v56 = vld [vmem:[%s1856_s24 + $0x8c] sm:$0x1] }
  0x86   : > { %v1076_v53 = vmax.bf16 %v1044_v57, %v2303_v10  ;;  %v710_v9 = vrot.slane %v708_v25, 5  ;;  %v714_v7 = vrot.slane %v712_v61, 4  ;;  %v1307_v3 = vsel %vm1899_vm2, %v1302_v1, %v1306_v47  ;;  %v2406_v61 = vld [vmem:[%s1872_s28 + $0x78] sm:$0xf] }
  0x87   : > { %v1077_v11 = vmax.bf16 %v1045_v0, %v2310_v4  ;;  %v718_v63 = vshll.u32 %v290_v33, 16  ;;  %v924_v17 = vmax.bf16 %v2327_v12, %v2330_v42  ;;  %v705_v10 = vor.u32 %v704_v58, %v701_v55  ;;  %v292_v42 = vld [vmem:[%s1856_s24 + $0x88] sm:$0xf] }
  0x88   : > { %v1524_v15 = vmax.bf16 %v1297_v54, %v1076_v53  ;;  %v715_v22 = vor.u32 %v714_v7, %v710_v9  ;;  %v925_v16 = vmax.bf16 %v2333_v5, %v289_v35  ;;  %v1309_v4 = vshrl.u32 %v2356_v2, 16  ;;  %v2392_v35 = vld [vmem:[%s1912_s6 + $0x50] sm:$0xf] }
  0x89   : > { %v1525_v26 = vmax.bf16 %v1307_v3, %v1077_v11  ;;  %v720_v27 = vrot.slane %v718_v63, 5  ;;  %v1312_v8 = vshll.u32 %v2356_v2, 16  ;;  %v706_v59 = vrot.slane %v705_v10, 4  ;;  %v375_v3 = vld [vmem:[%s1872_s28 + $0x80] sm:$0x1] }
  0x8a   : > { %v716_v28 = vrot.slane %v715_v22, 4  ;;  %v1318_v30 = vshll.u32 %v2362_v62, 16  ;;  %v1322_v32 = vshrl.u32 %v2362_v62, 16  ;;  %v1311_v18 = vrot.slane %v1309_v4, 4 }
  0x8b   : > { %v1774_v14 = vcombine.low %v1524_v15, %v1525_v26  ;;  %v1314_v13 = vrot.slane %v1312_v8, 5  ;;  %v1328_v36 = vshll.u32 %v372_v19, 16  ;;  %v711_v21 = vsel %vm1899_vm2, %v706_v59, %v710_v9  ;;  %v2415_v9 = vld [vmem:[%s1872_s28 + $0x7c] sm:$0xf] }
  0x8c   : > { %v721_v23 = vsel %vm1899_vm2, %v716_v28, %v720_v27  ;;  %v1320_v6 = vrot.slane %v1318_v30, 5  ;;  %v1324_v38 = vrot.slane %v1322_v32, 4  ;;  %v894_v24 = vmax.bf16 %v711_v21, %v443_v48 }
  0x8d   : > { %1775 = vst [vmem:[%s1971_s9 + $0x40] sm:$0xff] %v1774_v14   ;;  %v2386_v12 = vmax.bf16 %v721_v23, %v444_v49  ;;  %v982_v40 = vmax.bf16 %v924_v17, %v711_v21  ;;  %v983_v41 = vmax.bf16 %v925_v16, %v721_v23  ;;  %v1315_v5 = vor.u32 %v1314_v13, %v1311_v18  ;;  %v2428_v14 = vld [vmem:[%s1856_s24 + $0x90] sm:$0xf] }
  0x8e   : > { %v1325_v43 = vor.u32 %v1324_v38, %v1320_v6  ;;  %v1330_v44 = vrot.slane %v1328_v36, 5  ;;  %v445_v29 = vmax.bf16 %v2373_v37, %v2380_v39  ;;  %v446_v49 = vmax.bf16 %v2383_v31, %v292_v42  ;;  %v2433_v37 = vld [vmem:[%s1851_s21 + $0x64] sm:$0xf]  ;;  %v295_v31 = vld [vmem:[%s1856_s24 + $0x94] sm:$0xf] }
  0x8f   : > { %v1014_v47 = vmax.bf16 %v982_v40, %v2341_v50  ;;  %v1015_v48 = vmax.bf16 %v983_v41, %v2344_v51  ;;  %v723_v52 = vshrl.u32 %v2380_v39, 16  ;;  %v1316_v20 = vrot.slane %v1315_v5, 4 }
  0x90   : > { %v1326_v45 = vrot.slane %v1325_v43, 4  ;;  %v726_v57 = vshll.u32 %v2380_v39, 16  ;;  %v732_v33 = vshll.u32 %v292_v42, 16  ;;  %v736_v51 = vshrl.u32 %v292_v42, 16 }
  0x91   : > { %v1046_v60 = vmax.bf16 %v1014_v47, %v2392_v35  ;;  %v1047_v25 = vmax.bf16 %v1015_v48, %v2395_v46  ;;  %v725_v50 = vrot.slane %v723_v52, 4  ;;  %v1321_v0 = vsel %vm1899_vm2, %v1316_v20, %v1320_v6  ;;  %v296_v52 = vld [vmem:[%s1856_s24 + $0x98] sm:$0x1] }
  0x92   : > { %v1331_v54 = vsel %vm1899_vm2, %v1326_v45, %v1330_v44  ;;  %v728_v1 = vrot.slane %v726_v57, 5  ;;  %v734_v55 = vrot.slane %v732_v33, 5  ;;  %v738_v7 = vrot.slane %v736_v51, 4  ;;  %v2451_v45 = vld [vmem:[%s1912_s6 + $0x5c] sm:$0xf] }
  0x93   : > { %v1078_v53 = vmax.bf16 %v1046_v60, %v2356_v2  ;;  %v1079_v58 = vmax.bf16 %v1047_v25, %v2362_v62  ;;  %v742_v11 = vshll.u32 %v293_v56, 16  ;;  %v926_v17 = vmax.bf16 %v894_v24, %v2380_v39  ;;  %v2422_v62 = vld [vmem:[%s1851_s21 + $0x60] sm:$0xf] }
  0x94   : > { %v729_v63 = vor.u32 %v728_v1, %v725_v50  ;;  %v927_v15 = vmax.bf16 %v2386_v12, %v292_v42  ;;  %v1333_v19 = vshrl.u32 %v2406_v61, 16  ;;  %v739_v16 = vor.u32 %v738_v7, %v734_v55  ;;  %v2442_v42 = vld [vmem:[%s1912_s6 + $0x58] sm:$0xf]  ;;  %v2464_v1 = vld [vmem:[%s1872_s28 + $0x88] sm:$0xf] }
  0x95   : > { %v1526_v10 = vmax.bf16 %v1321_v0, %v1078_v53  ;;  %v1527_v22 = vmax.bf16 %v1331_v54, %v1079_v58  ;;  %v744_v2 = vrot.slane %v742_v11, 5  ;;  %v1336_v4 = vshll.u32 %v2406_v61, 16  ;;  %v378_v7 = vld [vmem:[%s1872_s28 + $0x8c] sm:$0x1] }
  0x96   : > { %v730_v26 = vrot.slane %v729_v63, 4  ;;  %v1335_v27 = vrot.slane %v1333_v19, 4  ;;  %v1342_v8 = vshll.u32 %v2415_v9, 16  ;;  %v740_v28 = vrot.slane %v739_v16, 4 }
  0x97   : > { %v1776_v59 = vcombine.low %v1526_v10, %v1527_v22  ;;  %v1346_v30 = vshrl.u32 %v2415_v9, 16  ;;  %v1352_v32 = vshll.u32 %v375_v3, 16  ;;  %v1338_v13 = vrot.slane %v1336_v4, 5 }
  0x98   : > { %v735_v18 = vsel %vm1899_vm2, %v730_v26, %v734_v55  ;;  %v1344_v36 = vrot.slane %v1342_v8, 5  ;;  %v447_v21 = vmax.bf16 %v2422_v62, %v2428_v14  ;;  %v745_v23 = vsel %vm1899_vm2, %v740_v28, %v744_v2 }
  0x99   : > { %1777 = vst [vmem:[%s1971_s9 + $0x48] sm:$0xff] %v1776_v59   ;;  %v896_v6 = vmax.bf16 %v735_v18, %v445_v29  ;;  %v984_v38 = vmax.bf16 %v926_v17, %v735_v18  ;;  %v1348_v39 = vrot.slane %v1346_v30, 4  ;;  %v897_v24 = vmax.bf16 %v745_v23, %v446_v49  ;;  %v2476_v30 = vld [vmem:[%s1851_s21 + $0x68] sm:$0xf] }
  0x9a   : > { %v985_v12 = vmax.bf16 %v927_v15, %v745_v23  ;;  %v1339_v40 = vor.u32 %v1338_v13, %v1335_v27  ;;  %v1354_v41 = vrot.slane %v1352_v32, 5  ;;  %v448_v44 = vmax.bf16 %v2433_v37, %v295_v31  ;;  %v2479_v32 = vld [vmem:[%s1851_s21 + $0x6c] sm:$0xf]  ;;  %v297_v37 = vld [vmem:[%s1856_s24 + $0x9c] sm:$0xf] }
  0x9b   : > { %v1016_v5 = vmax.bf16 %v984_v38, %v2392_v35  ;;  %v1349_v43 = vor.u32 %v1348_v39, %v1344_v36  ;;  %v747_v47 = vshrl.u32 %v2428_v14, 16  ;;  %v750_v49 = vshll.u32 %v2428_v14, 16 }
  0x9c   : > { %v1017_v29 = vmax.bf16 %v985_v12, %v2395_v46  ;;  %v1340_v48 = vrot.slane %v1339_v40, 4  ;;  %v756_v20 = vshll.u32 %v295_v31, 16  ;;  %v760_v33 = vshrl.u32 %v295_v31, 16  ;;  %v2458_v46 = vld [vmem:[%s1872_s28 + $0x84] sm:$0xf] }
  0x9d   : > { %v1048_v56 = vmax.bf16 %v1016_v5, %v2442_v42  ;;  %v1350_v35 = vrot.slane %v1349_v43, 4  ;;  %v749_v57 = vrot.slane %v747_v47, 4  ;;  %v752_v50 = vrot.slane %v750_v49, 5  ;;  %v2493_v5 = vld [vmem:[%s1912_s6 + $0x64] sm:$0xf] }
  0x9e   : > { %v1049_v60 = vmax.bf16 %v1017_v29, %v2451_v45  ;;  %v1345_v25 = vsel %vm1899_vm2, %v1340_v48, %v1344_v36  ;;  %v758_v51 = vrot.slane %v756_v20, 5  ;;  %v762_v55 = vrot.slane %v760_v33, 4  ;;  %v299_v49 = vld [vmem:[%s1856_s24 + $0xa4] sm:$0x1] }
  0x9f   : > { %v1080_v0 = vmax.bf16 %v1048_v56, %v2406_v61  ;;  %v1355_v54 = vsel %vm1899_vm2, %v1350_v35, %v1354_v41  ;;  %v766_v53 = vshll.u32 %v296_v52, 16  ;;  %v753_v11 = vor.u32 %v752_v50, %v749_v57  ;;  %v2502_v57 = vld [vmem:[%s1872_s28 + $0x90] sm:$0xf] }
  0xa0   : > { %v1081_v58 = vmax.bf16 %v1049_v60, %v2415_v9  ;;  %v928_v3 = vmax.bf16 %v896_v6, %v2428_v14  ;;  %v929_v63 = vmax.bf16 %v897_v24, %v295_v31  ;;  %v763_v15 = vor.u32 %v762_v55, %v758_v51  ;;  %v298_v31 = vld [vmem:[%s1856_s24 + $0xa0] sm:$0xf] }
  0xa1   : > { %v1528_v17 = vmax.bf16 %v1345_v25, %v1080_v0  ;;  %v768_v19 = vrot.slane %v766_v53, 5  ;;  %v1357_v61 = vshrl.u32 %v2458_v46, 16  ;;  %v754_v22 = vrot.slane %v753_v11, 4  ;;  %v2487_v24 = vld [vmem:[%s1912_s6 + $0x60] sm:$0xf] }
  0xa2   : > { %v1529_v10 = vmax.bf16 %v1355_v54, %v1081_v58  ;;  %v1360_v16 = vshll.u32 %v2458_v46, 16  ;;  %v1366_v2 = vshll.u32 %v2464_v1, 16  ;;  %v764_v9 = vrot.slane %v763_v15, 4  ;;  %v2509_v54 = vld [vmem:[%s1872_s28 + $0x94] sm:$0xf] }
  0xa3   : > { %v1359_v62 = vrot.slane %v1357_v61, 4  ;;  %v1370_v26 = vshrl.u32 %v2464_v1, 16  ;;  %v1376_v27 = vshll.u32 %v378_v7, 16  ;;  %v759_v8 = vsel %vm1899_vm2, %v754_v22, %v758_v51  ;;  %v381_v11 = vld [vmem:[%s1872_s28 + $0x98] sm:$0x1] }
  0xa4   : > { %v1778_v4 = vcombine.low %v1528_v17, %v1529_v10  ;;  %v1362_v59 = vrot.slane %v1360_v16, 5  ;;  %v1368_v28 = vrot.slane %v1366_v2, 5  ;;  %v769_v14 = vsel %vm1899_vm2, %v764_v9, %v768_v19 }
  0xa5   : > { %v898_v18 = vmax.bf16 %v759_v8, %v447_v21  ;;  %v986_v13 = vmax.bf16 %v928_v3, %v759_v8  ;;  %v1372_v36 = vrot.slane %v1370_v26, 4  ;;  %v899_v23 = vmax.bf16 %v769_v14, %v448_v44 }
  0xa6   : > { %1779 = vst [vmem:[%s1971_s9 + $0x50] sm:$0xff] %v1778_v4   ;;  %v987_v6 = vmax.bf16 %v929_v63, %v769_v14  ;;  %v1363_v38 = vor.u32 %v1362_v59, %v1359_v62  ;;  %v1378_v39 = vrot.slane %v1376_v27, 5  ;;  %v449_v41 = vmax.bf16 %v2476_v30, %v297_v37  ;;  %v2519_v27 = vld [vmem:[%s1851_s21 + $0x70] sm:$0xf]  ;;  %v2522_v4 = vld [vmem:[%s1851_s21 + $0x74] sm:$0xf] }
  0xa7   : > { %v1018_v12 = vmax.bf16 %v986_v13, %v2442_v42  ;;  %v1373_v40 = vor.u32 %v1372_v36, %v1368_v28  ;;  %v450_v21 = vmax.bf16 %v2479_v32, %v298_v31  ;;  %v771_v47 = vshrl.u32 %v297_v37, 16  ;;  %v2529_v32 = vld [vmem:[%s1856_s24 + $0xa8] sm:$0xf] }
  0xa8   : > { %v1019_v43 = vmax.bf16 %v987_v6, %v2451_v45  ;;  %v1364_v44 = vrot.slane %v1363_v38, 4  ;;  %v774_v29 = vshll.u32 %v297_v37, 16  ;;  %v780_v20 = vshll.u32 %v298_v31, 16 }
  0xa9   : > { %v1050_v48 = vmax.bf16 %v1018_v12, %v2487_v24  ;;  %v1374_v52 = vrot.slane %v1373_v40, 4  ;;  %v784_v42 = vshrl.u32 %v298_v31, 16  ;;  %v773_v33 = vrot.slane %v771_v47, 4  ;;  %v2543_v12 = vld [vmem:[%s1912_s6 + $0x6c] sm:$0xf] }
  0xaa   : > { %v1051_v56 = vmax.bf16 %v1019_v43, %v2493_v5  ;;  %v1369_v35 = vsel %vm1899_vm2, %v1364_v44, %v1368_v28  ;;  %v776_v45 = vrot.slane %v774_v29, 5  ;;  %v782_v50 = vrot.slane %v780_v20, 5 }
  0xab   : > { %v1082_v60 = vmax.bf16 %v1050_v48, %v2458_v46  ;;  %v1379_v25 = vsel %vm1899_vm2, %v1374_v52, %v1378_v39  ;;  %v786_v51 = vrot.slane %v784_v42, 4  ;;  %v790_v53 = vshll.u32 %v299_v49, 16 }
  0xac   : > { %v1083_v0 = vmax.bf16 %v1051_v56, %v2464_v1  ;;  %v777_v55 = vor.u32 %v776_v45, %v773_v33  ;;  %v930_v58 = vmax.bf16 %v898_v18, %v297_v37  ;;  %v931_v63 = vmax.bf16 %v899_v23, %v298_v31  ;;  %v301_v37 = vld [vmem:[%s1856_s24 + $0xac] sm:$0xf]  ;;  %v2540_v31 = vld [vmem:[%s1912_s6 + $0x68] sm:$0xf]  ;;  %v2555_v56 = vld [vmem:[%s1872_s28 + $0x9c] sm:$0xf] }
  0xad   : > { %v1530_v7 = vmax.bf16 %v1369_v35, %v1082_v60  ;;  %v787_v3 = vor.u32 %v786_v51, %v782_v50  ;;  %v1381_v46 = vshrl.u32 %v2502_v57, 16  ;;  %v792_v19 = vrot.slane %v790_v53, 5  ;;  %v384_v53 = vld [vmem:[%s1872_s28 + $0xa4] sm:$0x1] }
  0xae   : > { %v1531_v17 = vmax.bf16 %v1379_v25, %v1083_v0  ;;  %v778_v15 = vrot.slane %v777_v55, 4  ;;  %v1384_v61 = vshll.u32 %v2502_v57, 16  ;;  %v1390_v22 = vshll.u32 %v2509_v54, 16 }
  0xaf   : > { %v788_v1 = vrot.slane %v787_v3, 4  ;;  %v1383_v10 = vrot.slane %v1381_v46, 4  ;;  %v1394_v16 = vshrl.u32 %v2509_v54, 16  ;;  %v1400_v26 = vshll.u32 %v381_v11, 16 }
  0xb0   : > { %v1780_v2 = vcombine.low %v1530_v7, %v1531_v17  ;;  %v783_v9 = vsel %vm1899_vm2, %v778_v15, %v782_v50  ;;  %v1386_v62 = vrot.slane %v1384_v61, 5  ;;  %v1392_v30 = vrot.slane %v1390_v22, 5  ;;  %v2561_v50 = vld [vmem:[%s1872_s28 + $0xa0] sm:$0xf] }
  0xb1   : > { %v793_v8 = vsel %vm1899_vm2, %v788_v1, %v792_v19  ;;  %v2526_v59 = vmax.bf16 %v783_v9, %v449_v41  ;;  %v988_v28 = vmax.bf16 %v930_v58, %v783_v9  ;;  %v1396_v36 = vrot.slane %v1394_v16, 4  ;;  %v2572_v16 = vld [vmem:[%s1851_s21 + $0x78] sm:$0xf] }
  0xb2   : > { %1781 = vst [vmem:[%s1971_s9 + $0x58] sm:$0xff] %v1780_v2   ;;  %v2532_v14 = vmax.bf16 %v793_v8, %v450_v21  ;;  %v989_v18 = vmax.bf16 %v931_v63, %v793_v8  ;;  %v1387_v13 = vor.u32 %v1386_v62, %v1383_v10  ;;  %v1402_v6 = vrot.slane %v1400_v26, 5 }
  0xb3   : > { %v1020_v23 = vmax.bf16 %v988_v28, %v2487_v24  ;;  %v451_v38 = vmax.bf16 %v2519_v27, %v2529_v32  ;;  %v452_v39 = vmax.bf16 %v2522_v4, %v301_v37  ;;  %v1397_v21 = vor.u32 %v1396_v36, %v1392_v30  ;;  %v302_v24 = vld [vmem:[%s1856_s24 + $0xb0] sm:$0x1]  ;;  %v2579_v27 = vld [vmem:[%s1856_s24 + $0xb4] sm:$0xf]  ;;  %v2582_v4 = vld [vmem:[%s1851_s21 + $0x7c] sm:$0xf] }
  0xb4   : > { %v1021_v40 = vmax.bf16 %v989_v18, %v2493_v5  ;;  %v1388_v41 = vrot.slane %v1387_v13, 4  ;;  %v795_v43 = vshrl.u32 %v2529_v32, 16  ;;  %v798_v47 = vshll.u32 %v2529_v32, 16 }
  0xb5   : > { %v1052_v44 = vmax.bf16 %v1020_v23, %v2540_v31  ;;  %v804_v29 = vshll.u32 %v301_v37, 16  ;;  %v808_v48 = vshrl.u32 %v301_v37, 16  ;;  %v1398_v20 = vrot.slane %v1397_v21, 4  ;;  %v2592_v23 = vld [vmem:[%s1912_s6 + $0x74] sm:$0xf] }
  0xb6   : > { %v1053_v52 = vmax.bf16 %v1021_v40, %v2543_v12  ;;  %v1393_v49 = vsel %vm1899_vm2, %v1388_v41, %v1392_v30  ;;  %v797_v5 = vrot.slane %v795_v43, 4  ;;  %v800_v35 = vrot.slane %v798_v47, 5  ;;  %v305_v43 = vld [vmem:[%s1856_s24 + $0xbc] sm:$0x1] }
  0xb7   : > { %v1084_v42 = vmax.bf16 %v1052_v44, %v2502_v57  ;;  %v806_v33 = vrot.slane %v804_v29, 5  ;;  %v810_v45 = vrot.slane %v808_v48, 4  ;;  %v1403_v25 = vsel %vm1899_vm2, %v1398_v20, %v1402_v6  ;;  %v2603_v48 = vld [vmem:[%s1872_s28 + $0xa8] sm:$0xf] }
  0xb8   : > { %v1085_v60 = vmax.bf16 %v1053_v52, %v2509_v54  ;;  %v814_v51 = vshll.u32 %v302_v24, 16  ;;  %v932_v0 = vmax.bf16 %v2526_v59, %v2529_v32  ;;  %v801_v57 = vor.u32 %v800_v35, %v797_v5  ;;  %v304_v32 = vld [vmem:[%s1856_s24 + $0xb8] sm:$0xf] }
  0xb9   : > { %v1532_v55 = vmax.bf16 %v1393_v49, %v1084_v42  ;;  %v811_v58 = vor.u32 %v810_v45, %v806_v33  ;;  %v933_v7 = vmax.bf16 %v2532_v14, %v301_v37  ;;  %v1405_v54 = vshrl.u32 %v2555_v56, 16  ;;  %v2589_v37 = vld [vmem:[%s1912_s6 + $0x70] sm:$0xf] }
  0xba   : > { %v1533_v11 = vmax.bf16 %v1403_v25, %v1085_v60  ;;  %v816_v3 = vrot.slane %v814_v51, 5  ;;  %v1408_v63 = vshll.u32 %v2555_v56, 16  ;;  %v802_v46 = vrot.slane %v801_v57, 4  ;;  %v387_v25 = vld [vmem:[%s1872_s28 + $0xb0] sm:$0x1] }
  0xbb   : > { %v812_v17 = vrot.slane %v811_v58, 4  ;;  %v1414_v15 = vshll.u32 %v2561_v50, 16  ;;  %v1418_v19 = vshrl.u32 %v2561_v50, 16  ;;  %v1407_v1 = vrot.slane %v1405_v54, 4 }
  0xbc   : > { %v1782_v61 = vcombine.low %v1532_v55, %v1533_v11  ;;  %v1410_v10 = vrot.slane %v1408_v63, 5  ;;  %v1424_v22 = vshll.u32 %v384_v53, 16  ;;  %v807_v2 = vsel %vm1899_vm2, %v802_v46, %v806_v33  ;;  %v2612_v33 = vld [vmem:[%s1872_s28 + $0xac] sm:$0xf] }
  0xbd   : > { %v817_v9 = vsel %vm1899_vm2, %v812_v17, %v816_v3  ;;  %v1416_v62 = vrot.slane %v1414_v15, 5  ;;  %v1420_v26 = vrot.slane %v1418_v19, 4  ;;  %v902_v8 = vmax.bf16 %v807_v2, %v451_v38  ;;  %v2618_v3 = vld [vmem:[%s1856_s24 + $0xc0] sm:$0xf] }
  0xbe   : > { %1783 = vst [vmem:[%s1971_s9 + $0x60] sm:$0xff] %v1782_v61   ;;  %v903_v59 = vmax.bf16 %v817_v9, %v452_v39  ;;  %v990_v28 = vmax.bf16 %v932_v0, %v807_v2  ;;  %v991_v30 = vmax.bf16 %v933_v7, %v817_v9  ;;  %v1411_v14 = vor.u32 %v1410_v10, %v1407_v1 }
  0xbf   : > { %v1421_v18 = vor.u32 %v1420_v26, %v1416_v62  ;;  %v1426_v13 = vrot.slane %v1424_v22, 5  ;;  %v453_v36 = vmax.bf16 %v2572_v16, %v2579_v27  ;;  %v454_v39 = vmax.bf16 %v2582_v4, %v304_v32 }
  0xc0   : > { %v1022_v6 = vmax.bf16 %v990_v28, %v2540_v31  ;;  %v1023_v38 = vmax.bf16 %v991_v30, %v2543_v12  ;;  %v819_v40 = vshrl.u32 %v2579_v27, 16  ;;  %v1412_v41 = vrot.slane %v1411_v14, 4 }
  0xc1   : > { %v1422_v21 = vrot.slane %v1421_v18, 4  ;;  %v822_v44 = vshll.u32 %v2579_v27, 16  ;;  %v828_v24 = vshll.u32 %v304_v32, 16  ;;  %v832_v12 = vshrl.u32 %v304_v32, 16 }
  0xc2   : > { %v1054_v47 = vmax.bf16 %v1022_v6, %v2589_v37  ;;  %v1055_v29 = vmax.bf16 %v1023_v38, %v2592_v23  ;;  %v821_v31 = vrot.slane %v819_v40, 4  ;;  %v1417_v52 = vsel %vm1899_vm2, %v1412_v41, %v1416_v62  ;;  %v340_v6 = vld [vmem:[%s1912_s6 + $0x7c] sm:$0xf] }
  0xc3   : > { %v1427_v49 = vsel %vm1899_vm2, %v1422_v21, %v1426_v13  ;;  %v824_v20 = vrot.slane %v822_v44, 5  ;;  %v830_v5 = vrot.slane %v828_v24, 5  ;;  %v834_v45 = vrot.slane %v832_v12, 4  ;;  %v339_v13 = vld [vmem:[%s1912_s6 + $0x78] sm:$0xf] }
  0xc4   : > { %v1086_v42 = vmax.bf16 %v1054_v47, %v2555_v56  ;;  %v1087_v35 = vmax.bf16 %v1055_v29, %v2561_v50  ;;  %v838_v60 = vshll.u32 %v305_v43, 16  ;;  %v934_v0 = vmax.bf16 %v902_v8, %v2579_v27  ;;  %v388_v43 = vld [vmem:[%s1872_s28 + $0xb4] sm:$0xf]  ;;  %v389_v29 = vld [vmem:[%s1872_s28 + $0xb8] sm:$0xf] }
  0xc5   : > { %v825_v51 = vor.u32 %v824_v20, %v821_v31  ;;  %v935_v55 = vmax.bf16 %v903_v59, %v304_v32  ;;  %v1429_v53 = vshrl.u32 %v2603_v48, 16  ;;  %v835_v7 = vor.u32 %v834_v45, %v830_v5  ;;  %v307_v59 = vld [vmem:[%s1856_s24 + $0xc4] sm:$0xf]  ;;  %v308_v32 = vld [vmem:[%s1856_s24 + $0xc8] sm:$0x1] }
  0xc6   : > { %v1534_v57 = vmax.bf16 %v1417_v52, %v1086_v42  ;;  %v1535_v58 = vmax.bf16 %v1427_v49, %v1087_v35  ;;  %v840_v11 = vrot.slane %v838_v60, 5  ;;  %v1432_v54 = vshll.u32 %v2603_v48, 16  ;;  %v390_v42 = vld [vmem:[%s1872_s28 + $0xbc] sm:$0x1] }
  0xc7   : > { %v826_v56 = vrot.slane %v825_v51, 4  ;;  %v1431_v50 = vrot.slane %v1429_v53, 4  ;;  %v1438_v63 = vshll.u32 %v2612_v33, 16  ;;  %v836_v17 = vrot.slane %v835_v7, 4 }
  0xc8   : > { %v1784_v46 = vcombine.low %v1534_v57, %v1535_v58  ;;  %v1442_v15 = vshrl.u32 %v2612_v33, 16  ;;  %v1448_v19 = vshll.u32 %v387_v25, 16  ;;  %v1434_v1 = vrot.slane %v1432_v54, 5 }
  0xc9   : > { %v831_v61 = vsel %vm1899_vm2, %v826_v56, %v830_v5  ;;  %v1440_v10 = vrot.slane %v1438_v63, 5  ;;  %v939_v22 = vshrl.u32 %v2618_v3, 16  ;;  %v841_v16 = vsel %vm1899_vm2, %v836_v17, %v840_v11 }
  0xca   : > { %1785 = vst [vmem:[%s1971_s9 + $0x68] sm:$0xff] %v1784_v46   ;;  %v904_v2 = vmax.bf16 %v831_v61, %v453_v36  ;;  %v992_v9 = vmax.bf16 %v934_v0, %v831_v61  ;;  %v1444_v62 = vrot.slane %v1442_v15, 4  ;;  %v905_v26 = vmax.bf16 %v841_v16, %v454_v39  ;;  %v341_v15 = vld [vmem:[%s1912_s6 + $0x80] sm:$0xf] }
  0xcb   : > { %v993_v27 = vmax.bf16 %v935_v55, %v841_v16  ;;  %v1435_v4 = vor.u32 %v1434_v1, %v1431_v50  ;;  %v1450_v8 = vrot.slane %v1448_v19, 5  ;;  %v941_v18 = vrot.slane %v939_v22, 4  ;;  %v342_v1 = vld [vmem:[%s1912_s6 + $0x84] sm:$0xf] }
  0xcc   : > { %v1024_v28 = vmax.bf16 %v992_v9, %v2589_v37  ;;  %v1445_v30 = vor.u32 %v1444_v62, %v1440_v10  ;;  %v936_v14 = vmax.bf16 %v904_v2, %v2618_v3  ;;  %v937_v40 = vmax.bf16 %v905_v26, %v307_v59 }
  0xcd   : > { %v1025_v36 = vmax.bf16 %v993_v27, %v2592_v23  ;;  %v1436_v38 = vrot.slane %v1435_v4, 4  ;;  %v942_v39 = vshll.u32 %v2618_v3, 16  ;;  %v948_v44 = vshll.u32 %v307_v59, 16 }
  0xce   : > { %v1056_v41 = vmax.bf16 %v1024_v28, %v339_v13  ;;  %v1446_v21 = vrot.slane %v1445_v30, 4  ;;  %v952_v37 = vshrl.u32 %v307_v59, 16  ;;  %v958_v12 = vshll.u32 %v308_v32, 16 }
  0xcf   : > { %v1057_v24 = vmax.bf16 %v1025_v36, %v340_v6  ;;  %v1441_v47 = vsel %vm1899_vm2, %v1436_v38, %v1440_v10  ;;  %v944_v31 = vrot.slane %v942_v39, 5  ;;  %v950_v49 = vrot.slane %v948_v44, 5 }
  0xd0   : > { %v1088_v52 = vmax.bf16 %v1056_v41, %v2603_v48  ;;  %v1451_v23 = vsel %vm1899_vm2, %v1446_v21, %v1450_v8  ;;  %v954_v20 = vrot.slane %v952_v37, 4  ;;  %v960_v45 = vrot.slane %v958_v12, 5 }
  0xd1   : > { %v1089_v5 = vmax.bf16 %v1057_v24, %v2612_v33  ;;  %v945_v35 = vor.u32 %v944_v31, %v941_v18  ;;  %v1453_v60 = vshrl.u32 %v388_v43, 16  ;;  %v1456_v0 = vshll.u32 %v388_v43, 16 }
  0xd2   : > { %v1536_v25 = vmax.bf16 %v1441_v47, %v1088_v52  ;;  %v955_v51 = vor.u32 %v954_v20, %v950_v49  ;;  %v1462_v55 = vshll.u32 %v389_v29, 16  ;;  %v1466_v58 = vshrl.u32 %v389_v29, 16 }
  0xd3   : > { %v1537_v53 = vmax.bf16 %v1451_v23, %v1089_v5  ;;  %v946_v57 = vrot.slane %v945_v35, 4  ;;  %v1455_v48 = vrot.slane %v1453_v60, 4  ;;  %v1458_v11 = vrot.slane %v1456_v0, 5 }
  0xd4   : > { %v956_v7 = vrot.slane %v955_v51, 4  ;;  %v1464_v3 = vrot.slane %v1462_v55, 5  ;;  %v1472_v56 = vshll.u32 %v390_v42, 16  ;;  %v1468_v54 = vrot.slane %v1466_v58, 4 }
  0xd5   : > { %v1786_v33 = vcombine.low %v1536_v25, %v1537_v53  ;;  %v951_v50 = vsel %vm1899_vm2, %v946_v57, %v950_v49  ;;  %v1459_v17 = vor.u32 %v1458_v11, %v1455_v48 }
  0xd6   : > { %v961_v63 = vsel %vm1899_vm2, %v956_v7, %v960_v45  ;;  %v994_v46 = vmax.bf16 %v951_v50, %v936_v14  ;;  %v1469_v61 = vor.u32 %v1468_v54, %v1464_v3  ;;  %v1474_v16 = vrot.slane %v1472_v56, 5 }
  0xd7   : > { %1787 = vst [vmem:[%s1971_s9 + $0x70] sm:$0xff] %v1786_v33   ;;  %v995_v19 = vmax.bf16 %v961_v63, %v937_v40  ;;  %v1460_v22 = vrot.slane %v1459_v17, 4 }
  0xd8   : > { %v1026_v10 = vmax.bf16 %v994_v46, %v339_v13  ;;  %v1470_v9 = vrot.slane %v1469_v61, 4 }
  0xd9   : > { %v1027_v2 = vmax.bf16 %v995_v19, %v340_v6  ;;  %v1465_v27 = vsel %vm1899_vm2, %v1460_v22, %v1464_v3 }
  0xda   : > { %v1058_v62 = vmax.bf16 %v1026_v10, %v341_v15  ;;  %v1475_v8 = vsel %vm1899_vm2, %v1470_v9, %v1474_v16 }
  0xdb   : > { %v1059_v26 = vmax.bf16 %v1027_v2, %v342_v1 }
  0xdc   : > { %v1090_v4 = vmax.bf16 %v1058_v62, %v388_v43 }
  0xdd   : > { %v1091_v59 = vmax.bf16 %v1059_v26, %v389_v29 }
  0xde   : > { %v1538_v28 = vmax.bf16 %v1465_v27, %v1090_v4 }
  0xdf   : > { %v1539_v30 = vmax.bf16 %v1475_v8, %v1091_v59 }
  0xe1   : > { %v1788_v32 = vcombine.low %v1538_v28, %v1539_v30 }
  0xe3   : > { %1789 = vst [vmem:[%s1971_s9 + $0x78] sm:$0xff] %v1788_v32  }
  0xe4 PF: > { %s14_s15 = sadd.s32 1, %s1807_s15  }
  0xe5   : > { %p11_p4 = scmp.ge.s32.totalorder %s14_s15, 4  }
  0xe7   :  { %13 = sbr.rel (!%p11_p4) target bundleno = 1 (0x1), region = 75 }

// kernel: _lambda_.24
= control target key start
LH: loop header
LB: loop body
LE: loop exit
PB: predicated region body
PF: predicated region fallthrough
CT: control target
= control target key end

     0   :  { %v1769_v0 = vmov 0   ;;  %vm446_vm0 = vcmask 130048   ;;  %s2206_s1 = inlined_call_operand.vmem [shape: bf16[144,128], index: 1, kind: input, shape index: {}]   ;;  %s2207_s0 = inlined_call_operand.vmem [shape: bf16[512,144], index: 0, kind: input, shape index: {}]   ;;  %s2208_s2 = inlined_call_operand.vmem [shape: f32[1,128], index: 2, kind: input, shape index: {}]   ;;  %s2209_s3 = inlined_call_operand.vmem [shape: bf16[512,128], index: 3, kind: output, shape index: {}]  }
   0x1   :  { %543 = vmatprep.subr.bf16.mxu0 %v1769_v0  ;;  %1645 = vmatprep.subr.bf16.mxu1 %v1769_v0  ;;  %v1664_v1 = vld [vmem:[%s2206_s1] sm:$0xff]   ;;  %v1665_v2 = vld [vmem:[%s2206_s1 + $0x8] sm:$0xff]   ;;  %v1666_v3 = vld [vmem:[%s2206_s1 + $0x10] sm:$0xff]  }
   0x2   :  { %544 = vmatpush1.bf16.msra.mxu0 %v1664_v1  ;;  %1654 = vmatpush1.bf16.msra.mxu1 %v1664_v1  ;;  %v1667_v4 = vld [vmem:[%s2206_s1 + $0x18] sm:$0xff]   ;;  %v1675_v5 = vld [vmem:[%s2207_s0 + $0x4] ss:$8 sps:$4 sm:$0xff]   ;;  %v1670_v9 = vld [vmem:[%s2206_s1 + $0x30] sm:$0xff]  }
   0x3   :  { %545 = vmatprep.subr.bf16.mxu0 %v1769_v0  ;;  %1646 = vmatprep.subr.bf16.mxu1 %v1769_v0  ;;  %v1678_v6 = vld [vmem:[%s2207_s0 + $0x104] ss:$8 sps:$4 sm:$0xff]   ;;  %v1671_v10 = vld [vmem:[%s2206_s1 + $0x38] sm:$0xff]   ;;  %v1673_v12 = vld [vmem:[%s2207_s0] ss:$8 sps:$4 sm:$0xff]  }
   0x4   :  { %1294 = vmatprep.mubr.msk.bf16.mxu0 %vm446_vm0, %v1675_v5  ;;  %1310 = vmatprep.mubr.msk.bf16.mxu1 %vm446_vm0, %v1678_v6  ;;  %v1668_v7 = vld [vmem:[%s2206_s1 + $0x20] sm:$0xff]   ;;  %v1669_v8 = vld [vmem:[%s2206_s1 + $0x28] sm:$0xff]   ;;  %v1679_v14 = vld [vmem:[%s2207_s0 + $0x14] ss:$8 sps:$4 sm:$0xff]  }
   0x5   :  { %v1672_v11 = vld [vmem:[%s2206_s1 + $0x40] sm:$0xff]   ;;  %v1681_v15 = vld [vmem:[%s2207_s0 + $0x114] ss:$8 sps:$4 sm:$0xff]   ;;  %v1683_v16 = vld [vmem:[%s2207_s0 + $0x10] ss:$8 sps:$4 sm:$0xff]  }
   0x6   :  { %546 = vmatpush1.bf16.msra.mxu0 %v1665_v2  ;;  %1655 = vmatpush1.bf16.msra.mxu1 %v1665_v2  ;;  %v1676_v13 = vld [vmem:[%s2207_s0 + $0x100] ss:$8 sps:$4 sm:$0xff]   ;;  %v1684_v17 = vld [vmem:[%s2207_s0 + $0x110] ss:$8 sps:$4 sm:$0xff]   ;;  %v1685_v18 = vld [vmem:[%s2207_s0 + $0x24] ss:$8 sps:$4 sm:$0xff]  }
   0x7   :  { %547 = vmatprep.subr.bf16.mxu0 %v1769_v0  ;;  %1647 = vmatprep.subr.bf16.mxu1 %v1769_v0  ;;  %v1687_v19 = vld [vmem:[%s2207_s0 + $0x124] ss:$8 sps:$4 sm:$0xff]   ;;  %v1689_v20 = vld [vmem:[%s2207_s0 + $0x20] ss:$8 sps:$4 sm:$0xff]   ;;  %v1691_v22 = vld [vmem:[%s2207_s0 + $0x34] ss:$8 sps:$4 sm:$0xff]  }
   0x8   :  { %v1690_v21 = vld [vmem:[%s2207_s0 + $0x120] ss:$8 sps:$4 sm:$0xff]   ;;  %v1693_v23 = vld [vmem:[%s2207_s0 + $0x134] ss:$8 sps:$4 sm:$0xff]   ;;  %v1695_v24 = vld [vmem:[%s2207_s0 + $0x30] ss:$8 sps:$4 sm:$0xff]  }
   0x9   :  { %v1696_v25 = vld [vmem:[%s2207_s0 + $0x130] ss:$8 sps:$4 sm:$0xff]   ;;  %v1697_v26 = vld [vmem:[%s2207_s0 + $0x44] ss:$8 sps:$4 sm:$0xff]   ;;  %v1701_v28 = vld [vmem:[%s2207_s0 + $0x40] ss:$8 sps:$4 sm:$0xff]  }
   0xa   :  { %548 = vmatpush1.bf16.msra.mxu0 %v1666_v3  ;;  %1656 = vmatpush1.bf16.msra.mxu1 %v1666_v3  ;;  %v1699_v27 = vld [vmem:[%s2207_s0 + $0x144] ss:$8 sps:$4 sm:$0xff]   ;;  %v1702_v29 = vld [vmem:[%s2207_s0 + $0x140] ss:$8 sps:$4 sm:$0xff]   ;;  %v1703_v30 = vld [vmem:[%s2207_s0 + $0x54] ss:$8 sps:$4 sm:$0xff]  }
   0xb   :  { %549 = vmatprep.subr.bf16.mxu0 %v1769_v0  ;;  %1648 = vmatprep.subr.bf16.mxu1 %v1769_v0  ;;  %v1705_v31 = vld [vmem:[%s2207_s0 + $0x154] ss:$8 sps:$4 sm:$0xff]   ;;  %v1707_v32 = vld [vmem:[%s2207_s0 + $0x50] ss:$8 sps:$4 sm:$0xff]   ;;  %v1709_v34 = vld [vmem:[%s2207_s0 + $0x64] ss:$8 sps:$4 sm:$0xff]  }
   0xc   :  { %v1708_v33 = vld [vmem:[%s2207_s0 + $0x150] ss:$8 sps:$4 sm:$0xff]   ;;  %v1711_v35 = vld [vmem:[%s2207_s0 + $0x164] ss:$8 sps:$4 sm:$0xff]   ;;  %v1713_v36 = vld [vmem:[%s2207_s0 + $0x60] ss:$8 sps:$4 sm:$0xff]  }
   0xd   :  { %v1714_v37 = vld [vmem:[%s2207_s0 + $0x160] ss:$8 sps:$4 sm:$0xff]   ;;  %v1715_v38 = vld [vmem:[%s2207_s0 + $0x74] ss:$8 sps:$4 sm:$0xff]   ;;  %v1719_v40 = vld [vmem:[%s2207_s0 + $0x70] ss:$8 sps:$4 sm:$0xff]  }
   0xe   :  { %550 = vmatpush1.bf16.msra.mxu0 %v1667_v4  ;;  %1657 = vmatpush1.bf16.msra.mxu1 %v1667_v4  ;;  %v1717_v39 = vld [vmem:[%s2207_s0 + $0x174] ss:$8 sps:$4 sm:$0xff]   ;;  %v1720_v41 = vld [vmem:[%s2207_s0 + $0x170] ss:$8 sps:$4 sm:$0xff]   ;;  %v1721_v42 = vld [vmem:[%s2207_s0 + $0x84] ss:$8 sps:$4 sm:$0xff]  }
   0xf   :  { %551 = vmatprep.subr.bf16.mxu0 %v1769_v0  ;;  %1649 = vmatprep.subr.bf16.mxu1 %v1769_v0  ;;  %v1723_v43 = vld [vmem:[%s2207_s0 + $0x184] ss:$8 sps:$4 sm:$0xff]   ;;  %v1725_v44 = vld [vmem:[%s2207_s0 + $0x80] ss:$8 sps:$4 sm:$0xff]   ;;  %v1727_v46 = vld [vmem:[%s2207_s0 + $0x94] ss:$8 sps:$4 sm:$0xff]  }
  0x10   :  { %v1726_v45 = vld [vmem:[%s2207_s0 + $0x180] ss:$8 sps:$4 sm:$0xff]   ;;  %v1729_v47 = vld [vmem:[%s2207_s0 + $0x194] ss:$8 sps:$4 sm:$0xff]   ;;  %v1731_v48 = vld [vmem:[%s2207_s0 + $0x90] ss:$8 sps:$4 sm:$0xff]  }
  0x11   :  { %v1732_v49 = vld [vmem:[%s2207_s0 + $0x190] ss:$8 sps:$4 sm:$0xff]   ;;  %v1733_v50 = vld [vmem:[%s2207_s0 + $0xa4] ss:$8 sps:$4 sm:$0xff]   ;;  %v1737_v52 = vld [vmem:[%s2207_s0 + $0xa0] ss:$8 sps:$4 sm:$0xff]  }
  0x12   :  { %552 = vmatpush1.bf16.msra.mxu0 %v1668_v7  ;;  %1658 = vmatpush1.bf16.msra.mxu1 %v1668_v7  ;;  %v1735_v51 = vld [vmem:[%s2207_s0 + $0x1a4] ss:$8 sps:$4 sm:$0xff]   ;;  %v1738_v53 = vld [vmem:[%s2207_s0 + $0x1a0] ss:$8 sps:$4 sm:$0xff]   ;;  %v1739_v54 = vld [vmem:[%s2207_s0 + $0xb4] ss:$8 sps:$4 sm:$0xff]  }
  0x13   :  { %553 = vmatprep.subr.bf16.mxu0 %v1769_v0  ;;  %1650 = vmatprep.subr.bf16.mxu1 %v1769_v0  ;;  %v1741_v55 = vld [vmem:[%s2207_s0 + $0x1b4] ss:$8 sps:$4 sm:$0xff]   ;;  %v1743_v56 = vld [vmem:[%s2207_s0 + $0xb0] ss:$8 sps:$4 sm:$0xff]   ;;  %v1745_v58 = vld [vmem:[%s2207_s0 + $0xc4] ss:$8 sps:$4 sm:$0xff]  }
  0x14   :  { %v1744_v57 = vld [vmem:[%s2207_s0 + $0x1b0] ss:$8 sps:$4 sm:$0xff]   ;;  %v1747_v59 = vld [vmem:[%s2207_s0 + $0x1c4] ss:$8 sps:$4 sm:$0xff]   ;;  %v1749_v60 = vld [vmem:[%s2207_s0 + $0xc0] ss:$8 sps:$4 sm:$0xff]  }
  0x15   :  { %v1750_v61 = vld [vmem:[%s2207_s0 + $0x1c0] ss:$8 sps:$4 sm:$0xff]   ;;  %v1751_v62 = vld [vmem:[%s2207_s0 + $0xd4] ss:$8 sps:$4 sm:$0xff]   ;;  %v1756_v1 = vld [vmem:[%s2207_s0 + $0x1d0] ss:$8 sps:$4 sm:$0xff]  }
  0x16   :  { %554 = vmatpush1.bf16.msra.mxu0 %v1669_v8  ;;  %1659 = vmatpush1.bf16.msra.mxu1 %v1669_v8  ;;  %v1753_v63 = vld [vmem:[%s2207_s0 + $0x1d4] ss:$8 sps:$4 sm:$0xff]   ;;  %v1757_v2 = vld [vmem:[%s2207_s0 + $0xe4] ss:$8 sps:$4 sm:$0xff]   ;;  %v1761_v4 = vld [vmem:[%s2207_s0 + $0xe0] ss:$8 sps:$4 sm:$0xff]  }
  0x17   :  { %555 = vmatprep.subr.bf16.mxu0 %v1769_v0  ;;  %1651 = vmatprep.subr.bf16.mxu1 %v1769_v0  ;;  %v1759_v3 = vld [vmem:[%s2207_s0 + $0x1e4] ss:$8 sps:$4 sm:$0xff]   ;;  %v1762_v5 = vld [vmem:[%s2207_s0 + $0x1e0] ss:$8 sps:$4 sm:$0xff]   ;;  %v1763_v6 = vld [vmem:[%s2207_s0 + $0xf4] ss:$8 sps:$4 sm:$0xff]  }
  0x18   :  { %v1765_v7 = vld [vmem:[%s2207_s0 + $0x1f4] ss:$8 sps:$4 sm:$0xff]   ;;  %v1767_v8 = vld [vmem:[%s2207_s0 + $0xf0] ss:$8 sps:$4 sm:$0xff]  }
  0x1a   :  { %556 = vmatpush1.bf16.msra.mxu0 %v1670_v9  ;;  %1660 = vmatpush1.bf16.msra.mxu1 %v1670_v9  ;;  %v1768_v9 = vld [vmem:[%s2207_s0 + $0x1f0] ss:$8 sps:$4 sm:$0xff]  }
  0x1b   :  { %557 = vmatprep.subr.bf16.mxu0 %v1769_v0  ;;  %1652 = vmatprep.subr.bf16.mxu1 %v1769_v0 }
  0x1e   :  { %558 = vmatpush1.bf16.msra.mxu0 %v1671_v10  ;;  %1661 = vmatpush1.bf16.msra.mxu1 %v1671_v10  ;;  %v2044_v10 = vld [vmem:[%s2208_s2] ss:$0 sm:$0xff] }
  0x1f   :  { %559 = vmatprep.subr.bf16.mxu0 %v1769_v0  ;;  %1653 = vmatprep.subr.bf16.mxu1 %v1769_v0  ;;  %v1755_v0 = vld [vmem:[%s2207_s0 + $0xd0] ss:$8 sps:$4 sm:$0xff]  }
  0x22   :  { %560 = vmatpush1.bf16.msra.mxu0 %v1672_v11  ;;  %1662 = vmatpush1.bf16.msra.mxu1 %v1672_v11 }
  0x25   :  { %576 = vmatmul.mubr.bf16.vlgmr.msra.gmra.mrb[0].mxu0 %v1673_v12  ;;  %704 = vmatmul.mubr.bf16.vlgmr.msra.gmra.mrb[0].mxu1 %v1676_v13 }
  0x26   :  { %1295 = vmatprep.mubr.msk.bf16.mxu0 %vm446_vm0, %v1679_v14  ;;  %1311 = vmatprep.mubr.msk.bf16.mxu1 %vm446_vm0, %v1681_v15 }
  0x2d   :  { %584 = vmatmul.mubr.bf16.gmra.mrb[4].mxu0 %v1683_v16  ;;  %712 = vmatmul.mubr.bf16.gmra.mrb[4].mxu1 %v1684_v17 }
  0x2e   :  { %1296 = vmatprep.mubr.msk.bf16.mxu0 %vm446_vm0, %v1685_v18  ;;  %1312 = vmatprep.mubr.msk.bf16.mxu1 %vm446_vm0, %v1687_v19 }
  0x35   :  { %592 = vmatmul.mubr.bf16.gmra.mrb[8].mxu0 %v1689_v20  ;;  %720 = vmatmul.mubr.bf16.gmra.mrb[8].mxu1 %v1690_v21 }
  0x36   :  { %1297 = vmatprep.mubr.msk.bf16.mxu0 %vm446_vm0, %v1691_v22  ;;  %1313 = vmatprep.mubr.msk.bf16.mxu1 %vm446_vm0, %v1693_v23 }
  0x3d   :  { %600 = vmatmul.mubr.bf16.gmra.mrb[12].mxu0 %v1695_v24  ;;  %728 = vmatmul.mubr.bf16.gmra.mrb[12].mxu1 %v1696_v25 }
  0x3e   :  { %1298 = vmatprep.mubr.msk.bf16.mxu0 %vm446_vm0, %v1697_v26  ;;  %1314 = vmatprep.mubr.msk.bf16.mxu1 %vm446_vm0, %v1699_v27 }
  0x45   :  { %608 = vmatmul.mubr.bf16.gmra.mrb[16].mxu0 %v1701_v28  ;;  %736 = vmatmul.mubr.bf16.gmra.mrb[16].mxu1 %v1702_v29 }
  0x46   :  { %1299 = vmatprep.mubr.msk.bf16.mxu0 %vm446_vm0, %v1703_v30  ;;  %1315 = vmatprep.mubr.msk.bf16.mxu1 %vm446_vm0, %v1705_v31 }
  0x4d   :  { %616 = vmatmul.mubr.bf16.gmra.mrb[20].mxu0 %v1707_v32  ;;  %744 = vmatmul.mubr.bf16.gmra.mrb[20].mxu1 %v1708_v33 }
  0x4e   :  { %1300 = vmatprep.mubr.msk.bf16.mxu0 %vm446_vm0, %v1709_v34  ;;  %1316 = vmatprep.mubr.msk.bf16.mxu1 %vm446_vm0, %v1711_v35 }
  0x55   :  { %624 = vmatmul.mubr.bf16.gmra.mrb[24].mxu0 %v1713_v36  ;;  %752 = vmatmul.mubr.bf16.gmra.mrb[24].mxu1 %v1714_v37 }
  0x56   :  { %1301 = vmatprep.mubr.msk.bf16.mxu0 %vm446_vm0, %v1715_v38  ;;  %1317 = vmatprep.mubr.msk.bf16.mxu1 %vm446_vm0, %v1717_v39 }
  0x5d   :  { %632 = vmatmul.mubr.bf16.gmra.mrb[28].mxu0 %v1719_v40  ;;  %760 = vmatmul.mubr.bf16.gmra.mrb[28].mxu1 %v1720_v41 }
  0x5e   :  { %1302 = vmatprep.mubr.msk.bf16.mxu0 %vm446_vm0, %v1721_v42  ;;  %1318 = vmatprep.mubr.msk.bf16.mxu1 %vm446_vm0, %v1723_v43 }
  0x65   :  { %640 = vmatmul.mubr.bf16.gmra.mrb[32].mxu0 %v1725_v44  ;;  %768 = vmatmul.mubr.bf16.gmra.mrb[32].mxu1 %v1726_v45 }
  0x66   :  { %1303 = vmatprep.mubr.msk.bf16.mxu0 %vm446_vm0, %v1727_v46  ;;  %1319 = vmatprep.mubr.msk.bf16.mxu1 %vm446_vm0, %v1729_v47 }
  0x6d   :  { %648 = vmatmul.mubr.bf16.gmra.mrb[36].mxu0 %v1731_v48  ;;  %776 = vmatmul.mubr.bf16.gmra.mrb[36].mxu1 %v1732_v49 }
  0x6e   :  { %1304 = vmatprep.mubr.msk.bf16.mxu0 %vm446_vm0, %v1733_v50  ;;  %1320 = vmatprep.mubr.msk.bf16.mxu1 %vm446_vm0, %v1735_v51 }
  0x75   :  { %656 = vmatmul.mubr.bf16.gmra.mrb[40].mxu0 %v1737_v52  ;;  %784 = vmatmul.mubr.bf16.gmra.mrb[40].mxu1 %v1738_v53 }
  0x76   :  { %1305 = vmatprep.mubr.msk.bf16.mxu0 %vm446_vm0, %v1739_v54  ;;  %1321 = vmatprep.mubr.msk.bf16.mxu1 %vm446_vm0, %v1741_v55 }
  0x7d   :  { %664 = vmatmul.mubr.bf16.gmra.mrb[44].mxu0 %v1743_v56  ;;  %792 = vmatmul.mubr.bf16.gmra.mrb[44].mxu1 %v1744_v57 }
  0x7e   :  { %1306 = vmatprep.mubr.msk.bf16.mxu0 %vm446_vm0, %v1745_v58  ;;  %1322 = vmatprep.mubr.msk.bf16.mxu1 %vm446_vm0, %v1747_v59 }
  0x85   :  { %672 = vmatmul.mubr.bf16.gmra.mrb[48].mxu0 %v1749_v60  ;;  %800 = vmatmul.mubr.bf16.gmra.mrb[48].mxu1 %v1750_v61 }
  0x86   :  { %1307 = vmatprep.mubr.msk.bf16.mxu0 %vm446_vm0, %v1751_v62  ;;  %1323 = vmatprep.mubr.msk.bf16.mxu1 %vm446_vm0, %v1753_v63 }
  0x8d   :  { %680 = vmatmul.mubr.bf16.gmra.mrb[52].mxu0 %v1755_v0  ;;  %808 = vmatmul.mubr.bf16.gmra.mrb[52].mxu1 %v1756_v1 }
  0x8e   :  { %1308 = vmatprep.mubr.msk.bf16.mxu0 %vm446_vm0, %v1757_v2  ;;  %1324 = vmatprep.mubr.msk.bf16.mxu1 %vm446_vm0, %v1759_v3 }
  0x95   :  { %688 = vmatmul.mubr.bf16.gmra.mrb[56].mxu0 %v1761_v4  ;;  %816 = vmatmul.mubr.bf16.gmra.mrb[56].mxu1 %v1762_v5 }
  0x96   :  { %1309 = vmatprep.mubr.msk.bf16.mxu0 %vm446_vm0, %v1763_v6  ;;  %1325 = vmatprep.mubr.msk.bf16.mxu1 %vm446_vm0, %v1765_v7 }
  0x9d   :  { %696 = vmatmul.mubr.bf16.gmra.mrb[60].mxu0 %v1767_v8  ;;  %824 = vmatmul.mubr.bf16.gmra.mrb[60].mxu1 %v1768_v9 }
  0xf8   :  { %v577_v11 = vpop.f32.mrb[0].mxu0  ;;  %v705_v12 = vpop.f32.mrb[0].mxu1 }
  0xf9   :  { %v578_v13 = vadd.f32 %v2044_v10, %v577_v11  ;;  %v706_v14 = vadd.f32 %v2044_v10, %v705_v12  ;;  %v579_v15 = vpop.f32.mrb[1].mxu0  ;;  %v707_v16 = vpop.f32.mrb[1].mxu1 }
  0xfa   :  { %v580_v17 = vpop.f32.mrb[2].mxu0  ;;  %v708_v18 = vpop.f32.mrb[2].mxu1 }
  0xfb   :  { %v581_v19 = vadd.f32 %v2044_v10, %v580_v17  ;;  %v709_v20 = vadd.f32 %v2044_v10, %v708_v18  ;;  %v582_v21 = vpop.f32.mrb[3].mxu0  ;;  %v710_v22 = vpop.f32.mrb[3].mxu1  ;;  %v832_v23 = vmax.f32 %v578_v13, 0.0  ;;  %v864_v24 = vmax.f32 %v706_v14, 0.0 }
  0xfd   :  { %v833_v25 = vmax.f32 %v581_v19, 0.0  ;;  %v865_v26 = vmax.f32 %v709_v20, 0.0 }
  0xff   :  { %v1457_v27 = vpack.c.bf16 %v833_v25, %v832_v23  ;;  %v1537_v28 = vpack.c.bf16 %v865_v26, %v864_v24 }
 0x100   :  { %v585_v29 = vpop.f32.mrb[4].mxu0  ;;  %v713_v30 = vpop.f32.mrb[4].mxu1 }
 0x101   :  { %1458 = vst [vmem:[%s2209_s3] sm:$0xff] %v1457_v27   ;;  %1629 = vst [vmem:[%s2209_s3 + $0x80] sm:$0xff] %v1537_v28   ;;  %v586_v31 = vadd.f32 %v2044_v10, %v585_v29  ;;  %v714_v32 = vadd.f32 %v2044_v10, %v713_v30  ;;  %v587_v33 = vpop.f32.mrb[5].mxu0  ;;  %v715_v34 = vpop.f32.mrb[5].mxu1 }
 0x102   :  { %v588_v35 = vpop.f32.mrb[6].mxu0  ;;  %v716_v36 = vpop.f32.mrb[6].mxu1 }
 0x103   :  { %v589_v37 = vadd.f32 %v2044_v10, %v588_v35  ;;  %v717_v38 = vadd.f32 %v2044_v10, %v716_v36  ;;  %v590_v39 = vpop.f32.mrb[7].mxu0  ;;  %v718_v40 = vpop.f32.mrb[7].mxu1  ;;  %v834_v41 = vmax.f32 %v586_v31, 0.0  ;;  %v866_v42 = vmax.f32 %v714_v32, 0.0 }
 0x105   :  { %v835_v43 = vmax.f32 %v589_v37, 0.0  ;;  %v867_v44 = vmax.f32 %v717_v38, 0.0 }
 0x107   :  { %v1462_v45 = vpack.c.bf16 %v835_v43, %v834_v41  ;;  %v1542_v46 = vpack.c.bf16 %v867_v44, %v866_v42 }
 0x108   :  { %v593_v47 = vpop.f32.mrb[8].mxu0  ;;  %v721_v48 = vpop.f32.mrb[8].mxu1 }
 0x109   :  { %1614 = vst [vmem:[%s2209_s3 + $0x8] sm:$0xff] %v1462_v45   ;;  %1630 = vst [vmem:[%s2209_s3 + $0x88] sm:$0xff] %v1542_v46   ;;  %v594_v49 = vadd.f32 %v2044_v10, %v593_v47  ;;  %v722_v50 = vadd.f32 %v2044_v10, %v721_v48  ;;  %v595_v51 = vpop.f32.mrb[9].mxu0  ;;  %v723_v52 = vpop.f32.mrb[9].mxu1 }
 0x10a   :  { %v596_v53 = vpop.f32.mrb[10].mxu0  ;;  %v724_v54 = vpop.f32.mrb[10].mxu1 }
 0x10b   :  { %v597_v55 = vadd.f32 %v2044_v10, %v596_v53  ;;  %v725_v56 = vadd.f32 %v2044_v10, %v724_v54  ;;  %v598_v57 = vpop.f32.mrb[11].mxu0  ;;  %v726_v58 = vpop.f32.mrb[11].mxu1  ;;  %v836_v59 = vmax.f32 %v594_v49, 0.0  ;;  %v868_v60 = vmax.f32 %v722_v50, 0.0 }
 0x10d   :  { %v837_v61 = vmax.f32 %v597_v55, 0.0  ;;  %v869_v62 = vmax.f32 %v725_v56, 0.0 }
 0x10f   :  { %v1467_v63 = vpack.c.bf16 %v837_v61, %v836_v59  ;;  %v1547_v0 = vpack.c.bf16 %v869_v62, %v868_v60 }
 0x110   :  { %v601_v1 = vpop.f32.mrb[12].mxu0  ;;  %v729_v2 = vpop.f32.mrb[12].mxu1 }
 0x111   :  { %1615 = vst [vmem:[%s2209_s3 + $0x10] sm:$0xff] %v1467_v63   ;;  %1631 = vst [vmem:[%s2209_s3 + $0x90] sm:$0xff] %v1547_v0   ;;  %v602_v3 = vadd.f32 %v2044_v10, %v601_v1  ;;  %v730_v4 = vadd.f32 %v2044_v10, %v729_v2  ;;  %v603_v5 = vpop.f32.mrb[13].mxu0  ;;  %v731_v6 = vpop.f32.mrb[13].mxu1 }
 0x112   :  { %v604_v7 = vpop.f32.mrb[14].mxu0  ;;  %v732_v8 = vpop.f32.mrb[14].mxu1 }
 0x113   :  { %v605_v9 = vadd.f32 %v2044_v10, %v604_v7  ;;  %v733_v11 = vadd.f32 %v2044_v10, %v732_v8  ;;  %v606_v12 = vpop.f32.mrb[15].mxu0  ;;  %v734_v13 = vpop.f32.mrb[15].mxu1  ;;  %v838_v14 = vmax.f32 %v602_v3, 0.0  ;;  %v870_v15 = vmax.f32 %v730_v4, 0.0 }
 0x115   :  { %v839_v16 = vmax.f32 %v605_v9, 0.0  ;;  %v871_v17 = vmax.f32 %v733_v11, 0.0 }
 0x117   :  { %v1472_v18 = vpack.c.bf16 %v839_v16, %v838_v14  ;;  %v1552_v19 = vpack.c.bf16 %v871_v17, %v870_v15 }
 0x118   :  { %v609_v20 = vpop.f32.mrb[16].mxu0  ;;  %v737_v21 = vpop.f32.mrb[16].mxu1 }
 0x119   :  { %1616 = vst [vmem:[%s2209_s3 + $0x18] sm:$0xff] %v1472_v18   ;;  %1632 = vst [vmem:[%s2209_s3 + $0x98] sm:$0xff] %v1552_v19   ;;  %v610_v22 = vadd.f32 %v2044_v10, %v609_v20  ;;  %v738_v23 = vadd.f32 %v2044_v10, %v737_v21  ;;  %v611_v24 = vpop.f32.mrb[17].mxu0  ;;  %v739_v25 = vpop.f32.mrb[17].mxu1 }
 0x11a   :  { %v612_v26 = vpop.f32.mrb[18].mxu0  ;;  %v740_v27 = vpop.f32.mrb[18].mxu1 }
 0x11b   :  { %v613_v28 = vadd.f32 %v2044_v10, %v612_v26  ;;  %v741_v29 = vadd.f32 %v2044_v10, %v740_v27  ;;  %v614_v30 = vpop.f32.mrb[19].mxu0  ;;  %v742_v31 = vpop.f32.mrb[19].mxu1  ;;  %v840_v32 = vmax.f32 %v610_v22, 0.0  ;;  %v872_v33 = vmax.f32 %v738_v23, 0.0 }
 0x11d   :  { %v841_v34 = vmax.f32 %v613_v28, 0.0  ;;  %v873_v35 = vmax.f32 %v741_v29, 0.0 }
 0x11f   :  { %v1477_v36 = vpack.c.bf16 %v841_v34, %v840_v32  ;;  %v1557_v37 = vpack.c.bf16 %v873_v35, %v872_v33 }
 0x120   :  { %v617_v38 = vpop.f32.mrb[20].mxu0  ;;  %v745_v39 = vpop.f32.mrb[20].mxu1 }
 0x121   :  { %1617 = vst [vmem:[%s2209_s3 + $0x20] sm:$0xff] %v1477_v36   ;;  %1633 = vst [vmem:[%s2209_s3 + $0xa0] sm:$0xff] %v1557_v37   ;;  %v618_v40 = vadd.f32 %v2044_v10, %v617_v38  ;;  %v746_v41 = vadd.f32 %v2044_v10, %v745_v39  ;;  %v619_v42 = vpop.f32.mrb[21].mxu0  ;;  %v747_v43 = vpop.f32.mrb[21].mxu1 }
 0x122   :  { %v620_v44 = vpop.f32.mrb[22].mxu0  ;;  %v748_v45 = vpop.f32.mrb[22].mxu1 }
 0x123   :  { %v621_v46 = vadd.f32 %v2044_v10, %v620_v44  ;;  %v749_v47 = vadd.f32 %v2044_v10, %v748_v45  ;;  %v622_v48 = vpop.f32.mrb[23].mxu0  ;;  %v750_v49 = vpop.f32.mrb[23].mxu1  ;;  %v842_v50 = vmax.f32 %v618_v40, 0.0  ;;  %v874_v51 = vmax.f32 %v746_v41, 0.0 }
 0x125   :  { %v843_v52 = vmax.f32 %v621_v46, 0.0  ;;  %v875_v53 = vmax.f32 %v749_v47, 0.0 }
 0x127   :  { %v1482_v54 = vpack.c.bf16 %v843_v52, %v842_v50  ;;  %v1562_v55 = vpack.c.bf16 %v875_v53, %v874_v51 }
 0x128   :  { %v625_v56 = vpop.f32.mrb[24].mxu0  ;;  %v753_v57 = vpop.f32.mrb[24].mxu1 }
 0x129   :  { %1618 = vst [vmem:[%s2209_s3 + $0x28] sm:$0xff] %v1482_v54   ;;  %1634 = vst [vmem:[%s2209_s3 + $0xa8] sm:$0xff] %v1562_v55   ;;  %v626_v58 = vadd.f32 %v2044_v10, %v625_v56  ;;  %v754_v59 = vadd.f32 %v2044_v10, %v753_v57  ;;  %v627_v60 = vpop.f32.mrb[25].mxu0  ;;  %v755_v61 = vpop.f32.mrb[25].mxu1 }
 0x12a   :  { %v628_v62 = vpop.f32.mrb[26].mxu0  ;;  %v756_v63 = vpop.f32.mrb[26].mxu1 }
 0x12b   :  { %v629_v0 = vadd.f32 %v2044_v10, %v628_v62  ;;  %v757_v1 = vadd.f32 %v2044_v10, %v756_v63  ;;  %v630_v2 = vpop.f32.mrb[27].mxu0  ;;  %v758_v3 = vpop.f32.mrb[27].mxu1  ;;  %v844_v4 = vmax.f32 %v626_v58, 0.0  ;;  %v876_v5 = vmax.f32 %v754_v59, 0.0 }
 0x12d   :  { %v845_v6 = vmax.f32 %v629_v0, 0.0  ;;  %v877_v7 = vmax.f32 %v757_v1, 0.0 }
 0x12f   :  { %v1487_v8 = vpack.c.bf16 %v845_v6, %v844_v4  ;;  %v1567_v9 = vpack.c.bf16 %v877_v7, %v876_v5 }
 0x130   :  { %v633_v11 = vpop.f32.mrb[28].mxu0  ;;  %v761_v12 = vpop.f32.mrb[28].mxu1 }
 0x131   :  { %1619 = vst [vmem:[%s2209_s3 + $0x30] sm:$0xff] %v1487_v8   ;;  %1635 = vst [vmem:[%s2209_s3 + $0xb0] sm:$0xff] %v1567_v9   ;;  %v634_v13 = vadd.f32 %v2044_v10, %v633_v11  ;;  %v762_v14 = vadd.f32 %v2044_v10, %v761_v12  ;;  %v635_v15 = vpop.f32.mrb[29].mxu0  ;;  %v763_v16 = vpop.f32.mrb[29].mxu1 }
 0x132   :  { %v636_v17 = vpop.f32.mrb[30].mxu0  ;;  %v764_v18 = vpop.f32.mrb[30].mxu1 }
 0x133   :  { %v637_v19 = vadd.f32 %v2044_v10, %v636_v17  ;;  %v765_v20 = vadd.f32 %v2044_v10, %v764_v18  ;;  %v638_v21 = vpop.f32.mrb[31].mxu0  ;;  %v766_v22 = vpop.f32.mrb[31].mxu1  ;;  %v846_v23 = vmax.f32 %v634_v13, 0.0  ;;  %v878_v24 = vmax.f32 %v762_v14, 0.0 }
 0x135   :  { %v847_v25 = vmax.f32 %v637_v19, 0.0  ;;  %v879_v26 = vmax.f32 %v765_v20, 0.0 }
 0x137   :  { %v1492_v27 = vpack.c.bf16 %v847_v25, %v846_v23  ;;  %v1572_v28 = vpack.c.bf16 %v879_v26, %v878_v24 }
 0x138   :  { %v641_v29 = vpop.f32.mrb[32].mxu0  ;;  %v769_v30 = vpop.f32.mrb[32].mxu1 }
 0x139   :  { %1620 = vst [vmem:[%s2209_s3 + $0x38] sm:$0xff] %v1492_v27   ;;  %1636 = vst [vmem:[%s2209_s3 + $0xb8] sm:$0xff] %v1572_v28   ;;  %v642_v31 = vadd.f32 %v2044_v10, %v641_v29  ;;  %v770_v32 = vadd.f32 %v2044_v10, %v769_v30  ;;  %v643_v33 = vpop.f32.mrb[33].mxu0  ;;  %v771_v34 = vpop.f32.mrb[33].mxu1 }
 0x13a   :  { %v644_v35 = vpop.f32.mrb[34].mxu0  ;;  %v772_v36 = vpop.f32.mrb[34].mxu1 }
 0x13b   :  { %v645_v37 = vadd.f32 %v2044_v10, %v644_v35  ;;  %v773_v38 = vadd.f32 %v2044_v10, %v772_v36  ;;  %v646_v39 = vpop.f32.mrb[35].mxu0  ;;  %v774_v40 = vpop.f32.mrb[35].mxu1  ;;  %v848_v41 = vmax.f32 %v642_v31, 0.0  ;;  %v880_v42 = vmax.f32 %v770_v32, 0.0 }
 0x13d   :  { %v849_v43 = vmax.f32 %v645_v37, 0.0  ;;  %v881_v44 = vmax.f32 %v773_v38, 0.0 }
 0x13f   :  { %v1497_v45 = vpack.c.bf16 %v849_v43, %v848_v41  ;;  %v1577_v46 = vpack.c.bf16 %v881_v44, %v880_v42 }
 0x140   :  { %v649_v47 = vpop.f32.mrb[36].mxu0  ;;  %v777_v48 = vpop.f32.mrb[36].mxu1 }
 0x141   :  { %1621 = vst [vmem:[%s2209_s3 + $0x40] sm:$0xff] %v1497_v45   ;;  %1637 = vst [vmem:[%s2209_s3 + $0xc0] sm:$0xff] %v1577_v46   ;;  %v650_v49 = vadd.f32 %v2044_v10, %v649_v47  ;;  %v778_v50 = vadd.f32 %v2044_v10, %v777_v48  ;;  %v651_v51 = vpop.f32.mrb[37].mxu0  ;;  %v779_v52 = vpop.f32.mrb[37].mxu1 }
 0x142   :  { %v652_v53 = vpop.f32.mrb[38].mxu0  ;;  %v780_v54 = vpop.f32.mrb[38].mxu1 }
 0x143   :  { %v653_v55 = vadd.f32 %v2044_v10, %v652_v53  ;;  %v781_v56 = vadd.f32 %v2044_v10, %v780_v54  ;;  %v654_v57 = vpop.f32.mrb[39].mxu0  ;;  %v782_v58 = vpop.f32.mrb[39].mxu1  ;;  %v850_v59 = vmax.f32 %v650_v49, 0.0  ;;  %v882_v60 = vmax.f32 %v778_v50, 0.0 }
 0x145   :  { %v851_v61 = vmax.f32 %v653_v55, 0.0  ;;  %v883_v62 = vmax.f32 %v781_v56, 0.0 }
 0x147   :  { %v1502_v63 = vpack.c.bf16 %v851_v61, %v850_v59  ;;  %v1582_v0 = vpack.c.bf16 %v883_v62, %v882_v60 }
 0x148   :  { %v657_v1 = vpop.f32.mrb[40].mxu0  ;;  %v785_v2 = vpop.f32.mrb[40].mxu1 }
 0x149   :  { %1622 = vst [vmem:[%s2209_s3 + $0x48] sm:$0xff] %v1502_v63   ;;  %1638 = vst [vmem:[%s2209_s3 + $0xc8] sm:$0xff] %v1582_v0   ;;  %v658_v3 = vadd.f32 %v2044_v10, %v657_v1  ;;  %v786_v4 = vadd.f32 %v2044_v10, %v785_v2  ;;  %v659_v5 = vpop.f32.mrb[41].mxu0  ;;  %v787_v6 = vpop.f32.mrb[41].mxu1 }
 0x14a   :  { %v660_v7 = vpop.f32.mrb[42].mxu0  ;;  %v788_v8 = vpop.f32.mrb[42].mxu1 }
 0x14b   :  { %v661_v9 = vadd.f32 %v2044_v10, %v660_v7  ;;  %v789_v11 = vadd.f32 %v2044_v10, %v788_v8  ;;  %v662_v12 = vpop.f32.mrb[43].mxu0  ;;  %v790_v13 = vpop.f32.mrb[43].mxu1  ;;  %v852_v14 = vmax.f32 %v658_v3, 0.0  ;;  %v884_v15 = vmax.f32 %v786_v4, 0.0 }
 0x14d   :  { %v853_v16 = vmax.f32 %v661_v9, 0.0  ;;  %v885_v17 = vmax.f32 %v789_v11, 0.0 }
 0x14f   :  { %v1507_v18 = vpack.c.bf16 %v853_v16, %v852_v14  ;;  %v1587_v19 = vpack.c.bf16 %v885_v17, %v884_v15 }
 0x150   :  { %v665_v20 = vpop.f32.mrb[44].mxu0  ;;  %v793_v21 = vpop.f32.mrb[44].mxu1 }
 0x151   :  { %1623 = vst [vmem:[%s2209_s3 + $0x50] sm:$0xff] %v1507_v18   ;;  %1639 = vst [vmem:[%s2209_s3 + $0xd0] sm:$0xff] %v1587_v19   ;;  %v666_v22 = vadd.f32 %v2044_v10, %v665_v20  ;;  %v794_v23 = vadd.f32 %v2044_v10, %v793_v21  ;;  %v667_v24 = vpop.f32.mrb[45].mxu0  ;;  %v795_v25 = vpop.f32.mrb[45].mxu1 }
 0x152   :  { %v668_v26 = vpop.f32.mrb[46].mxu0  ;;  %v796_v27 = vpop.f32.mrb[46].mxu1 }
 0x153   :  { %v669_v28 = vadd.f32 %v2044_v10, %v668_v26  ;;  %v797_v29 = vadd.f32 %v2044_v10, %v796_v27  ;;  %v670_v30 = vpop.f32.mrb[47].mxu0  ;;  %v798_v31 = vpop.f32.mrb[47].mxu1  ;;  %v854_v32 = vmax.f32 %v666_v22, 0.0  ;;  %v886_v33 = vmax.f32 %v794_v23, 0.0 }
 0x155   :  { %v855_v34 = vmax.f32 %v669_v28, 0.0  ;;  %v887_v35 = vmax.f32 %v797_v29, 0.0 }
 0x157   :  { %v1512_v36 = vpack.c.bf16 %v855_v34, %v854_v32  ;;  %v1592_v37 = vpack.c.bf16 %v887_v35, %v886_v33 }
 0x158   :  { %v673_v38 = vpop.f32.mrb[48].mxu0  ;;  %v801_v39 = vpop.f32.mrb[48].mxu1 }
 0x159   :  { %1624 = vst [vmem:[%s2209_s3 + $0x58] sm:$0xff] %v1512_v36   ;;  %1640 = vst [vmem:[%s2209_s3 + $0xd8] sm:$0xff] %v1592_v37   ;;  %v674_v40 = vadd.f32 %v2044_v10, %v673_v38  ;;  %v802_v41 = vadd.f32 %v2044_v10, %v801_v39  ;;  %v675_v42 = vpop.f32.mrb[49].mxu0  ;;  %v803_v43 = vpop.f32.mrb[49].mxu1 }
 0x15a   :  { %v676_v44 = vpop.f32.mrb[50].mxu0  ;;  %v804_v45 = vpop.f32.mrb[50].mxu1 }
 0x15b   :  { %v677_v46 = vadd.f32 %v2044_v10, %v676_v44  ;;  %v805_v47 = vadd.f32 %v2044_v10, %v804_v45  ;;  %v678_v48 = vpop.f32.mrb[51].mxu0  ;;  %v806_v49 = vpop.f32.mrb[51].mxu1  ;;  %v856_v50 = vmax.f32 %v674_v40, 0.0  ;;  %v888_v51 = vmax.f32 %v802_v41, 0.0 }
 0x15d   :  { %v857_v52 = vmax.f32 %v677_v46, 0.0  ;;  %v889_v53 = vmax.f32 %v805_v47, 0.0 }
 0x15f   :  { %v1517_v54 = vpack.c.bf16 %v857_v52, %v856_v50  ;;  %v1597_v55 = vpack.c.bf16 %v889_v53, %v888_v51 }
 0x160   :  { %v681_v56 = vpop.f32.mrb[52].mxu0  ;;  %v809_v57 = vpop.f32.mrb[52].mxu1 }
 0x161   :  { %1625 = vst [vmem:[%s2209_s3 + $0x60] sm:$0xff] %v1517_v54   ;;  %1641 = vst [vmem:[%s2209_s3 + $0xe0] sm:$0xff] %v1597_v55   ;;  %v682_v58 = vadd.f32 %v2044_v10, %v681_v56  ;;  %v810_v59 = vadd.f32 %v2044_v10, %v809_v57  ;;  %v683_v60 = vpop.f32.mrb[53].mxu0  ;;  %v811_v61 = vpop.f32.mrb[53].mxu1 }
 0x162   :  { %v684_v62 = vpop.f32.mrb[54].mxu0  ;;  %v812_v63 = vpop.f32.mrb[54].mxu1 }
 0x163   :  { %v685_v0 = vadd.f32 %v2044_v10, %v684_v62  ;;  %v813_v1 = vadd.f32 %v2044_v10, %v812_v63  ;;  %v686_v2 = vpop.f32.mrb[55].mxu0  ;;  %v814_v3 = vpop.f32.mrb[55].mxu1  ;;  %v858_v4 = vmax.f32 %v682_v58, 0.0  ;;  %v890_v5 = vmax.f32 %v810_v59, 0.0 }
 0x165   :  { %v859_v6 = vmax.f32 %v685_v0, 0.0  ;;  %v891_v7 = vmax.f32 %v813_v1, 0.0 }
 0x167   :  { %v1522_v8 = vpack.c.bf16 %v859_v6, %v858_v4  ;;  %v1602_v9 = vpack.c.bf16 %v891_v7, %v890_v5 }
 0x168   :  { %v689_v11 = vpop.f32.mrb[56].mxu0  ;;  %v817_v12 = vpop.f32.mrb[56].mxu1 }
 0x169   :  { %1626 = vst [vmem:[%s2209_s3 + $0x68] sm:$0xff] %v1522_v8   ;;  %1642 = vst [vmem:[%s2209_s3 + $0xe8] sm:$0xff] %v1602_v9   ;;  %v690_v13 = vadd.f32 %v2044_v10, %v689_v11  ;;  %v818_v14 = vadd.f32 %v2044_v10, %v817_v12  ;;  %v691_v15 = vpop.f32.mrb[57].mxu0  ;;  %v819_v16 = vpop.f32.mrb[57].mxu1 }
 0x16a   :  { %v692_v17 = vpop.f32.mrb[58].mxu0  ;;  %v820_v18 = vpop.f32.mrb[58].mxu1 }
 0x16b   :  { %v693_v19 = vadd.f32 %v2044_v10, %v692_v17  ;;  %v821_v20 = vadd.f32 %v2044_v10, %v820_v18  ;;  %v694_v21 = vpop.f32.mrb[59].mxu0  ;;  %v822_v22 = vpop.f32.mrb[59].mxu1  ;;  %v860_v23 = vmax.f32 %v690_v13, 0.0  ;;  %v892_v24 = vmax.f32 %v818_v14, 0.0 }
 0x16d   :  { %v861_v25 = vmax.f32 %v693_v19, 0.0  ;;  %v893_v26 = vmax.f32 %v821_v20, 0.0 }
 0x16f   :  { %v1527_v27 = vpack.c.bf16 %v861_v25, %v860_v23  ;;  %v1607_v28 = vpack.c.bf16 %v893_v26, %v892_v24 }
 0x170   :  { %v697_v29 = vpop.f32.mrb[60].mxu0  ;;  %v825_v30 = vpop.f32.mrb[60].mxu1 }
 0x171   :  { %1627 = vst [vmem:[%s2209_s3 + $0x70] sm:$0xff] %v1527_v27   ;;  %1643 = vst [vmem:[%s2209_s3 + $0xf0] sm:$0xff] %v1607_v28   ;;  %v698_v31 = vadd.f32 %v2044_v10, %v697_v29  ;;  %v826_v32 = vadd.f32 %v2044_v10, %v825_v30  ;;  %v699_v33 = vpop.f32.mrb[61].mxu0  ;;  %v827_v34 = vpop.f32.mrb[61].mxu1 }
 0x172   :  { %v700_v35 = vpop.f32.mrb[62].mxu0  ;;  %v828_v36 = vpop.f32.mrb[62].mxu1 }
 0x173   :  { %v701_v37 = vadd.f32 %v2044_v10, %v700_v35  ;;  %v829_v38 = vadd.f32 %v2044_v10, %v828_v36  ;;  %v702_v39 = vpop.f32.mrb[63].mxu0  ;;  %v830_v40 = vpop.f32.mrb[63].mxu1  ;;  %v862_v41 = vmax.f32 %v698_v31, 0.0  ;;  %v894_v42 = vmax.f32 %v826_v32, 0.0 }
 0x175   :  { %v863_v43 = vmax.f32 %v701_v37, 0.0  ;;  %v895_v44 = vmax.f32 %v829_v38, 0.0 }
 0x177   :  { %v1532_v45 = vpack.c.bf16 %v863_v43, %v862_v41  ;;  %v1612_v46 = vpack.c.bf16 %v895_v44, %v894_v42 }
 0x179   :  { %1628 = vst [vmem:[%s2209_s3 + $0x78] sm:$0xff] %v1532_v45   ;;  %1644 = vst [vmem:[%s2209_s3 + $0xf8] sm:$0xff] %v1612_v46  }

// kernel: _lambda_.26
= control target key start
LH: loop header
LB: loop body
LE: loop exit
PB: predicated region body
PF: predicated region fallthrough
CT: control target
= control target key end

     0   :  { %vm282_vm0 = vcmask 588800   ;;  %vm379_vm1 = vcmask 1043456   ;;  %s1937_s1 = inlined_call_operand.vmem [shape: bf16[72,128], index: 1, kind: input, shape index: {}]   ;;  %s1938_s0 = inlined_call_operand.vmem [shape: bf16[512,72], index: 0, kind: input, shape index: {}]   ;;  %s1939_s2 = inlined_call_operand.vmem [shape: f32[1,128], index: 2, kind: input, shape index: {}]   ;;  %s1940_s3 = inlined_call_operand.vmem [shape: bf16[512,128], index: 3, kind: output, shape index: {}]  }
   0x1   :  { %v1572_v0 = vld [vmem:[%s1937_s1] sm:$0xff]   ;;  %v1573_v1 = vld [vmem:[%s1937_s1 + $0x8] sm:$0xff]   ;;  %v1574_v2 = vld [vmem:[%s1937_s1 + $0x10] sm:$0xff]  }
   0x2   :  { %1486 = vmatprep.subr.bf16.mxu0 %v1572_v0  ;;  %1560 = vmatprep.subr.bf16.mxu1 %v1572_v0  ;;  %v1577_v3 = vld [vmem:[%s1938_s0] sm:$0xff]   ;;  %v1575_v5 = vld [vmem:[%s1937_s1 + $0x18] sm:$0xff]   ;;  %v1579_v8 = vld [vmem:[%s1938_s0 + $0x8] sm:$0xff]  }
   0x3   :  { %1487 = vmatpush3.bf16.msra.mxu0 %v1572_v0  ;;  %1565 = vmatpush3.bf16.msra.mxu1 %v1572_v0  ;;  %v1578_v4 = vld [vmem:[%s1938_s0 + $0x80] sm:$0xff]   ;;  %v1580_v9 = vld [vmem:[%s1938_s0 + $0x88] sm:$0xff]   ;;  %v1581_v10 = vld [vmem:[%s1938_s0 + $0x10] sm:$0xff]  }
   0x4   :  { %1488 = vmatprep.subr.bf16.mxu0 %v1573_v1  ;;  %1561 = vmatprep.subr.bf16.mxu1 %v1573_v1  ;;  %v1576_v6 = vld [vmem:[%s1937_s1 + $0x20] ss:$0 sps:$4 sm:$0xff]   ;;  %v1582_v11 = vld [vmem:[%s1938_s0 + $0x90] sm:$0xff]   ;;  %v1583_v12 = vld [vmem:[%s1938_s0 + $0x18] sm:$0xff]  }
   0x5   :  { %1496 = vmatprep.mubr.msk.bf16.mxu0 %vm282_vm0, %v1577_v3  ;;  %1528 = vmatprep.mubr.msk.bf16.mxu1 %vm282_vm0, %v1578_v4  ;;  %v381_v7 = vsel %vm379_vm1, %v1576_v6, 0  ;;  %v1584_v13 = vld [vmem:[%s1938_s0 + $0x98] sm:$0xff]   ;;  %v1585_v14 = vld [vmem:[%s1938_s0 + $0x20] sm:$0xff]   ;;  %v1587_v16 = vld [vmem:[%s1938_s0 + $0x28] sm:$0xff]  }
   0x6   :  { %v1586_v15 = vld [vmem:[%s1938_s0 + $0xa0] sm:$0xff]   ;;  %v1588_v17 = vld [vmem:[%s1938_s0 + $0xa8] sm:$0xff]   ;;  %v1589_v18 = vld [vmem:[%s1938_s0 + $0x30] sm:$0xff]  }
   0x7   :  { %1489 = vmatpush3.bf16.msra.mxu0 %v1573_v1  ;;  %1566 = vmatpush3.bf16.msra.mxu1 %v1573_v1  ;;  %v1590_v19 = vld [vmem:[%s1938_s0 + $0xb0] sm:$0xff]   ;;  %v1591_v20 = vld [vmem:[%s1938_s0 + $0x38] sm:$0xff]   ;;  %v1593_v22 = vld [vmem:[%s1938_s0 + $0x40] sm:$0xff]  }
   0x8   :  { %1490 = vmatprep.subr.bf16.mxu0 %v1574_v2  ;;  %1562 = vmatprep.subr.bf16.mxu1 %v1574_v2  ;;  %v1592_v21 = vld [vmem:[%s1938_s0 + $0xb8] sm:$0xff]   ;;  %v1594_v23 = vld [vmem:[%s1938_s0 + $0xc0] sm:$0xff]   ;;  %v1595_v24 = vld [vmem:[%s1938_s0 + $0x48] sm:$0xff]  }
   0x9   :  { %v1596_v25 = vld [vmem:[%s1938_s0 + $0xc8] sm:$0xff]   ;;  %v1597_v26 = vld [vmem:[%s1938_s0 + $0x50] sm:$0xff]   ;;  %v1599_v28 = vld [vmem:[%s1938_s0 + $0x58] sm:$0xff]  }
   0xa   :  { %v1598_v27 = vld [vmem:[%s1938_s0 + $0xd0] sm:$0xff]   ;;  %v1600_v29 = vld [vmem:[%s1938_s0 + $0xd8] sm:$0xff]   ;;  %v1601_v30 = vld [vmem:[%s1938_s0 + $0x60] sm:$0xff]  }
   0xb   :  { %1491 = vmatpush3.bf16.msra.mxu0 %v1574_v2  ;;  %1567 = vmatpush3.bf16.msra.mxu1 %v1574_v2  ;;  %v1602_v31 = vld [vmem:[%s1938_s0 + $0xe0] sm:$0xff]   ;;  %v1603_v32 = vld [vmem:[%s1938_s0 + $0x68] sm:$0xff]   ;;  %v1605_v34 = vld [vmem:[%s1938_s0 + $0x70] sm:$0xff]  }
   0xc   :  { %1492 = vmatprep.subr.bf16.mxu0 %v1575_v5  ;;  %1563 = vmatprep.subr.bf16.mxu1 %v1575_v5  ;;  %v1604_v33 = vld [vmem:[%s1938_s0 + $0xe8] sm:$0xff]   ;;  %v1606_v35 = vld [vmem:[%s1938_s0 + $0xf0] sm:$0xff]   ;;  %v1607_v36 = vld [vmem:[%s1938_s0 + $0x78] sm:$0xff]  }
   0xd   :  { %v1608_v37 = vld [vmem:[%s1938_s0 + $0xf8] sm:$0xff]   ;;  %v1775_v38 = vld [vmem:[%s1939_s2] ss:$0 sm:$0xff] }
   0xf   :  { %1493 = vmatpush3.bf16.msra.mxu0 %v1575_v5  ;;  %1568 = vmatpush3.bf16.msra.mxu1 %v1575_v5 }
  0x10   :  { %1570 = vmatprep.subr.msk.bf16.mxu0 %vm379_vm1, %v1576_v6  ;;  %1571 = vmatprep.subr.msk.bf16.mxu1 %vm379_vm1, %v1576_v6 }
  0x13   :  { %1495 = vmatpush3.bf16.msra.mxu0 %v381_v7  ;;  %1569 = vmatpush3.bf16.msra.mxu1 %v381_v7 }
  0x16   :  { %1497 = vmatmul.mubr.msk.bf16.vlgmr.msra.gmra.mrb[0].mxu0 %vm282_vm0, %v1579_v8  ;;  %1529 = vmatmul.mubr.msk.bf16.vlgmr.msra.gmra.mrb[0].mxu1 %vm282_vm0, %v1580_v9 }
  0x17   :  { %1500 = vmatprep.mubr.msk.bf16.mxu0 %vm282_vm0, %v1581_v10  ;;  %1532 = vmatprep.mubr.msk.bf16.mxu1 %vm282_vm0, %v1582_v11 }
  0x1e   :  { %1501 = vmatmul.mubr.msk.bf16.gmra.mrb[4].mxu0 %vm282_vm0, %v1583_v12  ;;  %1533 = vmatmul.mubr.msk.bf16.gmra.mrb[4].mxu1 %vm282_vm0, %v1584_v13 }
  0x1f   :  { %1504 = vmatprep.mubr.msk.bf16.mxu0 %vm282_vm0, %v1585_v14  ;;  %1536 = vmatprep.mubr.msk.bf16.mxu1 %vm282_vm0, %v1586_v15 }
  0x26   :  { %1505 = vmatmul.mubr.msk.bf16.gmra.mrb[8].mxu0 %vm282_vm0, %v1587_v16  ;;  %1537 = vmatmul.mubr.msk.bf16.gmra.mrb[8].mxu1 %vm282_vm0, %v1588_v17 }
  0x27   :  { %1508 = vmatprep.mubr.msk.bf16.mxu0 %vm282_vm0, %v1589_v18  ;;  %1540 = vmatprep.mubr.msk.bf16.mxu1 %vm282_vm0, %v1590_v19 }
  0x2e   :  { %1509 = vmatmul.mubr.msk.bf16.gmra.mrb[12].mxu0 %vm282_vm0, %v1591_v20  ;;  %1541 = vmatmul.mubr.msk.bf16.gmra.mrb[12].mxu1 %vm282_vm0, %v1592_v21 }
  0x2f   :  { %1512 = vmatprep.mubr.msk.bf16.mxu0 %vm282_vm0, %v1593_v22  ;;  %1544 = vmatprep.mubr.msk.bf16.mxu1 %vm282_vm0, %v1594_v23 }
  0x36   :  { %1513 = vmatmul.mubr.msk.bf16.gmra.mrb[16].mxu0 %vm282_vm0, %v1595_v24  ;;  %1545 = vmatmul.mubr.msk.bf16.gmra.mrb[16].mxu1 %vm282_vm0, %v1596_v25 }
  0x37   :  { %1516 = vmatprep.mubr.msk.bf16.mxu0 %vm282_vm0, %v1597_v26  ;;  %1548 = vmatprep.mubr.msk.bf16.mxu1 %vm282_vm0, %v1598_v27 }
  0x3e   :  { %1517 = vmatmul.mubr.msk.bf16.gmra.mrb[20].mxu0 %vm282_vm0, %v1599_v28  ;;  %1549 = vmatmul.mubr.msk.bf16.gmra.mrb[20].mxu1 %vm282_vm0, %v1600_v29 }
  0x3f   :  { %1520 = vmatprep.mubr.msk.bf16.mxu0 %vm282_vm0, %v1601_v30  ;;  %1552 = vmatprep.mubr.msk.bf16.mxu1 %vm282_vm0, %v1602_v31 }
  0x46   :  { %1521 = vmatmul.mubr.msk.bf16.gmra.mrb[24].mxu0 %vm282_vm0, %v1603_v32  ;;  %1553 = vmatmul.mubr.msk.bf16.gmra.mrb[24].mxu1 %vm282_vm0, %v1604_v33 }
  0x47   :  { %1524 = vmatprep.mubr.msk.bf16.mxu0 %vm282_vm0, %v1605_v34  ;;  %1556 = vmatprep.mubr.msk.bf16.mxu1 %vm282_vm0, %v1606_v35 }
  0x4e   :  { %1525 = vmatmul.mubr.msk.bf16.gmra.mrb[28].mxu0 %vm282_vm0, %v1607_v36  ;;  %1557 = vmatmul.mubr.msk.bf16.gmra.mrb[28].mxu1 %vm282_vm0, %v1608_v37 }
  0xe9   :  { %v1498_v39 = vpop.f32.mrb[0].mxu0  ;;  %v1530_v40 = vpop.f32.mrb[0].mxu1 }
  0xea   :  { %v426_v41 = vadd.f32 %v1498_v39, %v1775_v38  ;;  %v554_v42 = vadd.f32 %v1530_v40, %v1775_v38  ;;  %v417_v43 = vpop.f32.mrb[1].mxu0  ;;  %v545_v44 = vpop.f32.mrb[1].mxu1 }
  0xeb   :  { %v418_v45 = vadd.f32 %v1775_v38, %v417_v43  ;;  %v546_v46 = vadd.f32 %v1775_v38, %v545_v44  ;;  %v1499_v47 = vpop.f32.mrb[2].mxu0  ;;  %v1531_v48 = vpop.f32.mrb[2].mxu1 }
  0xec   :  { %v429_v49 = vadd.f32 %v1499_v47, %v1775_v38  ;;  %v557_v50 = vadd.f32 %v1531_v48, %v1775_v38  ;;  %v420_v51 = vpop.f32.mrb[3].mxu0  ;;  %v548_v52 = vpop.f32.mrb[3].mxu1  ;;  %v674_v55 = vmax.f32 %v426_v41, 0.0  ;;  %v706_v56 = vmax.f32 %v554_v42, 0.0 }
  0xed   :  { %v421_v53 = vadd.f32 %v1775_v38, %v420_v51  ;;  %v549_v54 = vadd.f32 %v1775_v38, %v548_v52  ;;  %v672_v59 = vmax.f32 %v418_v45, 0.0  ;;  %v704_v60 = vmax.f32 %v546_v46, 0.0 }
  0xee   :  { %v675_v57 = vmax.f32 %v429_v49, 0.0  ;;  %v707_v58 = vmax.f32 %v557_v50, 0.0 }
  0xef   :  { %v673_v61 = vmax.f32 %v421_v53, 0.0  ;;  %v705_v62 = vmax.f32 %v549_v54, 0.0 }
  0xf0   :  { %v1266_v63 = vpack.c.bf16 %v675_v57, %v674_v55  ;;  %v1346_v0 = vpack.c.bf16 %v707_v58, %v706_v56 }
  0xf1   :  { %v1261_v1 = vpack.c.bf16 %v673_v61, %v672_v59  ;;  %v1341_v2 = vpack.c.bf16 %v705_v62, %v704_v60  ;;  %v1502_v3 = vpop.f32.mrb[4].mxu0  ;;  %v1534_v4 = vpop.f32.mrb[4].mxu1 }
  0xf2   :  { %1418 = vst [vmem:[%s1940_s3 + $0x8] sm:$0xff] %v1266_v63   ;;  %1434 = vst [vmem:[%s1940_s3 + $0x88] sm:$0xff] %v1346_v0   ;;  %v442_v5 = vadd.f32 %v1502_v3, %v1775_v38  ;;  %v570_v6 = vadd.f32 %v1534_v4, %v1775_v38  ;;  %v433_v7 = vpop.f32.mrb[5].mxu0  ;;  %v561_v8 = vpop.f32.mrb[5].mxu1 }
  0xf3   :  { %1262 = vst [vmem:[%s1940_s3] sm:$0xff] %v1261_v1   ;;  %1433 = vst [vmem:[%s1940_s3 + $0x80] sm:$0xff] %v1341_v2   ;;  %v434_v9 = vadd.f32 %v1775_v38, %v433_v7  ;;  %v562_v10 = vadd.f32 %v1775_v38, %v561_v8  ;;  %v1503_v11 = vpop.f32.mrb[6].mxu0  ;;  %v1535_v12 = vpop.f32.mrb[6].mxu1 }
  0xf4   :  { %v445_v13 = vadd.f32 %v1503_v11, %v1775_v38  ;;  %v573_v14 = vadd.f32 %v1535_v12, %v1775_v38  ;;  %v436_v15 = vpop.f32.mrb[7].mxu0  ;;  %v564_v16 = vpop.f32.mrb[7].mxu1  ;;  %v678_v19 = vmax.f32 %v442_v5, 0.0  ;;  %v710_v20 = vmax.f32 %v570_v6, 0.0 }
  0xf5   :  { %v437_v17 = vadd.f32 %v1775_v38, %v436_v15  ;;  %v565_v18 = vadd.f32 %v1775_v38, %v564_v16  ;;  %v676_v23 = vmax.f32 %v434_v9, 0.0  ;;  %v708_v24 = vmax.f32 %v562_v10, 0.0 }
  0xf6   :  { %v679_v21 = vmax.f32 %v445_v13, 0.0  ;;  %v711_v22 = vmax.f32 %v573_v14, 0.0 }
  0xf7   :  { %v677_v25 = vmax.f32 %v437_v17, 0.0  ;;  %v709_v26 = vmax.f32 %v565_v18, 0.0 }
  0xf8   :  { %v1276_v27 = vpack.c.bf16 %v679_v21, %v678_v19  ;;  %v1356_v28 = vpack.c.bf16 %v711_v22, %v710_v20 }
  0xf9   :  { %v1271_v29 = vpack.c.bf16 %v677_v25, %v676_v23  ;;  %v1351_v30 = vpack.c.bf16 %v709_v26, %v708_v24  ;;  %v1506_v31 = vpop.f32.mrb[8].mxu0  ;;  %v1538_v32 = vpop.f32.mrb[8].mxu1 }
  0xfa   :  { %1420 = vst [vmem:[%s1940_s3 + $0x18] sm:$0xff] %v1276_v27   ;;  %1436 = vst [vmem:[%s1940_s3 + $0x98] sm:$0xff] %v1356_v28   ;;  %v458_v33 = vadd.f32 %v1506_v31, %v1775_v38  ;;  %v586_v34 = vadd.f32 %v1538_v32, %v1775_v38  ;;  %v449_v35 = vpop.f32.mrb[9].mxu0  ;;  %v577_v36 = vpop.f32.mrb[9].mxu1 }
  0xfb   :  { %1419 = vst [vmem:[%s1940_s3 + $0x10] sm:$0xff] %v1271_v29   ;;  %1435 = vst [vmem:[%s1940_s3 + $0x90] sm:$0xff] %v1351_v30   ;;  %v450_v37 = vadd.f32 %v1775_v38, %v449_v35  ;;  %v578_v39 = vadd.f32 %v1775_v38, %v577_v36  ;;  %v1507_v40 = vpop.f32.mrb[10].mxu0  ;;  %v1539_v41 = vpop.f32.mrb[10].mxu1 }
  0xfc   :  { %v461_v42 = vadd.f32 %v1507_v40, %v1775_v38  ;;  %v589_v43 = vadd.f32 %v1539_v41, %v1775_v38  ;;  %v452_v44 = vpop.f32.mrb[11].mxu0  ;;  %v580_v45 = vpop.f32.mrb[11].mxu1  ;;  %v682_v48 = vmax.f32 %v458_v33, 0.0  ;;  %v714_v49 = vmax.f32 %v586_v34, 0.0 }
  0xfd   :  { %v453_v46 = vadd.f32 %v1775_v38, %v452_v44  ;;  %v581_v47 = vadd.f32 %v1775_v38, %v580_v45  ;;  %v680_v52 = vmax.f32 %v450_v37, 0.0  ;;  %v712_v53 = vmax.f32 %v578_v39, 0.0 }
  0xfe   :  { %v683_v50 = vmax.f32 %v461_v42, 0.0  ;;  %v715_v51 = vmax.f32 %v589_v43, 0.0 }
  0xff   :  { %v681_v54 = vmax.f32 %v453_v46, 0.0  ;;  %v713_v55 = vmax.f32 %v581_v47, 0.0 }
 0x100   :  { %v1286_v56 = vpack.c.bf16 %v683_v50, %v682_v48  ;;  %v1366_v57 = vpack.c.bf16 %v715_v51, %v714_v49 }
 0x101   :  { %v1281_v58 = vpack.c.bf16 %v681_v54, %v680_v52  ;;  %v1361_v59 = vpack.c.bf16 %v713_v55, %v712_v53  ;;  %v1510_v60 = vpop.f32.mrb[12].mxu0  ;;  %v1542_v61 = vpop.f32.mrb[12].mxu1 }
 0x102   :  { %1422 = vst [vmem:[%s1940_s3 + $0x28] sm:$0xff] %v1286_v56   ;;  %1438 = vst [vmem:[%s1940_s3 + $0xa8] sm:$0xff] %v1366_v57   ;;  %v474_v62 = vadd.f32 %v1510_v60, %v1775_v38  ;;  %v602_v63 = vadd.f32 %v1542_v61, %v1775_v38  ;;  %v465_v0 = vpop.f32.mrb[13].mxu0  ;;  %v593_v1 = vpop.f32.mrb[13].mxu1 }
 0x103   :  { %1421 = vst [vmem:[%s1940_s3 + $0x20] sm:$0xff] %v1281_v58   ;;  %1437 = vst [vmem:[%s1940_s3 + $0xa0] sm:$0xff] %v1361_v59   ;;  %v466_v2 = vadd.f32 %v1775_v38, %v465_v0  ;;  %v594_v3 = vadd.f32 %v1775_v38, %v593_v1  ;;  %v1511_v4 = vpop.f32.mrb[14].mxu0  ;;  %v1543_v5 = vpop.f32.mrb[14].mxu1 }
 0x104   :  { %v477_v6 = vadd.f32 %v1511_v4, %v1775_v38  ;;  %v605_v7 = vadd.f32 %v1543_v5, %v1775_v38  ;;  %v468_v8 = vpop.f32.mrb[15].mxu0  ;;  %v596_v9 = vpop.f32.mrb[15].mxu1  ;;  %v686_v12 = vmax.f32 %v474_v62, 0.0  ;;  %v718_v13 = vmax.f32 %v602_v63, 0.0 }
 0x105   :  { %v469_v10 = vadd.f32 %v1775_v38, %v468_v8  ;;  %v597_v11 = vadd.f32 %v1775_v38, %v596_v9  ;;  %v684_v16 = vmax.f32 %v466_v2, 0.0  ;;  %v716_v17 = vmax.f32 %v594_v3, 0.0 }
 0x106   :  { %v687_v14 = vmax.f32 %v477_v6, 0.0  ;;  %v719_v15 = vmax.f32 %v605_v7, 0.0 }
 0x107   :  { %v685_v18 = vmax.f32 %v469_v10, 0.0  ;;  %v717_v19 = vmax.f32 %v597_v11, 0.0 }
 0x108   :  { %v1296_v20 = vpack.c.bf16 %v687_v14, %v686_v12  ;;  %v1376_v21 = vpack.c.bf16 %v719_v15, %v718_v13 }
 0x109   :  { %v1291_v22 = vpack.c.bf16 %v685_v18, %v684_v16  ;;  %v1371_v23 = vpack.c.bf16 %v717_v19, %v716_v17  ;;  %v1514_v24 = vpop.f32.mrb[16].mxu0  ;;  %v1546_v25 = vpop.f32.mrb[16].mxu1 }
 0x10a   :  { %1424 = vst [vmem:[%s1940_s3 + $0x38] sm:$0xff] %v1296_v20   ;;  %1440 = vst [vmem:[%s1940_s3 + $0xb8] sm:$0xff] %v1376_v21   ;;  %v490_v26 = vadd.f32 %v1514_v24, %v1775_v38  ;;  %v618_v27 = vadd.f32 %v1546_v25, %v1775_v38  ;;  %v481_v28 = vpop.f32.mrb[17].mxu0  ;;  %v609_v29 = vpop.f32.mrb[17].mxu1 }
 0x10b   :  { %1423 = vst [vmem:[%s1940_s3 + $0x30] sm:$0xff] %v1291_v22   ;;  %1439 = vst [vmem:[%s1940_s3 + $0xb0] sm:$0xff] %v1371_v23   ;;  %v482_v30 = vadd.f32 %v1775_v38, %v481_v28  ;;  %v610_v31 = vadd.f32 %v1775_v38, %v609_v29  ;;  %v1515_v32 = vpop.f32.mrb[18].mxu0  ;;  %v1547_v33 = vpop.f32.mrb[18].mxu1 }
 0x10c   :  { %v493_v34 = vadd.f32 %v1515_v32, %v1775_v38  ;;  %v621_v35 = vadd.f32 %v1547_v33, %v1775_v38  ;;  %v484_v36 = vpop.f32.mrb[19].mxu0  ;;  %v612_v37 = vpop.f32.mrb[19].mxu1  ;;  %v690_v41 = vmax.f32 %v490_v26, 0.0  ;;  %v722_v42 = vmax.f32 %v618_v27, 0.0 }
 0x10d   :  { %v485_v39 = vadd.f32 %v1775_v38, %v484_v36  ;;  %v613_v40 = vadd.f32 %v1775_v38, %v612_v37  ;;  %v688_v45 = vmax.f32 %v482_v30, 0.0  ;;  %v720_v46 = vmax.f32 %v610_v31, 0.0 }
 0x10e   :  { %v691_v43 = vmax.f32 %v493_v34, 0.0  ;;  %v723_v44 = vmax.f32 %v621_v35, 0.0 }
 0x10f   :  { %v689_v47 = vmax.f32 %v485_v39, 0.0  ;;  %v721_v48 = vmax.f32 %v613_v40, 0.0 }
 0x110   :  { %v1306_v49 = vpack.c.bf16 %v691_v43, %v690_v41  ;;  %v1386_v50 = vpack.c.bf16 %v723_v44, %v722_v42 }
 0x111   :  { %v1301_v51 = vpack.c.bf16 %v689_v47, %v688_v45  ;;  %v1381_v52 = vpack.c.bf16 %v721_v48, %v720_v46  ;;  %v1518_v53 = vpop.f32.mrb[20].mxu0  ;;  %v1550_v54 = vpop.f32.mrb[20].mxu1 }
 0x112   :  { %1426 = vst [vmem:[%s1940_s3 + $0x48] sm:$0xff] %v1306_v49   ;;  %1442 = vst [vmem:[%s1940_s3 + $0xc8] sm:$0xff] %v1386_v50   ;;  %v506_v55 = vadd.f32 %v1518_v53, %v1775_v38  ;;  %v634_v56 = vadd.f32 %v1550_v54, %v1775_v38  ;;  %v497_v57 = vpop.f32.mrb[21].mxu0  ;;  %v625_v58 = vpop.f32.mrb[21].mxu1 }
 0x113   :  { %1425 = vst [vmem:[%s1940_s3 + $0x40] sm:$0xff] %v1301_v51   ;;  %1441 = vst [vmem:[%s1940_s3 + $0xc0] sm:$0xff] %v1381_v52   ;;  %v498_v59 = vadd.f32 %v1775_v38, %v497_v57  ;;  %v626_v60 = vadd.f32 %v1775_v38, %v625_v58  ;;  %v1519_v61 = vpop.f32.mrb[22].mxu0  ;;  %v1551_v62 = vpop.f32.mrb[22].mxu1 }
 0x114   :  { %v509_v63 = vadd.f32 %v1519_v61, %v1775_v38  ;;  %v637_v0 = vadd.f32 %v1551_v62, %v1775_v38  ;;  %v500_v1 = vpop.f32.mrb[23].mxu0  ;;  %v628_v2 = vpop.f32.mrb[23].mxu1  ;;  %v694_v5 = vmax.f32 %v506_v55, 0.0  ;;  %v726_v6 = vmax.f32 %v634_v56, 0.0 }
 0x115   :  { %v501_v3 = vadd.f32 %v1775_v38, %v500_v1  ;;  %v629_v4 = vadd.f32 %v1775_v38, %v628_v2  ;;  %v692_v9 = vmax.f32 %v498_v59, 0.0  ;;  %v724_v10 = vmax.f32 %v626_v60, 0.0 }
 0x116   :  { %v695_v7 = vmax.f32 %v509_v63, 0.0  ;;  %v727_v8 = vmax.f32 %v637_v0, 0.0 }
 0x117   :  { %v693_v11 = vmax.f32 %v501_v3, 0.0  ;;  %v725_v12 = vmax.f32 %v629_v4, 0.0 }
 0x118   :  { %v1316_v13 = vpack.c.bf16 %v695_v7, %v694_v5  ;;  %v1396_v14 = vpack.c.bf16 %v727_v8, %v726_v6 }
 0x119   :  { %v1311_v15 = vpack.c.bf16 %v693_v11, %v692_v9  ;;  %v1391_v16 = vpack.c.bf16 %v725_v12, %v724_v10  ;;  %v1522_v17 = vpop.f32.mrb[24].mxu0  ;;  %v1554_v18 = vpop.f32.mrb[24].mxu1 }
 0x11a   :  { %1428 = vst [vmem:[%s1940_s3 + $0x58] sm:$0xff] %v1316_v13   ;;  %1444 = vst [vmem:[%s1940_s3 + $0xd8] sm:$0xff] %v1396_v14   ;;  %v522_v19 = vadd.f32 %v1522_v17, %v1775_v38  ;;  %v650_v20 = vadd.f32 %v1554_v18, %v1775_v38  ;;  %v513_v21 = vpop.f32.mrb[25].mxu0  ;;  %v641_v22 = vpop.f32.mrb[25].mxu1 }
 0x11b   :  { %1427 = vst [vmem:[%s1940_s3 + $0x50] sm:$0xff] %v1311_v15   ;;  %1443 = vst [vmem:[%s1940_s3 + $0xd0] sm:$0xff] %v1391_v16   ;;  %v514_v23 = vadd.f32 %v1775_v38, %v513_v21  ;;  %v642_v24 = vadd.f32 %v1775_v38, %v641_v22  ;;  %v1523_v25 = vpop.f32.mrb[26].mxu0  ;;  %v1555_v26 = vpop.f32.mrb[26].mxu1 }
 0x11c   :  { %v525_v27 = vadd.f32 %v1523_v25, %v1775_v38  ;;  %v653_v28 = vadd.f32 %v1555_v26, %v1775_v38  ;;  %v516_v29 = vpop.f32.mrb[27].mxu0  ;;  %v644_v30 = vpop.f32.mrb[27].mxu1  ;;  %v698_v33 = vmax.f32 %v522_v19, 0.0  ;;  %v730_v34 = vmax.f32 %v650_v20, 0.0 }
 0x11d   :  { %v517_v31 = vadd.f32 %v1775_v38, %v516_v29  ;;  %v645_v32 = vadd.f32 %v1775_v38, %v644_v30  ;;  %v696_v37 = vmax.f32 %v514_v23, 0.0  ;;  %v728_v39 = vmax.f32 %v642_v24, 0.0 }
 0x11e   :  { %v699_v35 = vmax.f32 %v525_v27, 0.0  ;;  %v731_v36 = vmax.f32 %v653_v28, 0.0 }
 0x11f   :  { %v697_v40 = vmax.f32 %v517_v31, 0.0  ;;  %v729_v41 = vmax.f32 %v645_v32, 0.0 }
 0x120   :  { %v1326_v42 = vpack.c.bf16 %v699_v35, %v698_v33  ;;  %v1406_v43 = vpack.c.bf16 %v731_v36, %v730_v34 }
 0x121   :  { %v1321_v44 = vpack.c.bf16 %v697_v40, %v696_v37  ;;  %v1401_v45 = vpack.c.bf16 %v729_v41, %v728_v39  ;;  %v1526_v46 = vpop.f32.mrb[28].mxu0  ;;  %v1558_v47 = vpop.f32.mrb[28].mxu1 }
 0x122   :  { %1430 = vst [vmem:[%s1940_s3 + $0x68] sm:$0xff] %v1326_v42   ;;  %1446 = vst [vmem:[%s1940_s3 + $0xe8] sm:$0xff] %v1406_v43   ;;  %v538_v48 = vadd.f32 %v1526_v46, %v1775_v38  ;;  %v666_v49 = vadd.f32 %v1558_v47, %v1775_v38  ;;  %v529_v50 = vpop.f32.mrb[29].mxu0  ;;  %v657_v51 = vpop.f32.mrb[29].mxu1 }
 0x123   :  { %1429 = vst [vmem:[%s1940_s3 + $0x60] sm:$0xff] %v1321_v44   ;;  %1445 = vst [vmem:[%s1940_s3 + $0xe0] sm:$0xff] %v1401_v45   ;;  %v530_v52 = vadd.f32 %v1775_v38, %v529_v50  ;;  %v658_v53 = vadd.f32 %v1775_v38, %v657_v51  ;;  %v1527_v54 = vpop.f32.mrb[30].mxu0  ;;  %v1559_v55 = vpop.f32.mrb[30].mxu1 }
 0x124   :  { %v541_v56 = vadd.f32 %v1527_v54, %v1775_v38  ;;  %v669_v57 = vadd.f32 %v1559_v55, %v1775_v38  ;;  %v532_v58 = vpop.f32.mrb[31].mxu0  ;;  %v660_v59 = vpop.f32.mrb[31].mxu1  ;;  %v702_v62 = vmax.f32 %v538_v48, 0.0  ;;  %v734_v63 = vmax.f32 %v666_v49, 0.0 }
 0x125   :  { %v533_v60 = vadd.f32 %v1775_v38, %v532_v58  ;;  %v661_v61 = vadd.f32 %v1775_v38, %v660_v59  ;;  %v700_v2 = vmax.f32 %v530_v52, 0.0  ;;  %v732_v3 = vmax.f32 %v658_v53, 0.0 }
 0x126   :  { %v703_v0 = vmax.f32 %v541_v56, 0.0  ;;  %v735_v1 = vmax.f32 %v669_v57, 0.0 }
 0x127   :  { %v701_v4 = vmax.f32 %v533_v60, 0.0  ;;  %v733_v5 = vmax.f32 %v661_v61, 0.0 }
 0x128   :  { %v1336_v6 = vpack.c.bf16 %v703_v0, %v702_v62  ;;  %v1416_v7 = vpack.c.bf16 %v735_v1, %v734_v63 }
 0x129   :  { %v1331_v8 = vpack.c.bf16 %v701_v4, %v700_v2  ;;  %v1411_v9 = vpack.c.bf16 %v733_v5, %v732_v3 }
 0x12a   :  { %1432 = vst [vmem:[%s1940_s3 + $0x78] sm:$0xff] %v1336_v6   ;;  %1448 = vst [vmem:[%s1940_s3 + $0xf8] sm:$0xff] %v1416_v7  }
 0x12b   :  { %1431 = vst [vmem:[%s1940_s3 + $0x70] sm:$0xff] %v1331_v8   ;;  %1447 = vst [vmem:[%s1940_s3 + $0xf0] sm:$0xff] %v1411_v9  }

// kernel: _lambda_.25
= control target key start
LH: loop header
LB: loop body
LE: loop exit
PB: predicated region body
PF: predicated region fallthrough
CT: control target
= control target key end

     0   :  { %vm326_vm0 = vcmask 130048   ;;  %vm899_vm1 = vcmask 588800   ;;  %vm996_vm2 = vcmask 1043456   ;;  %s3027_s3 = inlined_call_operand.vmem [shape: bf16[16,128], index: 3, kind: input, shape index: {}]   ;;  %s3028_s1 = inlined_call_operand.vmem [shape: bf16[72,128], index: 1, kind: input, shape index: {}]   ;;  %s3029_s2 = inlined_call_operand.vmem [shape: bf16[512,16], index: 2, kind: input, shape index: {}]   ;;  %s3030_s0 = inlined_call_operand.vmem [shape: bf16[512,72], index: 0, kind: input, shape index: {}]   ;;  %s3031_s4 = inlined_call_operand.vmem [shape: f32[1,128], index: 4, kind: input, shape index: {}]   ;;  %s3032_s5 = inlined_call_operand.vmem [shape: bf16[512,128], index: 5, kind: output, shape index: {}]  }
   0x1   :  { %v2488_v0 = vld [vmem:[%s3027_s3] sm:$0xff]   ;;  %v2491_v3 = vld [vmem:[%s3029_s2 + $0x8] sm:$0xff]   ;;  %v2493_v5 = vld [vmem:[%s3028_s1 + $0x10] sm:$0xff]  }
   0x2   :  { %v2489_v1 = vld [vmem:[%s3028_s1] sm:$0xff]   ;;  %2272 = vmatprep.subr.bf16.mxu0 %v2488_v0  ;;  %v2492_v4 = vld [vmem:[%s3028_s1 + $0x8] sm:$0xff]   ;;  %v2494_v6 = vld [vmem:[%s3029_s2 + $0x10] sm:$0xff]  }
   0x3   :  { %v2490_v2 = vld [vmem:[%s3029_s2] sm:$0xff]   ;;  %2412 = vmatprep.subr.bf16.mxu1 %v2489_v1  ;;  %2273 = vmatpush3.bf16.msra.mxu0 %v2488_v0  ;;  %v2495_v7 = vld [vmem:[%s3029_s2 + $0x18] sm:$0xff]   ;;  %v2499_v10 = vld [vmem:[%s3030_s0 + $0x10] sm:$0xff]  }
   0x4   :  { %2417 = vmatpush3.bf16.msra.mxu1 %v2489_v1  ;;  %2274 = vmatprep.mubr.msk.bf16.mxu0 %vm326_vm0, %v2490_v2  ;;  %v2496_v8 = vld [vmem:[%s3028_s1 + $0x18] sm:$0xff]   ;;  %v2498_v9 = vld [vmem:[%s3029_s2 + $0x20] sm:$0xff]   ;;  %v2500_v13 = vld [vmem:[%s3029_s2 + $0x28] sm:$0xff]  }
   0x5   :  { %2338 = vmatprep.subr.bf16.mxu0 %v2489_v1  ;;  %2413 = vmatprep.subr.bf16.mxu1 %v2492_v4  ;;  %v2497_v11 = vld [vmem:[%s3028_s1 + $0x20] ss:$0 sps:$4 sm:$0xff]   ;;  %v2501_v14 = vld [vmem:[%s3030_s0 + $0x18] sm:$0xff]   ;;  %v2502_v15 = vld [vmem:[%s3029_s2 + $0x30] sm:$0xff]  }
   0x6   :  { %2275 = vmatmul.mubr.msk.bf16.vlgmr.msra.gmra.mrb[0].mxu0 %vm326_vm0, %v2491_v3  ;;  %2352 = vmatprep.mubr.msk.bf16.mxu1 %vm899_vm1, %v2499_v10  ;;  %v998_v12 = vsel %vm996_vm2, %v2497_v11, 0  ;;  %v2503_v16 = vld [vmem:[%s3030_s0 + $0x20] sm:$0xff]   ;;  %v2504_v17 = vld [vmem:[%s3029_s2 + $0x38] sm:$0xff]   ;;  %v2505_v18 = vld [vmem:[%s3030_s0 + $0x28] sm:$0xff]  }
   0x7   :  { %2339 = vmatpush3.bf16.msra.mxu0 %v2489_v1  ;;  %2278 = vmatprep.mubr.msk.bf16.mxu0 %vm326_vm0, %v2494_v6  ;;  %v2506_v19 = vld [vmem:[%s3029_s2 + $0x40] sm:$0xff]   ;;  %v2507_v20 = vld [vmem:[%s3030_s0 + $0x30] sm:$0xff]   ;;  %v2508_v21 = vld [vmem:[%s3029_s2 + $0x48] sm:$0xff]  }
   0x8   :  { %2418 = vmatpush3.bf16.msra.mxu1 %v2492_v4  ;;  %2340 = vmatprep.subr.bf16.mxu0 %v2492_v4  ;;  %v2509_v22 = vld [vmem:[%s3030_s0 + $0x38] sm:$0xff]   ;;  %v2510_v23 = vld [vmem:[%s3029_s2 + $0x50] sm:$0xff]   ;;  %v2511_v24 = vld [vmem:[%s3030_s0 + $0x40] sm:$0xff]  }
   0x9   :  { %2414 = vmatprep.subr.bf16.mxu1 %v2493_v5  ;;  %v2512_v25 = vld [vmem:[%s3029_s2 + $0x58] sm:$0xff]   ;;  %v2513_v26 = vld [vmem:[%s3030_s0 + $0x48] sm:$0xff]   ;;  %v2514_v27 = vld [vmem:[%s3029_s2 + $0x60] sm:$0xff]  }
   0xa   :  { %v2515_v28 = vld [vmem:[%s3030_s0 + $0x50] sm:$0xff]   ;;  %v2516_v29 = vld [vmem:[%s3029_s2 + $0x68] sm:$0xff]   ;;  %v2517_v30 = vld [vmem:[%s3030_s0 + $0x58] sm:$0xff]  }
   0xb   :  { %2341 = vmatpush3.bf16.msra.mxu0 %v2492_v4  ;;  %v2518_v31 = vld [vmem:[%s3029_s2 + $0x70] sm:$0xff]   ;;  %v2519_v32 = vld [vmem:[%s3030_s0 + $0x60] sm:$0xff]   ;;  %v2520_v33 = vld [vmem:[%s3029_s2 + $0x78] sm:$0xff]  }
   0xc   :  { %2419 = vmatpush3.bf16.msra.mxu1 %v2493_v5  ;;  %2342 = vmatprep.subr.bf16.mxu0 %v2493_v5  ;;  %v2521_v34 = vld [vmem:[%s3030_s0 + $0x68] sm:$0xff]   ;;  %v2522_v35 = vld [vmem:[%s3029_s2 + $0x80] sm:$0xff]   ;;  %v2523_v36 = vld [vmem:[%s3030_s0 + $0x70] sm:$0xff]  }
   0xd   :  { %2415 = vmatprep.subr.bf16.mxu1 %v2496_v8  ;;  %v2524_v37 = vld [vmem:[%s3029_s2 + $0x88] sm:$0xff]   ;;  %v2525_v38 = vld [vmem:[%s3030_s0 + $0x78] sm:$0xff]   ;;  %v2526_v39 = vld [vmem:[%s3029_s2 + $0x90] sm:$0xff]  }
   0xe   :  { %2279 = vmatmul.mubr.msk.bf16.gmra.mrb[4].mxu0 %vm326_vm0, %v2495_v7  ;;  %v2527_v40 = vld [vmem:[%s3030_s0 + $0x80] sm:$0xff]   ;;  %v2528_v41 = vld [vmem:[%s3029_s2 + $0x98] sm:$0xff]   ;;  %v2529_v42 = vld [vmem:[%s3030_s0 + $0x88] sm:$0xff]  }
   0xf   :  { %2282 = vmatprep.mubr.msk.bf16.mxu0 %vm326_vm0, %v2498_v9  ;;  %2343 = vmatpush3.bf16.msra.mxu0 %v2493_v5  ;;  %v2530_v43 = vld [vmem:[%s3029_s2 + $0xa0] sm:$0xff]   ;;  %v2531_v44 = vld [vmem:[%s3030_s0 + $0x90] sm:$0xff]   ;;  %v2532_v45 = vld [vmem:[%s3029_s2 + $0xa8] sm:$0xff]  }
  0x10   :  { %2420 = vmatpush3.bf16.msra.mxu1 %v2496_v8  ;;  %2344 = vmatprep.subr.bf16.mxu0 %v2496_v8  ;;  %v2533_v46 = vld [vmem:[%s3030_s0 + $0x98] sm:$0xff]   ;;  %v2534_v47 = vld [vmem:[%s3029_s2 + $0xb0] sm:$0xff]   ;;  %v2535_v48 = vld [vmem:[%s3030_s0 + $0xa0] sm:$0xff]  }
  0x11   :  { %2487 = vmatprep.subr.msk.bf16.mxu1 %vm996_vm2, %v2497_v11  ;;  %v2536_v49 = vld [vmem:[%s3029_s2 + $0xb8] sm:$0xff]   ;;  %v2537_v50 = vld [vmem:[%s3030_s0 + $0xa8] sm:$0xff]   ;;  %v2538_v51 = vld [vmem:[%s3029_s2 + $0xc0] sm:$0xff]  }
  0x12   :  { %v2539_v52 = vld [vmem:[%s3030_s0 + $0xb0] sm:$0xff]   ;;  %v2540_v53 = vld [vmem:[%s3029_s2 + $0xc8] sm:$0xff]   ;;  %v2541_v54 = vld [vmem:[%s3030_s0 + $0xb8] sm:$0xff]  }
  0x13   :  { %2345 = vmatpush3.bf16.msra.mxu0 %v2496_v8  ;;  %v2542_v55 = vld [vmem:[%s3029_s2 + $0xd0] sm:$0xff]   ;;  %v2543_v56 = vld [vmem:[%s3030_s0 + $0xc0] sm:$0xff]   ;;  %v2544_v57 = vld [vmem:[%s3029_s2 + $0xd8] sm:$0xff]  }
  0x14   :  { %2421 = vmatpush3.bf16.msra.mxu1 %v998_v12  ;;  %2486 = vmatprep.subr.msk.bf16.mxu0 %vm996_vm2, %v2497_v11  ;;  %v2545_v58 = vld [vmem:[%s3030_s0 + $0xc8] sm:$0xff]   ;;  %v2546_v59 = vld [vmem:[%s3029_s2 + $0xe0] sm:$0xff]   ;;  %v2547_v60 = vld [vmem:[%s3030_s0 + $0xd0] sm:$0xff]  }
  0x15   :  { %v2548_v61 = vld [vmem:[%s3029_s2 + $0xe8] sm:$0xff]   ;;  %v2549_v62 = vld [vmem:[%s3030_s0 + $0xd8] sm:$0xff]   ;;  %v2550_v63 = vld [vmem:[%s3029_s2 + $0xf0] sm:$0xff]  }
  0x16   :  { %2283 = vmatmul.mubr.msk.bf16.gmra.mrb[8].mxu0 %vm326_vm0, %v2500_v13  ;;  %v2551_v0 = vld [vmem:[%s3030_s0 + $0xe0] sm:$0xff]   ;;  %v2552_v1 = vld [vmem:[%s3029_s2 + $0xf8] sm:$0xff]   ;;  %v2553_v2 = vld [vmem:[%s3030_s0 + $0xe8] sm:$0xff]  }
  0x17   :  { %2353 = vmatmul.mubr.msk.bf16.vlgmr.msra.gmra.mrb[0].mxu1 %vm899_vm1, %v2501_v14  ;;  %2286 = vmatprep.mubr.msk.bf16.mxu0 %vm326_vm0, %v2502_v15  ;;  %v2554_v3 = vld [vmem:[%s3030_s0] sm:$0xff]   ;;  %v2555_v4 = vld [vmem:[%s3030_s0 + $0xf0] sm:$0xff]   ;;  %v2556_v5 = vld [vmem:[%s3030_s0 + $0x8] sm:$0xff]  }
  0x18   :  { %2356 = vmatprep.mubr.msk.bf16.mxu1 %vm899_vm1, %v2503_v16  ;;  %2347 = vmatpush3.bf16.msra.mxu0 %v998_v12  ;;  %v2557_v6 = vld [vmem:[%s3030_s0 + $0xf8] sm:$0xff]   ;;  %v2865_v13 = vld [vmem:[%s3031_s4] ss:$0 sm:$0xff] }
  0x1e   :  { %2287 = vmatmul.mubr.msk.bf16.gmra.mrb[12].mxu0 %vm326_vm0, %v2504_v17 }
  0x1f   :  { %2357 = vmatmul.mubr.msk.bf16.gmra.mrb[4].mxu1 %vm899_vm1, %v2505_v18  ;;  %2290 = vmatprep.mubr.msk.bf16.mxu0 %vm326_vm0, %v2506_v19 }
  0x20   :  { %2360 = vmatprep.mubr.msk.bf16.mxu1 %vm899_vm1, %v2507_v20 }
  0x26   :  { %2291 = vmatmul.mubr.msk.bf16.gmra.mrb[16].mxu0 %vm326_vm0, %v2508_v21 }
  0x27   :  { %2361 = vmatmul.mubr.msk.bf16.gmra.mrb[8].mxu1 %vm899_vm1, %v2509_v22  ;;  %2294 = vmatprep.mubr.msk.bf16.mxu0 %vm326_vm0, %v2510_v23 }
  0x28   :  { %2364 = vmatprep.mubr.msk.bf16.mxu1 %vm899_vm1, %v2511_v24 }
  0x2e   :  { %2295 = vmatmul.mubr.msk.bf16.gmra.mrb[20].mxu0 %vm326_vm0, %v2512_v25 }
  0x2f   :  { %2365 = vmatmul.mubr.msk.bf16.gmra.mrb[12].mxu1 %vm899_vm1, %v2513_v26  ;;  %2298 = vmatprep.mubr.msk.bf16.mxu0 %vm326_vm0, %v2514_v27 }
  0x30   :  { %2368 = vmatprep.mubr.msk.bf16.mxu1 %vm899_vm1, %v2515_v28 }
  0x36   :  { %2299 = vmatmul.mubr.msk.bf16.gmra.mrb[24].mxu0 %vm326_vm0, %v2516_v29 }
  0x37   :  { %2369 = vmatmul.mubr.msk.bf16.gmra.mrb[16].mxu1 %vm899_vm1, %v2517_v30  ;;  %2302 = vmatprep.mubr.msk.bf16.mxu0 %vm326_vm0, %v2518_v31 }
  0x38   :  { %2372 = vmatprep.mubr.msk.bf16.mxu1 %vm899_vm1, %v2519_v32 }
  0x3e   :  { %2303 = vmatmul.mubr.msk.bf16.gmra.mrb[28].mxu0 %vm326_vm0, %v2520_v33 }
  0x3f   :  { %2373 = vmatmul.mubr.msk.bf16.gmra.mrb[20].mxu1 %vm899_vm1, %v2521_v34  ;;  %2306 = vmatprep.mubr.msk.bf16.mxu0 %vm326_vm0, %v2522_v35 }
  0x40   :  { %2376 = vmatprep.mubr.msk.bf16.mxu1 %vm899_vm1, %v2523_v36 }
  0x46   :  { %2307 = vmatmul.mubr.msk.bf16.gmra.mrb[32].mxu0 %vm326_vm0, %v2524_v37 }
  0x47   :  { %2377 = vmatmul.mubr.msk.bf16.gmra.mrb[24].mxu1 %vm899_vm1, %v2525_v38  ;;  %2310 = vmatprep.mubr.msk.bf16.mxu0 %vm326_vm0, %v2526_v39 }
  0x48   :  { %2380 = vmatprep.mubr.msk.bf16.mxu1 %vm899_vm1, %v2527_v40 }
  0x4e   :  { %2311 = vmatmul.mubr.msk.bf16.gmra.mrb[36].mxu0 %vm326_vm0, %v2528_v41 }
  0x4f   :  { %2381 = vmatmul.mubr.msk.bf16.gmra.mrb[28].mxu1 %vm899_vm1, %v2529_v42  ;;  %2314 = vmatprep.mubr.msk.bf16.mxu0 %vm326_vm0, %v2530_v43 }
  0x50   :  { %2384 = vmatprep.mubr.msk.bf16.mxu1 %vm899_vm1, %v2531_v44 }
  0x56   :  { %2315 = vmatmul.mubr.msk.bf16.gmra.mrb[40].mxu0 %vm326_vm0, %v2532_v45 }
  0x57   :  { %2385 = vmatmul.mubr.msk.bf16.gmra.mrb[32].mxu1 %vm899_vm1, %v2533_v46  ;;  %2318 = vmatprep.mubr.msk.bf16.mxu0 %vm326_vm0, %v2534_v47 }
  0x58   :  { %2388 = vmatprep.mubr.msk.bf16.mxu1 %vm899_vm1, %v2535_v48 }
  0x5e   :  { %2319 = vmatmul.mubr.msk.bf16.gmra.mrb[44].mxu0 %vm326_vm0, %v2536_v49 }
  0x5f   :  { %2389 = vmatmul.mubr.msk.bf16.gmra.mrb[36].mxu1 %vm899_vm1, %v2537_v50  ;;  %2322 = vmatprep.mubr.msk.bf16.mxu0 %vm326_vm0, %v2538_v51 }
  0x60   :  { %2392 = vmatprep.mubr.msk.bf16.mxu1 %vm899_vm1, %v2539_v52 }
  0x66   :  { %2323 = vmatmul.mubr.msk.bf16.gmra.mrb[48].mxu0 %vm326_vm0, %v2540_v53 }
  0x67   :  { %2393 = vmatmul.mubr.msk.bf16.gmra.mrb[40].mxu1 %vm899_vm1, %v2541_v54  ;;  %2326 = vmatprep.mubr.msk.bf16.mxu0 %vm326_vm0, %v2542_v55 }
  0x68   :  { %2396 = vmatprep.mubr.msk.bf16.mxu1 %vm899_vm1, %v2543_v56 }
  0x6e   :  { %2327 = vmatmul.mubr.msk.bf16.gmra.mrb[52].mxu0 %vm326_vm0, %v2544_v57 }
  0x6f   :  { %2397 = vmatmul.mubr.msk.bf16.gmra.mrb[44].mxu1 %vm899_vm1, %v2545_v58  ;;  %2330 = vmatprep.mubr.msk.bf16.mxu0 %vm326_vm0, %v2546_v59 }
  0x70   :  { %2400 = vmatprep.mubr.msk.bf16.mxu1 %vm899_vm1, %v2547_v60 }
  0x76   :  { %2331 = vmatmul.mubr.msk.bf16.gmra.mrb[56].mxu0 %vm326_vm0, %v2548_v61 }
  0x77   :  { %2401 = vmatmul.mubr.msk.bf16.gmra.mrb[48].mxu1 %vm899_vm1, %v2549_v62  ;;  %2334 = vmatprep.mubr.msk.bf16.mxu0 %vm326_vm0, %v2550_v63 }
  0x78   :  { %2404 = vmatprep.mubr.msk.bf16.mxu1 %vm899_vm1, %v2551_v0 }
  0x7e   :  { %2335 = vmatmul.mubr.msk.bf16.gmra.mrb[60].mxu0 %vm326_vm0, %v2552_v1 }
  0x7f   :  { %2405 = vmatmul.mubr.msk.bf16.gmra.mrb[52].mxu1 %vm899_vm1, %v2553_v2  ;;  %2348 = vmatprep.mubr.msk.bf16.mxu0 %vm899_vm1, %v2554_v3 }
  0x80   :  { %2408 = vmatprep.mubr.msk.bf16.mxu1 %vm899_vm1, %v2555_v4 }
  0x86   :  { %2349 = vmatmul.mubr.msk.bf16.vlgmr.msra.gmra.mrb[0].mxu0 %vm899_vm1, %v2556_v5 }
  0x87   :  { %2409 = vmatmul.mubr.msk.bf16.gmra.mrb[56].mxu1 %vm899_vm1, %v2557_v6 }
  0xe1   :  { %v2280_v7 = vpop.f32.mrb[4].mxu0 }
  0xe2   :  { %v473_v8 = vpop.f32.mrb[5].mxu0 }
  0xe3   :  { %v2281_v9 = vpop.f32.mrb[6].mxu0 }
  0xe4   :  { %v476_v10 = vpop.f32.mrb[7].mxu0 }
  0xe9   :  { %v2284_v11 = vpop.f32.mrb[8].mxu0 }
  0xea   :  { %v2354_v12 = vpop.f32.mrb[0].mxu1  ;;  %v489_v14 = vpop.f32.mrb[9].mxu0 }
  0xeb   :  { %v1059_v15 = vadd.f32 %v2354_v12, %v2280_v7  ;;  %v1050_v16 = vpop.f32.mrb[1].mxu1  ;;  %v2285_v17 = vpop.f32.mrb[10].mxu0 }
  0xec   :  { %v1051_v18 = vadd.f32 %v1050_v16, %v473_v8  ;;  %v2355_v19 = vpop.f32.mrb[2].mxu1  ;;  %v492_v20 = vpop.f32.mrb[11].mxu0 }
  0xed   :  { %v1302_v21 = vadd.f32 %v2865_v13, %v1059_v15  ;;  %v1062_v22 = vadd.f32 %v2355_v19, %v2281_v9  ;;  %v1053_v23 = vpop.f32.mrb[3].mxu1 }
  0xee   :  { %v1300_v24 = vadd.f32 %v2865_v13, %v1051_v18  ;;  %v1054_v25 = vadd.f32 %v1053_v23, %v476_v10 }
  0xef   :  { %v1303_v26 = vadd.f32 %v2865_v13, %v1062_v22  ;;  %v1366_v28 = vmax.f32 %v1302_v21, 0.0 }
  0xf0   :  { %v1301_v27 = vadd.f32 %v2865_v13, %v1054_v25  ;;  %v1364_v31 = vmax.f32 %v1300_v24, 0.0 }
  0xf1   :  { %v1367_v29 = vmax.f32 %v1303_v26, 0.0  ;;  %v2288_v30 = vpop.f32.mrb[12].mxu0 }
  0xf2   :  { %v1365_v32 = vmax.f32 %v1301_v27, 0.0  ;;  %v2358_v33 = vpop.f32.mrb[4].mxu1  ;;  %v505_v34 = vpop.f32.mrb[13].mxu0 }
  0xf3   :  { %v2029_v35 = vpack.c.bf16 %v1367_v29, %v1366_v28  ;;  %v1075_v36 = vadd.f32 %v2358_v33, %v2284_v11  ;;  %v1066_v37 = vpop.f32.mrb[5].mxu1  ;;  %v2289_v38 = vpop.f32.mrb[14].mxu0 }
  0xf4   :  { %v2024_v39 = vpack.c.bf16 %v1365_v32, %v1364_v31  ;;  %v1067_v40 = vadd.f32 %v1066_v37, %v489_v14  ;;  %v2359_v41 = vpop.f32.mrb[6].mxu1  ;;  %v508_v42 = vpop.f32.mrb[15].mxu0 }
  0xf5   :  { %2173 = vst [vmem:[%s3032_s5 + $0x18] sm:$0xff] %v2029_v35   ;;  %v1306_v43 = vadd.f32 %v2865_v13, %v1075_v36  ;;  %v1078_v44 = vadd.f32 %v2359_v41, %v2285_v17  ;;  %v1069_v45 = vpop.f32.mrb[7].mxu1 }
  0xf6   :  { %2172 = vst [vmem:[%s3032_s5 + $0x10] sm:$0xff] %v2024_v39   ;;  %v1304_v46 = vadd.f32 %v2865_v13, %v1067_v40  ;;  %v1070_v47 = vadd.f32 %v1069_v45, %v492_v20 }
  0xf7   :  { %v1307_v48 = vadd.f32 %v2865_v13, %v1078_v44  ;;  %v1370_v50 = vmax.f32 %v1306_v43, 0.0 }
  0xf8   :  { %v1305_v49 = vadd.f32 %v2865_v13, %v1070_v47  ;;  %v1368_v53 = vmax.f32 %v1304_v46, 0.0 }
  0xf9   :  { %v1371_v51 = vmax.f32 %v1307_v48, 0.0  ;;  %v2292_v52 = vpop.f32.mrb[16].mxu0 }
  0xfa   :  { %v1369_v54 = vmax.f32 %v1305_v49, 0.0  ;;  %v2362_v55 = vpop.f32.mrb[8].mxu1  ;;  %v521_v56 = vpop.f32.mrb[17].mxu0 }
  0xfb   :  { %v2039_v57 = vpack.c.bf16 %v1371_v51, %v1370_v50  ;;  %v1091_v58 = vadd.f32 %v2362_v55, %v2288_v30  ;;  %v1082_v59 = vpop.f32.mrb[9].mxu1  ;;  %v2293_v60 = vpop.f32.mrb[18].mxu0 }
  0xfc   :  { %v2034_v61 = vpack.c.bf16 %v1369_v54, %v1368_v53  ;;  %v1083_v62 = vadd.f32 %v1082_v59, %v505_v34  ;;  %v2363_v63 = vpop.f32.mrb[10].mxu1  ;;  %v524_v0 = vpop.f32.mrb[19].mxu0 }
  0xfd   :  { %2175 = vst [vmem:[%s3032_s5 + $0x28] sm:$0xff] %v2039_v57   ;;  %v1310_v1 = vadd.f32 %v2865_v13, %v1091_v58  ;;  %v1094_v2 = vadd.f32 %v2363_v63, %v2289_v38  ;;  %v1085_v3 = vpop.f32.mrb[11].mxu1 }
  0xfe   :  { %2174 = vst [vmem:[%s3032_s5 + $0x20] sm:$0xff] %v2034_v61   ;;  %v1308_v4 = vadd.f32 %v2865_v13, %v1083_v62  ;;  %v1086_v5 = vadd.f32 %v1085_v3, %v508_v42 }
  0xff   :  { %v1311_v6 = vadd.f32 %v2865_v13, %v1094_v2  ;;  %v1374_v8 = vmax.f32 %v1310_v1, 0.0 }
 0x100   :  { %v1309_v7 = vadd.f32 %v2865_v13, %v1086_v5  ;;  %v1372_v11 = vmax.f32 %v1308_v4, 0.0 }
 0x101   :  { %v1375_v9 = vmax.f32 %v1311_v6, 0.0  ;;  %v2296_v10 = vpop.f32.mrb[20].mxu0 }
 0x102   :  { %v1373_v12 = vmax.f32 %v1309_v7, 0.0  ;;  %v2366_v14 = vpop.f32.mrb[12].mxu1  ;;  %v537_v15 = vpop.f32.mrb[21].mxu0 }
 0x103   :  { %v2049_v16 = vpack.c.bf16 %v1375_v9, %v1374_v8  ;;  %v1107_v17 = vadd.f32 %v2366_v14, %v2292_v52  ;;  %v1098_v18 = vpop.f32.mrb[13].mxu1  ;;  %v2297_v19 = vpop.f32.mrb[22].mxu0 }
 0x104   :  { %v2044_v20 = vpack.c.bf16 %v1373_v12, %v1372_v11  ;;  %v1099_v21 = vadd.f32 %v1098_v18, %v521_v56  ;;  %v2367_v22 = vpop.f32.mrb[14].mxu1  ;;  %v540_v23 = vpop.f32.mrb[23].mxu0 }
 0x105   :  { %2177 = vst [vmem:[%s3032_s5 + $0x38] sm:$0xff] %v2049_v16   ;;  %v1314_v24 = vadd.f32 %v2865_v13, %v1107_v17  ;;  %v1110_v25 = vadd.f32 %v2367_v22, %v2293_v60  ;;  %v1101_v26 = vpop.f32.mrb[15].mxu1 }
 0x106   :  { %2176 = vst [vmem:[%s3032_s5 + $0x30] sm:$0xff] %v2044_v20   ;;  %v1312_v27 = vadd.f32 %v2865_v13, %v1099_v21  ;;  %v1102_v28 = vadd.f32 %v1101_v26, %v524_v0 }
 0x107   :  { %v1315_v29 = vadd.f32 %v2865_v13, %v1110_v25  ;;  %v1378_v31 = vmax.f32 %v1314_v24, 0.0 }
 0x108   :  { %v1313_v30 = vadd.f32 %v2865_v13, %v1102_v28  ;;  %v1376_v34 = vmax.f32 %v1312_v27, 0.0 }
 0x109   :  { %v1379_v32 = vmax.f32 %v1315_v29, 0.0  ;;  %v2300_v33 = vpop.f32.mrb[24].mxu0 }
 0x10a   :  { %v1377_v35 = vmax.f32 %v1313_v30, 0.0  ;;  %v2370_v36 = vpop.f32.mrb[16].mxu1  ;;  %v553_v37 = vpop.f32.mrb[25].mxu0 }
 0x10b   :  { %v2059_v38 = vpack.c.bf16 %v1379_v32, %v1378_v31  ;;  %v1123_v39 = vadd.f32 %v2370_v36, %v2296_v10  ;;  %v1114_v40 = vpop.f32.mrb[17].mxu1  ;;  %v2301_v41 = vpop.f32.mrb[26].mxu0 }
 0x10c   :  { %v2054_v42 = vpack.c.bf16 %v1377_v35, %v1376_v34  ;;  %v1115_v43 = vadd.f32 %v1114_v40, %v537_v15  ;;  %v2371_v44 = vpop.f32.mrb[18].mxu1  ;;  %v556_v45 = vpop.f32.mrb[27].mxu0 }
 0x10d   :  { %2179 = vst [vmem:[%s3032_s5 + $0x48] sm:$0xff] %v2059_v38   ;;  %v1318_v46 = vadd.f32 %v2865_v13, %v1123_v39  ;;  %v1126_v47 = vadd.f32 %v2371_v44, %v2297_v19  ;;  %v1117_v48 = vpop.f32.mrb[19].mxu1 }
 0x10e   :  { %2178 = vst [vmem:[%s3032_s5 + $0x40] sm:$0xff] %v2054_v42   ;;  %v1316_v49 = vadd.f32 %v2865_v13, %v1115_v43  ;;  %v1118_v50 = vadd.f32 %v1117_v48, %v540_v23 }
 0x10f   :  { %v1319_v51 = vadd.f32 %v2865_v13, %v1126_v47  ;;  %v1382_v53 = vmax.f32 %v1318_v46, 0.0 }
 0x110   :  { %v1317_v52 = vadd.f32 %v2865_v13, %v1118_v50  ;;  %v1380_v56 = vmax.f32 %v1316_v49, 0.0 }
 0x111   :  { %v1383_v54 = vmax.f32 %v1319_v51, 0.0  ;;  %v2304_v55 = vpop.f32.mrb[28].mxu0 }
 0x112   :  { %v1381_v57 = vmax.f32 %v1317_v52, 0.0  ;;  %v2374_v58 = vpop.f32.mrb[20].mxu1  ;;  %v569_v59 = vpop.f32.mrb[29].mxu0 }
 0x113   :  { %v2069_v60 = vpack.c.bf16 %v1383_v54, %v1382_v53  ;;  %v1139_v61 = vadd.f32 %v2374_v58, %v2300_v33  ;;  %v1130_v62 = vpop.f32.mrb[21].mxu1  ;;  %v2305_v63 = vpop.f32.mrb[30].mxu0 }
 0x114   :  { %v2064_v0 = vpack.c.bf16 %v1381_v57, %v1380_v56  ;;  %v1131_v1 = vadd.f32 %v1130_v62, %v553_v37  ;;  %v2375_v2 = vpop.f32.mrb[22].mxu1  ;;  %v572_v3 = vpop.f32.mrb[31].mxu0 }
 0x115   :  { %2181 = vst [vmem:[%s3032_s5 + $0x58] sm:$0xff] %v2069_v60   ;;  %v1322_v4 = vadd.f32 %v2865_v13, %v1139_v61  ;;  %v1142_v5 = vadd.f32 %v2375_v2, %v2301_v41  ;;  %v1133_v6 = vpop.f32.mrb[23].mxu1 }
 0x116   :  { %2180 = vst [vmem:[%s3032_s5 + $0x50] sm:$0xff] %v2064_v0   ;;  %v1320_v7 = vadd.f32 %v2865_v13, %v1131_v1  ;;  %v1134_v8 = vadd.f32 %v1133_v6, %v556_v45 }
 0x117   :  { %v1323_v9 = vadd.f32 %v2865_v13, %v1142_v5  ;;  %v1386_v11 = vmax.f32 %v1322_v4, 0.0 }
 0x118   :  { %v1321_v10 = vadd.f32 %v2865_v13, %v1134_v8  ;;  %v1384_v15 = vmax.f32 %v1320_v7, 0.0 }
 0x119   :  { %v1387_v12 = vmax.f32 %v1323_v9, 0.0  ;;  %v2308_v14 = vpop.f32.mrb[32].mxu0 }
 0x11a   :  { %v1385_v16 = vmax.f32 %v1321_v10, 0.0  ;;  %v2378_v17 = vpop.f32.mrb[24].mxu1  ;;  %v585_v18 = vpop.f32.mrb[33].mxu0 }
 0x11b   :  { %v2079_v19 = vpack.c.bf16 %v1387_v12, %v1386_v11  ;;  %v1155_v20 = vadd.f32 %v2378_v17, %v2304_v55  ;;  %v1146_v21 = vpop.f32.mrb[25].mxu1  ;;  %v2309_v22 = vpop.f32.mrb[34].mxu0 }
 0x11c   :  { %v2074_v23 = vpack.c.bf16 %v1385_v16, %v1384_v15  ;;  %v1147_v24 = vadd.f32 %v1146_v21, %v569_v59  ;;  %v2379_v25 = vpop.f32.mrb[26].mxu1  ;;  %v588_v26 = vpop.f32.mrb[35].mxu0 }
 0x11d   :  { %2183 = vst [vmem:[%s3032_s5 + $0x68] sm:$0xff] %v2079_v19   ;;  %v1326_v27 = vadd.f32 %v2865_v13, %v1155_v20  ;;  %v1158_v28 = vadd.f32 %v2379_v25, %v2305_v63  ;;  %v1149_v29 = vpop.f32.mrb[27].mxu1 }
 0x11e   :  { %2182 = vst [vmem:[%s3032_s5 + $0x60] sm:$0xff] %v2074_v23   ;;  %v1324_v30 = vadd.f32 %v2865_v13, %v1147_v24  ;;  %v1150_v31 = vadd.f32 %v1149_v29, %v572_v3 }
 0x11f   :  { %v1327_v32 = vadd.f32 %v2865_v13, %v1158_v28  ;;  %v1390_v34 = vmax.f32 %v1326_v27, 0.0 }
 0x120   :  { %v1325_v33 = vadd.f32 %v2865_v13, %v1150_v31  ;;  %v1388_v37 = vmax.f32 %v1324_v30, 0.0 }
 0x121   :  { %v1391_v35 = vmax.f32 %v1327_v32, 0.0  ;;  %v2312_v36 = vpop.f32.mrb[36].mxu0 }
 0x122   :  { %v1389_v38 = vmax.f32 %v1325_v33, 0.0  ;;  %v2382_v39 = vpop.f32.mrb[28].mxu1  ;;  %v601_v40 = vpop.f32.mrb[37].mxu0 }
 0x123   :  { %v2089_v41 = vpack.c.bf16 %v1391_v35, %v1390_v34  ;;  %v1171_v42 = vadd.f32 %v2382_v39, %v2308_v14  ;;  %v1162_v43 = vpop.f32.mrb[29].mxu1  ;;  %v2313_v44 = vpop.f32.mrb[38].mxu0 }
 0x124   :  { %v2084_v45 = vpack.c.bf16 %v1389_v38, %v1388_v37  ;;  %v1163_v46 = vadd.f32 %v1162_v43, %v585_v18  ;;  %v2383_v47 = vpop.f32.mrb[30].mxu1  ;;  %v604_v48 = vpop.f32.mrb[39].mxu0 }
 0x125   :  { %2185 = vst [vmem:[%s3032_s5 + $0x78] sm:$0xff] %v2089_v41   ;;  %v1330_v49 = vadd.f32 %v2865_v13, %v1171_v42  ;;  %v1174_v50 = vadd.f32 %v2383_v47, %v2309_v22  ;;  %v1165_v51 = vpop.f32.mrb[31].mxu1 }
 0x126   :  { %2184 = vst [vmem:[%s3032_s5 + $0x70] sm:$0xff] %v2084_v45   ;;  %v1328_v52 = vadd.f32 %v2865_v13, %v1163_v46  ;;  %v1166_v53 = vadd.f32 %v1165_v51, %v588_v26 }
 0x127   :  { %v1331_v54 = vadd.f32 %v2865_v13, %v1174_v50  ;;  %v1394_v56 = vmax.f32 %v1330_v49, 0.0 }
 0x128   :  { %v1329_v55 = vadd.f32 %v2865_v13, %v1166_v53  ;;  %v1392_v59 = vmax.f32 %v1328_v52, 0.0 }
 0x129   :  { %v1395_v57 = vmax.f32 %v1331_v54, 0.0  ;;  %v2316_v58 = vpop.f32.mrb[40].mxu0 }
 0x12a   :  { %v1393_v60 = vmax.f32 %v1329_v55, 0.0  ;;  %v2386_v61 = vpop.f32.mrb[32].mxu1  ;;  %v617_v62 = vpop.f32.mrb[41].mxu0 }
 0x12b   :  { %v2099_v63 = vpack.c.bf16 %v1395_v57, %v1394_v56  ;;  %v1187_v0 = vadd.f32 %v2386_v61, %v2312_v36  ;;  %v1178_v1 = vpop.f32.mrb[33].mxu1  ;;  %v2317_v2 = vpop.f32.mrb[42].mxu0 }
 0x12c   :  { %v2094_v3 = vpack.c.bf16 %v1393_v60, %v1392_v59  ;;  %v1179_v4 = vadd.f32 %v1178_v1, %v601_v40  ;;  %v2387_v5 = vpop.f32.mrb[34].mxu1  ;;  %v620_v6 = vpop.f32.mrb[43].mxu0 }
 0x12d   :  { %2187 = vst [vmem:[%s3032_s5 + $0x88] sm:$0xff] %v2099_v63   ;;  %v1334_v7 = vadd.f32 %v2865_v13, %v1187_v0  ;;  %v1190_v8 = vadd.f32 %v2387_v5, %v2313_v44  ;;  %v1181_v9 = vpop.f32.mrb[35].mxu1 }
 0x12e   :  { %2186 = vst [vmem:[%s3032_s5 + $0x80] sm:$0xff] %v2094_v3   ;;  %v1332_v10 = vadd.f32 %v2865_v13, %v1179_v4  ;;  %v1182_v11 = vadd.f32 %v1181_v9, %v604_v48 }
 0x12f   :  { %v1335_v12 = vadd.f32 %v2865_v13, %v1190_v8  ;;  %v1398_v15 = vmax.f32 %v1334_v7, 0.0 }
 0x130   :  { %v1333_v14 = vadd.f32 %v2865_v13, %v1182_v11  ;;  %v1396_v18 = vmax.f32 %v1332_v10, 0.0 }
 0x131   :  { %v1399_v16 = vmax.f32 %v1335_v12, 0.0  ;;  %v2320_v17 = vpop.f32.mrb[44].mxu0 }
 0x132   :  { %v1397_v19 = vmax.f32 %v1333_v14, 0.0  ;;  %v2390_v20 = vpop.f32.mrb[36].mxu1  ;;  %v633_v21 = vpop.f32.mrb[45].mxu0 }
 0x133   :  { %v2109_v22 = vpack.c.bf16 %v1399_v16, %v1398_v15  ;;  %v1203_v23 = vadd.f32 %v2390_v20, %v2316_v58  ;;  %v1194_v24 = vpop.f32.mrb[37].mxu1  ;;  %v2321_v25 = vpop.f32.mrb[46].mxu0 }
 0x134   :  { %v2104_v26 = vpack.c.bf16 %v1397_v19, %v1396_v18  ;;  %v1195_v27 = vadd.f32 %v1194_v24, %v617_v62  ;;  %v2391_v28 = vpop.f32.mrb[38].mxu1  ;;  %v636_v29 = vpop.f32.mrb[47].mxu0 }
 0x135   :  { %2189 = vst [vmem:[%s3032_s5 + $0x98] sm:$0xff] %v2109_v22   ;;  %v1338_v30 = vadd.f32 %v2865_v13, %v1203_v23  ;;  %v1206_v31 = vadd.f32 %v2391_v28, %v2317_v2  ;;  %v1197_v32 = vpop.f32.mrb[39].mxu1 }
 0x136   :  { %2188 = vst [vmem:[%s3032_s5 + $0x90] sm:$0xff] %v2104_v26   ;;  %v1336_v33 = vadd.f32 %v2865_v13, %v1195_v27  ;;  %v1198_v34 = vadd.f32 %v1197_v32, %v620_v6 }
 0x137   :  { %v1339_v35 = vadd.f32 %v2865_v13, %v1206_v31  ;;  %v1402_v37 = vmax.f32 %v1338_v30, 0.0 }
 0x138   :  { %v1337_v36 = vadd.f32 %v2865_v13, %v1198_v34  ;;  %v1400_v40 = vmax.f32 %v1336_v33, 0.0 }
 0x139   :  { %v1403_v38 = vmax.f32 %v1339_v35, 0.0  ;;  %v2324_v39 = vpop.f32.mrb[48].mxu0 }
 0x13a   :  { %v1401_v41 = vmax.f32 %v1337_v36, 0.0  ;;  %v2394_v42 = vpop.f32.mrb[40].mxu1  ;;  %v649_v43 = vpop.f32.mrb[49].mxu0 }
 0x13b   :  { %v2119_v44 = vpack.c.bf16 %v1403_v38, %v1402_v37  ;;  %v1219_v45 = vadd.f32 %v2394_v42, %v2320_v17  ;;  %v1210_v46 = vpop.f32.mrb[41].mxu1  ;;  %v2325_v47 = vpop.f32.mrb[50].mxu0 }
 0x13c   :  { %v2114_v48 = vpack.c.bf16 %v1401_v41, %v1400_v40  ;;  %v1211_v49 = vadd.f32 %v1210_v46, %v633_v21  ;;  %v2395_v50 = vpop.f32.mrb[42].mxu1  ;;  %v652_v51 = vpop.f32.mrb[51].mxu0 }
 0x13d   :  { %2191 = vst [vmem:[%s3032_s5 + $0xa8] sm:$0xff] %v2119_v44   ;;  %v1342_v52 = vadd.f32 %v2865_v13, %v1219_v45  ;;  %v1222_v53 = vadd.f32 %v2395_v50, %v2321_v25  ;;  %v1213_v54 = vpop.f32.mrb[43].mxu1 }
 0x13e   :  { %2190 = vst [vmem:[%s3032_s5 + $0xa0] sm:$0xff] %v2114_v48   ;;  %v1340_v55 = vadd.f32 %v2865_v13, %v1211_v49  ;;  %v1214_v56 = vadd.f32 %v1213_v54, %v636_v29 }
 0x13f   :  { %v1343_v57 = vadd.f32 %v2865_v13, %v1222_v53  ;;  %v1406_v59 = vmax.f32 %v1342_v52, 0.0 }
 0x140   :  { %v1341_v58 = vadd.f32 %v2865_v13, %v1214_v56  ;;  %v1404_v62 = vmax.f32 %v1340_v55, 0.0 }
 0x141   :  { %v1407_v60 = vmax.f32 %v1343_v57, 0.0  ;;  %v2328_v61 = vpop.f32.mrb[52].mxu0 }
 0x142   :  { %v1405_v63 = vmax.f32 %v1341_v58, 0.0  ;;  %v2398_v0 = vpop.f32.mrb[44].mxu1  ;;  %v665_v1 = vpop.f32.mrb[53].mxu0 }
 0x143   :  { %v2129_v2 = vpack.c.bf16 %v1407_v60, %v1406_v59  ;;  %v1235_v3 = vadd.f32 %v2398_v0, %v2324_v39  ;;  %v1226_v4 = vpop.f32.mrb[45].mxu1  ;;  %v2329_v5 = vpop.f32.mrb[54].mxu0 }
 0x144   :  { %v2124_v6 = vpack.c.bf16 %v1405_v63, %v1404_v62  ;;  %v1227_v7 = vadd.f32 %v1226_v4, %v649_v43  ;;  %v2399_v8 = vpop.f32.mrb[46].mxu1  ;;  %v668_v9 = vpop.f32.mrb[55].mxu0 }
 0x145   :  { %2193 = vst [vmem:[%s3032_s5 + $0xb8] sm:$0xff] %v2129_v2   ;;  %v1346_v10 = vadd.f32 %v2865_v13, %v1235_v3  ;;  %v1238_v11 = vadd.f32 %v2399_v8, %v2325_v47  ;;  %v1229_v12 = vpop.f32.mrb[47].mxu1 }
 0x146   :  { %2192 = vst [vmem:[%s3032_s5 + $0xb0] sm:$0xff] %v2124_v6   ;;  %v1344_v14 = vadd.f32 %v2865_v13, %v1227_v7  ;;  %v1230_v15 = vadd.f32 %v1229_v12, %v652_v51 }
 0x147   :  { %v1347_v16 = vadd.f32 %v2865_v13, %v1238_v11  ;;  %v1410_v18 = vmax.f32 %v1346_v10, 0.0 }
 0x148   :  { %v1345_v17 = vadd.f32 %v2865_v13, %v1230_v15  ;;  %v1408_v21 = vmax.f32 %v1344_v14, 0.0 }
 0x149   :  { %v1411_v19 = vmax.f32 %v1347_v16, 0.0  ;;  %v2332_v20 = vpop.f32.mrb[56].mxu0 }
 0x14a   :  { %v1409_v22 = vmax.f32 %v1345_v17, 0.0  ;;  %v2402_v23 = vpop.f32.mrb[48].mxu1  ;;  %v681_v24 = vpop.f32.mrb[57].mxu0 }
 0x14b   :  { %v2139_v25 = vpack.c.bf16 %v1411_v19, %v1410_v18  ;;  %v1251_v26 = vadd.f32 %v2402_v23, %v2328_v61  ;;  %v1242_v27 = vpop.f32.mrb[49].mxu1  ;;  %v2333_v28 = vpop.f32.mrb[58].mxu0 }
 0x14c   :  { %v2134_v29 = vpack.c.bf16 %v1409_v22, %v1408_v21  ;;  %v1243_v30 = vadd.f32 %v1242_v27, %v665_v1  ;;  %v2403_v31 = vpop.f32.mrb[50].mxu1  ;;  %v684_v32 = vpop.f32.mrb[59].mxu0 }
 0x14d   :  { %2195 = vst [vmem:[%s3032_s5 + $0xc8] sm:$0xff] %v2139_v25   ;;  %v1350_v33 = vadd.f32 %v2865_v13, %v1251_v26  ;;  %v1254_v34 = vadd.f32 %v2403_v31, %v2329_v5  ;;  %v1245_v35 = vpop.f32.mrb[51].mxu1 }
 0x14e   :  { %2194 = vst [vmem:[%s3032_s5 + $0xc0] sm:$0xff] %v2134_v29   ;;  %v1348_v36 = vadd.f32 %v2865_v13, %v1243_v30  ;;  %v1246_v37 = vadd.f32 %v1245_v35, %v668_v9 }
 0x14f   :  { %v1351_v38 = vadd.f32 %v2865_v13, %v1254_v34  ;;  %v1414_v40 = vmax.f32 %v1350_v33, 0.0 }
 0x150   :  { %v1349_v39 = vadd.f32 %v2865_v13, %v1246_v37  ;;  %v1412_v43 = vmax.f32 %v1348_v36, 0.0 }
 0x151   :  { %v1415_v41 = vmax.f32 %v1351_v38, 0.0  ;;  %v2336_v42 = vpop.f32.mrb[60].mxu0 }
 0x152   :  { %v1413_v44 = vmax.f32 %v1349_v39, 0.0  ;;  %v2406_v45 = vpop.f32.mrb[52].mxu1  ;;  %v697_v46 = vpop.f32.mrb[61].mxu0 }
 0x153   :  { %v2149_v47 = vpack.c.bf16 %v1415_v41, %v1414_v40  ;;  %v1267_v48 = vadd.f32 %v2406_v45, %v2332_v20  ;;  %v1258_v49 = vpop.f32.mrb[53].mxu1  ;;  %v2337_v50 = vpop.f32.mrb[62].mxu0 }
 0x154   :  { %v2144_v51 = vpack.c.bf16 %v1413_v44, %v1412_v43  ;;  %v1259_v52 = vadd.f32 %v1258_v49, %v681_v24  ;;  %v2407_v53 = vpop.f32.mrb[54].mxu1  ;;  %v700_v54 = vpop.f32.mrb[63].mxu0 }
 0x155   :  { %2197 = vst [vmem:[%s3032_s5 + $0xd8] sm:$0xff] %v2149_v47   ;;  %v1354_v55 = vadd.f32 %v2865_v13, %v1267_v48  ;;  %v1270_v56 = vadd.f32 %v2407_v53, %v2333_v28  ;;  %v1261_v57 = vpop.f32.mrb[55].mxu1 }
 0x156   :  { %2196 = vst [vmem:[%s3032_s5 + $0xd0] sm:$0xff] %v2144_v51   ;;  %v1352_v58 = vadd.f32 %v2865_v13, %v1259_v52  ;;  %v1262_v59 = vadd.f32 %v1261_v57, %v684_v32 }
 0x157   :  { %v1355_v60 = vadd.f32 %v2865_v13, %v1270_v56  ;;  %v1418_v62 = vmax.f32 %v1354_v55, 0.0 }
 0x158   :  { %v1353_v61 = vadd.f32 %v2865_v13, %v1262_v59  ;;  %v1416_v1 = vmax.f32 %v1352_v58, 0.0 }
 0x159   :  { %v1419_v63 = vmax.f32 %v1355_v60, 0.0  ;;  %v2350_v0 = vpop.f32.mrb[0].mxu0 }
 0x15a   :  { %v1417_v2 = vmax.f32 %v1353_v61, 0.0  ;;  %v1298_v3 = vadd.f32 %v2350_v0, %v2865_v13  ;;  %v2410_v4 = vpop.f32.mrb[56].mxu1  ;;  %v1034_v5 = vpop.f32.mrb[1].mxu0 }
 0x15b   :  { %v2159_v6 = vpack.c.bf16 %v1419_v63, %v1418_v62  ;;  %v1283_v7 = vadd.f32 %v2410_v4, %v2336_v42  ;;  %v1296_v8 = vadd.f32 %v2865_v13, %v1034_v5  ;;  %v1274_v9 = vpop.f32.mrb[57].mxu1  ;;  %v2351_v10 = vpop.f32.mrb[2].mxu0 }
 0x15c   :  { %v2154_v11 = vpack.c.bf16 %v1417_v2, %v1416_v1  ;;  %v1275_v12 = vadd.f32 %v1274_v9, %v697_v46  ;;  %v1299_v14 = vadd.f32 %v2351_v10, %v2865_v13  ;;  %v2411_v15 = vpop.f32.mrb[58].mxu1  ;;  %v1037_v16 = vpop.f32.mrb[3].mxu0  ;;  %v1362_v21 = vmax.f32 %v1298_v3, 0.0 }
 0x15d   :  { %2199 = vst [vmem:[%s3032_s5 + $0xe8] sm:$0xff] %v2159_v6   ;;  %v1358_v17 = vadd.f32 %v2865_v13, %v1283_v7  ;;  %v1286_v18 = vadd.f32 %v2411_v15, %v2337_v50  ;;  %v1297_v19 = vadd.f32 %v2865_v13, %v1037_v16  ;;  %v1277_v20 = vpop.f32.mrb[59].mxu1  ;;  %v1360_v25 = vmax.f32 %v1296_v8, 0.0 }
 0x15e   :  { %2198 = vst [vmem:[%s3032_s5 + $0xe0] sm:$0xff] %v2154_v11   ;;  %v1356_v22 = vadd.f32 %v2865_v13, %v1275_v12  ;;  %v1363_v23 = vmax.f32 %v1299_v14, 0.0  ;;  %v1278_v24 = vadd.f32 %v1277_v20, %v700_v54 }
 0x15f   :  { %v1359_v26 = vadd.f32 %v2865_v13, %v1286_v18  ;;  %v1361_v27 = vmax.f32 %v1297_v19, 0.0  ;;  %v1422_v30 = vmax.f32 %v1358_v17, 0.0 }
 0x160   :  { %v2019_v28 = vpack.c.bf16 %v1363_v23, %v1362_v21  ;;  %v1357_v29 = vadd.f32 %v2865_v13, %v1278_v24  ;;  %v1420_v33 = vmax.f32 %v1356_v22, 0.0 }
 0x161   :  { %v1423_v31 = vmax.f32 %v1359_v26, 0.0  ;;  %v2014_v32 = vpack.c.bf16 %v1361_v27, %v1360_v25 }
 0x162   :  { %2171 = vst [vmem:[%s3032_s5 + $0x8] sm:$0xff] %v2019_v28   ;;  %v1421_v34 = vmax.f32 %v1357_v29, 0.0 }
 0x163   :  { %v2169_v35 = vpack.c.bf16 %v1423_v31, %v1422_v30  ;;  %2015 = vst [vmem:[%s3032_s5] sm:$0xff] %v2014_v32  }
 0x164   :  { %v2164_v36 = vpack.c.bf16 %v1421_v34, %v1420_v33 }
 0x165   :  { %2201 = vst [vmem:[%s3032_s5 + $0xf8] sm:$0xff] %v2169_v35  }
 0x166   :  { %2200 = vst [vmem:[%s3032_s5 + $0xf0] sm:$0xff] %v2164_v36  }

// kernel: _lambda_.27
= control target key start
LH: loop header
LB: loop body
LE: loop exit
PB: predicated region body
PF: predicated region fallthrough
CT: control target
= control target key end

     0   :  { %vm285_vm0 = vcmask 588800   ;;  %vm382_vm1 = vcmask 1043456   ;;  %s2636_s1 = inlined_call_operand.vmem [shape: bf16[72,128], index: 1, kind: input, shape index: {}]   ;;  %s2637_s0 = inlined_call_operand.vmem [shape: bf16[512,72], index: 0, kind: input, shape index: {}]   ;;  %s2638_s3 = inlined_call_operand.vmem [shape: bf16[512,128], index: 3, kind: input, shape index: {}]   ;;  %s2639_s2 = inlined_call_operand.vmem [shape: f32[1,128], index: 2, kind: input, shape index: {}]   ;;  %s2640_s4 = inlined_call_operand.vmem [shape: bf16[512,128], index: 4, kind: output, shape index: {}]  }
   0x1   :  { %v1926_v0 = vld [vmem:[%s2636_s1] sm:$0xff]   ;;  %v1927_v1 = vld [vmem:[%s2636_s1 + $0x8] sm:$0xff]   ;;  %v1928_v2 = vld [vmem:[%s2636_s1 + $0x10] sm:$0xff]  }
   0x2   :  { %1840 = vmatprep.subr.bf16.mxu0 %v1926_v0  ;;  %1914 = vmatprep.subr.bf16.mxu1 %v1926_v0  ;;  %v1931_v3 = vld [vmem:[%s2637_s0] sm:$0xff]   ;;  %v1929_v5 = vld [vmem:[%s2636_s1 + $0x18] sm:$0xff]   ;;  %v1933_v8 = vld [vmem:[%s2637_s0 + $0x8] sm:$0xff]  }
   0x3   :  { %1841 = vmatpush3.bf16.msra.mxu0 %v1926_v0  ;;  %1919 = vmatpush3.bf16.msra.mxu1 %v1926_v0  ;;  %v1932_v4 = vld [vmem:[%s2637_s0 + $0x80] sm:$0xff]   ;;  %v1934_v9 = vld [vmem:[%s2637_s0 + $0x88] sm:$0xff]   ;;  %v1935_v10 = vld [vmem:[%s2637_s0 + $0x10] sm:$0xff]  }
   0x4   :  { %1842 = vmatprep.subr.bf16.mxu0 %v1927_v1  ;;  %1915 = vmatprep.subr.bf16.mxu1 %v1927_v1  ;;  %v1930_v6 = vld [vmem:[%s2636_s1 + $0x20] ss:$0 sps:$4 sm:$0xff]   ;;  %v1936_v11 = vld [vmem:[%s2637_s0 + $0x90] sm:$0xff]   ;;  %v1937_v12 = vld [vmem:[%s2637_s0 + $0x18] sm:$0xff]  }
   0x5   :  { %1850 = vmatprep.mubr.msk.bf16.mxu0 %vm285_vm0, %v1931_v3  ;;  %1882 = vmatprep.mubr.msk.bf16.mxu1 %vm285_vm0, %v1932_v4  ;;  %v384_v7 = vsel %vm382_vm1, %v1930_v6, 0  ;;  %v1938_v13 = vld [vmem:[%s2637_s0 + $0x98] sm:$0xff]   ;;  %v1939_v14 = vld [vmem:[%s2637_s0 + $0x20] sm:$0xff]   ;;  %v1941_v16 = vld [vmem:[%s2637_s0 + $0x28] sm:$0xff]  }
   0x6   :  { %v1940_v15 = vld [vmem:[%s2637_s0 + $0xa0] sm:$0xff]   ;;  %v1942_v17 = vld [vmem:[%s2637_s0 + $0xa8] sm:$0xff]   ;;  %v1943_v18 = vld [vmem:[%s2637_s0 + $0x30] sm:$0xff]  }
   0x7   :  { %1843 = vmatpush3.bf16.msra.mxu0 %v1927_v1  ;;  %1920 = vmatpush3.bf16.msra.mxu1 %v1927_v1  ;;  %v1944_v19 = vld [vmem:[%s2637_s0 + $0xb0] sm:$0xff]   ;;  %v1945_v20 = vld [vmem:[%s2637_s0 + $0x38] sm:$0xff]   ;;  %v1947_v22 = vld [vmem:[%s2637_s0 + $0x40] sm:$0xff]  }
   0x8   :  { %1844 = vmatprep.subr.bf16.mxu0 %v1928_v2  ;;  %1916 = vmatprep.subr.bf16.mxu1 %v1928_v2  ;;  %v1946_v21 = vld [vmem:[%s2637_s0 + $0xb8] sm:$0xff]   ;;  %v1948_v23 = vld [vmem:[%s2637_s0 + $0xc0] sm:$0xff]   ;;  %v1949_v24 = vld [vmem:[%s2637_s0 + $0x48] sm:$0xff]  }
   0x9   :  { %v1950_v25 = vld [vmem:[%s2637_s0 + $0xc8] sm:$0xff]   ;;  %v1951_v26 = vld [vmem:[%s2637_s0 + $0x50] sm:$0xff]   ;;  %v1953_v28 = vld [vmem:[%s2637_s0 + $0x58] sm:$0xff]  }
   0xa   :  { %v1952_v27 = vld [vmem:[%s2637_s0 + $0xd0] sm:$0xff]   ;;  %v1954_v29 = vld [vmem:[%s2637_s0 + $0xd8] sm:$0xff]   ;;  %v1955_v30 = vld [vmem:[%s2637_s0 + $0x60] sm:$0xff]  }
   0xb   :  { %1845 = vmatpush3.bf16.msra.mxu0 %v1928_v2  ;;  %1921 = vmatpush3.bf16.msra.mxu1 %v1928_v2  ;;  %v1956_v31 = vld [vmem:[%s2637_s0 + $0xe0] sm:$0xff]   ;;  %v1957_v32 = vld [vmem:[%s2637_s0 + $0x68] sm:$0xff]   ;;  %v1959_v34 = vld [vmem:[%s2637_s0 + $0x70] sm:$0xff]  }
   0xc   :  { %1846 = vmatprep.subr.bf16.mxu0 %v1929_v5  ;;  %1917 = vmatprep.subr.bf16.mxu1 %v1929_v5  ;;  %v1958_v33 = vld [vmem:[%s2637_s0 + $0xe8] sm:$0xff]   ;;  %v1960_v35 = vld [vmem:[%s2637_s0 + $0xf0] sm:$0xff]   ;;  %v1961_v36 = vld [vmem:[%s2637_s0 + $0x78] sm:$0xff]  }
   0xd   :  { %v1962_v37 = vld [vmem:[%s2637_s0 + $0xf8] sm:$0xff]   ;;  %v2134_v38 = vld [vmem:[%s2638_s3 + $0x8] sm:$0xff]   ;;  %v2144_v40 = vld [vmem:[%s2638_s3] sm:$0xff]  }
   0xe   :  { %v2139_v39 = vld [vmem:[%s2638_s3 + $0x88] sm:$0xff]   ;;  %v2149_v41 = vld [vmem:[%s2638_s3 + $0x80] sm:$0xff]   ;;  %v2154_v42 = vld [vmem:[%s2638_s3 + $0x18] sm:$0xff]   ;;  %v1459_v46 = vunpack.c.l.bf16 %v2134_v38  ;;  %v1455_v48 = vunpack.c.l.bf16 %v2144_v40  ;;  %v1460_v51 = vunpack.c.h.bf16 %v2134_v38  ;;  %v1456_v53 = vunpack.c.h.bf16 %v2144_v40 }
   0xf   :  { %1847 = vmatpush3.bf16.msra.mxu0 %v1929_v5  ;;  %1922 = vmatpush3.bf16.msra.mxu1 %v1929_v5  ;;  %v2159_v43 = vld [vmem:[%s2638_s3 + $0x98] sm:$0xff]   ;;  %v2164_v44 = vld [vmem:[%s2638_s3 + $0x10] sm:$0xff]   ;;  %v1523_v47 = vunpack.c.l.bf16 %v2139_v39  ;;  %v1519_v49 = vunpack.c.l.bf16 %v2149_v41  ;;  %v2178_v50 = vld [vmem:[%s2638_s3 + $0x28] sm:$0xff]   ;;  %v1524_v52 = vunpack.c.h.bf16 %v2139_v39  ;;  %v1520_v54 = vunpack.c.h.bf16 %v2149_v41 }
  0x10   :  { %1924 = vmatprep.subr.msk.bf16.mxu0 %vm382_vm1, %v1930_v6  ;;  %1925 = vmatprep.subr.msk.bf16.mxu1 %vm382_vm1, %v1930_v6  ;;  %v2169_v45 = vld [vmem:[%s2638_s3 + $0x90] sm:$0xff]   ;;  %v2187_v55 = vld [vmem:[%s2638_s3 + $0xa8] sm:$0xff]   ;;  %v2192_v56 = vld [vmem:[%s2638_s3 + $0x20] sm:$0xff]   ;;  %v1467_v58 = vunpack.c.l.bf16 %v2154_v42  ;;  %v1531_v59 = vunpack.c.l.bf16 %v2159_v43  ;;  %v1463_v60 = vunpack.c.l.bf16 %v2164_v44  ;;  %v1468_v63 = vunpack.c.h.bf16 %v2154_v42 }
  0x11   :  { %v2197_v57 = vld [vmem:[%s2638_s3 + $0xa0] sm:$0xff]   ;;  %v1527_v61 = vunpack.c.l.bf16 %v2169_v45  ;;  %v2206_v62 = vld [vmem:[%s2638_s3 + $0x38] sm:$0xff]   ;;  %v1532_v0 = vunpack.c.h.bf16 %v2159_v43  ;;  %v1464_v1 = vunpack.c.h.bf16 %v2164_v44  ;;  %v1528_v2 = vunpack.c.h.bf16 %v2169_v45  ;;  %v2220_v4 = vld [vmem:[%s2638_s3 + $0x30] sm:$0xff]  }
  0x12   :  { %v2215_v3 = vld [vmem:[%s2638_s3 + $0xb8] sm:$0xff]   ;;  %v2225_v5 = vld [vmem:[%s2638_s3 + $0xb0] sm:$0xff]   ;;  %v1475_v6 = vunpack.c.l.bf16 %v2178_v50 }
  0x13   :  { %1849 = vmatpush3.bf16.msra.mxu0 %v384_v7  ;;  %1923 = vmatpush3.bf16.msra.mxu1 %v384_v7  ;;  %v1539_v7 = vunpack.c.l.bf16 %v2187_v55 }
  0x16   :  { %1851 = vmatmul.mubr.msk.bf16.vlgmr.msra.gmra.mrb[0].mxu0 %vm285_vm0, %v1933_v8  ;;  %1883 = vmatmul.mubr.msk.bf16.vlgmr.msra.gmra.mrb[0].mxu1 %vm285_vm0, %v1934_v9  ;;  %v1471_v8 = vunpack.c.l.bf16 %v2192_v56  ;;  %v1535_v9 = vunpack.c.l.bf16 %v2197_v57 }
  0x17   :  { %1854 = vmatprep.mubr.msk.bf16.mxu0 %vm285_vm0, %v1935_v10  ;;  %1886 = vmatprep.mubr.msk.bf16.mxu1 %vm285_vm0, %v1936_v11  ;;  %v2234_v10 = vld [vmem:[%s2639_s2] ss:$0 sm:$0xff]  ;;  %v1476_v11 = vunpack.c.h.bf16 %v2178_v50 }
  0x1e   :  { %1855 = vmatmul.mubr.msk.bf16.gmra.mrb[4].mxu0 %vm285_vm0, %v1937_v12  ;;  %1887 = vmatmul.mubr.msk.bf16.gmra.mrb[4].mxu1 %vm285_vm0, %v1938_v13  ;;  %v1540_v12 = vunpack.c.h.bf16 %v2187_v55  ;;  %v1472_v13 = vunpack.c.h.bf16 %v2192_v56 }
  0x1f   :  { %1858 = vmatprep.mubr.msk.bf16.mxu0 %vm285_vm0, %v1939_v14  ;;  %1890 = vmatprep.mubr.msk.bf16.mxu1 %vm285_vm0, %v1940_v15  ;;  %v1536_v14 = vunpack.c.h.bf16 %v2197_v57  ;;  %v2243_v15 = vld [vmem:[%s2638_s3 + $0x48] sm:$0xff]  }
  0x26   :  { %1859 = vmatmul.mubr.msk.bf16.gmra.mrb[8].mxu0 %vm285_vm0, %v1941_v16  ;;  %1891 = vmatmul.mubr.msk.bf16.gmra.mrb[8].mxu1 %vm285_vm0, %v1942_v17  ;;  %v2248_v16 = vld [vmem:[%s2638_s3 + $0xc8] sm:$0xff]   ;;  %v1483_v17 = vunpack.c.l.bf16 %v2206_v62 }
  0x27   :  { %1862 = vmatprep.mubr.msk.bf16.mxu0 %vm285_vm0, %v1943_v18  ;;  %1894 = vmatprep.mubr.msk.bf16.mxu1 %vm285_vm0, %v1944_v19  ;;  %v1547_v18 = vunpack.c.l.bf16 %v2215_v3 }
  0x2e   :  { %1863 = vmatmul.mubr.msk.bf16.gmra.mrb[12].mxu0 %vm285_vm0, %v1945_v20  ;;  %1895 = vmatmul.mubr.msk.bf16.gmra.mrb[12].mxu1 %vm285_vm0, %v1946_v21  ;;  %v2257_v21 = vld [vmem:[%s2638_s3 + $0x40] sm:$0xff]  }
  0x2f   :  { %1866 = vmatprep.mubr.msk.bf16.mxu0 %vm285_vm0, %v1947_v22  ;;  %1898 = vmatprep.mubr.msk.bf16.mxu1 %vm285_vm0, %v1948_v23  ;;  %v2262_v22 = vld [vmem:[%s2638_s3 + $0xc0] sm:$0xff]  }
  0x36   :  { %1867 = vmatmul.mubr.msk.bf16.gmra.mrb[16].mxu0 %vm285_vm0, %v1949_v24  ;;  %1899 = vmatmul.mubr.msk.bf16.gmra.mrb[16].mxu1 %vm285_vm0, %v1950_v25 }
  0x37   :  { %1870 = vmatprep.mubr.msk.bf16.mxu0 %vm285_vm0, %v1951_v26  ;;  %1902 = vmatprep.mubr.msk.bf16.mxu1 %vm285_vm0, %v1952_v27 }
  0x3e   :  { %1871 = vmatmul.mubr.msk.bf16.gmra.mrb[20].mxu0 %vm285_vm0, %v1953_v28  ;;  %1903 = vmatmul.mubr.msk.bf16.gmra.mrb[20].mxu1 %vm285_vm0, %v1954_v29  ;;  %v1551_v28 = vunpack.c.l.bf16 %v2262_v22 }
  0x3f   :  { %1874 = vmatprep.mubr.msk.bf16.mxu0 %vm285_vm0, %v1955_v30  ;;  %1906 = vmatprep.mubr.msk.bf16.mxu1 %vm285_vm0, %v1956_v31 }
  0x46   :  { %1875 = vmatmul.mubr.msk.bf16.gmra.mrb[24].mxu0 %vm285_vm0, %v1957_v32  ;;  %1907 = vmatmul.mubr.msk.bf16.gmra.mrb[24].mxu1 %vm285_vm0, %v1958_v33 }
  0x47   :  { %1878 = vmatprep.mubr.msk.bf16.mxu0 %vm285_vm0, %v1959_v34  ;;  %1910 = vmatprep.mubr.msk.bf16.mxu1 %vm285_vm0, %v1960_v35 }
  0x4e   :  { %1879 = vmatmul.mubr.msk.bf16.gmra.mrb[28].mxu0 %vm285_vm0, %v1961_v36  ;;  %1911 = vmatmul.mubr.msk.bf16.gmra.mrb[28].mxu1 %vm285_vm0, %v1962_v37 }
  0xe9   :  { %v1852_v23 = vpop.f32.mrb[0].mxu0  ;;  %v1884_v24 = vpop.f32.mrb[0].mxu1 }
  0xea   :  { %v429_v29 = vadd.f32 %v1852_v23, %v2234_v10  ;;  %v557_v30 = vadd.f32 %v1884_v24, %v2234_v10  ;;  %v420_v31 = vpop.f32.mrb[1].mxu0  ;;  %v548_v32 = vpop.f32.mrb[1].mxu1 }
  0xeb   :  { %v421_v35 = vadd.f32 %v2234_v10, %v420_v31  ;;  %v549_v36 = vadd.f32 %v2234_v10, %v548_v32  ;;  %v1853_v37 = vpop.f32.mrb[2].mxu0  ;;  %v1885_v26 = vpop.f32.mrb[2].mxu1 }
  0xec   :  { %v805_v25 = vadd.f32 %v1459_v46, %v429_v29  ;;  %v837_v23 = vadd.f32 %v1523_v47, %v557_v30  ;;  %v432_v24 = vadd.f32 %v1853_v37, %v2234_v10  ;;  %v560_v20 = vadd.f32 %v1885_v26, %v2234_v10  ;;  %v423_v19 = vpop.f32.mrb[3].mxu0  ;;  %v551_v33 = vpop.f32.mrb[3].mxu1 }
  0xed   :  { %v803_v34 = vadd.f32 %v1455_v48, %v421_v35  ;;  %v835_v31 = vadd.f32 %v1519_v49, %v549_v36  ;;  %v424_v32 = vadd.f32 %v2234_v10, %v423_v19  ;;  %v552_v27 = vadd.f32 %v2234_v10, %v551_v33 }
  0xee   :  { %v806_v46 = vadd.f32 %v1460_v51, %v432_v24  ;;  %v838_v47 = vadd.f32 %v1524_v52, %v560_v20  ;;  %v1492_v26 = vunpack.c.h.bf16 %v2243_v15  ;;  %v1488_v19 = vunpack.c.h.bf16 %v2257_v21 }
  0xef   :  { %v804_v48 = vadd.f32 %v1456_v53, %v424_v32  ;;  %v836_v49 = vadd.f32 %v1520_v54, %v552_v27  ;;  %v869_v33 = vmax.f32 %v805_v25, 0.0  ;;  %v901_v38 = vmax.f32 %v837_v23, 0.0 }
  0xf0   :  { %v870_v51 = vmax.f32 %v806_v46, 0.0  ;;  %v902_v35 = vmax.f32 %v838_v47, 0.0  ;;  %v867_v39 = vmax.f32 %v803_v34, 0.0  ;;  %v899_v52 = vmax.f32 %v835_v31, 0.0  ;;  %v2303_v46 = vld [vmem:[%s2638_s3 + $0x58] sm:$0xff]  }
  0xf1   :  { %v868_v20 = vmax.f32 %v804_v48, 0.0  ;;  %v900_v36 = vmax.f32 %v836_v49, 0.0  ;;  %v1856_v37 = vpop.f32.mrb[4].mxu0  ;;  %v1888_v24 = vpop.f32.mrb[4].mxu1  ;;  %v2308_v47 = vld [vmem:[%s2638_s3 + $0xd8] sm:$0xff]  }
  0xf2   :  { %v1589_v29 = vpack.c.bf16 %v870_v51, %v869_v33  ;;  %v1669_v40 = vpack.c.bf16 %v902_v35, %v901_v38  ;;  %v445_v53 = vadd.f32 %v1856_v37, %v2234_v10  ;;  %v573_v41 = vadd.f32 %v1888_v24, %v2234_v10  ;;  %v436_v54 = vpop.f32.mrb[5].mxu0  ;;  %v564_v27 = vpop.f32.mrb[5].mxu1 }
  0xf3   :  { %v1584_v32 = vpack.c.bf16 %v868_v20, %v867_v39  ;;  %v1664_v30 = vpack.c.bf16 %v900_v36, %v899_v52  ;;  %v437_v25 = vadd.f32 %v2234_v10, %v436_v54  ;;  %v565_v23 = vadd.f32 %v2234_v10, %v564_v27  ;;  %v1857_v34 = vpop.f32.mrb[6].mxu0  ;;  %v1889_v31 = vpop.f32.mrb[6].mxu1  ;;  %v2330_v39 = vld [vmem:[%s2638_s3 + $0xd0] sm:$0xff]  }
  0xf4   :  { %1772 = vst [vmem:[%s2640_s4 + $0x8] sm:$0xff] %v1589_v29   ;;  %1788 = vst [vmem:[%s2640_s4 + $0x88] sm:$0xff] %v1669_v40   ;;  %v809_v48 = vadd.f32 %v1467_v58, %v445_v53  ;;  %v841_v49 = vadd.f32 %v1531_v59, %v573_v41  ;;  %v448_v33 = vadd.f32 %v1857_v34, %v2234_v10  ;;  %v439_v51 = vpop.f32.mrb[7].mxu0  ;;  %v567_v35 = vpop.f32.mrb[7].mxu1  ;;  %v2325_v29 = vld [vmem:[%s2638_s3 + $0x50] sm:$0xff]   ;;  %v1499_v24 = vunpack.c.l.bf16 %v2303_v46 }
  0xf5   :  { %v576_v38 = vadd.f32 %v1889_v31, %v2234_v10  ;;  %1585 = vst [vmem:[%s2640_s4] sm:$0xff] %v1584_v32   ;;  %1787 = vst [vmem:[%s2640_s4 + $0x80] sm:$0xff] %v1664_v30   ;;  %v807_v58 = vadd.f32 %v1463_v60, %v437_v25  ;;  %v839_v59 = vadd.f32 %v1527_v61, %v565_v23  ;;  %v1563_v30 = vunpack.c.l.bf16 %v2308_v47 }
  0xf6   :  { %v440_v52 = vadd.f32 %v2234_v10, %v439_v51  ;;  %v568_v20 = vadd.f32 %v2234_v10, %v567_v35  ;;  %v810_v36 = vadd.f32 %v1468_v63, %v448_v33  ;;  %v1495_v40 = vunpack.c.l.bf16 %v2325_v29 }
  0xf7   :  { %v842_v37 = vadd.f32 %v1532_v0, %v576_v38  ;;  %v1559_v53 = vunpack.c.l.bf16 %v2330_v39  ;;  %v873_v41 = vmax.f32 %v809_v48, 0.0  ;;  %v905_v42 = vmax.f32 %v841_v49, 0.0 }
  0xf8   :  { %v808_v60 = vadd.f32 %v1464_v1, %v440_v52  ;;  %v840_v61 = vadd.f32 %v1528_v2, %v568_v20  ;;  %v874_v63 = vmax.f32 %v810_v36, 0.0  ;;  %v871_v43 = vmax.f32 %v807_v58, 0.0 }
  0xf9   :  { %v906_v54 = vmax.f32 %v842_v37, 0.0  ;;  %v903_v0 = vmax.f32 %v839_v59, 0.0  ;;  %v1860_v25 = vpop.f32.mrb[8].mxu0  ;;  %v1892_v23 = vpop.f32.mrb[8].mxu1 }
  0xfa   :  { %v872_v27 = vmax.f32 %v808_v60, 0.0  ;;  %v904_v32 = vmax.f32 %v840_v61, 0.0  ;;  %v1599_v34 = vpack.c.bf16 %v874_v63, %v873_v41  ;;  %v461_v1 = vadd.f32 %v1860_v25, %v2234_v10  ;;  %v452_v2 = vpop.f32.mrb[9].mxu0  ;;  %v580_v31 = vpop.f32.mrb[9].mxu1 }
  0xfb   :  { %v1679_v44 = vpack.c.bf16 %v906_v54, %v905_v42  ;;  %v589_v45 = vadd.f32 %v1892_v23, %v2234_v10  ;;  %v453_v48 = vadd.f32 %v2234_v10, %v452_v2  ;;  %v581_v49 = vadd.f32 %v2234_v10, %v580_v31  ;;  %v1861_v51 = vpop.f32.mrb[10].mxu0  ;;  %v1893_v35 = vpop.f32.mrb[10].mxu1 }
  0xfc   :  { %v1594_v33 = vpack.c.bf16 %v872_v27, %v871_v43  ;;  %v1674_v38 = vpack.c.bf16 %v904_v32, %v903_v0  ;;  %1774 = vst [vmem:[%s2640_s4 + $0x18] sm:$0xff] %v1599_v34   ;;  %v813_v58 = vadd.f32 %v1475_v6, %v461_v1  ;;  %v464_v52 = vadd.f32 %v1861_v51, %v2234_v10  ;;  %v455_v36 = vpop.f32.mrb[11].mxu0  ;;  %v583_v37 = vpop.f32.mrb[11].mxu1  ;;  %v2403_v51 = vld [vmem:[%s2638_s3 + $0x68] sm:$0xff]  }
  0xfd   :  { %1790 = vst [vmem:[%s2640_s4 + $0x98] sm:$0xff] %v1679_v44   ;;  %v845_v59 = vadd.f32 %v1539_v7, %v589_v45  ;;  %v592_v20 = vadd.f32 %v1893_v35, %v2234_v10  ;;  %v811_v6 = vadd.f32 %v1471_v8, %v453_v48  ;;  %v843_v7 = vadd.f32 %v1535_v9, %v581_v49  ;;  %v2408_v35 = vld [vmem:[%s2638_s3 + $0xe8] sm:$0xff]  }
  0xfe   :  { %1773 = vst [vmem:[%s2640_s4 + $0x10] sm:$0xff] %v1594_v33   ;;  %1789 = vst [vmem:[%s2640_s4 + $0x90] sm:$0xff] %v1674_v38   ;;  %v456_v60 = vadd.f32 %v2234_v10, %v455_v36  ;;  %v584_v61 = vadd.f32 %v2234_v10, %v583_v37  ;;  %v814_v41 = vadd.f32 %v1476_v11, %v464_v52  ;;  %v1500_v63 = vunpack.c.h.bf16 %v2303_v46 }
  0xff   :  { %v846_v42 = vadd.f32 %v1540_v12, %v592_v20  ;;  %v1564_v54 = vunpack.c.h.bf16 %v2308_v47  ;;  %v1496_v43 = vunpack.c.h.bf16 %v2325_v29  ;;  %v1560_v0 = vunpack.c.h.bf16 %v2330_v39 }
 0x100   :  { %v812_v8 = vadd.f32 %v1472_v13, %v456_v60  ;;  %v844_v9 = vadd.f32 %v1536_v14, %v584_v61  ;;  %v877_v27 = vmax.f32 %v813_v58, 0.0  ;;  %v909_v50 = vmax.f32 %v845_v59, 0.0 }
 0x101   :  { %v878_v11 = vmax.f32 %v814_v41, 0.0  ;;  %v910_v32 = vmax.f32 %v846_v42, 0.0  ;;  %v875_v55 = vmax.f32 %v811_v6, 0.0  ;;  %v907_v12 = vmax.f32 %v843_v7, 0.0  ;;  %v1864_v34 = vpop.f32.mrb[12].mxu0  ;;  %v1896_v44 = vpop.f32.mrb[12].mxu1 }
 0x102   :  { %v876_v25 = vmax.f32 %v812_v8, 0.0  ;;  %v908_v23 = vmax.f32 %v844_v9, 0.0  ;;  %v477_v13 = vadd.f32 %v1864_v34, %v2234_v10  ;;  %v605_v57 = vadd.f32 %v1896_v44, %v2234_v10  ;;  %v468_v14 = vpop.f32.mrb[13].mxu0  ;;  %v596_v45 = vpop.f32.mrb[13].mxu1  ;;  %v2425_v6 = vld [vmem:[%s2638_s3 + $0x60] sm:$0xff]  }
 0x103   :  { %v1609_v1 = vpack.c.bf16 %v878_v11, %v877_v27  ;;  %v1689_v56 = vpack.c.bf16 %v910_v32, %v909_v50  ;;  %v469_v33 = vadd.f32 %v2234_v10, %v468_v14  ;;  %v597_v38 = vadd.f32 %v2234_v10, %v596_v45  ;;  %v1865_v48 = vpop.f32.mrb[14].mxu0  ;;  %v1897_v49 = vpop.f32.mrb[14].mxu1  ;;  %v2430_v7 = vld [vmem:[%s2638_s3 + $0xe0] sm:$0xff]  }
 0x104   :  { %v1604_v2 = vpack.c.bf16 %v876_v25, %v875_v55  ;;  %v1684_v31 = vpack.c.bf16 %v908_v23, %v907_v12  ;;  %v817_v58 = vadd.f32 %v1483_v17, %v477_v13  ;;  %v849_v59 = vadd.f32 %v1547_v18, %v605_v57  ;;  %v471_v36 = vpop.f32.mrb[15].mxu0  ;;  %v599_v37 = vpop.f32.mrb[15].mxu1 }
 0x105   :  { %1776 = vst [vmem:[%s2640_s4 + $0x28] sm:$0xff] %v1609_v1   ;;  %1792 = vst [vmem:[%s2640_s4 + $0xa8] sm:$0xff] %v1689_v56   ;;  %v480_v52 = vadd.f32 %v1865_v48, %v2234_v10  ;;  %v608_v20 = vadd.f32 %v1897_v49, %v2234_v10  ;;  %v2641_v17 = vunpack.c.l.bf16 %v2220_v4  ;;  %v2642_v60 = vunpack.c.l.bf16 %v2225_v5 }
 0x106   :  { %1775 = vst [vmem:[%s2640_s4 + $0x20] sm:$0xff] %v1604_v2   ;;  %1791 = vst [vmem:[%s2640_s4 + $0xa0] sm:$0xff] %v1684_v31   ;;  %v472_v41 = vadd.f32 %v2234_v10, %v471_v36  ;;  %v600_v42 = vadd.f32 %v2234_v10, %v599_v37  ;;  %v2643_v8 = vunpack.c.h.bf16 %v2206_v62  ;;  %v2644_v27 = vunpack.c.h.bf16 %v2215_v3 }
 0x107   :  { %v815_v18 = vadd.f32 %v2641_v17, %v469_v33  ;;  %v847_v61 = vadd.f32 %v2642_v60, %v597_v38  ;;  %v1507_v11 = vunpack.c.l.bf16 %v2403_v51  ;;  %v1571_v32 = vunpack.c.l.bf16 %v2408_v35 }
 0x108   :  { %v818_v9 = vadd.f32 %v2643_v8, %v480_v52  ;;  %v850_v50 = vadd.f32 %v2644_v27, %v608_v20  ;;  %v2645_v55 = vunpack.c.h.bf16 %v2220_v4  ;;  %v2646_v25 = vunpack.c.h.bf16 %v2225_v5 }
 0x109   :  { %v1503_v34 = vunpack.c.l.bf16 %v2425_v6  ;;  %v1567_v44 = vunpack.c.l.bf16 %v2430_v7  ;;  %v881_v1 = vmax.f32 %v817_v58, 0.0  ;;  %v913_v62 = vmax.f32 %v849_v59, 0.0  ;;  %v1868_v2 = vpop.f32.mrb[16].mxu0  ;;  %v1900_v31 = vpop.f32.mrb[16].mxu1 }
 0x10a   :  { %v816_v12 = vadd.f32 %v2645_v55, %v472_v41  ;;  %v848_v23 = vadd.f32 %v2646_v25, %v600_v42  ;;  %v882_v56 = vmax.f32 %v818_v9, 0.0  ;;  %v914_v13 = vmax.f32 %v850_v50, 0.0  ;;  %v484_v48 = vpop.f32.mrb[17].mxu0  ;;  %v612_v49 = vpop.f32.mrb[17].mxu1 }
 0x10b   :  { %v879_v3 = vmax.f32 %v815_v18, 0.0  ;;  %v911_v57 = vmax.f32 %v847_v61, 0.0  ;;  %v493_v38 = vadd.f32 %v1868_v2, %v2234_v10  ;;  %v621_v5 = vadd.f32 %v1900_v31, %v2234_v10  ;;  %v1869_v36 = vpop.f32.mrb[18].mxu0  ;;  %v1901_v37 = vpop.f32.mrb[18].mxu1 }
 0x10c   :  { %v880_v14 = vmax.f32 %v816_v12, 0.0  ;;  %v912_v45 = vmax.f32 %v848_v23, 0.0  ;;  %v1619_v33 = vpack.c.bf16 %v882_v56, %v881_v1  ;;  %v1699_v4 = vpack.c.bf16 %v914_v13, %v913_v62  ;;  %v487_v8 = vpop.f32.mrb[19].mxu0  ;;  %v615_v9 = vpop.f32.mrb[19].mxu1 }
 0x10d   :  { %v485_v58 = vadd.f32 %v2234_v10, %v484_v48  ;;  %v613_v59 = vadd.f32 %v2234_v10, %v612_v49  ;;  %v2647_v17 = vunpack.c.l.bf16 %v2243_v15  ;;  %v2648_v60 = vunpack.c.l.bf16 %v2248_v16 }
 0x10e   :  { %v1614_v52 = vpack.c.bf16 %v880_v14, %v879_v3  ;;  %v1694_v20 = vpack.c.bf16 %v912_v45, %v911_v57  ;;  %1778 = vst [vmem:[%s2640_s4 + $0x38] sm:$0xff] %v1619_v33   ;;  %1794 = vst [vmem:[%s2640_s4 + $0xb8] sm:$0xff] %v1699_v4   ;;  %v496_v41 = vadd.f32 %v1869_v36, %v2234_v10  ;;  %v2649_v27 = vunpack.c.l.bf16 %v2257_v21 }
 0x10f   :  { %v821_v18 = vadd.f32 %v2647_v17, %v493_v38  ;;  %v853_v61 = vadd.f32 %v2648_v60, %v621_v5  ;;  %v624_v42 = vadd.f32 %v1901_v37, %v2234_v10  ;;  %v851_v55 = vadd.f32 %v1551_v28, %v613_v59  ;;  %v2503_v60 = vld [vmem:[%s2638_s3 + $0x78] sm:$0xff]  }
 0x110   :  { %1777 = vst [vmem:[%s2640_s4 + $0x30] sm:$0xff] %v1614_v52   ;;  %1793 = vst [vmem:[%s2640_s4 + $0xb0] sm:$0xff] %v1694_v20   ;;  %v819_v50 = vadd.f32 %v2649_v27, %v485_v58  ;;  %v488_v12 = vadd.f32 %v2234_v10, %v487_v8  ;;  %v616_v25 = vadd.f32 %v2234_v10, %v615_v9  ;;  %v2650_v1 = vunpack.c.h.bf16 %v2248_v16 }
 0x111   :  { %v822_v23 = vadd.f32 %v1492_v26, %v496_v41  ;;  %v1508_v56 = vunpack.c.h.bf16 %v2403_v51  ;;  %v1572_v13 = vunpack.c.h.bf16 %v2408_v35  ;;  %v2651_v57 = vunpack.c.h.bf16 %v2262_v22  ;;  %v1872_v5 = vpop.f32.mrb[20].mxu0  ;;  %v1904_v48 = vpop.f32.mrb[20].mxu1 }
 0x112   :  { %v854_v62 = vadd.f32 %v2650_v1, %v624_v42  ;;  %v820_v3 = vadd.f32 %v1488_v19, %v488_v12  ;;  %v1504_v14 = vunpack.c.h.bf16 %v2425_v6  ;;  %v1568_v45 = vunpack.c.h.bf16 %v2430_v7  ;;  %v500_v52 = vpop.f32.mrb[21].mxu0  ;;  %v628_v20 = vpop.f32.mrb[21].mxu1  ;;  %v2530_v12 = vld [vmem:[%s2638_s3 + $0xf0] sm:$0xff]  }
 0x113   :  { %v852_v28 = vadd.f32 %v2651_v57, %v616_v25  ;;  %v885_v2 = vmax.f32 %v821_v18, 0.0  ;;  %v917_v15 = vmax.f32 %v853_v61, 0.0  ;;  %v886_v26 = vmax.f32 %v822_v23, 0.0  ;;  %v1873_v17 = vpop.f32.mrb[22].mxu0  ;;  %v1905_v18 = vpop.f32.mrb[22].mxu1  ;;  %v2508_v61 = vld [vmem:[%s2638_s3 + $0xf8] sm:$0xff]  }
 0x114   :  { %v918_v31 = vmax.f32 %v854_v62, 0.0  ;;  %v883_v16 = vmax.f32 %v819_v50, 0.0  ;;  %v915_v33 = vmax.f32 %v851_v55, 0.0  ;;  %v884_v4 = vmax.f32 %v820_v3, 0.0  ;;  %v503_v27 = vpop.f32.mrb[23].mxu0  ;;  %v631_v50 = vpop.f32.mrb[23].mxu1 }
 0x115   :  { %v916_v38 = vmax.f32 %v852_v28, 0.0  ;;  %v1629_v49 = vpack.c.bf16 %v886_v26, %v885_v2  ;;  %v509_v19 = vadd.f32 %v1872_v5, %v2234_v10  ;;  %v637_v22 = vadd.f32 %v1904_v48, %v2234_v10  ;;  %v2525_v55 = vld [vmem:[%s2638_s3 + $0x70] sm:$0xff]  }
 0x116   :  { %v1709_v21 = vpack.c.bf16 %v918_v31, %v917_v15  ;;  %v1624_v58 = vpack.c.bf16 %v884_v4, %v883_v16  ;;  %v501_v36 = vadd.f32 %v2234_v10, %v500_v52  ;;  %v629_v37 = vadd.f32 %v2234_v10, %v628_v20 }
 0x117   :  { %v1704_v59 = vpack.c.bf16 %v916_v38, %v915_v33  ;;  %1780 = vst [vmem:[%s2640_s4 + $0x48] sm:$0xff] %v1629_v49   ;;  %v825_v41 = vadd.f32 %v1499_v24, %v509_v19  ;;  %v857_v42 = vadd.f32 %v1563_v30, %v637_v22  ;;  %v512_v8 = vadd.f32 %v1873_v17, %v2234_v10 }
 0x118   :  { %1796 = vst [vmem:[%s2640_s4 + $0xc8] sm:$0xff] %v1709_v21   ;;  %v640_v9 = vadd.f32 %v1905_v18, %v2234_v10  ;;  %1779 = vst [vmem:[%s2640_s4 + $0x40] sm:$0xff] %v1624_v58   ;;  %v823_v24 = vadd.f32 %v1495_v40, %v501_v36  ;;  %v855_v30 = vadd.f32 %v1559_v53, %v629_v37  ;;  %v1515_v3 = vunpack.c.l.bf16 %v2503_v60 }
 0x119   :  { %1795 = vst [vmem:[%s2640_s4 + $0xc0] sm:$0xff] %v1704_v59   ;;  %v504_v25 = vadd.f32 %v2234_v10, %v503_v27  ;;  %v632_v23 = vadd.f32 %v2234_v10, %v631_v50  ;;  %v826_v1 = vadd.f32 %v1500_v63, %v512_v8  ;;  %v1579_v57 = vunpack.c.l.bf16 %v2508_v61  ;;  %v1876_v33 = vpop.f32.mrb[24].mxu0  ;;  %v1908_v4 = vpop.f32.mrb[24].mxu1 }
 0x11a   :  { %v858_v62 = vadd.f32 %v1564_v54, %v640_v9  ;;  %v1511_v28 = vunpack.c.l.bf16 %v2525_v55  ;;  %v1575_v2 = vunpack.c.l.bf16 %v2530_v12  ;;  %v889_v15 = vmax.f32 %v825_v41, 0.0  ;;  %v644_v5 = vpop.f32.mrb[25].mxu1 }
 0x11b   :  { %v824_v40 = vadd.f32 %v1496_v43, %v504_v25  ;;  %v856_v53 = vadd.f32 %v1560_v0, %v632_v23  ;;  %v921_v46 = vmax.f32 %v857_v42, 0.0  ;;  %v890_v63 = vmax.f32 %v826_v1, 0.0  ;;  %v516_v0 = vpop.f32.mrb[25].mxu0  ;;  %v1909_v52 = vpop.f32.mrb[26].mxu1 }
 0x11c   :  { %v922_v26 = vmax.f32 %v858_v62, 0.0  ;;  %v887_v47 = vmax.f32 %v823_v24, 0.0  ;;  %v919_v54 = vmax.f32 %v855_v30, 0.0  ;;  %v525_v43 = vadd.f32 %v1876_v33, %v2234_v10  ;;  %v1877_v22 = vpop.f32.mrb[26].mxu0  ;;  %v647_v17 = vpop.f32.mrb[27].mxu1 }
 0x11d   :  { %v888_v31 = vmax.f32 %v824_v40, 0.0  ;;  %v920_v16 = vmax.f32 %v856_v53, 0.0  ;;  %v1639_v38 = vpack.c.bf16 %v890_v63, %v889_v15  ;;  %v653_v39 = vadd.f32 %v1908_v4, %v2234_v10  ;;  %v519_v37 = vpop.f32.mrb[27].mxu0 }
 0x11e   :  { %v1719_v29 = vpack.c.bf16 %v922_v26, %v921_v46  ;;  %v517_v21 = vadd.f32 %v2234_v10, %v516_v0  ;;  %v645_v19 = vadd.f32 %v2234_v10, %v644_v5  ;;  %v829_v20 = vadd.f32 %v1507_v11, %v525_v43 }
 0x11f   :  { %v1634_v48 = vpack.c.bf16 %v888_v31, %v887_v47  ;;  %v1714_v49 = vpack.c.bf16 %v920_v16, %v919_v54  ;;  %1782 = vst [vmem:[%s2640_s4 + $0x58] sm:$0xff] %v1639_v38   ;;  %v861_v58 = vadd.f32 %v1571_v32, %v653_v39  ;;  %v528_v59 = vadd.f32 %v1877_v22, %v2234_v10 }
 0x120   :  { %1798 = vst [vmem:[%s2640_s4 + $0xd8] sm:$0xff] %v1719_v29   ;;  %v656_v36 = vadd.f32 %v1909_v52, %v2234_v10  ;;  %v827_v11 = vadd.f32 %v1503_v34, %v517_v21  ;;  %v859_v32 = vadd.f32 %v1567_v44, %v645_v19  ;;  %v520_v18 = vadd.f32 %v2234_v10, %v519_v37 }
 0x121   :  { %1781 = vst [vmem:[%s2640_s4 + $0x50] sm:$0xff] %v1634_v48   ;;  %1797 = vst [vmem:[%s2640_s4 + $0xd0] sm:$0xff] %v1714_v49   ;;  %v648_v41 = vadd.f32 %v2234_v10, %v647_v17  ;;  %v830_v42 = vadd.f32 %v1508_v56, %v528_v59  ;;  %v1516_v9 = vunpack.c.h.bf16 %v2503_v60  ;;  %v1580_v27 = vunpack.c.h.bf16 %v2508_v61  ;;  %v1880_v62 = vpop.f32.mrb[28].mxu0  ;;  %v1912_v40 = vpop.f32.mrb[28].mxu1 }
 0x122   :  { %v862_v8 = vadd.f32 %v1572_v13, %v656_v36  ;;  %v828_v34 = vadd.f32 %v1504_v14, %v520_v18  ;;  %v1512_v50 = vunpack.c.h.bf16 %v2525_v55  ;;  %v1576_v24 = vunpack.c.h.bf16 %v2530_v12  ;;  %v660_v15 = vpop.f32.mrb[29].mxu1 }
 0x123   :  { %v860_v44 = vadd.f32 %v1568_v45, %v648_v41  ;;  %v893_v30 = vmax.f32 %v829_v20, 0.0  ;;  %v925_v51 = vmax.f32 %v861_v58, 0.0  ;;  %v894_v56 = vmax.f32 %v830_v42, 0.0  ;;  %v532_v45 = vpop.f32.mrb[29].mxu0  ;;  %v1913_v31 = vpop.f32.mrb[30].mxu1 }
 0x124   :  { %v926_v25 = vmax.f32 %v862_v8, 0.0  ;;  %v891_v35 = vmax.f32 %v827_v11, 0.0  ;;  %v923_v13 = vmax.f32 %v859_v32, 0.0  ;;  %v892_v23 = vmax.f32 %v828_v34, 0.0  ;;  %v1881_v54 = vpop.f32.mrb[30].mxu0  ;;  %v663_v43 = vpop.f32.mrb[31].mxu1 }
 0x125   :  { %v924_v1 = vmax.f32 %v860_v44, 0.0  ;;  %v1649_v53 = vpack.c.bf16 %v894_v56, %v893_v30  ;;  %v541_v14 = vadd.f32 %v1880_v62, %v2234_v10  ;;  %v669_v7 = vadd.f32 %v1912_v40, %v2234_v10  ;;  %v535_v29 = vpop.f32.mrb[31].mxu0 }
 0x126   :  { %v1729_v6 = vpack.c.bf16 %v926_v25, %v925_v51  ;;  %v1644_v46 = vpack.c.bf16 %v892_v23, %v891_v35  ;;  %v533_v26 = vadd.f32 %v2234_v10, %v532_v45  ;;  %v661_v47 = vadd.f32 %v2234_v10, %v660_v15 }
 0x127   :  { %v1724_v63 = vpack.c.bf16 %v924_v1, %v923_v13  ;;  %1784 = vst [vmem:[%s2640_s4 + $0x68] sm:$0xff] %v1649_v53   ;;  %v833_v16 = vadd.f32 %v1515_v3, %v541_v14  ;;  %v865_v33 = vadd.f32 %v1579_v57, %v669_v7  ;;  %v544_v4 = vadd.f32 %v1881_v54, %v2234_v10 }
 0x128   :  { %1800 = vst [vmem:[%s2640_s4 + $0xe8] sm:$0xff] %v1729_v6   ;;  %v672_v38 = vadd.f32 %v1913_v31, %v2234_v10  ;;  %1783 = vst [vmem:[%s2640_s4 + $0x60] sm:$0xff] %v1644_v46   ;;  %v831_v60 = vadd.f32 %v1511_v28, %v533_v26  ;;  %v863_v61 = vadd.f32 %v1575_v2, %v661_v47 }
 0x129   :  { %1799 = vst [vmem:[%s2640_s4 + $0xe0] sm:$0xff] %v1724_v63   ;;  %v536_v3 = vadd.f32 %v2234_v10, %v535_v29  ;;  %v664_v57 = vadd.f32 %v2234_v10, %v663_v43  ;;  %v834_v39 = vadd.f32 %v1516_v9, %v544_v4  ;;  %v897_v49 = vmax.f32 %v833_v16, 0.0 }
 0x12a   :  { %v866_v0 = vadd.f32 %v1580_v27, %v672_v38  ;;  %v929_v21 = vmax.f32 %v865_v33, 0.0  ;;  %v895_v52 = vmax.f32 %v831_v60, 0.0  ;;  %v927_v20 = vmax.f32 %v863_v61, 0.0 }
 0x12b   :  { %v832_v5 = vadd.f32 %v1512_v50, %v536_v3  ;;  %v864_v48 = vadd.f32 %v1576_v24, %v664_v57  ;;  %v898_v19 = vmax.f32 %v834_v39, 0.0 }
 0x12c   :  { %v930_v22 = vmax.f32 %v866_v0, 0.0 }
 0x12d   :  { %v896_v58 = vmax.f32 %v832_v5, 0.0  ;;  %v928_v55 = vmax.f32 %v864_v48, 0.0  ;;  %v1659_v28 = vpack.c.bf16 %v898_v19, %v897_v49 }
 0x12e   :  { %v1739_v59 = vpack.c.bf16 %v930_v22, %v929_v21 }
 0x12f   :  { %v1654_v12 = vpack.c.bf16 %v896_v58, %v895_v52  ;;  %v1734_v2 = vpack.c.bf16 %v928_v55, %v927_v20  ;;  %1786 = vst [vmem:[%s2640_s4 + $0x78] sm:$0xff] %v1659_v28  }
 0x130   :  { %1802 = vst [vmem:[%s2640_s4 + $0xf8] sm:$0xff] %v1739_v59  }
 0x131   :  { %1785 = vst [vmem:[%s2640_s4 + $0x70] sm:$0xff] %v1654_v12   ;;  %1801 = vst [vmem:[%s2640_s4 + $0xf0] sm:$0xff] %v1734_v2  }

// kernel: _lambda_.28
= control target key start
LH: loop header
LB: loop body
LE: loop exit
PB: predicated region body
PF: predicated region fallthrough
CT: control target
= control target key end

     0   :  { %vm114_vm0 = vcmask 588800   ;;  %vm139_vm1 = vcmask 1043456   ;;  %s599_s1 = inlined_call_operand.vmem [shape: bf16[72,128], index: 1, kind: input, shape index: {}]   ;;  %s600_s0 = inlined_call_operand.vmem [shape: bf16[128,72], index: 0, kind: input, shape index: {}]   ;;  %s601_s2 = inlined_call_operand.vmem [shape: f32[1,128], index: 2, kind: input, shape index: {}]   ;;  %s602_s3 = inlined_call_operand.vmem [shape: bf16[128,128], index: 3, kind: output, shape index: {}]  }
   0x1   :  { %v492_v0 = vld [vmem:[%s599_s1] sm:$0xff]   ;;  %v493_v1 = vld [vmem:[%s599_s1 + $0x8] sm:$0xff]   ;;  %v494_v2 = vld [vmem:[%s599_s1 + $0x10] sm:$0xff]  }
   0x2   :  { %454 = vmatprep.subr.bf16.mxu0 %v492_v0  ;;  %480 = vmatprep.subr.bf16.mxu1 %v492_v0  ;;  %v497_v3 = vld [vmem:[%s600_s0] sm:$0xff]   ;;  %v495_v5 = vld [vmem:[%s599_s1 + $0x18] sm:$0xff]   ;;  %v499_v8 = vld [vmem:[%s600_s0 + $0x8] sm:$0xff]  }
   0x3   :  { %455 = vmatpush3.bf16.msra.mxu0 %v492_v0  ;;  %485 = vmatpush3.bf16.msra.mxu1 %v492_v0  ;;  %v498_v4 = vld [vmem:[%s600_s0 + $0x20] sm:$0xff]   ;;  %v500_v9 = vld [vmem:[%s600_s0 + $0x28] sm:$0xff]   ;;  %v501_v10 = vld [vmem:[%s600_s0 + $0x10] sm:$0xff]  }
   0x4   :  { %456 = vmatprep.subr.bf16.mxu0 %v493_v1  ;;  %481 = vmatprep.subr.bf16.mxu1 %v493_v1  ;;  %v496_v6 = vld [vmem:[%s599_s1 + $0x20] ss:$0 sps:$4 sm:$0xff]   ;;  %v502_v11 = vld [vmem:[%s600_s0 + $0x30] sm:$0xff]   ;;  %v503_v12 = vld [vmem:[%s600_s0 + $0x18] sm:$0xff]  }
   0x5   :  { %464 = vmatprep.mubr.msk.bf16.mxu0 %vm114_vm0, %v497_v3  ;;  %472 = vmatprep.mubr.msk.bf16.mxu1 %vm114_vm0, %v498_v4  ;;  %v141_v7 = vsel %vm139_vm1, %v496_v6, 0  ;;  %v504_v13 = vld [vmem:[%s600_s0 + $0x38] sm:$0xff]   ;;  %v340_v14 = vld [vmem:[%s601_s2] ss:$0 sm:$0xff] }
   0x7   :  { %457 = vmatpush3.bf16.msra.mxu0 %v493_v1  ;;  %486 = vmatpush3.bf16.msra.mxu1 %v493_v1 }
   0x8   :  { %458 = vmatprep.subr.bf16.mxu0 %v494_v2  ;;  %482 = vmatprep.subr.bf16.mxu1 %v494_v2 }
   0xb   :  { %459 = vmatpush3.bf16.msra.mxu0 %v494_v2  ;;  %487 = vmatpush3.bf16.msra.mxu1 %v494_v2 }
   0xc   :  { %460 = vmatprep.subr.bf16.mxu0 %v495_v5  ;;  %483 = vmatprep.subr.bf16.mxu1 %v495_v5 }
   0xf   :  { %461 = vmatpush3.bf16.msra.mxu0 %v495_v5  ;;  %488 = vmatpush3.bf16.msra.mxu1 %v495_v5 }
  0x10   :  { %490 = vmatprep.subr.msk.bf16.mxu0 %vm139_vm1, %v496_v6  ;;  %491 = vmatprep.subr.msk.bf16.mxu1 %vm139_vm1, %v496_v6 }
  0x13   :  { %463 = vmatpush3.bf16.msra.mxu0 %v141_v7  ;;  %489 = vmatpush3.bf16.msra.mxu1 %v141_v7 }
  0x16   :  { %465 = vmatmul.mubr.msk.bf16.vlgmr.msra.gmra.mrb[0].mxu0 %vm114_vm0, %v499_v8  ;;  %473 = vmatmul.mubr.msk.bf16.vlgmr.msra.gmra.mrb[0].mxu1 %vm114_vm0, %v500_v9 }
  0x17   :  { %468 = vmatprep.mubr.msk.bf16.mxu0 %vm114_vm0, %v501_v10  ;;  %476 = vmatprep.mubr.msk.bf16.mxu1 %vm114_vm0, %v502_v11 }
  0x1e   :  { %469 = vmatmul.mubr.msk.bf16.gmra.mrb[4].mxu0 %vm114_vm0, %v503_v12  ;;  %477 = vmatmul.mubr.msk.bf16.gmra.mrb[4].mxu1 %vm114_vm0, %v504_v13 }
  0xe9   :  { %v466_v15 = vpop.f32.mrb[0].mxu0  ;;  %v474_v16 = vpop.f32.mrb[0].mxu1 }
  0xea   :  { %v186_v17 = vadd.f32 %v466_v15, %v340_v14  ;;  %v218_v18 = vadd.f32 %v474_v16, %v340_v14  ;;  %v177_v19 = vpop.f32.mrb[1].mxu0  ;;  %v209_v20 = vpop.f32.mrb[1].mxu1 }
  0xeb   :  { %v178_v21 = vadd.f32 %v340_v14, %v177_v19  ;;  %v210_v22 = vadd.f32 %v340_v14, %v209_v20  ;;  %v467_v23 = vpop.f32.mrb[2].mxu0  ;;  %v475_v24 = vpop.f32.mrb[2].mxu1 }
  0xec   :  { %v189_v25 = vadd.f32 %v467_v23, %v340_v14  ;;  %v221_v26 = vadd.f32 %v475_v24, %v340_v14  ;;  %v180_v27 = vpop.f32.mrb[3].mxu0  ;;  %v212_v28 = vpop.f32.mrb[3].mxu1  ;;  %v242_v31 = vmax.f32 %v186_v17, 0.0  ;;  %v250_v32 = vmax.f32 %v218_v18, 0.0 }
  0xed   :  { %v181_v29 = vadd.f32 %v340_v14, %v180_v27  ;;  %v213_v30 = vadd.f32 %v340_v14, %v212_v28  ;;  %v240_v35 = vmax.f32 %v178_v21, 0.0  ;;  %v248_v36 = vmax.f32 %v210_v22, 0.0 }
  0xee   :  { %v243_v33 = vmax.f32 %v189_v25, 0.0  ;;  %v251_v34 = vmax.f32 %v221_v26, 0.0 }
  0xef   :  { %v241_v37 = vmax.f32 %v181_v29, 0.0  ;;  %v249_v38 = vmax.f32 %v213_v30, 0.0 }
  0xf0   :  { %v402_v39 = vpack.c.bf16 %v243_v33, %v242_v31  ;;  %v422_v40 = vpack.c.bf16 %v251_v34, %v250_v32 }
  0xf1   :  { %v397_v41 = vpack.c.bf16 %v241_v37, %v240_v35  ;;  %v417_v42 = vpack.c.bf16 %v249_v38, %v248_v36  ;;  %v470_v43 = vpop.f32.mrb[4].mxu0  ;;  %v478_v44 = vpop.f32.mrb[4].mxu1 }
  0xf2   :  { %434 = vst [vmem:[%s602_s3 + $0x8] sm:$0xff] %v402_v39   ;;  %438 = vst [vmem:[%s602_s3 + $0x28] sm:$0xff] %v422_v40   ;;  %v202_v45 = vadd.f32 %v470_v43, %v340_v14  ;;  %v234_v46 = vadd.f32 %v478_v44, %v340_v14  ;;  %v193_v47 = vpop.f32.mrb[5].mxu0  ;;  %v225_v48 = vpop.f32.mrb[5].mxu1 }
  0xf3   :  { %398 = vst [vmem:[%s602_s3] sm:$0xff] %v397_v41   ;;  %437 = vst [vmem:[%s602_s3 + $0x20] sm:$0xff] %v417_v42   ;;  %v194_v49 = vadd.f32 %v340_v14, %v193_v47  ;;  %v226_v50 = vadd.f32 %v340_v14, %v225_v48  ;;  %v471_v51 = vpop.f32.mrb[6].mxu0  ;;  %v479_v52 = vpop.f32.mrb[6].mxu1 }
  0xf4   :  { %v205_v53 = vadd.f32 %v471_v51, %v340_v14  ;;  %v237_v54 = vadd.f32 %v479_v52, %v340_v14  ;;  %v196_v55 = vpop.f32.mrb[7].mxu0  ;;  %v228_v56 = vpop.f32.mrb[7].mxu1  ;;  %v246_v59 = vmax.f32 %v202_v45, 0.0  ;;  %v254_v60 = vmax.f32 %v234_v46, 0.0 }
  0xf5   :  { %v197_v57 = vadd.f32 %v340_v14, %v196_v55  ;;  %v229_v58 = vadd.f32 %v340_v14, %v228_v56  ;;  %v244_v63 = vmax.f32 %v194_v49, 0.0  ;;  %v252_v0 = vmax.f32 %v226_v50, 0.0 }
  0xf6   :  { %v247_v61 = vmax.f32 %v205_v53, 0.0  ;;  %v255_v62 = vmax.f32 %v237_v54, 0.0 }
  0xf7   :  { %v245_v1 = vmax.f32 %v197_v57, 0.0  ;;  %v253_v2 = vmax.f32 %v229_v58, 0.0 }
  0xf8   :  { %v412_v3 = vpack.c.bf16 %v247_v61, %v246_v59  ;;  %v432_v4 = vpack.c.bf16 %v255_v62, %v254_v60 }
  0xf9   :  { %v407_v5 = vpack.c.bf16 %v245_v1, %v244_v63  ;;  %v427_v6 = vpack.c.bf16 %v253_v2, %v252_v0 }
  0xfa   :  { %436 = vst [vmem:[%s602_s3 + $0x18] sm:$0xff] %v412_v3   ;;  %440 = vst [vmem:[%s602_s3 + $0x38] sm:$0xff] %v432_v4  }
  0xfb   :  { %435 = vst [vmem:[%s602_s3 + $0x10] sm:$0xff] %v407_v5   ;;  %439 = vst [vmem:[%s602_s3 + $0x30] sm:$0xff] %v427_v6  }

// kernel: _lambda_.30
= control target key start
LH: loop header
LB: loop body
LE: loop exit
PB: predicated region body
PF: predicated region fallthrough
CT: control target
= control target key end

     0   :  { %v569_v0 = vmov 0   ;;  %vm182_vm0 = vcmask 130048   ;;  %s718_s1 = inlined_call_operand.vmem [shape: bf16[144,128], index: 1, kind: input, shape index: {}]   ;;  %s719_s0 = inlined_call_operand.vmem [shape: bf16[128,144], index: 0, kind: input, shape index: {}]   ;;  %s720_s2 = inlined_call_operand.vmem [shape: f32[1,128], index: 2, kind: input, shape index: {}]   ;;  %s721_s3 = inlined_call_operand.vmem [shape: bf16[128,128], index: 3, kind: output, shape index: {}]  }
   0x1   :  { %207 = vmatprep.subr.bf16.mxu0 %v569_v0  ;;  %517 = vmatprep.subr.bf16.mxu1 %v569_v0  ;;  %v536_v1 = vld [vmem:[%s718_s1] sm:$0xff]   ;;  %v537_v2 = vld [vmem:[%s718_s1 + $0x8] sm:$0xff]   ;;  %v538_v3 = vld [vmem:[%s718_s1 + $0x10] sm:$0xff]  }
   0x2   :  { %208 = vmatpush1.bf16.msra.mxu0 %v536_v1  ;;  %526 = vmatpush1.bf16.msra.mxu1 %v536_v1  ;;  %v539_v4 = vld [vmem:[%s718_s1 + $0x18] sm:$0xff]   ;;  %v547_v5 = vld [vmem:[%s719_s0 + $0x4] ss:$8 sps:$4 sm:$0xff]   ;;  %v542_v9 = vld [vmem:[%s718_s1 + $0x30] sm:$0xff]  }
   0x3   :  { %209 = vmatprep.subr.bf16.mxu0 %v569_v0  ;;  %518 = vmatprep.subr.bf16.mxu1 %v569_v0  ;;  %v550_v6 = vld [vmem:[%s719_s0 + $0x44] ss:$8 sps:$4 sm:$0xff]   ;;  %v543_v10 = vld [vmem:[%s718_s1 + $0x38] sm:$0xff]   ;;  %v545_v12 = vld [vmem:[%s719_s0] ss:$8 sps:$4 sm:$0xff]  }
   0x4   :  { %430 = vmatprep.mubr.msk.bf16.mxu0 %vm182_vm0, %v547_v5  ;;  %434 = vmatprep.mubr.msk.bf16.mxu1 %vm182_vm0, %v550_v6  ;;  %v540_v7 = vld [vmem:[%s718_s1 + $0x20] sm:$0xff]   ;;  %v541_v8 = vld [vmem:[%s718_s1 + $0x28] sm:$0xff]   ;;  %v551_v14 = vld [vmem:[%s719_s0 + $0x14] ss:$8 sps:$4 sm:$0xff]  }
   0x5   :  { %v544_v11 = vld [vmem:[%s718_s1 + $0x40] sm:$0xff]   ;;  %v553_v15 = vld [vmem:[%s719_s0 + $0x54] ss:$8 sps:$4 sm:$0xff]   ;;  %v555_v16 = vld [vmem:[%s719_s0 + $0x10] ss:$8 sps:$4 sm:$0xff]  }
   0x6   :  { %210 = vmatpush1.bf16.msra.mxu0 %v537_v2  ;;  %527 = vmatpush1.bf16.msra.mxu1 %v537_v2  ;;  %v548_v13 = vld [vmem:[%s719_s0 + $0x40] ss:$8 sps:$4 sm:$0xff]   ;;  %v556_v17 = vld [vmem:[%s719_s0 + $0x50] ss:$8 sps:$4 sm:$0xff]   ;;  %v557_v18 = vld [vmem:[%s719_s0 + $0x24] ss:$8 sps:$4 sm:$0xff]  }
   0x7   :  { %211 = vmatprep.subr.bf16.mxu0 %v569_v0  ;;  %519 = vmatprep.subr.bf16.mxu1 %v569_v0  ;;  %v559_v19 = vld [vmem:[%s719_s0 + $0x64] ss:$8 sps:$4 sm:$0xff]   ;;  %v561_v20 = vld [vmem:[%s719_s0 + $0x20] ss:$8 sps:$4 sm:$0xff]   ;;  %v563_v22 = vld [vmem:[%s719_s0 + $0x34] ss:$8 sps:$4 sm:$0xff]  }
   0x8   :  { %v562_v21 = vld [vmem:[%s719_s0 + $0x60] ss:$8 sps:$4 sm:$0xff]   ;;  %v565_v23 = vld [vmem:[%s719_s0 + $0x74] ss:$8 sps:$4 sm:$0xff]   ;;  %v567_v24 = vld [vmem:[%s719_s0 + $0x30] ss:$8 sps:$4 sm:$0xff]  }
   0x9   :  { %v568_v25 = vld [vmem:[%s719_s0 + $0x70] ss:$8 sps:$4 sm:$0xff]   ;;  %v676_v26 = vld [vmem:[%s720_s2] ss:$0 sm:$0xff] }
   0xa   :  { %212 = vmatpush1.bf16.msra.mxu0 %v538_v3  ;;  %528 = vmatpush1.bf16.msra.mxu1 %v538_v3 }
   0xb   :  { %213 = vmatprep.subr.bf16.mxu0 %v569_v0  ;;  %520 = vmatprep.subr.bf16.mxu1 %v569_v0 }
   0xe   :  { %214 = vmatpush1.bf16.msra.mxu0 %v539_v4  ;;  %529 = vmatpush1.bf16.msra.mxu1 %v539_v4 }
   0xf   :  { %215 = vmatprep.subr.bf16.mxu0 %v569_v0  ;;  %521 = vmatprep.subr.bf16.mxu1 %v569_v0 }
  0x12   :  { %216 = vmatpush1.bf16.msra.mxu0 %v540_v7  ;;  %530 = vmatpush1.bf16.msra.mxu1 %v540_v7 }
  0x13   :  { %217 = vmatprep.subr.bf16.mxu0 %v569_v0  ;;  %522 = vmatprep.subr.bf16.mxu1 %v569_v0 }
  0x16   :  { %218 = vmatpush1.bf16.msra.mxu0 %v541_v8  ;;  %531 = vmatpush1.bf16.msra.mxu1 %v541_v8 }
  0x17   :  { %219 = vmatprep.subr.bf16.mxu0 %v569_v0  ;;  %523 = vmatprep.subr.bf16.mxu1 %v569_v0 }
  0x1a   :  { %220 = vmatpush1.bf16.msra.mxu0 %v542_v9  ;;  %532 = vmatpush1.bf16.msra.mxu1 %v542_v9 }
  0x1b   :  { %221 = vmatprep.subr.bf16.mxu0 %v569_v0  ;;  %524 = vmatprep.subr.bf16.mxu1 %v569_v0 }
  0x1e   :  { %222 = vmatpush1.bf16.msra.mxu0 %v543_v10  ;;  %533 = vmatpush1.bf16.msra.mxu1 %v543_v10 }
  0x1f   :  { %223 = vmatprep.subr.bf16.mxu0 %v569_v0  ;;  %525 = vmatprep.subr.bf16.mxu1 %v569_v0 }
  0x22   :  { %224 = vmatpush1.bf16.msra.mxu0 %v544_v11  ;;  %534 = vmatpush1.bf16.msra.mxu1 %v544_v11 }
  0x25   :  { %240 = vmatmul.mubr.bf16.vlgmr.msra.gmra.mrb[0].mxu0 %v545_v12  ;;  %272 = vmatmul.mubr.bf16.vlgmr.msra.gmra.mrb[0].mxu1 %v548_v13 }
  0x26   :  { %431 = vmatprep.mubr.msk.bf16.mxu0 %vm182_vm0, %v551_v14  ;;  %435 = vmatprep.mubr.msk.bf16.mxu1 %vm182_vm0, %v553_v15 }
  0x2d   :  { %248 = vmatmul.mubr.bf16.gmra.mrb[4].mxu0 %v555_v16  ;;  %280 = vmatmul.mubr.bf16.gmra.mrb[4].mxu1 %v556_v17 }
  0x2e   :  { %432 = vmatprep.mubr.msk.bf16.mxu0 %vm182_vm0, %v557_v18  ;;  %436 = vmatprep.mubr.msk.bf16.mxu1 %vm182_vm0, %v559_v19 }
  0x35   :  { %256 = vmatmul.mubr.bf16.gmra.mrb[8].mxu0 %v561_v20  ;;  %288 = vmatmul.mubr.bf16.gmra.mrb[8].mxu1 %v562_v21 }
  0x36   :  { %433 = vmatprep.mubr.msk.bf16.mxu0 %vm182_vm0, %v563_v22  ;;  %437 = vmatprep.mubr.msk.bf16.mxu1 %vm182_vm0, %v565_v23 }
  0x3d   :  { %264 = vmatmul.mubr.bf16.gmra.mrb[12].mxu0 %v567_v24  ;;  %296 = vmatmul.mubr.bf16.gmra.mrb[12].mxu1 %v568_v25 }
  0xf8   :  { %v241_v27 = vpop.f32.mrb[0].mxu0  ;;  %v273_v28 = vpop.f32.mrb[0].mxu1 }
  0xf9   :  { %v242_v29 = vadd.f32 %v676_v26, %v241_v27  ;;  %v274_v30 = vadd.f32 %v676_v26, %v273_v28  ;;  %v243_v31 = vpop.f32.mrb[1].mxu0  ;;  %v275_v32 = vpop.f32.mrb[1].mxu1 }
  0xfa   :  { %v244_v33 = vpop.f32.mrb[2].mxu0  ;;  %v276_v34 = vpop.f32.mrb[2].mxu1 }
  0xfb   :  { %v245_v35 = vadd.f32 %v676_v26, %v244_v33  ;;  %v277_v36 = vadd.f32 %v676_v26, %v276_v34  ;;  %v246_v37 = vpop.f32.mrb[3].mxu0  ;;  %v278_v38 = vpop.f32.mrb[3].mxu1  ;;  %v304_v39 = vmax.f32 %v242_v29, 0.0  ;;  %v312_v40 = vmax.f32 %v274_v30, 0.0 }
  0xfd   :  { %v305_v41 = vmax.f32 %v245_v35, 0.0  ;;  %v313_v42 = vmax.f32 %v277_v36, 0.0 }
  0xff   :  { %v473_v43 = vpack.c.bf16 %v305_v41, %v304_v39  ;;  %v493_v44 = vpack.c.bf16 %v313_v42, %v312_v40 }
 0x100   :  { %v249_v45 = vpop.f32.mrb[4].mxu0  ;;  %v281_v46 = vpop.f32.mrb[4].mxu1 }
 0x101   :  { %474 = vst [vmem:[%s721_s3] sm:$0xff] %v473_v43   ;;  %513 = vst [vmem:[%s721_s3 + $0x20] sm:$0xff] %v493_v44   ;;  %v250_v47 = vadd.f32 %v676_v26, %v249_v45  ;;  %v282_v48 = vadd.f32 %v676_v26, %v281_v46  ;;  %v251_v49 = vpop.f32.mrb[5].mxu0  ;;  %v283_v50 = vpop.f32.mrb[5].mxu1 }
 0x102   :  { %v252_v51 = vpop.f32.mrb[6].mxu0  ;;  %v284_v52 = vpop.f32.mrb[6].mxu1 }
 0x103   :  { %v253_v53 = vadd.f32 %v676_v26, %v252_v51  ;;  %v285_v54 = vadd.f32 %v676_v26, %v284_v52  ;;  %v254_v55 = vpop.f32.mrb[7].mxu0  ;;  %v286_v56 = vpop.f32.mrb[7].mxu1  ;;  %v306_v57 = vmax.f32 %v250_v47, 0.0  ;;  %v314_v58 = vmax.f32 %v282_v48, 0.0 }
 0x105   :  { %v307_v59 = vmax.f32 %v253_v53, 0.0  ;;  %v315_v60 = vmax.f32 %v285_v54, 0.0 }
 0x107   :  { %v478_v61 = vpack.c.bf16 %v307_v59, %v306_v57  ;;  %v498_v62 = vpack.c.bf16 %v315_v60, %v314_v58 }
 0x108   :  { %v257_v63 = vpop.f32.mrb[8].mxu0  ;;  %v289_v0 = vpop.f32.mrb[8].mxu1 }
 0x109   :  { %510 = vst [vmem:[%s721_s3 + $0x8] sm:$0xff] %v478_v61   ;;  %514 = vst [vmem:[%s721_s3 + $0x28] sm:$0xff] %v498_v62   ;;  %v258_v1 = vadd.f32 %v676_v26, %v257_v63  ;;  %v290_v2 = vadd.f32 %v676_v26, %v289_v0  ;;  %v259_v3 = vpop.f32.mrb[9].mxu0  ;;  %v291_v4 = vpop.f32.mrb[9].mxu1 }
 0x10a   :  { %v260_v5 = vpop.f32.mrb[10].mxu0  ;;  %v292_v6 = vpop.f32.mrb[10].mxu1 }
 0x10b   :  { %v261_v7 = vadd.f32 %v676_v26, %v260_v5  ;;  %v293_v8 = vadd.f32 %v676_v26, %v292_v6  ;;  %v262_v9 = vpop.f32.mrb[11].mxu0  ;;  %v294_v10 = vpop.f32.mrb[11].mxu1  ;;  %v308_v11 = vmax.f32 %v258_v1, 0.0  ;;  %v316_v12 = vmax.f32 %v290_v2, 0.0 }
 0x10d   :  { %v309_v13 = vmax.f32 %v261_v7, 0.0  ;;  %v317_v14 = vmax.f32 %v293_v8, 0.0 }
 0x10f   :  { %v483_v15 = vpack.c.bf16 %v309_v13, %v308_v11  ;;  %v503_v16 = vpack.c.bf16 %v317_v14, %v316_v12 }
 0x110   :  { %v265_v17 = vpop.f32.mrb[12].mxu0  ;;  %v297_v18 = vpop.f32.mrb[12].mxu1 }
 0x111   :  { %511 = vst [vmem:[%s721_s3 + $0x10] sm:$0xff] %v483_v15   ;;  %515 = vst [vmem:[%s721_s3 + $0x30] sm:$0xff] %v503_v16   ;;  %v266_v19 = vadd.f32 %v676_v26, %v265_v17  ;;  %v298_v20 = vadd.f32 %v676_v26, %v297_v18  ;;  %v267_v21 = vpop.f32.mrb[13].mxu0  ;;  %v299_v22 = vpop.f32.mrb[13].mxu1 }
 0x112   :  { %v268_v23 = vpop.f32.mrb[14].mxu0  ;;  %v300_v24 = vpop.f32.mrb[14].mxu1 }
 0x113   :  { %v269_v25 = vadd.f32 %v676_v26, %v268_v23  ;;  %v301_v27 = vadd.f32 %v676_v26, %v300_v24  ;;  %v270_v28 = vpop.f32.mrb[15].mxu0  ;;  %v302_v29 = vpop.f32.mrb[15].mxu1  ;;  %v310_v30 = vmax.f32 %v266_v19, 0.0  ;;  %v318_v31 = vmax.f32 %v298_v20, 0.0 }
 0x115   :  { %v311_v32 = vmax.f32 %v269_v25, 0.0  ;;  %v319_v33 = vmax.f32 %v301_v27, 0.0 }
 0x117   :  { %v488_v34 = vpack.c.bf16 %v311_v32, %v310_v30  ;;  %v508_v35 = vpack.c.bf16 %v319_v33, %v318_v31 }
 0x119   :  { %512 = vst [vmem:[%s721_s3 + $0x18] sm:$0xff] %v488_v34   ;;  %516 = vst [vmem:[%s721_s3 + $0x38] sm:$0xff] %v508_v35  }

// kernel: _lambda_.29
= control target key start
LH: loop header
LB: loop body
LE: loop exit
PB: predicated region body
PF: predicated region fallthrough
CT: control target
= control target key end

     0   :  { %vm137_vm0 = vcmask 1043456   ;;  %vm112_vm1 = vcmask 64512   ;;  %v826_v1 = vmov 0   ;;  %vm364_vm2 = vcmask 130048   ;;  %s1056_s3 = inlined_call_operand.vmem [shape: bf16[8,128], index: 3, kind: input, shape index: {}]   ;;  %s1057_s1 = inlined_call_operand.vmem [shape: bf16[144,128], index: 1, kind: input, shape index: {}]   ;;  %s1058_s2 = inlined_call_operand.vmem [shape: bf16[128,8], index: 2, kind: input, shape index: {}]   ;;  %s1059_s0 = inlined_call_operand.vmem [shape: bf16[128,144], index: 0, kind: input, shape index: {}]   ;;  %s1060_s4 = inlined_call_operand.vmem [shape: f32[1,128], index: 4, kind: input, shape index: {}]   ;;  %s1061_s5 = inlined_call_operand.vmem [shape: bf16[128,128], index: 5, kind: output, shape index: {}]  }
   0x1   :  { %v71_v0 = vld [vmem:[%s1056_s3] sm:$0xf]  ;;  %765 = vmatprep.subr.bf16.mxu1 %v826_v1  ;;  %v787_v5 = vld [vmem:[%s1058_s2 + $0x8] sm:$0xff]   ;;  %v789_v7 = vld [vmem:[%s1057_s1 + $0x10] sm:$0xff]  }
   0x2   :  { %783 = vmatprep.subr.msk.bf16.mxu0 %vm137_vm0, %v71_v0  ;;  %v139_v2 = vsel %vm137_vm0, %v71_v0, 0  ;;  %v785_v3 = vld [vmem:[%s1057_s1] sm:$0xff]   ;;  %v788_v6 = vld [vmem:[%s1057_s1 + $0x8] sm:$0xff]   ;;  %v791_v8 = vld [vmem:[%s1058_s2 + $0x10] sm:$0xff]  }
   0x3   :  { %748 = vmatpush3.bf16.msra.mxu0 %v139_v2  ;;  %v786_v4 = vld [vmem:[%s1058_s2] sm:$0xff]   ;;  %774 = vmatpush1.bf16.msra.mxu1 %v785_v3  ;;  %v792_v9 = vld [vmem:[%s1058_s2 + $0x18] sm:$0xff]   ;;  %v796_v13 = vld [vmem:[%s1058_s2 + $0x28] sm:$0xff]  }
   0x4   :  { %389 = vmatprep.subr.bf16.mxu0 %v826_v1  ;;  %749 = vmatprep.mubr.msk.bf16.mxu0 %vm112_vm1, %v786_v4  ;;  %v790_v10 = vld [vmem:[%s1057_s1 + $0x18] sm:$0xff]   ;;  %v795_v11 = vld [vmem:[%s1058_s2 + $0x20] sm:$0xff]   ;;  %v799_v14 = vld [vmem:[%s1058_s2 + $0x30] sm:$0xff]  }
   0x5   :  { %766 = vmatprep.subr.bf16.mxu1 %v826_v1  ;;  %v793_v12 = vld [vmem:[%s1057_s1 + $0x20] sm:$0xff]   ;;  %v804_v15 = vld [vmem:[%s1059_s0 + $0x34] ss:$8 sps:$4 sm:$0xff]   ;;  %v794_v16 = vld [vmem:[%s1057_s1 + $0x28] sm:$0xff]  }
   0x6   :  { %750 = vmatmul.mubr.msk.bf16.vlgmr.msra.gmra.mrb[0].mxu0 %vm112_vm1, %v787_v5  ;;  %653 = vmatprep.mubr.msk.bf16.mxu1 %vm364_vm2, %v804_v15  ;;  %v797_v17 = vld [vmem:[%s1057_s1 + $0x30] sm:$0xff]   ;;  %v800_v18 = vld [vmem:[%s1058_s2 + $0x38] sm:$0xff]   ;;  %v807_v19 = vld [vmem:[%s1059_s0 + $0x4] ss:$8 sps:$4 sm:$0xff]  }
   0x7   :  { %390 = vmatpush1.bf16.msra.mxu0 %v785_v3  ;;  %775 = vmatpush1.bf16.msra.mxu1 %v788_v6  ;;  %v798_v20 = vld [vmem:[%s1057_s1 + $0x38] sm:$0xff]   ;;  %v801_v21 = vld [vmem:[%s1057_s1 + $0x40] sm:$0xff]  }
   0x8   :  { %391 = vmatprep.subr.bf16.mxu0 %v826_v1  ;;  %767 = vmatprep.subr.bf16.mxu1 %v826_v1  ;;  %v802_v22 = vld [vmem:[%s1059_s0 + $0x30] ss:$8 sps:$4 sm:$0xff]   ;;  %v808_v23 = vld [vmem:[%s1059_s0 + $0x44] ss:$8 sps:$4 sm:$0xff]   ;;  %v805_v24 = vld [vmem:[%s1059_s0] ss:$8 sps:$4 sm:$0xff]  }
   0x9   :  { %753 = vmatprep.mubr.msk.bf16.mxu0 %vm112_vm1, %v791_v8  ;;  %v811_v25 = vld [vmem:[%s1059_s0 + $0x14] ss:$8 sps:$4 sm:$0xff]   ;;  %v810_v26 = vld [vmem:[%s1059_s0 + $0x40] ss:$8 sps:$4 sm:$0xff]   ;;  %v813_v28 = vld [vmem:[%s1059_s0 + $0x10] ss:$8 sps:$4 sm:$0xff]  }
   0xa   :  { %v814_v27 = vld [vmem:[%s1059_s0 + $0x54] ss:$8 sps:$4 sm:$0xff]   ;;  %v817_v29 = vld [vmem:[%s1059_s0 + $0x24] ss:$8 sps:$4 sm:$0xff]   ;;  %v816_v30 = vld [vmem:[%s1059_s0 + $0x50] ss:$8 sps:$4 sm:$0xff]  }
   0xb   :  { %392 = vmatpush1.bf16.msra.mxu0 %v788_v6  ;;  %776 = vmatpush1.bf16.msra.mxu1 %v789_v7  ;;  %v820_v31 = vld [vmem:[%s1059_s0 + $0x64] ss:$8 sps:$4 sm:$0xff]   ;;  %v819_v32 = vld [vmem:[%s1059_s0 + $0x20] ss:$8 sps:$4 sm:$0xff]   ;;  %v823_v34 = vld [vmem:[%s1059_s0 + $0x74] ss:$8 sps:$4 sm:$0xff]  }
   0xc   :  { %393 = vmatprep.subr.bf16.mxu0 %v826_v1  ;;  %768 = vmatprep.subr.bf16.mxu1 %v826_v1  ;;  %v822_v33 = vld [vmem:[%s1059_s0 + $0x60] ss:$8 sps:$4 sm:$0xff]   ;;  %v825_v35 = vld [vmem:[%s1059_s0 + $0x70] ss:$8 sps:$4 sm:$0xff]  }
   0xd   :  { %v1008_v53 = vld [vmem:[%s1060_s4] ss:$0 sm:$0xff] }
   0xe   :  { %754 = vmatmul.mubr.msk.bf16.gmra.mrb[4].mxu0 %vm112_vm1, %v792_v9 }
   0xf   :  { %394 = vmatpush1.bf16.msra.mxu0 %v789_v7  ;;  %757 = vmatprep.mubr.msk.bf16.mxu0 %vm112_vm1, %v795_v11 }
  0x10   :  { %777 = vmatpush1.bf16.msra.mxu1 %v790_v10  ;;  %395 = vmatprep.subr.bf16.mxu0 %v826_v1 }
  0x11   :  { %769 = vmatprep.subr.bf16.mxu1 %v826_v1 }
  0x13   :  { %396 = vmatpush1.bf16.msra.mxu0 %v790_v10 }
  0x14   :  { %778 = vmatpush1.bf16.msra.mxu1 %v793_v12  ;;  %397 = vmatprep.subr.bf16.mxu0 %v826_v1 }
  0x15   :  { %770 = vmatprep.subr.bf16.mxu1 %v826_v1 }
  0x16   :  { %758 = vmatmul.mubr.msk.bf16.gmra.mrb[8].mxu0 %vm112_vm1, %v796_v13 }
  0x17   :  { %398 = vmatpush1.bf16.msra.mxu0 %v793_v12  ;;  %761 = vmatprep.mubr.msk.bf16.mxu0 %vm112_vm1, %v799_v14 }
  0x18   :  { %779 = vmatpush1.bf16.msra.mxu1 %v794_v16  ;;  %399 = vmatprep.subr.bf16.mxu0 %v826_v1 }
  0x19   :  { %771 = vmatprep.subr.bf16.mxu1 %v826_v1 }
  0x1b   :  { %400 = vmatpush1.bf16.msra.mxu0 %v794_v16 }
  0x1c   :  { %780 = vmatpush1.bf16.msra.mxu1 %v797_v17  ;;  %401 = vmatprep.subr.bf16.mxu0 %v826_v1 }
  0x1d   :  { %772 = vmatprep.subr.bf16.mxu1 %v826_v1 }
  0x1e   :  { %762 = vmatmul.mubr.msk.bf16.gmra.mrb[12].mxu0 %vm112_vm1, %v800_v18 }
  0x1f   :  { %402 = vmatpush1.bf16.msra.mxu0 %v797_v17  ;;  %650 = vmatprep.mubr.msk.bf16.mxu0 %vm364_vm2, %v807_v19 }
  0x20   :  { %781 = vmatpush1.bf16.msra.mxu1 %v798_v20  ;;  %403 = vmatprep.subr.bf16.mxu0 %v826_v1 }
  0x21   :  { %773 = vmatprep.subr.bf16.mxu1 %v826_v1 }
  0x23   :  { %404 = vmatpush1.bf16.msra.mxu0 %v798_v20 }
  0x24   :  { %782 = vmatpush1.bf16.msra.mxu1 %v801_v21  ;;  %405 = vmatprep.subr.bf16.mxu0 %v826_v1 }
  0x27   :  { %406 = vmatpush1.bf16.msra.mxu0 %v801_v21  ;;  %446 = vmatmul.mubr.bf16.vlgmr.msra.gmra.mrb[0].mxu1 %v802_v22 }
  0x28   :  { %654 = vmatprep.mubr.msk.bf16.mxu1 %vm364_vm2, %v808_v23 }
  0x2a   :  { %422 = vmatmul.mubr.bf16.vlgmr.msra.gmra.mrb[16].mxu0 %v805_v24 }
  0x2b   :  { %651 = vmatprep.mubr.msk.bf16.mxu0 %vm364_vm2, %v811_v25 }
  0x2f   :  { %454 = vmatmul.mubr.bf16.gmra.mrb[4].mxu1 %v810_v26 }
  0x30   :  { %655 = vmatprep.mubr.msk.bf16.mxu1 %vm364_vm2, %v814_v27 }
  0x32   :  { %430 = vmatmul.mubr.bf16.gmra.mrb[20].mxu0 %v813_v28 }
  0x33   :  { %652 = vmatprep.mubr.msk.bf16.mxu0 %vm364_vm2, %v817_v29 }
  0x37   :  { %462 = vmatmul.mubr.bf16.gmra.mrb[8].mxu1 %v816_v30 }
  0x38   :  { %656 = vmatprep.mubr.msk.bf16.mxu1 %vm364_vm2, %v820_v31 }
  0x3a   :  { %438 = vmatmul.mubr.bf16.gmra.mrb[24].mxu0 %v819_v32 }
  0x3f   :  { %470 = vmatmul.mubr.bf16.gmra.mrb[12].mxu1 %v822_v33 }
  0x40   :  { %657 = vmatprep.mubr.msk.bf16.mxu1 %vm364_vm2, %v823_v34 }
  0x47   :  { %478 = vmatmul.mubr.bf16.gmra.mrb[16].mxu1 %v825_v35 }
  0xd9   :  { %v751_v36 = vpop.f32.mrb[0].mxu0 }
  0xda   :  { %v175_v37 = vpop.f32.mrb[1].mxu0 }
  0xdb   :  { %v752_v38 = vpop.f32.mrb[2].mxu0 }
  0xdc   :  { %v178_v39 = vpop.f32.mrb[3].mxu0 }
  0xe1   :  { %v755_v40 = vpop.f32.mrb[4].mxu0 }
  0xe2   :  { %v993_v41 = vpop.f32.mrb[5].mxu0 }
  0xe3   :  { %v756_v42 = vpop.f32.mrb[6].mxu0 }
  0xe4   :  { %v995_v43 = vpop.f32.mrb[7].mxu0 }
  0xe9   :  { %v759_v44 = vpop.f32.mrb[8].mxu0 }
  0xea   :  { %v207_v45 = vpop.f32.mrb[9].mxu0 }
  0xeb   :  { %v760_v46 = vpop.f32.mrb[10].mxu0 }
  0xec   :  { %v210_v47 = vpop.f32.mrb[11].mxu0 }
  0xf1   :  { %v997_v48 = vpop.f32.mrb[12].mxu0 }
  0xf2   :  { %v999_v49 = vpop.f32.mrb[13].mxu0 }
  0xf3   :  { %v1001_v50 = vpop.f32.mrb[14].mxu0 }
  0xf4   :  { %v1003_v51 = vpop.f32.mrb[15].mxu0 }
  0xfa   :  { %v447_v52 = vpop.f32.mrb[0].mxu1 }
  0xfb   :  { %v448_v54 = vadd.f32 %v755_v40, %v447_v52  ;;  %v449_v55 = vpop.f32.mrb[1].mxu1 }
  0xfc   :  { %v450_v56 = vpop.f32.mrb[2].mxu1 }
  0xfd   :  { %v499_v57 = vadd.f32 %v1008_v53, %v448_v54  ;;  %v451_v58 = vadd.f32 %v756_v42, %v450_v56  ;;  %v423_v59 = vpop.f32.mrb[16].mxu0  ;;  %v452_v60 = vpop.f32.mrb[3].mxu1 }
  0xfe   :  { %v424_v61 = vadd.f32 %v423_v59, %v175_v37  ;;  %v425_v62 = vpop.f32.mrb[17].mxu0 }
  0xff   :  { %v500_v63 = vadd.f32 %v1008_v53, %v451_v58  ;;  %v426_v0 = vpop.f32.mrb[18].mxu0  ;;  %v515_v4 = vmax.f32 %v499_v57, 0.0 }
 0x100   :  { %v493_v1 = vadd.f32 %v1008_v53, %v424_v61  ;;  %v427_v2 = vadd.f32 %v426_v0, %v178_v39  ;;  %v428_v3 = vpop.f32.mrb[19].mxu0 }
 0x101   :  { %v516_v5 = vmax.f32 %v500_v63, 0.0 }
 0x102   :  { %v494_v6 = vadd.f32 %v1008_v53, %v427_v2  ;;  %v455_v7 = vpop.f32.mrb[4].mxu1  ;;  %v509_v11 = vmax.f32 %v493_v1, 0.0 }
 0x103   :  { %v709_v8 = vpack.c.bf16 %v516_v5, %v515_v4  ;;  %v456_v9 = vadd.f32 %v455_v7, %v207_v45  ;;  %v457_v10 = vpop.f32.mrb[5].mxu1 }
 0x104   :  { %v510_v12 = vmax.f32 %v494_v6, 0.0  ;;  %v458_v13 = vpop.f32.mrb[6].mxu1 }
 0x105   :  { %733 = vst [vmem:[%s1061_s5 + $0x18] sm:$0xff] %v709_v8   ;;  %v501_v14 = vadd.f32 %v1008_v53, %v456_v9  ;;  %v459_v15 = vadd.f32 %v458_v13, %v210_v47  ;;  %v431_v16 = vpop.f32.mrb[20].mxu0  ;;  %v460_v17 = vpop.f32.mrb[7].mxu1 }
 0x106   :  { %v694_v18 = vpack.c.bf16 %v510_v12, %v509_v11  ;;  %v432_v19 = vadd.f32 %v751_v36, %v431_v16  ;;  %v433_v20 = vpop.f32.mrb[21].mxu0 }
 0x107   :  { %v502_v21 = vadd.f32 %v1008_v53, %v459_v15  ;;  %v434_v22 = vpop.f32.mrb[22].mxu0  ;;  %v517_v26 = vmax.f32 %v501_v14, 0.0 }
 0x108   :  { %695 = vst [vmem:[%s1061_s5] sm:$0xff] %v694_v18   ;;  %v495_v23 = vadd.f32 %v1008_v53, %v432_v19  ;;  %v435_v24 = vadd.f32 %v752_v38, %v434_v22  ;;  %v436_v25 = vpop.f32.mrb[23].mxu0 }
 0x109   :  { %v518_v27 = vmax.f32 %v502_v21, 0.0 }
 0x10a   :  { %v496_v28 = vadd.f32 %v1008_v53, %v435_v24  ;;  %v463_v29 = vpop.f32.mrb[8].mxu1  ;;  %v511_v33 = vmax.f32 %v495_v23, 0.0 }
 0x10b   :  { %v714_v30 = vpack.c.bf16 %v518_v27, %v517_v26  ;;  %v464_v31 = vadd.f32 %v759_v44, %v463_v29  ;;  %v465_v32 = vpop.f32.mrb[9].mxu1 }
 0x10c   :  { %v512_v34 = vmax.f32 %v496_v28, 0.0  ;;  %v466_v35 = vpop.f32.mrb[10].mxu1 }
 0x10d   :  { %734 = vst [vmem:[%s1061_s5 + $0x20] sm:$0xff] %v714_v30   ;;  %v503_v36 = vadd.f32 %v1008_v53, %v464_v31  ;;  %v467_v37 = vadd.f32 %v760_v46, %v466_v35  ;;  %v439_v38 = vpop.f32.mrb[24].mxu0  ;;  %v468_v39 = vpop.f32.mrb[11].mxu1 }
 0x10e   :  { %v699_v40 = vpack.c.bf16 %v512_v34, %v511_v33  ;;  %v440_v42 = vadd.f32 %v439_v38, %v993_v41  ;;  %v441_v45 = vpop.f32.mrb[25].mxu0 }
 0x10f   :  { %v504_v47 = vadd.f32 %v1008_v53, %v467_v37  ;;  %v442_v44 = vpop.f32.mrb[26].mxu0  ;;  %v519_v56 = vmax.f32 %v503_v36, 0.0 }
 0x110   :  { %731 = vst [vmem:[%s1061_s5 + $0x8] sm:$0xff] %v699_v40   ;;  %v497_v52 = vadd.f32 %v1008_v53, %v440_v42  ;;  %v443_v54 = vadd.f32 %v442_v44, %v995_v43  ;;  %v444_v55 = vpop.f32.mrb[27].mxu0 }
 0x111   :  { %v520_v46 = vmax.f32 %v504_v47, 0.0 }
 0x112   :  { %v498_v57 = vadd.f32 %v1008_v53, %v443_v54  ;;  %v471_v58 = vpop.f32.mrb[12].mxu1  ;;  %v513_v61 = vmax.f32 %v497_v52, 0.0 }
 0x113   :  { %v719_v59 = vpack.c.bf16 %v520_v46, %v519_v56  ;;  %v472_v41 = vadd.f32 %v471_v58, %v999_v49  ;;  %v473_v60 = vpop.f32.mrb[13].mxu1 }
 0x114   :  { %v514_v62 = vmax.f32 %v498_v57, 0.0  ;;  %v474_v63 = vpop.f32.mrb[14].mxu1 }
 0x115   :  { %735 = vst [vmem:[%s1061_s5 + $0x28] sm:$0xff] %v719_v59   ;;  %v505_v0 = vadd.f32 %v1008_v53, %v472_v41  ;;  %v475_v43 = vadd.f32 %v474_v63, %v1003_v51  ;;  %v476_v1 = vpop.f32.mrb[15].mxu1 }
 0x116   :  { %v704_v2 = vpack.c.bf16 %v514_v62, %v513_v61 }
 0x117   :  { %v506_v3 = vadd.f32 %v1008_v53, %v475_v43  ;;  %v521_v49 = vmax.f32 %v505_v0, 0.0 }
 0x118   :  { %732 = vst [vmem:[%s1061_s5 + $0x10] sm:$0xff] %v704_v2  }
 0x119   :  { %v522_v4 = vmax.f32 %v506_v3, 0.0 }
 0x11a   :  { %v479_v5 = vpop.f32.mrb[16].mxu1 }
 0x11b   :  { %v724_v6 = vpack.c.bf16 %v522_v4, %v521_v49  ;;  %v480_v7 = vadd.f32 %v997_v48, %v479_v5  ;;  %v481_v8 = vpop.f32.mrb[17].mxu1 }
 0x11c   :  { %v482_v9 = vpop.f32.mrb[18].mxu1 }
 0x11d   :  { %736 = vst [vmem:[%s1061_s5 + $0x30] sm:$0xff] %v724_v6   ;;  %v507_v51 = vadd.f32 %v1008_v53, %v480_v7  ;;  %v483_v10 = vadd.f32 %v1001_v50, %v482_v9  ;;  %v484_v11 = vpop.f32.mrb[19].mxu1 }
 0x11f   :  { %v508_v12 = vadd.f32 %v1008_v53, %v483_v10  ;;  %v523_v13 = vmax.f32 %v507_v51, 0.0 }
 0x121   :  { %v524_v14 = vmax.f32 %v508_v12, 0.0 }
 0x123   :  { %v729_v15 = vpack.c.bf16 %v524_v14, %v523_v13 }
 0x125   :  { %737 = vst [vmem:[%s1061_s5 + $0x38] sm:$0xff] %v729_v15  }

// kernel: _lambda_.31
= control target key start
LH: loop header
LB: loop body
LE: loop exit
PB: predicated region body
PF: predicated region fallthrough
CT: control target
= control target key end

     0   :  { %v659_v0 = vmov 0   ;;  %vm185_vm0 = vcmask 130048   ;;  %s837_s1 = inlined_call_operand.vmem [shape: bf16[144,128], index: 1, kind: input, shape index: {}]   ;;  %s838_s0 = inlined_call_operand.vmem [shape: bf16[128,144], index: 0, kind: input, shape index: {}]   ;;  %s839_s3 = inlined_call_operand.vmem [shape: bf16[128,128], index: 3, kind: input, shape index: {}]   ;;  %s840_s2 = inlined_call_operand.vmem [shape: f32[1,128], index: 2, kind: input, shape index: {}]   ;;  %s841_s4 = inlined_call_operand.vmem [shape: bf16[128,128], index: 4, kind: output, shape index: {}]  }
   0x1   :  { %210 = vmatprep.subr.bf16.mxu0 %v659_v0  ;;  %607 = vmatprep.subr.bf16.mxu1 %v659_v0  ;;  %v626_v1 = vld [vmem:[%s837_s1] sm:$0xff]   ;;  %v627_v2 = vld [vmem:[%s837_s1 + $0x8] sm:$0xff]   ;;  %v628_v3 = vld [vmem:[%s837_s1 + $0x10] sm:$0xff]  }
   0x2   :  { %211 = vmatpush1.bf16.msra.mxu0 %v626_v1  ;;  %616 = vmatpush1.bf16.msra.mxu1 %v626_v1  ;;  %v629_v4 = vld [vmem:[%s837_s1 + $0x18] sm:$0xff]   ;;  %v637_v5 = vld [vmem:[%s838_s0 + $0x4] ss:$8 sps:$4 sm:$0xff]   ;;  %v632_v9 = vld [vmem:[%s837_s1 + $0x30] sm:$0xff]  }
   0x3   :  { %212 = vmatprep.subr.bf16.mxu0 %v659_v0  ;;  %608 = vmatprep.subr.bf16.mxu1 %v659_v0  ;;  %v640_v6 = vld [vmem:[%s838_s0 + $0x44] ss:$8 sps:$4 sm:$0xff]   ;;  %v633_v10 = vld [vmem:[%s837_s1 + $0x38] sm:$0xff]   ;;  %v635_v12 = vld [vmem:[%s838_s0] ss:$8 sps:$4 sm:$0xff]  }
   0x4   :  { %481 = vmatprep.mubr.msk.bf16.mxu0 %vm185_vm0, %v637_v5  ;;  %485 = vmatprep.mubr.msk.bf16.mxu1 %vm185_vm0, %v640_v6  ;;  %v630_v7 = vld [vmem:[%s837_s1 + $0x20] sm:$0xff]   ;;  %v631_v8 = vld [vmem:[%s837_s1 + $0x28] sm:$0xff]   ;;  %v641_v14 = vld [vmem:[%s838_s0 + $0x14] ss:$8 sps:$4 sm:$0xff]  }
   0x5   :  { %v634_v11 = vld [vmem:[%s837_s1 + $0x40] sm:$0xff]   ;;  %v643_v15 = vld [vmem:[%s838_s0 + $0x54] ss:$8 sps:$4 sm:$0xff]   ;;  %v645_v16 = vld [vmem:[%s838_s0 + $0x10] ss:$8 sps:$4 sm:$0xff]  }
   0x6   :  { %213 = vmatpush1.bf16.msra.mxu0 %v627_v2  ;;  %617 = vmatpush1.bf16.msra.mxu1 %v627_v2  ;;  %v638_v13 = vld [vmem:[%s838_s0 + $0x40] ss:$8 sps:$4 sm:$0xff]   ;;  %v646_v17 = vld [vmem:[%s838_s0 + $0x50] ss:$8 sps:$4 sm:$0xff]   ;;  %v647_v18 = vld [vmem:[%s838_s0 + $0x24] ss:$8 sps:$4 sm:$0xff]  }
   0x7   :  { %214 = vmatprep.subr.bf16.mxu0 %v659_v0  ;;  %609 = vmatprep.subr.bf16.mxu1 %v659_v0  ;;  %v649_v19 = vld [vmem:[%s838_s0 + $0x64] ss:$8 sps:$4 sm:$0xff]   ;;  %v651_v20 = vld [vmem:[%s838_s0 + $0x20] ss:$8 sps:$4 sm:$0xff]   ;;  %v653_v22 = vld [vmem:[%s838_s0 + $0x34] ss:$8 sps:$4 sm:$0xff]  }
   0x8   :  { %v652_v21 = vld [vmem:[%s838_s0 + $0x60] ss:$8 sps:$4 sm:$0xff]   ;;  %v655_v23 = vld [vmem:[%s838_s0 + $0x74] ss:$8 sps:$4 sm:$0xff]   ;;  %v657_v24 = vld [vmem:[%s838_s0 + $0x30] ss:$8 sps:$4 sm:$0xff]  }
   0x9   :  { %v658_v25 = vld [vmem:[%s838_s0 + $0x70] ss:$8 sps:$4 sm:$0xff]   ;;  %v522_v26 = vld [vmem:[%s839_s3] sm:$0xff]   ;;  %v593_v47 = vld [vmem:[%s839_s3 + $0x8] sm:$0xff]  }
   0xa   :  { %215 = vmatpush1.bf16.msra.mxu0 %v628_v3  ;;  %618 = vmatpush1.bf16.msra.mxu1 %v628_v3  ;;  %v596_v27 = vld [vmem:[%s839_s3 + $0x20] sm:$0xff]   ;;  %v523_v29 = vunpack.c.l.bf16 %v522_v26  ;;  %v524_v37 = vunpack.c.h.bf16 %v522_v26  ;;  %v597_v48 = vld [vmem:[%s839_s3 + $0x28] sm:$0xff]   ;;  %v527_v51 = vunpack.c.l.bf16 %v593_v47  ;;  %v528_v59 = vunpack.c.h.bf16 %v593_v47 }
   0xb   :  { %216 = vmatprep.subr.bf16.mxu0 %v659_v0  ;;  %610 = vmatprep.subr.bf16.mxu1 %v659_v0  ;;  %v777_v28 = vld [vmem:[%s840_s2] ss:$0 sm:$0xff]  ;;  %v539_v30 = vunpack.c.l.bf16 %v596_v27  ;;  %v540_v38 = vunpack.c.h.bf16 %v596_v27  ;;  %v543_v52 = vunpack.c.l.bf16 %v597_v48  ;;  %v544_v60 = vunpack.c.h.bf16 %v597_v48 }
   0xe   :  { %217 = vmatpush1.bf16.msra.mxu0 %v629_v4  ;;  %619 = vmatpush1.bf16.msra.mxu1 %v629_v4 }
   0xf   :  { %218 = vmatprep.subr.bf16.mxu0 %v659_v0  ;;  %611 = vmatprep.subr.bf16.mxu1 %v659_v0 }
  0x12   :  { %219 = vmatpush1.bf16.msra.mxu0 %v630_v7  ;;  %620 = vmatpush1.bf16.msra.mxu1 %v630_v7 }
  0x13   :  { %220 = vmatprep.subr.bf16.mxu0 %v659_v0  ;;  %612 = vmatprep.subr.bf16.mxu1 %v659_v0 }
  0x16   :  { %221 = vmatpush1.bf16.msra.mxu0 %v631_v8  ;;  %621 = vmatpush1.bf16.msra.mxu1 %v631_v8 }
  0x17   :  { %222 = vmatprep.subr.bf16.mxu0 %v659_v0  ;;  %613 = vmatprep.subr.bf16.mxu1 %v659_v0 }
  0x1a   :  { %223 = vmatpush1.bf16.msra.mxu0 %v632_v9  ;;  %622 = vmatpush1.bf16.msra.mxu1 %v632_v9 }
  0x1b   :  { %224 = vmatprep.subr.bf16.mxu0 %v659_v0  ;;  %614 = vmatprep.subr.bf16.mxu1 %v659_v0 }
  0x1e   :  { %225 = vmatpush1.bf16.msra.mxu0 %v633_v10  ;;  %623 = vmatpush1.bf16.msra.mxu1 %v633_v10 }
  0x1f   :  { %226 = vmatprep.subr.bf16.mxu0 %v659_v0  ;;  %615 = vmatprep.subr.bf16.mxu1 %v659_v0 }
  0x22   :  { %227 = vmatpush1.bf16.msra.mxu0 %v634_v11  ;;  %624 = vmatpush1.bf16.msra.mxu1 %v634_v11  ;;  %v594_v11 = vld [vmem:[%s839_s3 + $0x10] sm:$0xff]  }
  0x25   :  { %243 = vmatmul.mubr.bf16.vlgmr.msra.gmra.mrb[0].mxu0 %v635_v12  ;;  %275 = vmatmul.mubr.bf16.vlgmr.msra.gmra.mrb[0].mxu1 %v638_v13  ;;  %v598_v12 = vld [vmem:[%s839_s3 + $0x30] sm:$0xff]  }
  0x26   :  { %482 = vmatprep.mubr.msk.bf16.mxu0 %vm185_vm0, %v641_v14  ;;  %486 = vmatprep.mubr.msk.bf16.mxu1 %vm185_vm0, %v643_v15  ;;  %v531_v15 = vunpack.c.l.bf16 %v594_v11 }
  0x2d   :  { %251 = vmatmul.mubr.bf16.gmra.mrb[4].mxu0 %v645_v16  ;;  %283 = vmatmul.mubr.bf16.gmra.mrb[4].mxu1 %v646_v17  ;;  %v547_v16 = vunpack.c.l.bf16 %v598_v12 }
  0x2e   :  { %483 = vmatprep.mubr.msk.bf16.mxu0 %vm185_vm0, %v647_v18  ;;  %487 = vmatprep.mubr.msk.bf16.mxu1 %vm185_vm0, %v649_v19 }
  0x35   :  { %259 = vmatmul.mubr.bf16.gmra.mrb[8].mxu0 %v651_v20  ;;  %291 = vmatmul.mubr.bf16.gmra.mrb[8].mxu1 %v652_v21 }
  0x36   :  { %484 = vmatprep.mubr.msk.bf16.mxu0 %vm185_vm0, %v653_v22  ;;  %488 = vmatprep.mubr.msk.bf16.mxu1 %vm185_vm0, %v655_v23  ;;  %v532_v23 = vunpack.c.h.bf16 %v594_v11 }
  0x3d   :  { %267 = vmatmul.mubr.bf16.gmra.mrb[12].mxu0 %v657_v24  ;;  %299 = vmatmul.mubr.bf16.gmra.mrb[12].mxu1 %v658_v25  ;;  %v548_v24 = vunpack.c.h.bf16 %v598_v12 }
  0xf8   :  { %v244_v31 = vpop.f32.mrb[0].mxu0  ;;  %v276_v32 = vpop.f32.mrb[0].mxu1 }
  0xf9   :  { %v245_v33 = vadd.f32 %v777_v28, %v244_v31  ;;  %v277_v34 = vadd.f32 %v777_v28, %v276_v32  ;;  %v246_v35 = vpop.f32.mrb[1].mxu0  ;;  %v278_v36 = vpop.f32.mrb[1].mxu1 }
  0xfa   :  { %v247_v39 = vpop.f32.mrb[2].mxu0  ;;  %v279_v40 = vpop.f32.mrb[2].mxu1 }
  0xfb   :  { %v339_v41 = vadd.f32 %v523_v29, %v245_v33  ;;  %v347_v42 = vadd.f32 %v539_v30, %v277_v34  ;;  %v248_v43 = vadd.f32 %v777_v28, %v247_v39  ;;  %v280_v44 = vadd.f32 %v777_v28, %v279_v40  ;;  %v249_v45 = vpop.f32.mrb[3].mxu0  ;;  %v281_v46 = vpop.f32.mrb[3].mxu1  ;;  %v595_v40 = vld [vmem:[%s839_s3 + $0x18] sm:$0xff]  }
  0xfd   :  { %v340_v49 = vadd.f32 %v524_v37, %v248_v43  ;;  %v348_v50 = vadd.f32 %v540_v38, %v280_v44  ;;  %v355_v53 = vmax.f32 %v339_v41, 0.0  ;;  %v363_v54 = vmax.f32 %v347_v42, 0.0  ;;  %v599_v41 = vld [vmem:[%s839_s3 + $0x38] sm:$0xff]  }
  0xfe   :  { %v535_v44 = vunpack.c.l.bf16 %v595_v40  ;;  %v551_v45 = vunpack.c.l.bf16 %v599_v41 }
  0xff   :  { %v356_v55 = vmax.f32 %v340_v49, 0.0  ;;  %v364_v56 = vmax.f32 %v348_v50, 0.0 }
 0x100   :  { %v252_v57 = vpop.f32.mrb[4].mxu0  ;;  %v284_v58 = vpop.f32.mrb[4].mxu1 }
 0x101   :  { %v556_v61 = vpack.c.bf16 %v356_v55, %v355_v53  ;;  %v576_v62 = vpack.c.bf16 %v364_v56, %v363_v54  ;;  %v253_v63 = vadd.f32 %v777_v28, %v252_v57  ;;  %v285_v0 = vadd.f32 %v777_v28, %v284_v58  ;;  %v254_v1 = vpop.f32.mrb[5].mxu0  ;;  %v286_v2 = vpop.f32.mrb[5].mxu1 }
 0x102   :  { %v255_v3 = vpop.f32.mrb[6].mxu0  ;;  %v287_v4 = vpop.f32.mrb[6].mxu1  ;;  %v552_v53 = vunpack.c.h.bf16 %v599_v41 }
 0x103   :  { %557 = vst [vmem:[%s841_s4] sm:$0xff] %v556_v61   ;;  %603 = vst [vmem:[%s841_s4 + $0x20] sm:$0xff] %v576_v62   ;;  %v341_v5 = vadd.f32 %v527_v51, %v253_v63  ;;  %v349_v6 = vadd.f32 %v543_v52, %v285_v0  ;;  %v256_v7 = vadd.f32 %v777_v28, %v255_v3  ;;  %v257_v9 = vpop.f32.mrb[7].mxu0  ;;  %v289_v10 = vpop.f32.mrb[7].mxu1  ;;  %v536_v52 = vunpack.c.h.bf16 %v595_v40 }
 0x104   :  { %v288_v8 = vadd.f32 %v777_v28, %v287_v4 }
 0x105   :  { %v342_v13 = vadd.f32 %v528_v59, %v256_v7  ;;  %v357_v17 = vmax.f32 %v341_v5, 0.0  ;;  %v365_v18 = vmax.f32 %v349_v6, 0.0 }
 0x106   :  { %v350_v14 = vadd.f32 %v544_v60, %v288_v8 }
 0x107   :  { %v358_v19 = vmax.f32 %v342_v13, 0.0 }
 0x108   :  { %v366_v20 = vmax.f32 %v350_v14, 0.0  ;;  %v260_v21 = vpop.f32.mrb[8].mxu0  ;;  %v292_v22 = vpop.f32.mrb[8].mxu1 }
 0x109   :  { %v561_v25 = vpack.c.bf16 %v358_v19, %v357_v17  ;;  %v261_v27 = vadd.f32 %v777_v28, %v260_v21  ;;  %v293_v29 = vadd.f32 %v777_v28, %v292_v22  ;;  %v262_v30 = vpop.f32.mrb[9].mxu0  ;;  %v294_v31 = vpop.f32.mrb[9].mxu1 }
 0x10a   :  { %v581_v26 = vpack.c.bf16 %v366_v20, %v365_v18  ;;  %v263_v32 = vpop.f32.mrb[10].mxu0  ;;  %v295_v33 = vpop.f32.mrb[10].mxu1 }
 0x10b   :  { %600 = vst [vmem:[%s841_s4 + $0x8] sm:$0xff] %v561_v25   ;;  %v343_v34 = vadd.f32 %v531_v15, %v261_v27  ;;  %v351_v35 = vadd.f32 %v547_v16, %v293_v29  ;;  %v264_v36 = vadd.f32 %v777_v28, %v263_v32  ;;  %v296_v37 = vadd.f32 %v777_v28, %v295_v33  ;;  %v265_v38 = vpop.f32.mrb[11].mxu0  ;;  %v297_v39 = vpop.f32.mrb[11].mxu1 }
 0x10c   :  { %604 = vst [vmem:[%s841_s4 + $0x28] sm:$0xff] %v581_v26  }
 0x10d   :  { %v344_v42 = vadd.f32 %v532_v23, %v264_v36  ;;  %v352_v43 = vadd.f32 %v548_v24, %v296_v37  ;;  %v359_v46 = vmax.f32 %v343_v34, 0.0  ;;  %v367_v47 = vmax.f32 %v351_v35, 0.0 }
 0x10f   :  { %v360_v48 = vmax.f32 %v344_v42, 0.0  ;;  %v368_v49 = vmax.f32 %v352_v43, 0.0 }
 0x110   :  { %v268_v50 = vpop.f32.mrb[12].mxu0  ;;  %v300_v51 = vpop.f32.mrb[12].mxu1 }
 0x111   :  { %v566_v54 = vpack.c.bf16 %v360_v48, %v359_v46  ;;  %v586_v55 = vpack.c.bf16 %v368_v49, %v367_v47  ;;  %v269_v56 = vadd.f32 %v777_v28, %v268_v50  ;;  %v301_v57 = vadd.f32 %v777_v28, %v300_v51  ;;  %v270_v58 = vpop.f32.mrb[13].mxu0  ;;  %v302_v59 = vpop.f32.mrb[13].mxu1 }
 0x112   :  { %v271_v60 = vpop.f32.mrb[14].mxu0  ;;  %v303_v61 = vpop.f32.mrb[14].mxu1 }
 0x113   :  { %601 = vst [vmem:[%s841_s4 + $0x10] sm:$0xff] %v566_v54   ;;  %605 = vst [vmem:[%s841_s4 + $0x30] sm:$0xff] %v586_v55   ;;  %v345_v62 = vadd.f32 %v535_v44, %v269_v56  ;;  %v353_v63 = vadd.f32 %v551_v45, %v301_v57  ;;  %v272_v0 = vadd.f32 %v777_v28, %v271_v60  ;;  %v273_v2 = vpop.f32.mrb[15].mxu0  ;;  %v305_v3 = vpop.f32.mrb[15].mxu1 }
 0x114   :  { %v304_v1 = vadd.f32 %v777_v28, %v303_v61 }
 0x115   :  { %v346_v4 = vadd.f32 %v536_v52, %v272_v0  ;;  %v361_v6 = vmax.f32 %v345_v62, 0.0  ;;  %v369_v7 = vmax.f32 %v353_v63, 0.0 }
 0x116   :  { %v354_v5 = vadd.f32 %v552_v53, %v304_v1 }
 0x117   :  { %v362_v8 = vmax.f32 %v346_v4, 0.0 }
 0x118   :  { %v370_v9 = vmax.f32 %v354_v5, 0.0 }
 0x119   :  { %v571_v10 = vpack.c.bf16 %v362_v8, %v361_v6 }
 0x11a   :  { %v591_v11 = vpack.c.bf16 %v370_v9, %v369_v7 }
 0x11b   :  { %602 = vst [vmem:[%s841_s4 + $0x18] sm:$0xff] %v571_v10  }
 0x11c   :  { %606 = vst [vmem:[%s841_s4 + $0x38] sm:$0xff] %v591_v11  }

// kernel: _lambda_.32
= control target key start
LH: loop header
LB: loop body
LE: loop exit
PB: predicated region body
PF: predicated region fallthrough
CT: control target
= control target key end

     0   :  { %v269_v0 = vmov 0   ;;  %vm116_vm0 = vcmask 130048   ;;  %s338_s1 = inlined_call_operand.vmem [shape: bf16[144,128], index: 1, kind: input, shape index: {}]   ;;  %s339_s0 = inlined_call_operand.vmem [shape: bf16[32,144], index: 0, kind: input, shape index: {}]   ;;  %s340_s2 = inlined_call_operand.vmem [shape: f32[1,128], index: 2, kind: input, shape index: {}]   ;;  %s341_s3 = inlined_call_operand.vmem [shape: bf16[32,128], index: 3, kind: output, shape index: {}]  }
   0x1   :  { %123 = vmatprep.subr.bf16.mxu0 %v269_v0  ;;  %235 = vmatprep.subr.bf16.mxu1 %v269_v0  ;;  %v254_v1 = vld [vmem:[%s338_s1] sm:$0xff]   ;;  %v255_v2 = vld [vmem:[%s338_s1 + $0x8] sm:$0xff]   ;;  %v256_v3 = vld [vmem:[%s338_s1 + $0x10] sm:$0xff]  }
   0x2   :  { %124 = vmatpush1.bf16.msra.mxu0 %v254_v1  ;;  %244 = vmatpush1.bf16.msra.mxu1 %v254_v1  ;;  %v257_v4 = vld [vmem:[%s338_s1 + $0x18] sm:$0xff]   ;;  %v265_v5 = vld [vmem:[%s339_s0 + $0x4] ss:$8 sps:$4 sm:$0xff]   ;;  %v260_v9 = vld [vmem:[%s338_s1 + $0x30] sm:$0xff]  }
   0x3   :  { %125 = vmatprep.subr.bf16.mxu0 %v269_v0  ;;  %236 = vmatprep.subr.bf16.mxu1 %v269_v0  ;;  %v268_v6 = vld [vmem:[%s339_s0 + $0x14] ss:$8 sps:$4 sm:$0xff]   ;;  %v258_v7 = vld [vmem:[%s338_s1 + $0x20] sm:$0xff]   ;;  %v259_v8 = vld [vmem:[%s338_s1 + $0x28] sm:$0xff]  }
   0x4   :  { %214 = vmatprep.mubr.msk.bf16.mxu0 %vm116_vm0, %v265_v5  ;;  %215 = vmatprep.mubr.msk.bf16.mxu1 %vm116_vm0, %v268_v6  ;;  %v261_v10 = vld [vmem:[%s338_s1 + $0x38] sm:$0xff]   ;;  %v262_v11 = vld [vmem:[%s338_s1 + $0x40] sm:$0xff]  }
   0x5   :  { %v263_v12 = vld [vmem:[%s339_s0] ss:$8 sps:$4 sm:$0xff]   ;;  %v266_v13 = vld [vmem:[%s339_s0 + $0x10] ss:$8 sps:$4 sm:$0xff]  }
   0x6   :  { %126 = vmatpush1.bf16.msra.mxu0 %v255_v2  ;;  %245 = vmatpush1.bf16.msra.mxu1 %v255_v2  ;;  %v200_v14 = vld [vmem:[%s340_s2] ss:$0 sm:$0xff] }
   0x7   :  { %127 = vmatprep.subr.bf16.mxu0 %v269_v0  ;;  %237 = vmatprep.subr.bf16.mxu1 %v269_v0 }
   0xa   :  { %128 = vmatpush1.bf16.msra.mxu0 %v256_v3  ;;  %246 = vmatpush1.bf16.msra.mxu1 %v256_v3 }
   0xb   :  { %129 = vmatprep.subr.bf16.mxu0 %v269_v0  ;;  %238 = vmatprep.subr.bf16.mxu1 %v269_v0 }
   0xe   :  { %130 = vmatpush1.bf16.msra.mxu0 %v257_v4  ;;  %247 = vmatpush1.bf16.msra.mxu1 %v257_v4 }
   0xf   :  { %131 = vmatprep.subr.bf16.mxu0 %v269_v0  ;;  %239 = vmatprep.subr.bf16.mxu1 %v269_v0 }
  0x12   :  { %132 = vmatpush1.bf16.msra.mxu0 %v258_v7  ;;  %248 = vmatpush1.bf16.msra.mxu1 %v258_v7 }
  0x13   :  { %133 = vmatprep.subr.bf16.mxu0 %v269_v0  ;;  %240 = vmatprep.subr.bf16.mxu1 %v269_v0 }
  0x16   :  { %134 = vmatpush1.bf16.msra.mxu0 %v259_v8  ;;  %249 = vmatpush1.bf16.msra.mxu1 %v259_v8 }
  0x17   :  { %135 = vmatprep.subr.bf16.mxu0 %v269_v0  ;;  %241 = vmatprep.subr.bf16.mxu1 %v269_v0 }
  0x1a   :  { %136 = vmatpush1.bf16.msra.mxu0 %v260_v9  ;;  %250 = vmatpush1.bf16.msra.mxu1 %v260_v9 }
  0x1b   :  { %137 = vmatprep.subr.bf16.mxu0 %v269_v0  ;;  %242 = vmatprep.subr.bf16.mxu1 %v269_v0 }
  0x1e   :  { %138 = vmatpush1.bf16.msra.mxu0 %v261_v10  ;;  %251 = vmatpush1.bf16.msra.mxu1 %v261_v10 }
  0x1f   :  { %139 = vmatprep.subr.bf16.mxu0 %v269_v0  ;;  %243 = vmatprep.subr.bf16.mxu1 %v269_v0 }
  0x22   :  { %140 = vmatpush1.bf16.msra.mxu0 %v262_v11  ;;  %252 = vmatpush1.bf16.msra.mxu1 %v262_v11 }
  0x25   :  { %156 = vmatmul.mubr.bf16.vlgmr.msra.gmra.mrb[0].mxu0 %v263_v12  ;;  %164 = vmatmul.mubr.bf16.vlgmr.msra.gmra.mrb[0].mxu1 %v266_v13 }
  0xf8   :  { %v157_v15 = vpop.f32.mrb[0].mxu0  ;;  %v165_v16 = vpop.f32.mrb[0].mxu1 }
  0xf9   :  { %v158_v17 = vadd.f32 %v200_v14, %v157_v15  ;;  %v166_v18 = vadd.f32 %v200_v14, %v165_v16  ;;  %v159_v19 = vpop.f32.mrb[1].mxu0  ;;  %v167_v20 = vpop.f32.mrb[1].mxu1 }
  0xfa   :  { %v160_v21 = vpop.f32.mrb[2].mxu0  ;;  %v168_v22 = vpop.f32.mrb[2].mxu1 }
  0xfb   :  { %v161_v23 = vadd.f32 %v200_v14, %v160_v21  ;;  %v169_v24 = vadd.f32 %v200_v14, %v168_v22  ;;  %v162_v25 = vpop.f32.mrb[3].mxu0  ;;  %v170_v26 = vpop.f32.mrb[3].mxu1  ;;  %v172_v27 = vmax.f32 %v158_v17, 0.0  ;;  %v174_v28 = vmax.f32 %v166_v18, 0.0 }
  0xfd   :  { %v173_v29 = vmax.f32 %v161_v23, 0.0  ;;  %v175_v30 = vmax.f32 %v169_v24, 0.0 }
  0xff   :  { %v227_v31 = vpack.c.bf16 %v173_v29, %v172_v27  ;;  %v232_v32 = vpack.c.bf16 %v175_v30, %v174_v28 }
 0x101   :  { %228 = vst [vmem:[%s341_s3] sm:$0xff] %v227_v31   ;;  %234 = vst [vmem:[%s341_s3 + $0x8] sm:$0xff] %v232_v32  }

// kernel: _lambda_.33
= control target key start
LH: loop header
LB: loop body
LE: loop exit
PB: predicated region body
PF: predicated region fallthrough
CT: control target
= control target key end

     0   :  { %vm87_vm0 = vcmask 130048   ;;  %vm281_vm1 = vcmask 261120   ;;  %s682_s1 = inlined_call_operand.vmem [shape: bf16[288,128], index: 1, kind: input, shape index: {}]   ;;  %s683_s3 = inlined_call_operand.vmem [shape: bf16[16,128], index: 3, kind: input, shape index: {}]   ;;  %s684_s2 = inlined_call_operand.vmem [shape: bf16[32,16], index: 2, kind: input, shape index: {}]   ;;  %s685_s0 = inlined_call_operand.vmem [shape: bf16[32,288], index: 0, kind: input, shape index: {}]   ;;  %s686_s4 = inlined_call_operand.vmem [shape: f32[1,128], index: 4, kind: input, shape index: {}]   ;;  %s687_s5 = inlined_call_operand.vmem [shape: bf16[32,128], index: 5, kind: output, shape index: {}]  }
   0x1   :  { %v533_v0 = vld [vmem:[%s682_s1 + $0x40] sm:$0xff]   ;;  %v535_v2 = vld [vmem:[%s682_s1 + $0x48] sm:$0xff]   ;;  %v537_v4 = vld [vmem:[%s682_s1 + $0x50] sm:$0xff]  }
   0x2   :  { %v534_v1 = vld [vmem:[%s682_s1] sm:$0xff]   ;;  %479 = vmatprep.subr.bf16.mxu1 %v533_v0  ;;  %v536_v3 = vld [vmem:[%s682_s1 + $0x8] sm:$0xff]   ;;  %v538_v6 = vld [vmem:[%s682_s1 + $0x10] sm:$0xff]  }
   0x3   :  { %480 = vmatpush3.bf16.msra.mxu1 %v534_v1  ;;  %v539_v5 = vld [vmem:[%s683_s3] sm:$0xff]   ;;  %v540_v7 = vld [vmem:[%s682_s1 + $0x58] sm:$0xff]   ;;  %v543_v9 = vld [vmem:[%s684_s2 + $0x8] sm:$0xff]  }
   0x4   :  { %481 = vmatprep.subr.bf16.mxu1 %v535_v2  ;;  %511 = vmatprep.subr.bf16.mxu0 %v539_v5  ;;  %v542_v8 = vld [vmem:[%s684_s2] sm:$0xff]   ;;  %v541_v10 = vld [vmem:[%s682_s1 + $0x18] sm:$0xff]   ;;  %v547_v14 = vld [vmem:[%s682_s1 + $0x68] sm:$0xff]  }
   0x5   :  { %512 = vmatpush3.bf16.msra.mxu0 %v539_v5  ;;  %513 = vmatprep.mubr.msk.bf16.mxu0 %vm87_vm0, %v542_v8  ;;  %v544_v11 = vld [vmem:[%s682_s1 + $0x60] sm:$0xff]   ;;  %v549_v15 = vld [vmem:[%s682_s1 + $0x88] sm:$0xff]   ;;  %v550_v17 = vld [vmem:[%s682_s1 + $0x70] sm:$0xff]  }
   0x6   :  { %v546_v12 = vld [vmem:[%s682_s1 + $0x80] sm:$0xff]   ;;  %v548_v16 = vld [vmem:[%s682_s1 + $0x28] sm:$0xff]   ;;  %v551_v20 = vld [vmem:[%s682_s1 + $0x30] sm:$0xff]  }
   0x7   :  { %482 = vmatpush3.bf16.msra.mxu1 %v536_v3  ;;  %v545_v13 = vld [vmem:[%s682_s1 + $0x20] sm:$0xff]   ;;  %517 = vmatprep.subr.bf16.mxu0 %v546_v12  ;;  %v552_v18 = vld [vmem:[%s685_s0 + $0x8] ss:$12 sps:$4 sm:$0xff]   ;;  %v554_v21 = vld [vmem:[%s682_s1 + $0x78] sm:$0xff]  }
   0x8   :  { %483 = vmatprep.subr.bf16.mxu1 %v537_v4  ;;  %514 = vmatmul.mubr.msk.bf16.vlgmr.msra.gmra.mrb[0].mxu0 %vm87_vm0, %v543_v9  ;;  %v553_v19 = vld [vmem:[%s685_s0 + $0x20] ss:$12 sps:$4 sm:$0xff]   ;;  %v558_v22 = vld [vmem:[%s685_s0 + $0x4] ss:$12 sps:$4 sm:$0xff]   ;;  %v555_v23 = vld [vmem:[%s682_s1 + $0x38] sm:$0xff]  }
   0x9   :  { %518 = vmatpush3.bf16.msra.mxu0 %v546_v12  ;;  %521 = vmatprep.mubr.msk.bf16.mxu0 %vm281_vm1, %v552_v18  ;;  %v556_v24 = vld [vmem:[%s685_s0] ss:$12 sps:$4 sm:$0xff]   ;;  %v559_v25 = vld [vmem:[%s685_s0 + $0x1c] ss:$12 sps:$4 sm:$0xff]   ;;  %v561_v26 = vld [vmem:[%s685_s0 + $0x18] ss:$12 sps:$4 sm:$0xff]  }
   0xa   :  { %519 = vmatprep.subr.bf16.mxu0 %v549_v15  ;;  %320 = vmatprep.mubr.bf16.mxu1 %v558_v22  ;;  %v456_v35 = vld [vmem:[%s686_s4] ss:$0 sm:$0xff] }
   0xb   :  { %484 = vmatpush3.bf16.msra.mxu1 %v538_v6 }
   0xc   :  { %485 = vmatprep.subr.bf16.mxu1 %v540_v7 }
   0xd   :  { %520 = vmatpush3.bf16.msra.mxu0 %v549_v15 }
   0xf   :  { %486 = vmatpush3.bf16.msra.mxu1 %v541_v10 }
  0x10   :  { %487 = vmatprep.subr.bf16.mxu1 %v544_v11 }
  0x13   :  { %488 = vmatpush3.bf16.msra.mxu1 %v545_v13 }
  0x14   :  { %489 = vmatprep.subr.bf16.mxu1 %v547_v14  ;;  %522 = vmatmul.mubr.msk.bf16.vlgmr.msra.gmra.mrb[0].mxu0 %vm281_vm1, %v553_v19 }
  0x17   :  { %490 = vmatpush3.bf16.msra.mxu1 %v548_v16 }
  0x18   :  { %491 = vmatprep.subr.bf16.mxu1 %v550_v17 }
  0x1b   :  { %492 = vmatpush3.bf16.msra.mxu1 %v551_v20 }
  0x1c   :  { %493 = vmatprep.subr.bf16.mxu1 %v554_v21 }
  0x1f   :  { %494 = vmatpush3.bf16.msra.mxu1 %v555_v23 }
  0x22   :  { %321 = vmatmul.mubr.bf16.vlgmr.msra.gmra.mrb[0].mxu1 %v556_v24 }
  0x23   :  { %328 = vmatprep.mubr.bf16.mxu1 %v559_v25 }
  0x2a   :  { %329 = vmatmul.mubr.bf16.gmra.mrb[4].mxu1 %v561_v26 }
  0xe7   :  { %v523_v27 = vpop.f32.mrb[0].mxu0 }
  0xe8   :  { %v371_v28 = vpop.f32.mrb[1].mxu0 }
  0xe9   :  { %v524_v29 = vpop.f32.mrb[2].mxu0 }
  0xea   :  { %v374_v30 = vpop.f32.mrb[3].mxu0 }
  0xf5   :  { %v495_v31 = vpop.f32.mrb[0].mxu1 }
  0xf6   :  { %v496_v32 = vpop.f32.mrb[1].mxu1 }
  0xf7   :  { %v497_v33 = vadd.f32 %v496_v32, %v495_v31  ;;  %v498_v34 = vpop.f32.mrb[2].mxu1 }
  0xf8   :  { %v499_v36 = vpop.f32.mrb[3].mxu1 }
  0xf9   :  { %v526_v37 = vadd.f32 %v497_v33, %v371_v28  ;;  %v500_v38 = vadd.f32 %v499_v36, %v498_v34 }
  0xfb   :  { %v393_v39 = vadd.f32 %v526_v37, %v456_v35  ;;  %v528_v40 = vadd.f32 %v500_v38, %v374_v30 }
  0xfd   :  { %v394_v41 = vadd.f32 %v528_v40, %v456_v35  ;;  %v501_v42 = vpop.f32.mrb[4].mxu1  ;;  %v397_v44 = vmax.f32 %v393_v39, 0.0 }
  0xfe   :  { %v502_v43 = vpop.f32.mrb[5].mxu1 }
  0xff   :  { %v398_v45 = vmax.f32 %v394_v41, 0.0  ;;  %v503_v46 = vadd.f32 %v502_v43, %v501_v42  ;;  %v504_v47 = vpop.f32.mrb[6].mxu1 }
 0x100   :  { %v505_v48 = vpop.f32.mrb[7].mxu1 }
 0x101   :  { %v468_v49 = vpack.c.bf16 %v398_v45, %v397_v44  ;;  %v525_v50 = vadd.f32 %v523_v27, %v503_v46  ;;  %v506_v51 = vadd.f32 %v505_v48, %v504_v47 }
 0x103   :  { %469 = vst [vmem:[%s687_s5] sm:$0xff] %v468_v49   ;;  %v395_v52 = vadd.f32 %v525_v50, %v456_v35  ;;  %v527_v53 = vadd.f32 %v524_v29, %v506_v51 }
 0x105   :  { %v396_v54 = vadd.f32 %v527_v53, %v456_v35  ;;  %v399_v55 = vmax.f32 %v395_v52, 0.0 }
 0x107   :  { %v400_v56 = vmax.f32 %v396_v54, 0.0 }
 0x109   :  { %v473_v57 = vpack.c.bf16 %v400_v56, %v399_v55 }
 0x10b   :  { %475 = vst [vmem:[%s687_s5 + $0x8] sm:$0xff] %v473_v57  }

// kernel: _lambda_.34
= control target key start
LH: loop header
LB: loop body
LE: loop exit
PB: predicated region body
PF: predicated region fallthrough
CT: control target
= control target key end

     0   :  { %vm204_vm0 = vcmask 261120   ;;  %s550_s1 = inlined_call_operand.vmem [shape: bf16[288,128], index: 1, kind: input, shape index: {}]   ;;  %s551_s0 = inlined_call_operand.vmem [shape: bf16[32,288], index: 0, kind: input, shape index: {}]   ;;  %s552_s2 = inlined_call_operand.vmem [shape: f32[1,128], index: 2, kind: input, shape index: {}]   ;;  %s553_s3 = inlined_call_operand.vmem [shape: bf16[32,128], index: 3, kind: output, shape index: {}]  }
   0x1   :  { %v423_v0 = vld [vmem:[%s550_s1 + $0x40] sm:$0xff]   ;;  %v425_v2 = vld [vmem:[%s550_s1 + $0x48] sm:$0xff]   ;;  %v427_v4 = vld [vmem:[%s550_s1 + $0x50] sm:$0xff]  }
   0x2   :  { %v424_v1 = vld [vmem:[%s550_s1] sm:$0xff]   ;;  %383 = vmatprep.subr.bf16.mxu0 %v423_v0  ;;  %v426_v3 = vld [vmem:[%s550_s1 + $0x8] sm:$0xff]   ;;  %v428_v5 = vld [vmem:[%s550_s1 + $0x10] sm:$0xff]  }
   0x3   :  { %384 = vmatpush3.bf16.msra.mxu0 %v424_v1  ;;  %v429_v6 = vld [vmem:[%s550_s1 + $0x58] sm:$0xff]   ;;  %v431_v8 = vld [vmem:[%s550_s1 + $0x60] sm:$0xff]   ;;  %v433_v11 = vld [vmem:[%s550_s1 + $0x68] sm:$0xff]  }
   0x4   :  { %385 = vmatprep.subr.bf16.mxu0 %v425_v2  ;;  %v430_v7 = vld [vmem:[%s550_s1 + $0x18] sm:$0xff]   ;;  %v432_v9 = vld [vmem:[%s550_s1 + $0x20] sm:$0xff]   ;;  %v434_v12 = vld [vmem:[%s550_s1 + $0x28] sm:$0xff]  }
   0x5   :  { %v438_v10 = vld [vmem:[%s550_s1 + $0x80] sm:$0xff]   ;;  %v435_v13 = vld [vmem:[%s550_s1 + $0x70] sm:$0xff]   ;;  %v443_v15 = vld [vmem:[%s550_s1 + $0x88] sm:$0xff]  }
   0x6   :  { %415 = vmatprep.subr.bf16.mxu1 %v438_v10  ;;  %v442_v14 = vld [vmem:[%s551_s0 + $0x4] ss:$12 sps:$4 sm:$0xff]   ;;  %v444_v16 = vld [vmem:[%s551_s0 + $0x8] ss:$12 sps:$4 sm:$0xff]   ;;  %v445_v17 = vld [vmem:[%s551_s0 + $0x20] ss:$12 sps:$4 sm:$0xff]  }
   0x7   :  { %386 = vmatpush3.bf16.msra.mxu0 %v426_v3  ;;  %416 = vmatpush3.bf16.msra.mxu1 %v438_v10  ;;  %v436_v18 = vld [vmem:[%s550_s1 + $0x30] sm:$0xff]   ;;  %v437_v19 = vld [vmem:[%s550_s1 + $0x78] sm:$0xff]   ;;  %v440_v21 = vld [vmem:[%s551_s0] ss:$12 sps:$4 sm:$0xff]  }
   0x8   :  { %387 = vmatprep.subr.bf16.mxu0 %v427_v4  ;;  %243 = vmatprep.mubr.bf16.mxu0 %v442_v14  ;;  %v439_v20 = vld [vmem:[%s550_s1 + $0x38] sm:$0xff]   ;;  %v337_v30 = vld [vmem:[%s552_s2] ss:$0 sm:$0xff] }
   0x9   :  { %417 = vmatprep.subr.bf16.mxu1 %v443_v15  ;;  %419 = vmatprep.mubr.msk.bf16.mxu1 %vm204_vm0, %v444_v16  ;;  %v446_v22 = vld [vmem:[%s551_s0 + $0x1c] ss:$12 sps:$4 sm:$0xff]   ;;  %v448_v23 = vld [vmem:[%s551_s0 + $0x18] ss:$12 sps:$4 sm:$0xff]  }
   0xb   :  { %388 = vmatpush3.bf16.msra.mxu0 %v428_v5  ;;  %418 = vmatpush3.bf16.msra.mxu1 %v443_v15 }
   0xc   :  { %389 = vmatprep.subr.bf16.mxu0 %v429_v6 }
   0xe   :  { %420 = vmatmul.mubr.msk.bf16.vlgmr.msra.gmra.mrb[0].mxu1 %vm204_vm0, %v445_v17 }
   0xf   :  { %390 = vmatpush3.bf16.msra.mxu0 %v430_v7 }
  0x10   :  { %391 = vmatprep.subr.bf16.mxu0 %v431_v8 }
  0x13   :  { %392 = vmatpush3.bf16.msra.mxu0 %v432_v9 }
  0x14   :  { %393 = vmatprep.subr.bf16.mxu0 %v433_v11 }
  0x17   :  { %394 = vmatpush3.bf16.msra.mxu0 %v434_v12 }
  0x18   :  { %395 = vmatprep.subr.bf16.mxu0 %v435_v13 }
  0x1b   :  { %396 = vmatpush3.bf16.msra.mxu0 %v436_v18 }
  0x1c   :  { %397 = vmatprep.subr.bf16.mxu0 %v437_v19 }
  0x1f   :  { %398 = vmatpush3.bf16.msra.mxu0 %v439_v20 }
  0x22   :  { %244 = vmatmul.mubr.bf16.vlgmr.msra.gmra.mrb[0].mxu0 %v440_v21 }
  0x23   :  { %251 = vmatprep.mubr.bf16.mxu0 %v446_v22 }
  0x2a   :  { %252 = vmatmul.mubr.bf16.gmra.mrb[4].mxu0 %v448_v23 }
  0xe1   :  { %v421_v24 = vpop.f32.mrb[0].mxu1 }
  0xe2   :  { %v294_v25 = vpop.f32.mrb[1].mxu1 }
  0xe3   :  { %v422_v26 = vpop.f32.mrb[2].mxu1 }
  0xe4   :  { %v297_v27 = vpop.f32.mrb[3].mxu1 }
  0xf5   :  { %v399_v28 = vpop.f32.mrb[0].mxu0 }
  0xf6   :  { %v400_v29 = vpop.f32.mrb[1].mxu0 }
  0xf7   :  { %v401_v31 = vadd.f32 %v400_v29, %v399_v28  ;;  %v402_v32 = vpop.f32.mrb[2].mxu0 }
  0xf8   :  { %v403_v33 = vpop.f32.mrb[3].mxu0 }
  0xf9   :  { %v404_v34 = vadd.f32 %v403_v33, %v402_v32  ;;  %v246_v35 = vadd.f32 %v401_v31, %v337_v30 }
  0xfb   :  { %v295_v36 = vadd.f32 %v294_v25, %v246_v35  ;;  %v249_v37 = vadd.f32 %v404_v34, %v337_v30 }
  0xfd   :  { %v298_v38 = vadd.f32 %v297_v27, %v249_v37  ;;  %v405_v39 = vpop.f32.mrb[4].mxu0  ;;  %v309_v41 = vmax.f32 %v295_v36, 0.0 }
  0xfe   :  { %v406_v40 = vpop.f32.mrb[5].mxu0 }
  0xff   :  { %v310_v42 = vmax.f32 %v298_v38, 0.0  ;;  %v407_v43 = vadd.f32 %v406_v40, %v405_v39  ;;  %v408_v44 = vpop.f32.mrb[6].mxu0 }
 0x100   :  { %v409_v45 = vpop.f32.mrb[7].mxu0 }
 0x101   :  { %v375_v46 = vpack.c.bf16 %v310_v42, %v309_v41  ;;  %v254_v47 = vadd.f32 %v407_v43, %v337_v30  ;;  %v410_v48 = vadd.f32 %v409_v45, %v408_v44 }
 0x103   :  { %376 = vst [vmem:[%s553_s3] sm:$0xff] %v375_v46   ;;  %v303_v49 = vadd.f32 %v421_v24, %v254_v47  ;;  %v257_v50 = vadd.f32 %v410_v48, %v337_v30 }
 0x105   :  { %v306_v51 = vadd.f32 %v422_v26, %v257_v50  ;;  %v311_v52 = vmax.f32 %v303_v49, 0.0 }
 0x107   :  { %v312_v53 = vmax.f32 %v306_v51, 0.0 }
 0x109   :  { %v380_v54 = vpack.c.bf16 %v312_v53, %v311_v52 }
 0x10b   :  { %382 = vst [vmem:[%s553_s3 + $0x8] sm:$0xff] %v380_v54  }

// kernel: _lambda_.35
= control target key start
LH: loop header
LB: loop body
LE: loop exit
PB: predicated region body
PF: predicated region fallthrough
CT: control target
= control target key end

     0   :  { %vm207_vm0 = vcmask 261120   ;;  %s585_s1 = inlined_call_operand.vmem [shape: bf16[288,128], index: 1, kind: input, shape index: {}]   ;;  %s586_s0 = inlined_call_operand.vmem [shape: bf16[32,288], index: 0, kind: input, shape index: {}]   ;;  %s587_s2 = inlined_call_operand.vmem [shape: f32[1,128], index: 2, kind: input, shape index: {}]   ;;  %s588_s3 = inlined_call_operand.vmem [shape: bf16[32,128], index: 3, kind: input, shape index: {}]   ;;  %s589_s4 = inlined_call_operand.vmem [shape: bf16[32,128], index: 4, kind: output, shape index: {}]  }
   0x1   :  { %v447_v0 = vld [vmem:[%s585_s1 + $0x40] sm:$0xff]   ;;  %v449_v2 = vld [vmem:[%s585_s1 + $0x48] sm:$0xff]   ;;  %v451_v4 = vld [vmem:[%s585_s1 + $0x50] sm:$0xff]  }
   0x2   :  { %v448_v1 = vld [vmem:[%s585_s1] sm:$0xff]   ;;  %407 = vmatprep.subr.bf16.mxu0 %v447_v0  ;;  %v450_v3 = vld [vmem:[%s585_s1 + $0x8] sm:$0xff]   ;;  %v452_v5 = vld [vmem:[%s585_s1 + $0x10] sm:$0xff]  }
   0x3   :  { %408 = vmatpush3.bf16.msra.mxu0 %v448_v1  ;;  %v453_v6 = vld [vmem:[%s585_s1 + $0x58] sm:$0xff]   ;;  %v455_v8 = vld [vmem:[%s585_s1 + $0x60] sm:$0xff]   ;;  %v457_v11 = vld [vmem:[%s585_s1 + $0x68] sm:$0xff]  }
   0x4   :  { %409 = vmatprep.subr.bf16.mxu0 %v449_v2  ;;  %v454_v7 = vld [vmem:[%s585_s1 + $0x18] sm:$0xff]   ;;  %v456_v9 = vld [vmem:[%s585_s1 + $0x20] sm:$0xff]   ;;  %v458_v12 = vld [vmem:[%s585_s1 + $0x28] sm:$0xff]  }
   0x5   :  { %v462_v10 = vld [vmem:[%s585_s1 + $0x80] sm:$0xff]   ;;  %v459_v13 = vld [vmem:[%s585_s1 + $0x70] sm:$0xff]   ;;  %v467_v15 = vld [vmem:[%s585_s1 + $0x88] sm:$0xff]  }
   0x6   :  { %439 = vmatprep.subr.bf16.mxu1 %v462_v10  ;;  %v466_v14 = vld [vmem:[%s586_s0 + $0x4] ss:$12 sps:$4 sm:$0xff]   ;;  %v468_v16 = vld [vmem:[%s586_s0 + $0x8] ss:$12 sps:$4 sm:$0xff]   ;;  %v469_v17 = vld [vmem:[%s586_s0 + $0x20] ss:$12 sps:$4 sm:$0xff]  }
   0x7   :  { %410 = vmatpush3.bf16.msra.mxu0 %v450_v3  ;;  %440 = vmatpush3.bf16.msra.mxu1 %v462_v10  ;;  %v460_v18 = vld [vmem:[%s585_s1 + $0x30] sm:$0xff]   ;;  %v461_v19 = vld [vmem:[%s585_s1 + $0x78] sm:$0xff]   ;;  %v464_v21 = vld [vmem:[%s586_s0] ss:$12 sps:$4 sm:$0xff]  }
   0x8   :  { %411 = vmatprep.subr.bf16.mxu0 %v451_v4  ;;  %246 = vmatprep.mubr.bf16.mxu0 %v466_v14  ;;  %v463_v20 = vld [vmem:[%s585_s1 + $0x38] sm:$0xff]   ;;  %v352_v30 = vld [vmem:[%s587_s2] ss:$0 sm:$0xff]  ;;  %v405_v41 = vld [vmem:[%s588_s3 + $0x8] sm:$0xff]  }
   0x9   :  { %441 = vmatprep.subr.bf16.mxu1 %v467_v15  ;;  %443 = vmatprep.mubr.msk.bf16.mxu1 %vm207_vm0, %v468_v16  ;;  %v470_v22 = vld [vmem:[%s586_s0 + $0x1c] ss:$12 sps:$4 sm:$0xff]   ;;  %v472_v23 = vld [vmem:[%s586_s0 + $0x18] ss:$12 sps:$4 sm:$0xff]   ;;  %v393_v49 = vunpack.c.l.bf16 %v405_v41  ;;  %v394_v58 = vunpack.c.h.bf16 %v405_v41 }
   0xa   :  { %v388_v31 = vld [vmem:[%s588_s3] sm:$0xff]  }
   0xb   :  { %412 = vmatpush3.bf16.msra.mxu0 %v452_v5  ;;  %442 = vmatpush3.bf16.msra.mxu1 %v467_v15  ;;  %v389_v37 = vunpack.c.l.bf16 %v388_v31  ;;  %v390_v40 = vunpack.c.h.bf16 %v388_v31 }
   0xc   :  { %413 = vmatprep.subr.bf16.mxu0 %v453_v6 }
   0xe   :  { %444 = vmatmul.mubr.msk.bf16.vlgmr.msra.gmra.mrb[0].mxu1 %vm207_vm0, %v469_v17 }
   0xf   :  { %414 = vmatpush3.bf16.msra.mxu0 %v454_v7 }
  0x10   :  { %415 = vmatprep.subr.bf16.mxu0 %v455_v8 }
  0x13   :  { %416 = vmatpush3.bf16.msra.mxu0 %v456_v9 }
  0x14   :  { %417 = vmatprep.subr.bf16.mxu0 %v457_v11 }
  0x17   :  { %418 = vmatpush3.bf16.msra.mxu0 %v458_v12 }
  0x18   :  { %419 = vmatprep.subr.bf16.mxu0 %v459_v13 }
  0x1b   :  { %420 = vmatpush3.bf16.msra.mxu0 %v460_v18 }
  0x1c   :  { %421 = vmatprep.subr.bf16.mxu0 %v461_v19 }
  0x1f   :  { %422 = vmatpush3.bf16.msra.mxu0 %v463_v20 }
  0x22   :  { %247 = vmatmul.mubr.bf16.vlgmr.msra.gmra.mrb[0].mxu0 %v464_v21 }
  0x23   :  { %254 = vmatprep.mubr.bf16.mxu0 %v470_v22 }
  0x2a   :  { %255 = vmatmul.mubr.bf16.gmra.mrb[4].mxu0 %v472_v23 }
  0xe1   :  { %v445_v24 = vpop.f32.mrb[0].mxu1 }
  0xe2   :  { %v297_v25 = vpop.f32.mrb[1].mxu1 }
  0xe3   :  { %v446_v26 = vpop.f32.mrb[2].mxu1 }
  0xe4   :  { %v300_v27 = vpop.f32.mrb[3].mxu1 }
  0xf5   :  { %v423_v28 = vpop.f32.mrb[0].mxu0 }
  0xf6   :  { %v424_v29 = vpop.f32.mrb[1].mxu0 }
  0xf7   :  { %v425_v32 = vadd.f32 %v424_v29, %v423_v28  ;;  %v426_v33 = vpop.f32.mrb[2].mxu0 }
  0xf8   :  { %v427_v34 = vpop.f32.mrb[3].mxu0 }
  0xf9   :  { %v428_v35 = vadd.f32 %v427_v34, %v426_v33  ;;  %v249_v36 = vadd.f32 %v425_v32, %v352_v30 }
  0xfb   :  { %v298_v38 = vadd.f32 %v297_v25, %v249_v36  ;;  %v252_v39 = vadd.f32 %v428_v35, %v352_v30 }
  0xfd   :  { %v320_v42 = vadd.f32 %v389_v37, %v298_v38  ;;  %v301_v43 = vadd.f32 %v300_v27, %v252_v39  ;;  %v429_v44 = vpop.f32.mrb[4].mxu0 }
  0xfe   :  { %v430_v45 = vpop.f32.mrb[5].mxu0 }
  0xff   :  { %v321_v46 = vadd.f32 %v390_v40, %v301_v43  ;;  %v431_v47 = vadd.f32 %v430_v45, %v429_v44  ;;  %v432_v48 = vpop.f32.mrb[6].mxu0  ;;  %v324_v51 = vmax.f32 %v320_v42, 0.0 }
 0x100   :  { %v433_v50 = vpop.f32.mrb[7].mxu0 }
 0x101   :  { %v325_v52 = vmax.f32 %v321_v46, 0.0  ;;  %v257_v53 = vadd.f32 %v431_v47, %v352_v30  ;;  %v434_v54 = vadd.f32 %v433_v50, %v432_v48 }
 0x103   :  { %v398_v55 = vpack.c.bf16 %v325_v52, %v324_v51  ;;  %v306_v56 = vadd.f32 %v445_v24, %v257_v53  ;;  %v260_v57 = vadd.f32 %v434_v54, %v352_v30 }
 0x105   :  { %399 = vst [vmem:[%s589_s4] sm:$0xff] %v398_v55   ;;  %v322_v59 = vadd.f32 %v393_v49, %v306_v56  ;;  %v309_v60 = vadd.f32 %v446_v26, %v260_v57 }
 0x107   :  { %v323_v61 = vadd.f32 %v394_v58, %v309_v60  ;;  %v326_v62 = vmax.f32 %v322_v59, 0.0 }
 0x109   :  { %v327_v63 = vmax.f32 %v323_v61, 0.0 }
 0x10b   :  { %v403_v0 = vpack.c.bf16 %v327_v63, %v326_v62 }
 0x10d   :  { %406 = vst [vmem:[%s589_s4 + $0x8] sm:$0xff] %v403_v0  }

// kernel: _lambda_.36
= control target key start
LH: loop header
LB: loop body
LE: loop exit
PB: predicated region body
PF: predicated region fallthrough
CT: control target
= control target key end

     0   :  { %v348_v1 = vmov 0.0   ;;  %vm349_vm0 = vmmov 0   ;;  %vm178_vm1 = vcmask 261120   ;;  %s436_s1 = inlined_call_operand.vmem [shape: bf16[288,128], index: 1, kind: input, shape index: {}]   ;;  %s437_s0 = inlined_call_operand.vmem [shape: bf16[8,288], index: 0, kind: input, shape index: {}]   ;;  %s438_s2 = inlined_call_operand.vmem [shape: f32[1,128], index: 2, kind: input, shape index: {}]   ;;  %s439_s3 = inlined_call_operand.vmem [shape: bf16[8,128], index: 3, kind: output, shape index: {}]  }
   0x1   :  { %v327_v0 = vld [vmem:[%s436_s1 + $0x40] sm:$0xff]   ;;  %317 = vmatprep.subr.bf16.mxu1 %v348_v1  ;;  %321 = vmatprep.mubr.msk.bf16.mxu1 %vm349_vm0, %v348_v1  ;;  %v329_v3 = vld [vmem:[%s436_s1 + $0x48] sm:$0xff]   ;;  %v331_v5 = vld [vmem:[%s436_s1 + $0x50] sm:$0xff]  }
   0x2   :  { %v328_v2 = vld [vmem:[%s436_s1] sm:$0xff]   ;;  %292 = vmatprep.subr.bf16.mxu0 %v327_v0  ;;  %v330_v4 = vld [vmem:[%s436_s1 + $0x8] sm:$0xff]   ;;  %v332_v6 = vld [vmem:[%s436_s1 + $0x10] sm:$0xff]  }
   0x3   :  { %293 = vmatpush3.bf16.msra.mxu0 %v328_v2  ;;  %v333_v7 = vld [vmem:[%s436_s1 + $0x58] sm:$0xff]   ;;  %v335_v9 = vld [vmem:[%s436_s1 + $0x60] sm:$0xff]   ;;  %v337_v12 = vld [vmem:[%s436_s1 + $0x68] sm:$0xff]  }
   0x4   :  { %294 = vmatprep.subr.bf16.mxu0 %v329_v3  ;;  %v334_v8 = vld [vmem:[%s436_s1 + $0x18] sm:$0xff]   ;;  %v341_v10 = vld [vmem:[%s436_s1 + $0x80] sm:$0xff]   ;;  %v347_v15 = vld [vmem:[%s436_s1 + $0x88] sm:$0xff]  }
   0x5   :  { %v336_v11 = vld [vmem:[%s436_s1 + $0x20] sm:$0xff]   ;;  %318 = vmatpush3.bf16.msra.mxu1 %v341_v10  ;;  %v338_v16 = vld [vmem:[%s436_s1 + $0x28] sm:$0xff]   ;;  %v339_v17 = vld [vmem:[%s436_s1 + $0x70] sm:$0xff]  }
   0x6   :  { %319 = vmatprep.subr.bf16.mxu1 %v348_v1  ;;  %v15_v13 = vld [vmem:[%s437_s0] sm:$0xff]  ;;  %v346_v18 = vld [vmem:[%s437_s0 + $0x8] ss:$0 sps:$4 sm:$0xff]   ;;  %v340_v19 = vld [vmem:[%s436_s1 + $0x30] sm:$0xff]  }
   0x7   :  { %295 = vmatpush3.bf16.msra.mxu0 %v330_v4  ;;  %v271_v14 = vcombine.high %v15_v13, %v15_v13  ;;  %v342_v20 = vld [vmem:[%s436_s1 + $0x78] sm:$0xff]   ;;  %v270_v22 = vcombine.low %v15_v13, %v15_v13  ;;  %v269_v29 = vld [vmem:[%s438_s2] ss:$0 sm:$0xff] }
   0x8   :  { %296 = vmatprep.subr.bf16.mxu0 %v331_v5  ;;  %v343_v21 = vld [vmem:[%s436_s1 + $0x38] sm:$0xff]  }
   0x9   :  { %214 = vmatprep.mubr.bf16.mxu0 %v271_v14  ;;  %320 = vmatpush3.bf16.msra.mxu1 %v347_v15 }
   0xb   :  { %297 = vmatpush3.bf16.msra.mxu0 %v332_v6 }
   0xc   :  { %298 = vmatprep.subr.bf16.mxu0 %v333_v7  ;;  %322 = vmatmul.mubr.msk.bf16.vlgmr.msra.gmra.mrb[0].mxu1 %vm178_vm1, %v346_v18 }
   0xf   :  { %299 = vmatpush3.bf16.msra.mxu0 %v334_v8 }
  0x10   :  { %300 = vmatprep.subr.bf16.mxu0 %v335_v9 }
  0x13   :  { %301 = vmatpush3.bf16.msra.mxu0 %v336_v11 }
  0x14   :  { %302 = vmatprep.subr.bf16.mxu0 %v337_v12 }
  0x17   :  { %303 = vmatpush3.bf16.msra.mxu0 %v338_v16 }
  0x18   :  { %304 = vmatprep.subr.bf16.mxu0 %v339_v17 }
  0x1b   :  { %305 = vmatpush3.bf16.msra.mxu0 %v340_v19 }
  0x1c   :  { %306 = vmatprep.subr.bf16.mxu0 %v342_v20 }
  0x1f   :  { %307 = vmatpush3.bf16.msra.mxu0 %v343_v21 }
  0x22   :  { %215 = vmatmul.mubr.bf16.vlgmr.msra.gmra.mrb[0].mxu0 %v270_v22 }
  0xdf   :  { %v256_v23 = vpop.f32.mrb[0].mxu1 }
  0xe0   :  { %v323_v24 = vpop.f32.mrb[1].mxu1 }
  0xe1   :  { %v259_v25 = vpop.f32.mrb[2].mxu1 }
  0xe2   :  { %v324_v26 = vpop.f32.mrb[3].mxu1 }
  0xf5   :  { %v308_v27 = vpop.f32.mrb[0].mxu0 }
  0xf6   :  { %v309_v28 = vpop.f32.mrb[1].mxu0 }
  0xf7   :  { %v310_v30 = vadd.f32 %v309_v28, %v308_v27  ;;  %v311_v31 = vpop.f32.mrb[2].mxu0 }
  0xf8   :  { %v312_v32 = vpop.f32.mrb[3].mxu0 }
  0xf9   :  { %v217_v33 = vadd.f32 %v310_v30, %v269_v29 }
  0xfb   :  { %v257_v34 = vadd.f32 %v256_v23, %v217_v33 }
  0xfd   :  { %v262_v35 = vmax.f32 %v257_v34, 0.0 }
  0xff   :  { %v263_v36 = vpack.c.bf16 %v262_v35, %v262_v35 }
 0x101   :  { %264 = vst [vmem:[%s439_s3] sm:$0xf] %v263_v36 }

// kernel: _lambda_.37
= control target key start
LH: loop header
LB: loop body
LE: loop exit
PB: predicated region body
PF: predicated region fallthrough
CT: control target
= control target key end

     0   :  { %v692_v0 = vmov 0.0   ;;  %vm693_vm0 = vmmov 0   ;;  %vm113_vm1 = vcmask 261120   ;;  %vm390_vm2 = vcmask 523264   ;;  %s866_s3 = inlined_call_operand.vmem [shape: bf16[32,128], index: 3, kind: input, shape index: {}]   ;;  %s867_s1 = inlined_call_operand.vmem [shape: bf16[576,128], index: 1, kind: input, shape index: {}]   ;;  %s868_s2 = inlined_call_operand.vmem [shape: bf16[8,32], index: 2, kind: input, shape index: {}]   ;;  %s869_s0 = inlined_call_operand.vmem [shape: bf16[8,576], index: 0, kind: input, shape index: {}]   ;;  %s870_s4 = inlined_call_operand.vmem [shape: f32[1,128], index: 4, kind: input, shape index: {}]   ;;  %s871_s5 = inlined_call_operand.vmem [shape: bf16[8,128], index: 5, kind: output, shape index: {}]  }
   0x1   :  { %627 = vmatprep.subr.bf16.mxu0 %v692_v0  ;;  %v649_v1 = vld [vmem:[%s866_s3] sm:$0xff]   ;;  %631 = vmatprep.mubr.msk.bf16.mxu0 %vm693_vm0, %v692_v0  ;;  %v652_v4 = vld [vmem:[%s866_s3 + $0x8] sm:$0xff]   ;;  %v656_v9 = vld [vmem:[%s867_s1 + $0x50] sm:$0xff]  }
   0x2   :  { %v650_v2 = vld [vmem:[%s867_s1 + $0x40] sm:$0xff]   ;;  %628 = vmatpush3.bf16.msra.mxu0 %v649_v1  ;;  %v653_v5 = vld [vmem:[%s867_s1 + $0x48] sm:$0xff]   ;;  %v658_v11 = vld [vmem:[%s867_s1 + $0x10] sm:$0xff]  }
   0x3   :  { %v651_v3 = vld [vmem:[%s867_s1] sm:$0xff]   ;;  %578 = vmatprep.subr.bf16.mxu1 %v650_v2  ;;  %629 = vmatprep.subr.bf16.mxu0 %v692_v0  ;;  %v654_v6 = vld [vmem:[%s867_s1 + $0x8] sm:$0xff]   ;;  %v660_v13 = vld [vmem:[%s867_s1 + $0x58] sm:$0xff]  }
   0x4   :  { %579 = vmatpush3.bf16.msra.mxu1 %v651_v3  ;;  %v655_v7 = vld [vmem:[%s867_s1 + $0xc0] sm:$0xff]   ;;  %v659_v12 = vld [vmem:[%s867_s1 + $0xc8] sm:$0xff]   ;;  %v662_v15 = vld [vmem:[%s867_s1 + $0x18] sm:$0xff]  }
   0x5   :  { %580 = vmatprep.subr.bf16.mxu1 %v653_v5  ;;  %v96_v8 = vld [vmem:[%s868_s2] sm:$0xf]  ;;  %v661_v14 = vld [vmem:[%s867_s1 + $0x88] sm:$0xff]   ;;  %v663_v16 = vld [vmem:[%s867_s1 + $0xd0] sm:$0xff]  }
   0x6   :  { %630 = vmatpush3.bf16.msra.mxu0 %v652_v4  ;;  %v657_v10 = vld [vmem:[%s867_s1 + $0x80] sm:$0xff]   ;;  %v665_v18 = vld [vmem:[%s867_s1 + $0x90] sm:$0xff]   ;;  %v667_v20 = vld [vmem:[%s867_s1 + $0xd8] sm:$0xff]  }
   0x7   :  { %600 = vmatprep.subr.bf16.mxu0 %v655_v7  ;;  %v664_v17 = vld [vmem:[%s867_s1 + $0x60] sm:$0xff]   ;;  %v668_v21 = vld [vmem:[%s867_s1 + $0x68] sm:$0xff]   ;;  %v669_v22 = vld [vmem:[%s867_s1 + $0x98] sm:$0xff]  }
   0x8   :  { %581 = vmatpush3.bf16.msra.mxu1 %v654_v6  ;;  %v666_v19 = vld [vmem:[%s867_s1 + $0x20] sm:$0xff]   ;;  %v670_v23 = vld [vmem:[%s867_s1 + $0x28] sm:$0xff]   ;;  %v672_v25 = vld [vmem:[%s867_s1 + $0x70] sm:$0xff]  }
   0x9   :  { %632 = vmatmul.mubr.msk.bf16.vlgmr.msra.gmra.mrb[0].mxu0 %vm113_vm1, %v96_v8  ;;  %582 = vmatprep.subr.bf16.mxu1 %v656_v9  ;;  %v671_v24 = vld [vmem:[%s867_s1 + $0xe0] sm:$0xff]   ;;  %v674_v27 = vld [vmem:[%s867_s1 + $0x30] sm:$0xff]   ;;  %v675_v28 = vld [vmem:[%s867_s1 + $0xe8] sm:$0xff]  }
   0xa   :  { %601 = vmatpush3.bf16.msra.mxu0 %v657_v10  ;;  %v673_v26 = vld [vmem:[%s867_s1 + $0xa0] sm:$0xff]   ;;  %v676_v29 = vld [vmem:[%s867_s1 + $0x78] sm:$0xff]   ;;  %v677_v30 = vld [vmem:[%s867_s1 + $0xa8] sm:$0xff]  }
   0xb   :  { %602 = vmatprep.subr.bf16.mxu0 %v659_v12  ;;  %v678_v31 = vld [vmem:[%s867_s1 + $0x38] sm:$0xff]   ;;  %v21_v32 = vld [vmem:[%s869_s0] sm:$0xff]  ;;  %v682_v35 = vld [vmem:[%s867_s1 + $0xf0] sm:$0xff]  }
   0xc   :  { %583 = vmatpush3.bf16.msra.mxu1 %v658_v11  ;;  %v532_v33 = vcombine.low %v21_v32, %v21_v32  ;;  %v533_v34 = vcombine.high %v21_v32, %v21_v32  ;;  %v683_v36 = vld [vmem:[%s867_s1 + $0xb0] sm:$0xff]   ;;  %v684_v37 = vld [vmem:[%s867_s1 + $0x100] sm:$0xff]   ;;  %v685_v38 = vld [vmem:[%s867_s1 + $0xf8] sm:$0xff]  }
   0xd   :  { %584 = vmatprep.subr.bf16.mxu1 %v660_v13  ;;  %v686_v39 = vld [vmem:[%s867_s1 + $0xb8] sm:$0xff]   ;;  %v687_v40 = vld [vmem:[%s867_s1 + $0x108] sm:$0xff]   ;;  %v690_v44 = vld [vmem:[%s867_s1 + $0x110] sm:$0xff]  }
   0xe   :  { %603 = vmatpush3.bf16.msra.mxu0 %v661_v14  ;;  %426 = vmatprep.mubr.bf16.mxu1 %v533_v34  ;;  %v22_v41 = vld [vmem:[%s869_s0 + $0x8] sm:$0xff]  ;;  %v691_v45 = vld [vmem:[%s867_s1 + $0x118] sm:$0xff]   ;;  %v681_v46 = vld [vmem:[%s869_s0 + $0x10] ss:$0 sps:$4 sm:$0xff]  }
   0xf   :  { %604 = vmatprep.subr.bf16.mxu0 %v663_v16  ;;  %v534_v42 = vcombine.low %v22_v41, %v22_v41  ;;  %v535_v43 = vcombine.high %v22_v41, %v22_v41 }
  0x10   :  { %585 = vmatpush3.bf16.msra.mxu1 %v662_v15 }
  0x11   :  { %586 = vmatprep.subr.bf16.mxu1 %v664_v17  ;;  %466 = vmatprep.mubr.bf16.mxu0 %v535_v43 }
  0x12   :  { %605 = vmatpush3.bf16.msra.mxu0 %v665_v18 }
  0x13   :  { %606 = vmatprep.subr.bf16.mxu0 %v667_v20 }
  0x14   :  { %587 = vmatpush3.bf16.msra.mxu1 %v666_v19 }
  0x15   :  { %588 = vmatprep.subr.bf16.mxu1 %v668_v21 }
  0x16   :  { %607 = vmatpush3.bf16.msra.mxu0 %v669_v22 }
  0x17   :  { %608 = vmatprep.subr.bf16.mxu0 %v671_v24 }
  0x18   :  { %589 = vmatpush3.bf16.msra.mxu1 %v670_v23 }
  0x19   :  { %590 = vmatprep.subr.bf16.mxu1 %v672_v25 }
  0x1a   :  { %609 = vmatpush3.bf16.msra.mxu0 %v673_v26 }
  0x1b   :  { %610 = vmatprep.subr.bf16.mxu0 %v675_v28 }
  0x1c   :  { %591 = vmatpush3.bf16.msra.mxu1 %v674_v27 }
  0x1d   :  { %592 = vmatprep.subr.bf16.mxu1 %v676_v29 }
  0x1e   :  { %611 = vmatpush3.bf16.msra.mxu0 %v677_v30 }
  0x1f   :  { %612 = vmatprep.subr.bf16.mxu0 %v682_v35 }
  0x20   :  { %593 = vmatpush3.bf16.msra.mxu1 %v678_v31 }
  0x21   :  { %635 = vmatprep.subr.bf16.mxu1 %v692_v0 }
  0x22   :  { %613 = vmatpush3.bf16.msra.mxu0 %v683_v36 }
  0x23   :  { %427 = vmatmul.mubr.bf16.vlgmr.msra.gmra.mrb[0].mxu1 %v532_v33  ;;  %614 = vmatprep.subr.bf16.mxu0 %v685_v38 }
  0x24   :  { %636 = vmatpush3.bf16.msra.mxu1 %v684_v37  ;;  %643 = vmatprep.mubr.msk.bf16.mxu1 %vm693_vm0, %v692_v0 }
  0x25   :  { %637 = vmatprep.subr.bf16.mxu1 %v692_v0 }
  0x26   :  { %615 = vmatpush3.bf16.msra.mxu0 %v686_v39 }
  0x28   :  { %638 = vmatpush3.bf16.msra.mxu1 %v687_v40 }
  0x29   :  { %639 = vmatprep.subr.bf16.mxu1 %v692_v0  ;;  %467 = vmatmul.mubr.bf16.vlgmr.msra.gmra.mrb[4].mxu0 %v534_v42 }
  0x2c   :  { %640 = vmatpush3.bf16.msra.mxu1 %v690_v44 }
  0x2d   :  { %641 = vmatprep.subr.bf16.mxu1 %v692_v0  ;;  %v574_v0 = vld [vmem:[%s870_s4] ss:$0 sm:$0xff] }
  0x30   :  { %642 = vmatpush3.bf16.msra.mxu1 %v691_v45 }
  0x33   :  { %644 = vmatmul.mubr.msk.bf16.vlgmr.msra.gmra.mrb[4].mxu1 %vm390_vm2, %v681_v46 }
  0xdc   :  { %v151_v47 = vpop.f32.mrb[0].mxu0 }
  0xdd   :  { %v633_v48 = vpop.f32.mrb[1].mxu0 }
  0xde   :  { %v154_v49 = vpop.f32.mrb[2].mxu0 }
  0xdf   :  { %v634_v50 = vpop.f32.mrb[3].mxu0 }
  0xf6   :  { %v594_v51 = vpop.f32.mrb[0].mxu1 }
  0xf7   :  { %v595_v52 = vpop.f32.mrb[1].mxu1 }
  0xf8   :  { %v596_v53 = vadd.f32 %v595_v52, %v594_v51  ;;  %v597_v54 = vpop.f32.mrb[2].mxu1 }
  0xf9   :  { %v598_v55 = vpop.f32.mrb[3].mxu1 }
  0xfa   :  { %v429_v56 = vadd.f32 %v596_v53, %v151_v47 }
  0xfc   :  { %v616_v57 = vpop.f32.mrb[4].mxu0 }
  0xfd   :  { %v617_v58 = vpop.f32.mrb[5].mxu0 }
  0xfe   :  { %v618_v59 = vadd.f32 %v617_v58, %v616_v57  ;;  %v619_v60 = vpop.f32.mrb[6].mxu0 }
  0xff   :  { %v620_v61 = vpop.f32.mrb[7].mxu0 }
 0x100   :  { %v469_v62 = vadd.f32 %v618_v59, %v429_v56 }
 0x106   :  { %v508_v63 = vpop.f32.mrb[4].mxu1 }
 0x107   :  { %v509_v1 = vadd.f32 %v508_v63, %v469_v62  ;;  %v645_v2 = vpop.f32.mrb[5].mxu1 }
 0x108   :  { %v511_v3 = vpop.f32.mrb[6].mxu1 }
 0x109   :  { %v521_v4 = vadd.f32 %v574_v0, %v509_v1  ;;  %v646_v5 = vpop.f32.mrb[7].mxu1 }
 0x10b   :  { %v522_v6 = vmax.f32 %v521_v4, 0.0 }
 0x10d   :  { %v523_v7 = vpack.c.bf16 %v522_v6, %v522_v6 }
 0x10f   :  { %524 = vst [vmem:[%s871_s5] sm:$0xf] %v523_v7 }

// kernel: _lambda_.38
= control target key start
LH: loop header
LB: loop body
LE: loop exit
PB: predicated region body
PF: predicated region fallthrough
CT: control target
= control target key end

     0   :  { %v608_v35 = vmov 0.0   ;;  %vm609_vm0 = vmmov 0   ;;  %vm330_vm1 = vcmask 523264   ;;  %s753_s1 = inlined_call_operand.vmem [shape: bf16[576,128], index: 1, kind: input, shape index: {}]   ;;  %s754_s0 = inlined_call_operand.vmem [shape: bf16[8,576], index: 0, kind: input, shape index: {}]   ;;  %s755_s2 = inlined_call_operand.vmem [shape: f32[1,128], index: 2, kind: input, shape index: {}]   ;;  %s756_s3 = inlined_call_operand.vmem [shape: bf16[8,128], index: 3, kind: output, shape index: {}]  }
   0x1   :  { %v567_v0 = vld [vmem:[%s753_s1 + $0x40] sm:$0xff]   ;;  %v571_v4 = vld [vmem:[%s753_s1 + $0x48] sm:$0xff]   ;;  %v575_v8 = vld [vmem:[%s753_s1 + $0x50] sm:$0xff]  }
   0x2   :  { %v568_v1 = vld [vmem:[%s753_s1] sm:$0xff]   ;;  %504 = vmatprep.subr.bf16.mxu0 %v567_v0  ;;  %v572_v5 = vld [vmem:[%s753_s1 + $0x8] sm:$0xff]   ;;  %v576_v9 = vld [vmem:[%s753_s1 + $0x10] sm:$0xff]  }
   0x3   :  { %v569_v2 = vld [vmem:[%s753_s1 + $0xc0] sm:$0xff]   ;;  %505 = vmatpush3.bf16.msra.mxu0 %v568_v1  ;;  %v573_v6 = vld [vmem:[%s753_s1 + $0xc8] sm:$0xff]   ;;  %v577_v10 = vld [vmem:[%s753_s1 + $0xd0] sm:$0xff]  }
   0x4   :  { %v570_v3 = vld [vmem:[%s753_s1 + $0x80] sm:$0xff]   ;;  %526 = vmatprep.subr.bf16.mxu1 %v569_v2  ;;  %506 = vmatprep.subr.bf16.mxu0 %v571_v4  ;;  %v574_v7 = vld [vmem:[%s753_s1 + $0x88] sm:$0xff]   ;;  %v578_v11 = vld [vmem:[%s753_s1 + $0x90] sm:$0xff]  }
   0x5   :  { %527 = vmatpush3.bf16.msra.mxu1 %v570_v3  ;;  %v579_v12 = vld [vmem:[%s753_s1 + $0x58] sm:$0xff]   ;;  %v583_v16 = vld [vmem:[%s753_s1 + $0x60] sm:$0xff]   ;;  %v587_v20 = vld [vmem:[%s753_s1 + $0x68] sm:$0xff]  }
   0x6   :  { %528 = vmatprep.subr.bf16.mxu1 %v573_v6  ;;  %v580_v13 = vld [vmem:[%s753_s1 + $0x18] sm:$0xff]   ;;  %v584_v17 = vld [vmem:[%s753_s1 + $0x20] sm:$0xff]   ;;  %v588_v21 = vld [vmem:[%s753_s1 + $0x28] sm:$0xff]  }
   0x7   :  { %507 = vmatpush3.bf16.msra.mxu0 %v572_v5  ;;  %v581_v14 = vld [vmem:[%s753_s1 + $0xd8] sm:$0xff]   ;;  %v585_v18 = vld [vmem:[%s753_s1 + $0xe0] sm:$0xff]   ;;  %v589_v22 = vld [vmem:[%s753_s1 + $0xe8] sm:$0xff]  }
   0x8   :  { %508 = vmatprep.subr.bf16.mxu0 %v575_v8  ;;  %v582_v15 = vld [vmem:[%s753_s1 + $0x98] sm:$0xff]   ;;  %v586_v19 = vld [vmem:[%s753_s1 + $0xa0] sm:$0xff]   ;;  %v590_v23 = vld [vmem:[%s753_s1 + $0xa8] sm:$0xff]  }
   0x9   :  { %529 = vmatpush3.bf16.msra.mxu1 %v574_v7  ;;  %v591_v24 = vld [vmem:[%s753_s1 + $0x70] sm:$0xff]   ;;  %v595_v28 = vld [vmem:[%s753_s1 + $0x78] sm:$0xff]   ;;  %v15_v31 = vld [vmem:[%s754_s0] sm:$0xff] }
   0xa   :  { %530 = vmatprep.subr.bf16.mxu1 %v577_v10  ;;  %v592_v25 = vld [vmem:[%s753_s1 + $0x30] sm:$0xff]   ;;  %v596_v29 = vld [vmem:[%s753_s1 + $0x38] sm:$0xff]   ;;  %v462_v32 = vcombine.low %v15_v31, %v15_v31  ;;  %v463_v33 = vcombine.high %v15_v31, %v15_v31  ;;  %v16_v36 = vld [vmem:[%s754_s0 + $0x8] sm:$0xff] }
   0xb   :  { %509 = vmatpush3.bf16.msra.mxu0 %v576_v9  ;;  %v593_v26 = vld [vmem:[%s753_s1 + $0xf0] sm:$0xff]   ;;  %v597_v30 = vld [vmem:[%s753_s1 + $0xf8] sm:$0xff]   ;;  %v464_v37 = vcombine.low %v16_v36, %v16_v36  ;;  %v465_v38 = vcombine.high %v16_v36, %v16_v36  ;;  %v604_v39 = vld [vmem:[%s753_s1 + $0x100] sm:$0xff]  }
   0xc   :  { %510 = vmatprep.subr.bf16.mxu0 %v579_v12  ;;  %v594_v27 = vld [vmem:[%s753_s1 + $0xb0] sm:$0xff]   ;;  %v601_v34 = vld [vmem:[%s753_s1 + $0xb8] sm:$0xff]   ;;  %366 = vmatprep.mubr.bf16.mxu0 %v463_v33  ;;  %v605_v40 = vld [vmem:[%s753_s1 + $0x108] sm:$0xff]  }
   0xd   :  { %531 = vmatpush3.bf16.msra.mxu1 %v578_v11  ;;  %406 = vmatprep.mubr.bf16.mxu1 %v465_v38  ;;  %v606_v41 = vld [vmem:[%s753_s1 + $0x110] sm:$0xff]   ;;  %v607_v42 = vld [vmem:[%s753_s1 + $0x118] sm:$0xff]   ;;  %v461_v45 = vld [vmem:[%s755_s2] ss:$0 sm:$0xff] }
   0xe   :  { %532 = vmatprep.subr.bf16.mxu1 %v581_v14  ;;  %v600_v43 = vld [vmem:[%s754_s0 + $0x10] ss:$0 sps:$4 sm:$0xff]  }
   0xf   :  { %511 = vmatpush3.bf16.msra.mxu0 %v580_v13 }
  0x10   :  { %512 = vmatprep.subr.bf16.mxu0 %v583_v16 }
  0x11   :  { %533 = vmatpush3.bf16.msra.mxu1 %v582_v15 }
  0x12   :  { %534 = vmatprep.subr.bf16.mxu1 %v585_v18 }
  0x13   :  { %513 = vmatpush3.bf16.msra.mxu0 %v584_v17 }
  0x14   :  { %514 = vmatprep.subr.bf16.mxu0 %v587_v20 }
  0x15   :  { %535 = vmatpush3.bf16.msra.mxu1 %v586_v19 }
  0x16   :  { %536 = vmatprep.subr.bf16.mxu1 %v589_v22 }
  0x17   :  { %515 = vmatpush3.bf16.msra.mxu0 %v588_v21 }
  0x18   :  { %516 = vmatprep.subr.bf16.mxu0 %v591_v24 }
  0x19   :  { %537 = vmatpush3.bf16.msra.mxu1 %v590_v23 }
  0x1a   :  { %538 = vmatprep.subr.bf16.mxu1 %v593_v26 }
  0x1b   :  { %517 = vmatpush3.bf16.msra.mxu0 %v592_v25 }
  0x1c   :  { %518 = vmatprep.subr.bf16.mxu0 %v595_v28 }
  0x1d   :  { %539 = vmatpush3.bf16.msra.mxu1 %v594_v27 }
  0x1e   :  { %540 = vmatprep.subr.bf16.mxu1 %v597_v30 }
  0x1f   :  { %519 = vmatpush3.bf16.msra.mxu0 %v596_v29 }
  0x20   :  { %553 = vmatprep.subr.bf16.mxu0 %v608_v35 }
  0x21   :  { %541 = vmatpush3.bf16.msra.mxu1 %v601_v34 }
  0x22   :  { %367 = vmatmul.mubr.bf16.vlgmr.msra.gmra.mrb[0].mxu0 %v462_v32 }
  0x23   :  { %554 = vmatpush3.bf16.msra.mxu0 %v604_v39  ;;  %561 = vmatprep.mubr.msk.bf16.mxu0 %vm609_vm0, %v608_v35 }
  0x24   :  { %407 = vmatmul.mubr.bf16.vlgmr.msra.gmra.mrb[0].mxu1 %v464_v37  ;;  %555 = vmatprep.subr.bf16.mxu0 %v608_v35 }
  0x27   :  { %556 = vmatpush3.bf16.msra.mxu0 %v605_v40 }
  0x28   :  { %557 = vmatprep.subr.bf16.mxu0 %v608_v35 }
  0x2b   :  { %558 = vmatpush3.bf16.msra.mxu0 %v606_v41 }
  0x2c   :  { %559 = vmatprep.subr.bf16.mxu0 %v608_v35 }
  0x2f   :  { %560 = vmatpush3.bf16.msra.mxu0 %v607_v42 }
  0x32   :  { %562 = vmatmul.mubr.msk.bf16.vlgmr.msra.gmra.mrb[4].mxu0 %vm330_vm1, %v600_v43 }
  0xf5   :  { %v520_v44 = vpop.f32.mrb[0].mxu0 }
  0xf6   :  { %v521_v46 = vpop.f32.mrb[1].mxu0 }
  0xf7   :  { %v522_v47 = vadd.f32 %v521_v46, %v520_v44  ;;  %v523_v48 = vpop.f32.mrb[2].mxu0  ;;  %v542_v49 = vpop.f32.mrb[0].mxu1 }
  0xf8   :  { %v524_v50 = vpop.f32.mrb[3].mxu0  ;;  %v543_v51 = vpop.f32.mrb[1].mxu1 }
  0xf9   :  { %v369_v52 = vadd.f32 %v522_v47, %v461_v45  ;;  %v544_v53 = vadd.f32 %v543_v51, %v542_v49  ;;  %v545_v54 = vpop.f32.mrb[2].mxu1 }
  0xfa   :  { %v546_v55 = vpop.f32.mrb[3].mxu1 }
  0xfb   :  { %v409_v56 = vadd.f32 %v544_v53, %v369_v52 }
 0x105   :  { %v448_v57 = vpop.f32.mrb[4].mxu0 }
 0x106   :  { %v449_v58 = vadd.f32 %v448_v57, %v409_v56  ;;  %v563_v59 = vpop.f32.mrb[5].mxu0 }
 0x107   :  { %v451_v60 = vpop.f32.mrb[6].mxu0 }
 0x108   :  { %v454_v61 = vmax.f32 %v449_v58, 0.0  ;;  %v564_v62 = vpop.f32.mrb[7].mxu0 }
 0x10a   :  { %v455_v63 = vpack.c.bf16 %v454_v61, %v454_v61 }
 0x10c   :  { %456 = vst [vmem:[%s756_s3] sm:$0xf] %v455_v63 }

// kernel: _lambda_.39
= control target key start
LH: loop header
LB: loop body
LE: loop exit
PB: predicated region body
PF: predicated region fallthrough
CT: control target
= control target key end

     0   :  { %v614_v35 = vmov 0.0   ;;  %vm615_vm0 = vmmov 0   ;;  %vm333_vm1 = vcmask 523264   ;;  %s767_s1 = inlined_call_operand.vmem [shape: bf16[576,128], index: 1, kind: input, shape index: {}]   ;;  %s768_s0 = inlined_call_operand.vmem [shape: bf16[8,576], index: 0, kind: input, shape index: {}]   ;;  %s769_s2 = inlined_call_operand.vmem [shape: f32[1,128], index: 2, kind: input, shape index: {}]   ;;  %s770_s3 = inlined_call_operand.vmem [shape: bf16[8,128], index: 3, kind: input, shape index: {}]   ;;  %s771_s4 = inlined_call_operand.vmem [shape: bf16[8,128], index: 4, kind: output, shape index: {}]  }
   0x1   :  { %v573_v0 = vld [vmem:[%s767_s1 + $0x40] sm:$0xff]   ;;  %v577_v4 = vld [vmem:[%s767_s1 + $0x48] sm:$0xff]   ;;  %v581_v8 = vld [vmem:[%s767_s1 + $0x50] sm:$0xff]  }
   0x2   :  { %v574_v1 = vld [vmem:[%s767_s1] sm:$0xff]   ;;  %510 = vmatprep.subr.bf16.mxu0 %v573_v0  ;;  %v578_v5 = vld [vmem:[%s767_s1 + $0x8] sm:$0xff]   ;;  %v582_v9 = vld [vmem:[%s767_s1 + $0x10] sm:$0xff]  }
   0x3   :  { %v575_v2 = vld [vmem:[%s767_s1 + $0xc0] sm:$0xff]   ;;  %511 = vmatpush3.bf16.msra.mxu0 %v574_v1  ;;  %v579_v6 = vld [vmem:[%s767_s1 + $0xc8] sm:$0xff]   ;;  %v583_v10 = vld [vmem:[%s767_s1 + $0xd0] sm:$0xff]  }
   0x4   :  { %v576_v3 = vld [vmem:[%s767_s1 + $0x80] sm:$0xff]   ;;  %532 = vmatprep.subr.bf16.mxu1 %v575_v2  ;;  %512 = vmatprep.subr.bf16.mxu0 %v577_v4  ;;  %v580_v7 = vld [vmem:[%s767_s1 + $0x88] sm:$0xff]   ;;  %v584_v11 = vld [vmem:[%s767_s1 + $0x90] sm:$0xff]  }
   0x5   :  { %533 = vmatpush3.bf16.msra.mxu1 %v576_v3  ;;  %v585_v12 = vld [vmem:[%s767_s1 + $0x58] sm:$0xff]   ;;  %v589_v16 = vld [vmem:[%s767_s1 + $0x60] sm:$0xff]   ;;  %v593_v20 = vld [vmem:[%s767_s1 + $0x68] sm:$0xff]  }
   0x6   :  { %534 = vmatprep.subr.bf16.mxu1 %v579_v6  ;;  %v586_v13 = vld [vmem:[%s767_s1 + $0x18] sm:$0xff]   ;;  %v590_v17 = vld [vmem:[%s767_s1 + $0x20] sm:$0xff]   ;;  %v594_v21 = vld [vmem:[%s767_s1 + $0x28] sm:$0xff]  }
   0x7   :  { %513 = vmatpush3.bf16.msra.mxu0 %v578_v5  ;;  %v587_v14 = vld [vmem:[%s767_s1 + $0xd8] sm:$0xff]   ;;  %v591_v18 = vld [vmem:[%s767_s1 + $0xe0] sm:$0xff]   ;;  %v595_v22 = vld [vmem:[%s767_s1 + $0xe8] sm:$0xff]  }
   0x8   :  { %514 = vmatprep.subr.bf16.mxu0 %v581_v8  ;;  %v588_v15 = vld [vmem:[%s767_s1 + $0x98] sm:$0xff]   ;;  %v592_v19 = vld [vmem:[%s767_s1 + $0xa0] sm:$0xff]   ;;  %v596_v23 = vld [vmem:[%s767_s1 + $0xa8] sm:$0xff]  }
   0x9   :  { %535 = vmatpush3.bf16.msra.mxu1 %v580_v7  ;;  %v597_v24 = vld [vmem:[%s767_s1 + $0x70] sm:$0xff]   ;;  %v601_v28 = vld [vmem:[%s767_s1 + $0x78] sm:$0xff]   ;;  %v18_v31 = vld [vmem:[%s768_s0] sm:$0xff] }
   0xa   :  { %536 = vmatprep.subr.bf16.mxu1 %v583_v10  ;;  %v598_v25 = vld [vmem:[%s767_s1 + $0x30] sm:$0xff]   ;;  %v602_v29 = vld [vmem:[%s767_s1 + $0x38] sm:$0xff]   ;;  %v468_v32 = vcombine.low %v18_v31, %v18_v31  ;;  %v469_v33 = vcombine.high %v18_v31, %v18_v31  ;;  %v19_v36 = vld [vmem:[%s768_s0 + $0x8] sm:$0xff] }
   0xb   :  { %515 = vmatpush3.bf16.msra.mxu0 %v582_v9  ;;  %v599_v26 = vld [vmem:[%s767_s1 + $0xf0] sm:$0xff]   ;;  %v603_v30 = vld [vmem:[%s767_s1 + $0xf8] sm:$0xff]   ;;  %v470_v37 = vcombine.low %v19_v36, %v19_v36  ;;  %v471_v38 = vcombine.high %v19_v36, %v19_v36  ;;  %v610_v39 = vld [vmem:[%s767_s1 + $0x100] sm:$0xff]  }
   0xc   :  { %516 = vmatprep.subr.bf16.mxu0 %v585_v12  ;;  %v600_v27 = vld [vmem:[%s767_s1 + $0xb0] sm:$0xff]   ;;  %v607_v34 = vld [vmem:[%s767_s1 + $0xb8] sm:$0xff]   ;;  %369 = vmatprep.mubr.bf16.mxu0 %v469_v33  ;;  %v611_v40 = vld [vmem:[%s767_s1 + $0x108] sm:$0xff]  }
   0xd   :  { %537 = vmatpush3.bf16.msra.mxu1 %v584_v11  ;;  %409 = vmatprep.mubr.bf16.mxu1 %v471_v38  ;;  %v612_v41 = vld [vmem:[%s767_s1 + $0x110] sm:$0xff]   ;;  %v613_v42 = vld [vmem:[%s767_s1 + $0x118] sm:$0xff]   ;;  %v467_v45 = vld [vmem:[%s769_s2] ss:$0 sm:$0xff] }
   0xe   :  { %538 = vmatprep.subr.bf16.mxu1 %v587_v14  ;;  %v606_v43 = vld [vmem:[%s768_s0 + $0x10] ss:$0 sps:$4 sm:$0xff]   ;;  %v457_v57 = vld [vmem:[%s770_s3] sm:$0xf] }
   0xf   :  { %517 = vmatpush3.bf16.msra.mxu0 %v586_v13  ;;  %v458_v58 = vunpack.c.l.bf16 %v457_v57 }
  0x10   :  { %518 = vmatprep.subr.bf16.mxu0 %v589_v16 }
  0x11   :  { %539 = vmatpush3.bf16.msra.mxu1 %v588_v15 }
  0x12   :  { %540 = vmatprep.subr.bf16.mxu1 %v591_v18 }
  0x13   :  { %519 = vmatpush3.bf16.msra.mxu0 %v590_v17 }
  0x14   :  { %520 = vmatprep.subr.bf16.mxu0 %v593_v20 }
  0x15   :  { %541 = vmatpush3.bf16.msra.mxu1 %v592_v19 }
  0x16   :  { %542 = vmatprep.subr.bf16.mxu1 %v595_v22 }
  0x17   :  { %521 = vmatpush3.bf16.msra.mxu0 %v594_v21 }
  0x18   :  { %522 = vmatprep.subr.bf16.mxu0 %v597_v24 }
  0x19   :  { %543 = vmatpush3.bf16.msra.mxu1 %v596_v23 }
  0x1a   :  { %544 = vmatprep.subr.bf16.mxu1 %v599_v26 }
  0x1b   :  { %523 = vmatpush3.bf16.msra.mxu0 %v598_v25 }
  0x1c   :  { %524 = vmatprep.subr.bf16.mxu0 %v601_v28 }
  0x1d   :  { %545 = vmatpush3.bf16.msra.mxu1 %v600_v27 }
  0x1e   :  { %546 = vmatprep.subr.bf16.mxu1 %v603_v30 }
  0x1f   :  { %525 = vmatpush3.bf16.msra.mxu0 %v602_v29 }
  0x20   :  { %559 = vmatprep.subr.bf16.mxu0 %v614_v35 }
  0x21   :  { %547 = vmatpush3.bf16.msra.mxu1 %v607_v34 }
  0x22   :  { %370 = vmatmul.mubr.bf16.vlgmr.msra.gmra.mrb[0].mxu0 %v468_v32 }
  0x23   :  { %560 = vmatpush3.bf16.msra.mxu0 %v610_v39  ;;  %567 = vmatprep.mubr.msk.bf16.mxu0 %vm615_vm0, %v614_v35 }
  0x24   :  { %410 = vmatmul.mubr.bf16.vlgmr.msra.gmra.mrb[0].mxu1 %v470_v37  ;;  %561 = vmatprep.subr.bf16.mxu0 %v614_v35 }
  0x27   :  { %562 = vmatpush3.bf16.msra.mxu0 %v611_v40 }
  0x28   :  { %563 = vmatprep.subr.bf16.mxu0 %v614_v35 }
  0x2b   :  { %564 = vmatpush3.bf16.msra.mxu0 %v612_v41 }
  0x2c   :  { %565 = vmatprep.subr.bf16.mxu0 %v614_v35 }
  0x2f   :  { %566 = vmatpush3.bf16.msra.mxu0 %v613_v42 }
  0x32   :  { %568 = vmatmul.mubr.msk.bf16.vlgmr.msra.gmra.mrb[4].mxu0 %vm333_vm1, %v606_v43 }
  0xf5   :  { %v526_v44 = vpop.f32.mrb[0].mxu0 }
  0xf6   :  { %v527_v46 = vpop.f32.mrb[1].mxu0 }
  0xf7   :  { %v528_v47 = vadd.f32 %v527_v46, %v526_v44  ;;  %v529_v48 = vpop.f32.mrb[2].mxu0  ;;  %v548_v49 = vpop.f32.mrb[0].mxu1 }
  0xf8   :  { %v530_v50 = vpop.f32.mrb[3].mxu0  ;;  %v549_v51 = vpop.f32.mrb[1].mxu1 }
  0xf9   :  { %v372_v52 = vadd.f32 %v528_v47, %v467_v45  ;;  %v550_v53 = vadd.f32 %v549_v51, %v548_v49  ;;  %v551_v54 = vpop.f32.mrb[2].mxu1 }
  0xfa   :  { %v552_v55 = vpop.f32.mrb[3].mxu1 }
  0xfb   :  { %v412_v56 = vadd.f32 %v550_v53, %v372_v52 }
 0x105   :  { %v451_v59 = vpop.f32.mrb[4].mxu0 }
 0x106   :  { %v452_v60 = vadd.f32 %v451_v59, %v412_v56  ;;  %v569_v61 = vpop.f32.mrb[5].mxu0 }
 0x107   :  { %v454_v62 = vpop.f32.mrb[6].mxu0 }
 0x108   :  { %v459_v63 = vadd.f32 %v458_v58, %v452_v60  ;;  %v570_v0 = vpop.f32.mrb[7].mxu0 }
 0x10a   :  { %v460_v1 = vmax.f32 %v459_v63, 0.0 }
 0x10c   :  { %v461_v2 = vpack.c.bf16 %v460_v1, %v460_v1 }
 0x10e   :  { %462 = vst [vmem:[%s771_s4] sm:$0xf] %v461_v2 }

</bundles_post_ra>
